<compile_context>
chip_gen: v6e
topology: v6e:2x2x1
jax: 0.10.0
libtpu: 0.0.40
codegen_flags: <defaults>
</compile_context>

<pallas_src>
import jax
import jax.numpy as jnp
from jax.experimental import pallas as pl
from jax.experimental.pallas import tpu as pltpu

EPS = 1e-5
REDUCTION = 16
LANE = 128
VMEM_LIMIT = 48 * 1024 * 1024   # safe on v5e/v6e (128 MiB) and v7x (64 MiB)


def _ru(v, m):
    return (v + m - 1) // m * m


def _pad_vec(v, c):
    return jnp.pad(v, (0, c - v.shape[0])).reshape(1, c).astype(jnp.float32)


def prepare_params(params, inplanes, planes, reduction=REDUCTION):
    """One-time prep: pad channels to lane multiples, put weights in matmul layout."""
    f32, bf16 = jnp.float32, jnp.bfloat16
    CP, PP, RP = _ru(inplanes, LANE), _ru(planes, LANE), _ru(reduction, LANE)

    def conv3x3_w(w, cin_p, cout_p):
        # torch layout (O, I, 3, 3) -> (9, cin_p, cout_p), tap index t = ky*3 + kx
        o, i = w.shape[0], w.shape[1]
        w = jnp.transpose(w, (2, 3, 1, 0)).reshape(9, i, o)
        return jnp.pad(w, ((0, 0), (0, cin_p - i), (0, cout_p - o))).astype(bf16)

    def mat(w, r_p, c_p):
        r, c = w.shape
        return jnp.pad(w, ((0, r_p - r), (0, c_p - c))).astype(f32)

    wd = params["wd"].reshape(planes, inplanes).T            # (Cin, P), 1x1 conv, no bias
    return {
        "w1": conv3x3_w(params["w1"], CP, PP),
        "b1": _pad_vec(params["b1"], PP),
        "g1": _pad_vec(params["g1"], PP), "be1": _pad_vec(params["be1"], PP),
        "w2": conv3x3_w(params["w2"], PP, PP),
        "b2": _pad_vec(params["b2"], PP),
        "g2": _pad_vec(params["g2"], PP), "be2": _pad_vec(params["be2"], PP),
        "wd": jnp.pad(wd, ((0, CP - inplanes), (0, PP - planes))).astype(bf16),
        "gd": _pad_vec(params["gd"], PP), "bed": _pad_vec(params["bed"], PP),
        "fc1w": mat(params["fc1w"].T, PP, RP), "fc1b": _pad_vec(params["fc1b"], RP),
        "alpha": params["alpha"].reshape(1, 1).astype(f32),
        "fc2w": mat(params["fc2w"].T, RP, PP), "fc2b": _pad_vec(params["fc2b"], PP),
    }


def ice_se_basic_block(x_nchw, pp, planes):
    f32, bf16 = jnp.float32, jnp.bfloat16
    N, Cin, H, W = x_nchw.shape
    P = planes
    CP = pp["w1"].shape[1]        # padded in-channels
    PP = pp["w1"].shape[2]        # padded planes

    Wp = W + 2                    # width incl. left/right zero pad
    Hp = H + 3                    # height incl. 1 top + 2 bottom zero-pad rows
    FLAT = Hp * Wp                # flattened padded rows per image
    HW2 = H * Wp                  # output rows per image (W valid + 2 junk cols per row)
    count = float(N * H * W)      # true per-channel element count for BN stats

    # ---------------- cheap XLA-side prep ----------------
    x = jnp.transpose(x_nchw, (0, 2, 3, 1)).astype(f32)               # NHWC
    x = jnp.pad(x, ((0, 0), (1, 2), (1, 1), (0, CP - Cin)))           # spatial + channel pad
    x = x.reshape(N, FLAT, CP)

    row = jnp.arange(HW2, dtype=jnp.int32)
    mask = ((row % Wp) < W).astype(f32).reshape(HW2, 1)               # 1 on valid pixels

    params_red = pltpu.CompilerParams(dimension_semantics=("arbitrary",),
                                      vmem_limit_bytes=VMEM_LIMIT)
    params_par = pltpu.CompilerParams(dimension_semantics=("parallel",),
                                      vmem_limit_bytes=VMEM_LIMIT)

    def full(shape):                                                  # resident across grid
        return pl.BlockSpec(shape, lambda n: (0,) * len(shape))

    def per_img(rows, cols):                                          # one block per image
        return pl.BlockSpec((None, rows, cols), lambda n: (n, 0, 0))

    # ----------------------------------------------------------------------
    # Pass 1: conv1 raw (+bias) and 1x1 downsample raw, per image;
    #         accumulate masked per-channel sum / sumsq for bn1 and bn_d.
    # ----------------------------------------------------------------------
    def pass1_kernel(x_ref, w1_ref, b1_ref, wd_ref, m_ref,
                     y1_ref, r_ref, sum1_ref, sq1_ref, sumd_ref, sqd_ref):
        n = pl.program_id(0)

        acc = jnp.zeros((HW2, PP), f32)
        for t in range(9):                                 # 9 shifted matmuls == 3x3 conv
            sh = (t // 3) * Wp + (t % 3)
            acc = acc + jnp.dot(x_ref[sh:sh + HW2, :].astype(bf16), w1_ref[t],
                                preferred_element_type=f32)
        y1 = acc + b1_ref[...]
        y1_ref[...] = y1

        r = jnp.dot(x_ref[Wp + 1:Wp + 1 + HW2, :].astype(bf16), wd_ref[...],
                    preferred_element_type=f32)            # 1x1 conv = center tap only
        r_ref[...] = r

        m = m_ref[...]
        y1m = y1 * m
        rm = r * m

        @pl.when(n == 0)
        def _():
            sum1_ref[...] = jnp.zeros_like(sum1_ref)
            sq1_ref[...] = jnp.zeros_like(sq1_ref)
            sumd_ref[...] = jnp.zeros_like(sumd_ref)
            sqd_ref[...] = jnp.zeros_like(sqd_ref)

        sum1_ref[...] += jnp.sum(y1m, axis=0, keepdims=True)
        sq1_ref[...] += jnp.sum(y1 * y1m, axis=0, keepdims=True)
        sumd_ref[...] += jnp.sum(rm, axis=0, keepdims=True)
        sqd_ref[...] += jnp.sum(r * rm, axis=0, keepdims=True)

    y1, r_raw, sum1, sq1, sumd, sqd = pl.pallas_call(
        pass1_kernel,
        grid=(N,),
        in_specs=[per_img(FLAT, CP), full((9, CP, PP)), full((1, PP)),
                  full((CP, PP)), full((HW2, 1))],
        out_specs=[per_img(HW2, PP), per_img(HW2, PP),
                   full((1, PP)), full((1, PP)), full((1, PP)), full((1, PP))],
        out_shape=[jax.ShapeDtypeStruct((N, HW2, PP), f32),
                   jax.ShapeDtypeStruct((N, HW2, PP), f32),
                   jax.ShapeDtypeStruct((1, PP), f32),
                   jax.ShapeDtypeStruct((1, PP), f32),
                   jax.ShapeDtypeStruct((1, PP), f32),
                   jax.ShapeDtypeStruct((1, PP), f32)],
        compiler_params=params_red,
    )(x, pp["w1"], pp["b1"], pp["wd"], mask)

    def bn_coeffs(s, q, gamma, beta):                      # finalize two-phase BN
        mean = s / count
        var = jnp.maximum(q / count - mean * mean, 0.0)    # biased batch variance
        a = gamma * jax.lax.rsqrt(var + EPS)
        return a, beta - mean * a

    a1, c1 = bn_coeffs(sum1, sq1, pp["g1"], pp["be1"])
    ad, cd = bn_coeffs(sumd, sqd, pp["gd"], pp["bed"])

    # ----------------------------------------------------------------------
    # Pass 2: bn1+relu -> conv2 raw (+bias), per image;
    #         masked per-image pool sum + per-channel sum/sumsq for bn2.
    # ----------------------------------------------------------------------
    def pass2_kernel(y1_ref, w2_ref, b2_ref, a1_ref, c1_ref, m_ref,
                     y2_ref, pool_ref, sum2_ref, sq2_ref, zpad_ref):
        n = pl.program_id(0)
        m = m_ref[...]
        # bn1 + relu; junk columns are zeroed so they become conv2's zero padding
        z = jnp.maximum(y1_ref[...] * a1_ref[...] + c1_ref[...], 0.0) * m

        @pl.when(n == 0)
        def _():
            zpad_ref[...] = jnp.zeros_like(zpad_ref)       # zero pad borders once

        zpad_ref[Wp + 1:Wp + 1 + HW2, :] = z               # interior of padded image

        acc = jnp.zeros((HW2, PP), f32)
        for t in range(9):
            sh = (t // 3) * Wp + (t % 3)
            acc = acc + jnp.dot(zpad_ref[sh:sh + HW2, :].astype(bf16), w2_ref[t],
                                preferred_element_type=f32)
        y2 = acc + b2_ref[...]
        y2_ref[...] = y2

        y2m = y2 * m
        pool_ref[...] = jnp.sum(y2m, axis=0, keepdims=True)   # SE pool (pre-bn2 affine)

        @pl.when(n == 0)
        def _():
            sum2_ref[...] = jnp.zeros_like(sum2_ref)
            sq2_ref[...] = jnp.zeros_like(sq2_ref)

        sum2_ref[...] += jnp.sum(y2m, axis=0, keepdims=True)
        sq2_ref[...] += jnp.sum(y2 * y2m, axis=0, keepdims=True)

    y2, pool_sum, sum2, sq2 = pl.pallas_call(
        pass2_kernel,
        grid=(N,),
        in_specs=[per_img(HW2, PP), full((9, PP, PP)), full((1, PP)),
                  full((1, PP)), full((1, PP)), full((HW2, 1))],
        out_specs=[per_img(HW2, PP), per_img(1, PP),
                   full((1, PP)), full((1, PP))],
        out_shape=[jax.ShapeDtypeStruct((N, HW2, PP), f32),
                   jax.ShapeDtypeStruct((N, 1, PP), f32),
                   jax.ShapeDtypeStruct((1, PP), f32),
                   jax.ShapeDtypeStruct((1, PP), f32)],
        scratch_shapes=[pltpu.VMEM((FLAT, PP), f32)],
        compiler_params=params_red,
    )(y1, pp["w2"], pp["b2"], a1, c1, mask)

    a2, c2 = bn_coeffs(sum2, sq2, pp["g2"], pp["be2"])
    # global average pool of bn2(y2): bn2 is affine per channel, so apply it to the mean
    pooled = a2 * (pool_sum.reshape(N, PP) / float(H * W)) + c2        # (N, PP)

    # ----------------------------------------------------------------------
    # SE MLP (tiny): fc -> PReLU -> fc -> sigmoid
    # ----------------------------------------------------------------------
    def se_kernel(p_ref, fw1_ref, fb1_ref, alpha_ref, fw2_ref, fb2_ref, o_ref):
        h = jnp.dot(p_ref[...], fw1_ref[...], preferred_element_type=f32) + fb1_ref[...]
        h = jnp.where(h >= 0.0, h, alpha_ref[...] * h)                 # PReLU (single alpha)
        s = jnp.dot(h, fw2_ref[...], preferred_element_type=f32) + fb2_ref[...]
        o_ref[...] = jax.nn.sigmoid(s)

    vmem = pl.BlockSpec(memory_space=pltpu.MemorySpace.VMEM)
    se = pl.pallas_call(
        se_kernel,
        in_specs=[vmem] * 6,
        out_specs=vmem,
        out_shape=jax.ShapeDtypeStruct((N, PP), f32),
    )(pooled, pp["fc1w"], pp["fc1b"], pp["alpha"], pp["fc2w"], pp["fc2b"])
    se = se.reshape(N, 1, PP)

    # ----------------------------------------------------------------------
    # Pass 3: bn2 * SE scale + bn_d(residual), relu     (fully parallel over images)
    # ----------------------------------------------------------------------
    def pass3_kernel(y2_ref, r_ref, se_ref, a2_ref, c2_ref, ad_ref, cd_ref, o_ref):
        o = (y2_ref[...] * a2_ref[...] + c2_ref[...]) * se_ref[...] \
            + (r_ref[...] * ad_ref[...] + cd_ref[...])
        o_ref[...] = jnp.maximum(o, 0.0)

    out_flat = pl.pallas_call(
        pass3_kernel,
        grid=(N,),
        in_specs=[per_img(HW2, PP), per_img(HW2, PP), per_img(1, PP),
                  full((1, PP)), full((1, PP)), full((1, PP)), full((1, PP))],
        out_specs=per_img(HW2, PP),
        out_shape=jax.ShapeDtypeStruct((N, HW2, PP), f32),
        compiler_params=params_par,
    )(y2, r_raw, se, a2, c2, ad, cd)

    # crop junk columns / padded channels, back to NCHW
    out = out_flat.reshape(N, H, Wp, PP)[:, :, :W, :P]
    return jnp.transpose(out, (0, 3, 1, 2))


def init_params(key, inplanes, planes, reduction=REDUCTION):
    ks = jax.random.split(key, 10)
    f32 = jnp.float32
    n = lambda k, s, sc=0.1: sc * jax.random.normal(k, s, dtype=f32)
    return {
        # conv3x3(inplanes, planes), bias=True   (PyTorch layout O,I,KH,KW)
        "w1": n(ks[0], (planes, inplanes, 3, 3)),
        "b1": n(ks[1], (planes,)),
        "g1": jnp.ones((planes,), f32), "be1": jnp.zeros((planes,), f32),
        # conv3x3(planes, planes), bias=True
        "w2": n(ks[2], (planes, planes, 3, 3)),
        "b2": n(ks[3], (planes,)),
        "g2": jnp.ones((planes,), f32), "be2": jnp.zeros((planes,), f32),
        # downsample: 1x1 conv (no bias) + BN
        "wd": n(ks[4], (planes, inplanes, 1, 1)),
        "gd": jnp.ones((planes,), f32), "bed": jnp.zeros((planes,), f32),
        # SE: Linear(planes, reduction) -> PReLU -> Linear(reduction, planes) -> Sigmoid
        "fc1w": n(ks[5], (reduction, planes)), "fc1b": n(ks[6], (reduction,)),
        "alpha": jnp.asarray(0.25, f32),
        "fc2w": n(ks[7], (planes, reduction)), "fc2b": n(ks[8], (planes,)),
    }


if __name__ == "__main__":
    key = jax.random.PRNGKey(0)
    kx, kp = jax.random.split(key)

    N, Cin, H, W = 2, 4, 16, 16
    planes = 8
    x = jax.random.normal(kx, (N, Cin, H, W), dtype=jnp.float32)   # NCHW like the module
    raw_params = init_params(kp, Cin, planes, REDUCTION)
    prepped = prepare_params(raw_params, Cin, planes, REDUCTION)   # hoisted one-time prep

    fwd = jax.jit(ice_se_basic_block, static_argnums=(2,))
    out = jax.block_until_ready(fwd(x, prepped, planes))

    assert out.shape == (N, planes, H, W)
    assert bool(jnp.all(jnp.isfinite(out)))
    print("KERNEL_OK")
</pallas_src>

<mosaic_0001>
module attributes {stable_mosaic.version = 11 : i64} {
  func.func @pass2_kernel(%arg0: i32, %arg1: memref<1x288x128xf32, #tpu.memory_space<vmem>>, %arg2: memref<9x128x128xbf16, #tpu.memory_space<vmem>>, %arg3: memref<1x128xf32, #tpu.memory_space<vmem>>, %arg4: memref<1x128xf32, #tpu.memory_space<vmem>>, %arg5: memref<1x128xf32, #tpu.memory_space<vmem>>, %arg6: memref<288x1xf32, #tpu.memory_space<vmem>>, %arg7: memref<1x288x128xf32, #tpu.memory_space<vmem>>, %arg8: memref<1x1x128xf32, #tpu.memory_space<vmem>>, %arg9: memref<1x128xf32, #tpu.memory_space<vmem>>, %arg10: memref<1x128xf32, #tpu.memory_space<vmem>>, %arg11: memref<342x128xf32, #tpu.memory_space<vmem>>) attributes {dimension_semantics = [#tpu.dimension_semantics<arbitrary>], iteration_bounds = array<i64: 2>, scalar_prefetch = 0 : i64, scratch_operands = 1 : i64, tpu.core_type = #tpu.core_type<tc>, window_params = [{transform_indices = @transform_0, window_bounds = array<i64: 1, 288, 128>}, {pipeline_mode = #tpu.pipeline_mode<synchronous>, transform_indices = @transform_1, window_bounds = array<i64: 9, 128, 128>}, {pipeline_mode = #tpu.pipeline_mode<synchronous>, transform_indices = @transform_2, window_bounds = array<i64: 1, 128>}, {pipeline_mode = #tpu.pipeline_mode<synchronous>, transform_indices = @transform_3, window_bounds = array<i64: 1, 128>}, {pipeline_mode = #tpu.pipeline_mode<synchronous>, transform_indices = @transform_4, window_bounds = array<i64: 1, 128>}, {pipeline_mode = #tpu.pipeline_mode<synchronous>, transform_indices = @transform_5, window_bounds = array<i64: 288, 1>}, {transform_indices = @transform_6, window_bounds = array<i64: 1, 288, 128>}, {transform_indices = @transform_7, window_bounds = array<i64: 1, 1, 128>}, {pipeline_mode = #tpu.pipeline_mode<synchronous>, transform_indices = @transform_8, window_bounds = array<i64: 1, 128>}, {pipeline_mode = #tpu.pipeline_mode<synchronous>, transform_indices = @transform_9, window_bounds = array<i64: 1, 128>}]} {
    %c0 = arith.constant 0 : index
    %c0_0 = arith.constant 0 : index
    %0 = vector.load %arg6[%c0, %c0_0] : memref<288x1xf32, #tpu.memory_space<vmem>>, vector<288x1xf32>
    %c0_1 = arith.constant 0 : index
    %c0_2 = arith.constant 0 : index
    %c0_3 = arith.constant 0 : index
    %1 = vector.load %arg1[%c0_1, %c0_2, %c0_3] : memref<1x288x128xf32, #tpu.memory_space<vmem>>, vector<1x288x128xf32>
    %2 = vector.shape_cast %1 : vector<1x288x128xf32> to vector<288x128xf32>
    %c0_4 = arith.constant 0 : index
    %c0_5 = arith.constant 0 : index
    %3 = vector.load %arg4[%c0_4, %c0_5] : memref<1x128xf32, #tpu.memory_space<vmem>>, vector<1x128xf32>
    %4 = vector.broadcast %3 : vector<1x128xf32> to vector<288x128xf32>
    %5 = arith.mulf %2, %4 : vector<288x128xf32>
    %c0_6 = arith.constant 0 : index
    %c0_7 = arith.constant 0 : index
    %6 = vector.load %arg5[%c0_6, %c0_7] : memref<1x128xf32, #tpu.memory_space<vmem>>, vector<1x128xf32>
    %7 = vector.broadcast %6 : vector<1x128xf32> to vector<288x128xf32>
    %8 = arith.addf %5, %7 : vector<288x128xf32>
    %cst = arith.constant 0.000000e+00 : f32
    %9 = vector.broadcast %cst : f32 to vector<288x128xf32>
    %10 = arith.maximumf %8, %9 : vector<288x128xf32>
    %11 = vector.broadcast %0 : vector<288x1xf32> to vector<288x128xf32>
    %12 = arith.mulf %10, %11 : vector<288x128xf32>
    %c0_i32 = arith.constant 0 : i32
    %13 = arith.cmpi eq, %arg0, %c0_i32 : i32
    %14 = arith.extui %13 : i1 to i32
    %c0_i32_8 = arith.constant 0 : i32
    %15 = arith.cmpi ne, %14, %c0_i32_8 : i32
    scf.if %15 {
      %cst_73 = arith.constant 0.000000e+00 : f32
      %99 = vector.broadcast %cst_73 : f32 to vector<342x128xf32>
      %c0_74 = arith.constant 0 : index
      %c0_75 = arith.constant 0 : index
      %100 = vector.load %arg11[%c0_74, %c0_75] : memref<342x128xf32, #tpu.memory_space<vmem>>, vector<342x128xf32>
      tpu.vector_store %arg11[%c0_74, %c0_75], %99 {strides = array<i32>} : memref<342x128xf32, #tpu.memory_space<vmem>>, vector<342x128xf32>,
    } else {
    }
    %c19 = arith.constant 19 : index
    %c0_9 = arith.constant 0 : index
    %16 = vector.load %arg11[%c19, %c0_9] : memref<342x128xf32, #tpu.memory_space<vmem>>, vector<288x128xf32>
    tpu.vector_store %arg11[%c19, %c0_9], %12 {strides = array<i32>} : memref<342x128xf32, #tpu.memory_space<vmem>>, vector<288x128xf32>,
    %cst_10 = arith.constant 0.000000e+00 : f32
    %17 = vector.broadcast %cst_10 : f32 to vector<288x128xf32>
    %c0_11 = arith.constant 0 : index
    %c0_12 = arith.constant 0 : index
    %18 = vector.load %arg11[%c0_11, %c0_12] : memref<342x128xf32, #tpu.memory_space<vmem>>, vector<288x128xf32>
    %19 = arith.truncf %18 : vector<288x128xf32> to vector<288x128xbf16>
    %c0_13 = arith.constant 0 : index
    %c0_14 = arith.constant 0 : index
    %c0_15 = arith.constant 0 : index
    %20 = vector.load %arg2[%c0_13, %c0_14, %c0_15] : memref<9x128x128xbf16, #tpu.memory_space<vmem>>, vector<1x128x128xbf16>
    %21 = vector.shape_cast %20 : vector<1x128x128xbf16> to vector<128x128xbf16>
    %cst_16 = arith.constant dense<0.000000e+00> : vector<288x128xf32>
    %22 = tpu.matmul %19, %21, %cst_16 {dimension_numbers = #tpu.dot_dimension_numbers<[1], [0], [0], [1], [0, 0, 1, 1], [], []>} : vector<288x128xbf16>, vector<128x128xbf16>, vector<288x128xf32> -> vector<288x128xf32>
    %23 = arith.addf %17, %22 : vector<288x128xf32>
    %c1 = arith.constant 1 : index
    %c0_17 = arith.constant 0 : index
    %24 = vector.load %arg11[%c1, %c0_17] : memref<342x128xf32, #tpu.memory_space<vmem>>, vector<288x128xf32>
    %25 = arith.truncf %24 : vector<288x128xf32> to vector<288x128xbf16>
    %c1_18 = arith.constant 1 : index
    %c0_19 = arith.constant 0 : index
    %c0_20 = arith.constant 0 : index
    %26 = vector.load %arg2[%c1_18, %c0_19, %c0_20] : memref<9x128x128xbf16, #tpu.memory_space<vmem>>, vector<1x128x128xbf16>
    %27 = vector.shape_cast %26 : vector<1x128x128xbf16> to vector<128x128xbf16>
    %cst_21 = arith.constant dense<0.000000e+00> : vector<288x128xf32>
    %28 = tpu.matmul %25, %27, %cst_21 {dimension_numbers = #tpu.dot_dimension_numbers<[1], [0], [0], [1], [0, 0, 1, 1], [], []>} : vector<288x128xbf16>, vector<128x128xbf16>, vector<288x128xf32> -> vector<288x128xf32>
    %29 = arith.addf %23, %28 : vector<288x128xf32>
    %c2 = arith.constant 2 : index
    %c0_22 = arith.constant 0 : index
    %30 = vector.load %arg11[%c2, %c0_22] : memref<342x128xf32, #tpu.memory_space<vmem>>, vector<288x128xf32>
    %31 = arith.truncf %30 : vector<288x128xf32> to vector<288x128xbf16>
    %c2_23 = arith.constant 2 : index
    %c0_24 = arith.constant 0 : index
    %c0_25 = arith.constant 0 : index
    %32 = vector.load %arg2[%c2_23, %c0_24, %c0_25] : memref<9x128x128xbf16, #tpu.memory_space<vmem>>, vector<1x128x128xbf16>
    %33 = vector.shape_cast %32 : vector<1x128x128xbf16> to vector<128x128xbf16>
    %cst_26 = arith.constant dense<0.000000e+00> : vector<288x128xf32>
    %34 = tpu.matmul %31, %33, %cst_26 {dimension_numbers = #tpu.dot_dimension_numbers<[1], [0], [0], [1], [0, 0, 1, 1], [], []>} : vector<288x128xbf16>, vector<128x128xbf16>, vector<288x128xf32> -> vector<288x128xf32>
    %35 = arith.addf %29, %34 : vector<288x128xf32>
    %c18 = arith.constant 18 : index
    %c0_27 = arith.constant 0 : index
    %36 = vector.load %arg11[%c18, %c0_27] : memref<342x128xf32, #tpu.memory_space<vmem>>, vector<288x128xf32>
    %37 = arith.truncf %36 : vector<288x128xf32> to vector<288x128xbf16>
    %c3 = arith.constant 3 : index
    %c0_28 = arith.constant 0 : index
    %c0_29 = arith.constant 0 : index
    %38 = vector.load %arg2[%c3, %c0_28, %c0_29] : memref<9x128x128xbf16, #tpu.memory_space<vmem>>, vector<1x128x128xbf16>
    %39 = vector.shape_cast %38 : vector<1x128x128xbf16> to vector<128x128xbf16>
    %cst_30 = arith.constant dense<0.000000e+00> : vector<288x128xf32>
    %40 = tpu.matmul %37, %39, %cst_30 {dimension_numbers = #tpu.dot_dimension_numbers<[1], [0], [0], [1], [0, 0, 1, 1], [], []>} : vector<288x128xbf16>, vector<128x128xbf16>, vector<288x128xf32> -> vector<288x128xf32>
    %41 = arith.addf %35, %40 : vector<288x128xf32>
    %c19_31 = arith.constant 19 : index
    %c0_32 = arith.constant 0 : index
    %42 = vector.load %arg11[%c19_31, %c0_32] : memref<342x128xf32, #tpu.memory_space<vmem>>, vector<288x128xf32>
    %43 = arith.truncf %42 : vector<288x128xf32> to vector<288x128xbf16>
    %c4 = arith.constant 4 : index
    %c0_33 = arith.constant 0 : index
    %c0_34 = arith.constant 0 : index
    %44 = vector.load %arg2[%c4, %c0_33, %c0_34] : memref<9x128x128xbf16, #tpu.memory_space<vmem>>, vector<1x128x128xbf16>
    %45 = vector.shape_cast %44 : vector<1x128x128xbf16> to vector<128x128xbf16>
    %cst_35 = arith.constant dense<0.000000e+00> : vector<288x128xf32>
    %46 = tpu.matmul %43, %45, %cst_35 {dimension_numbers = #tpu.dot_dimension_numbers<[1], [0], [0], [1], [0, 0, 1, 1], [], []>} : vector<288x128xbf16>, vector<128x128xbf16>, vector<288x128xf32> -> vector<288x128xf32>
    %47 = arith.addf %41, %46 : vector<288x128xf32>
    %c20 = arith.constant 20 : index
    %c0_36 = arith.constant 0 : index
    %48 = vector.load %arg11[%c20, %c0_36] : memref<342x128xf32, #tpu.memory_space<vmem>>, vector<288x128xf32>
    %49 = arith.truncf %48 : vector<288x128xf32> to vector<288x128xbf16>
    %c5 = arith.constant 5 : index
    %c0_37 = arith.constant 0 : index
    %c0_38 = arith.constant 0 : index
    %50 = vector.load %arg2[%c5, %c0_37, %c0_38] : memref<9x128x128xbf16, #tpu.memory_space<vmem>>, vector<1x128x128xbf16>
    %51 = vector.shape_cast %50 : vector<1x128x128xbf16> to vector<128x128xbf16>
    %cst_39 = arith.constant dense<0.000000e+00> : vector<288x128xf32>
    %52 = tpu.matmul %49, %51, %cst_39 {dimension_numbers = #tpu.dot_dimension_numbers<[1], [0], [0], [1], [0, 0, 1, 1], [], []>} : vector<288x128xbf16>, vector<128x128xbf16>, vector<288x128xf32> -> vector<288x128xf32>
    %53 = arith.addf %47, %52 : vector<288x128xf32>
    %c36 = arith.constant 36 : index
    %c0_40 = arith.constant 0 : index
    %54 = vector.load %arg11[%c36, %c0_40] : memref<342x128xf32, #tpu.memory_space<vmem>>, vector<288x128xf32>
    %55 = arith.truncf %54 : vector<288x128xf32> to vector<288x128xbf16>
    %c6 = arith.constant 6 : index
    %c0_41 = arith.constant 0 : index
    %c0_42 = arith.constant 0 : index
    %56 = vector.load %arg2[%c6, %c0_41, %c0_42] : memref<9x128x128xbf16, #tpu.memory_space<vmem>>, vector<1x128x128xbf16>
    %57 = vector.shape_cast %56 : vector<1x128x128xbf16> to vector<128x128xbf16>
    %cst_43 = arith.constant dense<0.000000e+00> : vector<288x128xf32>
    %58 = tpu.matmul %55, %57, %cst_43 {dimension_numbers = #tpu.dot_dimension_numbers<[1], [0], [0], [1], [0, 0, 1, 1], [], []>} : vector<288x128xbf16>, vector<128x128xbf16>, vector<288x128xf32> -> vector<288x128xf32>
    %59 = arith.addf %53, %58 : vector<288x128xf32>
    %c37 = arith.constant 37 : index
    %c0_44 = arith.constant 0 : index
    %60 = vector.load %arg11[%c37, %c0_44] : memref<342x128xf32, #tpu.memory_space<vmem>>, vector<288x128xf32>
    %61 = arith.truncf %60 : vector<288x128xf32> to vector<288x128xbf16>
    %c7 = arith.constant 7 : index
    %c0_45 = arith.constant 0 : index
    %c0_46 = arith.constant 0 : index
    %62 = vector.load %arg2[%c7, %c0_45, %c0_46] : memref<9x128x128xbf16, #tpu.memory_space<vmem>>, vector<1x128x128xbf16>
    %63 = vector.shape_cast %62 : vector<1x128x128xbf16> to vector<128x128xbf16>
    %cst_47 = arith.constant dense<0.000000e+00> : vector<288x128xf32>
    %64 = tpu.matmul %61, %63, %cst_47 {dimension_numbers = #tpu.dot_dimension_numbers<[1], [0], [0], [1], [0, 0, 1, 1], [], []>} : vector<288x128xbf16>, vector<128x128xbf16>, vector<288x128xf32> -> vector<288x128xf32>
    %65 = arith.addf %59, %64 : vector<288x128xf32>
    %c38 = arith.constant 38 : index
    %c0_48 = arith.constant 0 : index
    %66 = vector.load %arg11[%c38, %c0_48] : memref<342x128xf32, #tpu.memory_space<vmem>>, vector<288x128xf32>
    %67 = arith.truncf %66 : vector<288x128xf32> to vector<288x128xbf16>
    %c8 = arith.constant 8 : index
    %c0_49 = arith.constant 0 : index
    %c0_50 = arith.constant 0 : index
    %68 = vector.load %arg2[%c8, %c0_49, %c0_50] : memref<9x128x128xbf16, #tpu.memory_space<vmem>>, vector<1x128x128xbf16>
    %69 = vector.shape_cast %68 : vector<1x128x128xbf16> to vector<128x128xbf16>
    %cst_51 = arith.constant dense<0.000000e+00> : vector<288x128xf32>
    %70 = tpu.matmul %67, %69, %cst_51 {dimension_numbers = #tpu.dot_dimension_numbers<[1], [0], [0], [1], [0, 0, 1, 1], [], []>} : vector<288x128xbf16>, vector<128x128xbf16>, vector<288x128xf32> -> vector<288x128xf32>
    %71 = arith.addf %65, %70 : vector<288x128xf32>
    %c0_52 = arith.constant 0 : index
    %c0_53 = arith.constant 0 : index
    %72 = vector.load %arg3[%c0_52, %c0_53] : memref<1x128xf32, #tpu.memory_space<vmem>>, vector<1x128xf32>
    %73 = vector.broadcast %72 : vector<1x128xf32> to vector<288x128xf32>
    %74 = arith.addf %71, %73 : vector<288x128xf32>
    %c0_54 = arith.constant 0 : index
    %c0_55 = arith.constant 0 : index
    %c0_56 = arith.constant 0 : index
    %75 = vector.load %arg7[%c0_54, %c0_55, %c0_56] : memref<1x288x128xf32, #tpu.memory_space<vmem>>, vector<1x288x128xf32>
    %76 = vector.shape_cast %75 : vector<1x288x128xf32> to vector<288x128xf32>
    %77 = vector.shape_cast %74 : vector<288x128xf32> to vector<1x288x128xf32>
    tpu.vector_store %arg7[%c0_54, %c0_55, %c0_56], %77 {strides = array<i32>} : memref<1x288x128xf32, #tpu.memory_space<vmem>>, vector<1x288x128xf32>,
    %78 = vector.broadcast %0 : vector<288x1xf32> to vector<288x128xf32>
    %79 = arith.mulf %74, %78 : vector<288x128xf32>
    %cst_57 = arith.constant dense<0.000000e+00> : vector<128xf32>
    %80 = vector.multi_reduction <add>, %79, %cst_57 [0] : vector<288x128xf32> to vector<128xf32>
    %81 = vector.shape_cast %80 : vector<128xf32> to vector<1x128xf32>
    %c0_58 = arith.constant 0 : index
    %c0_59 = arith.constant 0 : index
    %c0_60 = arith.constant 0 : index
    %82 = vector.load %arg8[%c0_58, %c0_59, %c0_60] : memref<1x1x128xf32, #tpu.memory_space<vmem>>, vector<1x1x128xf32>
    %83 = vector.shape_cast %82 : vector<1x1x128xf32> to vector<1x128xf32>
    %84 = vector.shape_cast %81 : vector<1x128xf32> to vector<1x1x128xf32>
    tpu.vector_store %arg8[%c0_58, %c0_59, %c0_60], %84 {strides = array<i32>} : memref<1x1x128xf32, #tpu.memory_space<vmem>>, vector<1x1x128xf32>,
    %c0_i32_61 = arith.constant 0 : i32
    %85 = arith.cmpi eq, %arg0, %c0_i32_61 : i32
    %86 = arith.extui %85 : i1 to i32
    %c0_i32_62 = arith.constant 0 : i32
    %87 = arith.cmpi ne, %86, %c0_i32_62 : i32
    scf.if %87 {
      %cst_73 = arith.constant 0.000000e+00 : f32
      %99 = vector.broadcast %cst_73 : f32 to vector<1x128xf32>
      %c0_74 = arith.constant 0 : index
      %c0_75 = arith.constant 0 : index
      %100 = vector.load %arg9[%c0_74, %c0_75] : memref<1x128xf32, #tpu.memory_space<vmem>>, vector<1x128xf32>
      tpu.vector_store %arg9[%c0_74, %c0_75], %99 {strides = array<i32>} : memref<1x128xf32, #tpu.memory_space<vmem>>, vector<1x128xf32>,
      %cst_76 = arith.constant 0.000000e+00 : f32
      %101 = vector.broadcast %cst_76 : f32 to vector<1x128xf32>
      %c0_77 = arith.constant 0 : index
      %c0_78 = arith.constant 0 : index
      %102 = vector.load %arg10[%c0_77, %c0_78] : memref<1x128xf32, #tpu.memory_space<vmem>>, vector<1x128xf32>
      tpu.vector_store %arg10[%c0_77, %c0_78], %101 {strides = array<i32>} : memref<1x128xf32, #tpu.memory_space<vmem>>, vector<1x128xf32>,
    } else {
    }
    %c0_63 = arith.constant 0 : index
    %c0_64 = arith.constant 0 : index
    %88 = vector.load %arg9[%c0_63, %c0_64] : memref<1x128xf32, #tpu.memory_space<vmem>>, vector<1x128xf32>
    %cst_65 = arith.constant dense<0.000000e+00> : vector<128xf32>
    %89 = vector.multi_reduction <add>, %79, %cst_65 [0] : vector<288x128xf32> to vector<128xf32>
    %90 = vector.shape_cast %89 : vector<128xf32> to vector<1x128xf32>
    %91 = arith.addf %88, %90 : vector<1x128xf32>
    %c0_66 = arith.constant 0 : index
    %c0_67 = arith.constant 0 : index
    %92 = vector.load %arg9[%c0_66, %c0_67] : memref<1x128xf32, #tpu.memory_space<vmem>>, vector<1x128xf32>
    tpu.vector_store %arg9[%c0_66, %c0_67], %91 {strides = array<i32>} : memref<1x128xf32, #tpu.memory_space<vmem>>, vector<1x128xf32>,
    %c0_68 = arith.constant 0 : index
    %c0_69 = arith.constant 0 : index
    %93 = vector.load %arg10[%c0_68, %c0_69] : memref<1x128xf32, #tpu.memory_space<vmem>>, vector<1x128xf32>
    %94 = arith.mulf %74, %79 : vector<288x128xf32>
    %cst_70 = arith.constant dense<0.000000e+00> : vector<128xf32>
    %95 = vector.multi_reduction <add>, %94, %cst_70 [0] : vector<288x128xf32> to vector<128xf32>
    %96 = vector.shape_cast %95 : vector<128xf32> to vector<1x128xf32>
    %97 = arith.addf %93, %96 : vector<1x128xf32>
    %c0_71 = arith.constant 0 : index
    %c0_72 = arith.constant 0 : index
    %98 = vector.load %arg10[%c0_71, %c0_72] : memref<1x128xf32, #tpu.memory_space<vmem>>, vector<1x128xf32>
    tpu.vector_store %arg10[%c0_71, %c0_72], %97 {strides = array<i32>} : memref<1x128xf32, #tpu.memory_space<vmem>>, vector<1x128xf32>,
    return
  }
  func.func @transform_0(%arg0: i32) -> (i32, i32, i32) {
    %c0_i32 = arith.constant 0 : i32
    %c0_i32_0 = arith.constant 0 : i32
    %c0_i32_1 = arith.constant 0 : i32
    return %arg0, %c0_i32, %c0_i32_0 : i32, i32, i32
  }
  func.func @transform_1(%arg0: i32) -> (i32, i32, i32) {
    %c0_i32 = arith.constant 0 : i32
    %c0_i32_0 = arith.constant 0 : i32
    %c0_i32_1 = arith.constant 0 : i32
    %c0_i32_2 = arith.constant 0 : i32
    return %c0_i32, %c0_i32_0, %c0_i32_1 : i32, i32, i32
  }
  func.func @transform_2(%arg0: i32) -> (i32, i32) {
    %c0_i32 = arith.constant 0 : i32
    %c0_i32_0 = arith.constant 0 : i32
    %c0_i32_1 = arith.constant 0 : i32
    return %c0_i32, %c0_i32_0 : i32, i32
  }
  func.func @transform_3(%arg0: i32) -> (i32, i32) {
    %c0_i32 = arith.constant 0 : i32
    %c0_i32_0 = arith.constant 0 : i32
    %c0_i32_1 = arith.constant 0 : i32
    return %c0_i32, %c0_i32_0 : i32, i32
  }
  func.func @transform_4(%arg0: i32) -> (i32, i32) {
    %c0_i32 = arith.constant 0 : i32
    %c0_i32_0 = arith.constant 0 : i32
    %c0_i32_1 = arith.constant 0 : i32
    return %c0_i32, %c0_i32_0 : i32, i32
  }
  func.func @transform_5(%arg0: i32) -> (i32, i32) {
    %c0_i32 = arith.constant 0 : i32
    %c0_i32_0 = arith.constant 0 : i32
    %c0_i32_1 = arith.constant 0 : i32
    return %c0_i32, %c0_i32_0 : i32, i32
  }
  func.func @transform_6(%arg0: i32) -> (i32, i32, i32) {
    %c0_i32 = arith.constant 0 : i32
    %c0_i32_0 = arith.constant 0 : i32
    %c0_i32_1 = arith.constant 0 : i32
    return %arg0, %c0_i32, %c0_i32_0 : i32, i32, i32
  }
  func.func @transform_7(%arg0: i32) -> (i32, i32, i32) {
    %c0_i32 = arith.constant 0 : i32
    %c0_i32_0 = arith.constant 0 : i32
    %c0_i32_1 = arith.constant 0 : i32
    return %arg0, %c0_i32, %c0_i32_0 : i32, i32, i32
  }
  func.func @transform_8(%arg0: i32) -> (i32, i32) {
    %c0_i32 = arith.constant 0 : i32
    %c0_i32_0 = arith.constant 0 : i32
    %c0_i32_1 = arith.constant 0 : i32
    return %c0_i32, %c0_i32_0 : i32, i32
  }
  func.func @transform_9(%arg0: i32) -> (i32, i32) {
    %c0_i32 = arith.constant 0 : i32
    %c0_i32_0 = arith.constant 0 : i32
    %c0_i32_1 = arith.constant 0 : i32
    return %c0_i32, %c0_i32_0 : i32, i32
  }
}

module attributes {stable_mosaic.version = 11 : i64} {
  func.func @se_kernel(%arg0: memref<2x128xf32, #tpu.memory_space<vmem>>, %arg1: memref<128x128xf32, #tpu.memory_space<vmem>>, %arg2: memref<1x128xf32, #tpu.memory_space<vmem>>, %arg3: memref<1x1xf32, #tpu.memory_space<vmem>>, %arg4: memref<128x128xf32, #tpu.memory_space<vmem>>, %arg5: memref<1x128xf32, #tpu.memory_space<vmem>>, %arg6: memref<2x128xf32, #tpu.memory_space<vmem>>) attributes {dimension_semantics = [], scalar_prefetch = 0 : i64, scratch_operands = 0 : i64, tpu.core_type = #tpu.core_type<tc>} {
    %c0 = arith.constant 0 : index
    %c0_0 = arith.constant 0 : index
    %0 = vector.load %arg0[%c0, %c0_0] : memref<2x128xf32, #tpu.memory_space<vmem>>, vector<2x128xf32>
    %c0_1 = arith.constant 0 : index
    %c0_2 = arith.constant 0 : index
    %1 = vector.load %arg1[%c0_1, %c0_2] : memref<128x128xf32, #tpu.memory_space<vmem>>, vector<128x128xf32>
    %cst = arith.constant dense<0.000000e+00> : vector<2x128xf32>
    %2 = tpu.matmul %0, %1, %cst {dimension_numbers = #tpu.dot_dimension_numbers<[1], [0], [0], [1], [0, 0, 1, 1], [], []>} : vector<2x128xf32>, vector<128x128xf32>, vector<2x128xf32> -> vector<2x128xf32>
    %c0_3 = arith.constant 0 : index
    %c0_4 = arith.constant 0 : index
    %3 = vector.load %arg2[%c0_3, %c0_4] : memref<1x128xf32, #tpu.memory_space<vmem>>, vector<1x128xf32>
    %4 = vector.broadcast %3 : vector<1x128xf32> to vector<2x128xf32>
    %5 = arith.addf %2, %4 : vector<2x128xf32>
    %cst_5 = arith.constant 0.000000e+00 : f32
    %6 = vector.broadcast %cst_5 : f32 to vector<2x128xf32>
    %7 = arith.cmpf oge, %5, %6 : vector<2x128xf32>
    %c0_6 = arith.constant 0 : index
    %c0_7 = arith.constant 0 : index
    %8 = vector.load %arg3[%c0_6, %c0_7] : memref<1x1xf32, #tpu.memory_space<vmem>>, vector<1x1xf32>
    %9 = vector.broadcast %8 : vector<1x1xf32> to vector<2x128xf32>
    %10 = arith.mulf %9, %5 : vector<2x128xf32>
    %11 = arith.select %7, %5, %10 : vector<2x128xi1>, vector<2x128xf32>
    %c0_8 = arith.constant 0 : index
    %c0_9 = arith.constant 0 : index
    %12 = vector.load %arg4[%c0_8, %c0_9] : memref<128x128xf32, #tpu.memory_space<vmem>>, vector<128x128xf32>
    %cst_10 = arith.constant dense<0.000000e+00> : vector<2x128xf32>
    %13 = tpu.matmul %11, %12, %cst_10 {dimension_numbers = #tpu.dot_dimension_numbers<[1], [0], [0], [1], [0, 0, 1, 1], [], []>} : vector<2x128xf32>, vector<128x128xf32>, vector<2x128xf32> -> vector<2x128xf32>
    %c0_11 = arith.constant 0 : index
    %c0_12 = arith.constant 0 : index
    %14 = vector.load %arg5[%c0_11, %c0_12] : memref<1x128xf32, #tpu.memory_space<vmem>>, vector<1x128xf32>
    %15 = vector.broadcast %14 : vector<1x128xf32> to vector<2x128xf32>
    %16 = arith.addf %13, %15 : vector<2x128xf32>
    %17 = arith.negf %16 : vector<2x128xf32>
    %18 = math.exp %17 : vector<2x128xf32>
    %cst_13 = arith.constant 1.000000e+00 : f32
    %19 = vector.broadcast %cst_13 : f32 to vector<2x128xf32>
    %20 = arith.addf %19, %18 : vector<2x128xf32>
    %21 = arith.divf %19, %20 : vector<2x128xf32>
    %c0_14 = arith.constant 0 : index
    %c0_15 = arith.constant 0 : index
    %22 = vector.load %arg6[%c0_14, %c0_15] : memref<2x128xf32, #tpu.memory_space<vmem>>, vector<2x128xf32>
    tpu.vector_store %arg6[%c0_14, %c0_15], %21 {strides = array<i32>} : memref<2x128xf32, #tpu.memory_space<vmem>>, vector<2x128xf32>,
    return
  }
}

module attributes {stable_mosaic.version = 11 : i64} {
  func.func @pass1_kernel(%arg0: i32, %arg1: memref<1x342x128xf32, #tpu.memory_space<vmem>>, %arg2: memref<9x128x128xbf16, #tpu.memory_space<vmem>>, %arg3: memref<1x128xf32, #tpu.memory_space<vmem>>, %arg4: memref<128x128xbf16, #tpu.memory_space<vmem>>, %arg5: memref<288x1xf32, #tpu.memory_space<vmem>>, %arg6: memref<1x288x128xf32, #tpu.memory_space<vmem>>, %arg7: memref<1x288x128xf32, #tpu.memory_space<vmem>>, %arg8: memref<1x128xf32, #tpu.memory_space<vmem>>, %arg9: memref<1x128xf32, #tpu.memory_space<vmem>>, %arg10: memref<1x128xf32, #tpu.memory_space<vmem>>, %arg11: memref<1x128xf32, #tpu.memory_space<vmem>>) attributes {dimension_semantics = [#tpu.dimension_semantics<arbitrary>], iteration_bounds = array<i64: 2>, scalar_prefetch = 0 : i64, scratch_operands = 0 : i64, tpu.core_type = #tpu.core_type<tc>, window_params = [{transform_indices = @transform_0, window_bounds = array<i64: 1, 342, 128>}, {pipeline_mode = #tpu.pipeline_mode<synchronous>, transform_indices = @transform_1, window_bounds = array<i64: 9, 128, 128>}, {pipeline_mode = #tpu.pipeline_mode<synchronous>, transform_indices = @transform_2, window_bounds = array<i64: 1, 128>}, {pipeline_mode = #tpu.pipeline_mode<synchronous>, transform_indices = @transform_3, window_bounds = array<i64: 128, 128>}, {pipeline_mode = #tpu.pipeline_mode<synchronous>, transform_indices = @transform_4, window_bounds = array<i64: 288, 1>}, {transform_indices = @transform_5, window_bounds = array<i64: 1, 288, 128>}, {transform_indices = @transform_6, window_bounds = array<i64: 1, 288, 128>}, {pipeline_mode = #tpu.pipeline_mode<synchronous>, transform_indices = @transform_7, window_bounds = array<i64: 1, 128>}, {pipeline_mode = #tpu.pipeline_mode<synchronous>, transform_indices = @transform_8, window_bounds = array<i64: 1, 128>}, {pipeline_mode = #tpu.pipeline_mode<synchronous>, transform_indices = @transform_9, window_bounds = array<i64: 1, 128>}, {pipeline_mode = #tpu.pipeline_mode<synchronous>, transform_indices = @transform_10, window_bounds = array<i64: 1, 128>}]} {
    %cst = arith.constant 0.000000e+00 : f32
    %0 = vector.broadcast %cst : f32 to vector<288x128xf32>
    %c0 = arith.constant 0 : index
    %c0_0 = arith.constant 0 : index
    %c0_1 = arith.constant 0 : index
    %1 = vector.load %arg1[%c0, %c0_0, %c0_1] : memref<1x342x128xf32, #tpu.memory_space<vmem>>, vector<1x288x128xf32>
    %2 = vector.shape_cast %1 : vector<1x288x128xf32> to vector<288x128xf32>
    %3 = arith.truncf %2 : vector<288x128xf32> to vector<288x128xbf16>
    %c0_2 = arith.constant 0 : index
    %c0_3 = arith.constant 0 : index
    %c0_4 = arith.constant 0 : index
    %4 = vector.load %arg2[%c0_2, %c0_3, %c0_4] : memref<9x128x128xbf16, #tpu.memory_space<vmem>>, vector<1x128x128xbf16>
    %5 = vector.shape_cast %4 : vector<1x128x128xbf16> to vector<128x128xbf16>
    %cst_5 = arith.constant dense<0.000000e+00> : vector<288x128xf32>
    %6 = tpu.matmul %3, %5, %cst_5 {dimension_numbers = #tpu.dot_dimension_numbers<[1], [0], [0], [1], [0, 0, 1, 1], [], []>} : vector<288x128xbf16>, vector<128x128xbf16>, vector<288x128xf32> -> vector<288x128xf32>
    %7 = arith.addf %0, %6 : vector<288x128xf32>
    %c0_6 = arith.constant 0 : index
    %c1 = arith.constant 1 : index
    %c0_7 = arith.constant 0 : index
    %8 = vector.load %arg1[%c0_6, %c1, %c0_7] : memref<1x342x128xf32, #tpu.memory_space<vmem>>, vector<1x288x128xf32>
    %9 = vector.shape_cast %8 : vector<1x288x128xf32> to vector<288x128xf32>
    %10 = arith.truncf %9 : vector<288x128xf32> to vector<288x128xbf16>
    %c1_8 = arith.constant 1 : index
    %c0_9 = arith.constant 0 : index
    %c0_10 = arith.constant 0 : index
    %11 = vector.load %arg2[%c1_8, %c0_9, %c0_10] : memref<9x128x128xbf16, #tpu.memory_space<vmem>>, vector<1x128x128xbf16>
    %12 = vector.shape_cast %11 : vector<1x128x128xbf16> to vector<128x128xbf16>
    %cst_11 = arith.constant dense<0.000000e+00> : vector<288x128xf32>
    %13 = tpu.matmul %10, %12, %cst_11 {dimension_numbers = #tpu.dot_dimension_numbers<[1], [0], [0], [1], [0, 0, 1, 1], [], []>} : vector<288x128xbf16>, vector<128x128xbf16>, vector<288x128xf32> -> vector<288x128xf32>
    %14 = arith.addf %7, %13 : vector<288x128xf32>
    %c0_12 = arith.constant 0 : index
    %c2 = arith.constant 2 : index
    %c0_13 = arith.constant 0 : index
    %15 = vector.load %arg1[%c0_12, %c2, %c0_13] : memref<1x342x128xf32, #tpu.memory_space<vmem>>, vector<1x288x128xf32>
    %16 = vector.shape_cast %15 : vector<1x288x128xf32> to vector<288x128xf32>
    %17 = arith.truncf %16 : vector<288x128xf32> to vector<288x128xbf16>
    %c2_14 = arith.constant 2 : index
    %c0_15 = arith.constant 0 : index
    %c0_16 = arith.constant 0 : index
    %18 = vector.load %arg2[%c2_14, %c0_15, %c0_16] : memref<9x128x128xbf16, #tpu.memory_space<vmem>>, vector<1x128x128xbf16>
    %19 = vector.shape_cast %18 : vector<1x128x128xbf16> to vector<128x128xbf16>
    %cst_17 = arith.constant dense<0.000000e+00> : vector<288x128xf32>
    %20 = tpu.matmul %17, %19, %cst_17 {dimension_numbers = #tpu.dot_dimension_numbers<[1], [0], [0], [1], [0, 0, 1, 1], [], []>} : vector<288x128xbf16>, vector<128x128xbf16>, vector<288x128xf32> -> vector<288x128xf32>
    %21 = arith.addf %14, %20 : vector<288x128xf32>
    %c0_18 = arith.constant 0 : index
    %c18 = arith.constant 18 : index
    %c0_19 = arith.constant 0 : index
    %22 = vector.load %arg1[%c0_18, %c18, %c0_19] : memref<1x342x128xf32, #tpu.memory_space<vmem>>, vector<1x288x128xf32>
    %23 = vector.shape_cast %22 : vector<1x288x128xf32> to vector<288x128xf32>
    %24 = arith.truncf %23 : vector<288x128xf32> to vector<288x128xbf16>
    %c3 = arith.constant 3 : index
    %c0_20 = arith.constant 0 : index
    %c0_21 = arith.constant 0 : index
    %25 = vector.load %arg2[%c3, %c0_20, %c0_21] : memref<9x128x128xbf16, #tpu.memory_space<vmem>>, vector<1x128x128xbf16>
    %26 = vector.shape_cast %25 : vector<1x128x128xbf16> to vector<128x128xbf16>
    %cst_22 = arith.constant dense<0.000000e+00> : vector<288x128xf32>
    %27 = tpu.matmul %24, %26, %cst_22 {dimension_numbers = #tpu.dot_dimension_numbers<[1], [0], [0], [1], [0, 0, 1, 1], [], []>} : vector<288x128xbf16>, vector<128x128xbf16>, vector<288x128xf32> -> vector<288x128xf32>
    %28 = arith.addf %21, %27 : vector<288x128xf32>
    %c0_23 = arith.constant 0 : index
    %c19 = arith.constant 19 : index
    %c0_24 = arith.constant 0 : index
    %29 = vector.load %arg1[%c0_23, %c19, %c0_24] : memref<1x342x128xf32, #tpu.memory_space<vmem>>, vector<1x288x128xf32>
    %30 = vector.shape_cast %29 : vector<1x288x128xf32> to vector<288x128xf32>
    %31 = arith.truncf %30 : vector<288x128xf32> to vector<288x128xbf16>
    %c4 = arith.constant 4 : index
    %c0_25 = arith.constant 0 : index
    %c0_26 = arith.constant 0 : index
    %32 = vector.load %arg2[%c4, %c0_25, %c0_26] : memref<9x128x128xbf16, #tpu.memory_space<vmem>>, vector<1x128x128xbf16>
    %33 = vector.shape_cast %32 : vector<1x128x128xbf16> to vector<128x128xbf16>
    %cst_27 = arith.constant dense<0.000000e+00> : vector<288x128xf32>
    %34 = tpu.matmul %31, %33, %cst_27 {dimension_numbers = #tpu.dot_dimension_numbers<[1], [0], [0], [1], [0, 0, 1, 1], [], []>} : vector<288x128xbf16>, vector<128x128xbf16>, vector<288x128xf32> -> vector<288x128xf32>
    %35 = arith.addf %28, %34 : vector<288x128xf32>
    %c0_28 = arith.constant 0 : index
    %c20 = arith.constant 20 : index
    %c0_29 = arith.constant 0 : index
    %36 = vector.load %arg1[%c0_28, %c20, %c0_29] : memref<1x342x128xf32, #tpu.memory_space<vmem>>, vector<1x288x128xf32>
    %37 = vector.shape_cast %36 : vector<1x288x128xf32> to vector<288x128xf32>
    %38 = arith.truncf %37 : vector<288x128xf32> to vector<288x128xbf16>
    %c5 = arith.constant 5 : index
    %c0_30 = arith.constant 0 : index
    %c0_31 = arith.constant 0 : index
    %39 = vector.load %arg2[%c5, %c0_30, %c0_31] : memref<9x128x128xbf16, #tpu.memory_space<vmem>>, vector<1x128x128xbf16>
    %40 = vector.shape_cast %39 : vector<1x128x128xbf16> to vector<128x128xbf16>
    %cst_32 = arith.constant dense<0.000000e+00> : vector<288x128xf32>
    %41 = tpu.matmul %38, %40, %cst_32 {dimension_numbers = #tpu.dot_dimension_numbers<[1], [0], [0], [1], [0, 0, 1, 1], [], []>} : vector<288x128xbf16>, vector<128x128xbf16>, vector<288x128xf32> -> vector<288x128xf32>
    %42 = arith.addf %35, %41 : vector<288x128xf32>
    %c0_33 = arith.constant 0 : index
    %c36 = arith.constant 36 : index
    %c0_34 = arith.constant 0 : index
    %43 = vector.load %arg1[%c0_33, %c36, %c0_34] : memref<1x342x128xf32, #tpu.memory_space<vmem>>, vector<1x288x128xf32>
    %44 = vector.shape_cast %43 : vector<1x288x128xf32> to vector<288x128xf32>
    %45 = arith.truncf %44 : vector<288x128xf32> to vector<288x128xbf16>
    %c6 = arith.constant 6 : index
    %c0_35 = arith.constant 0 : index
    %c0_36 = arith.constant 0 : index
    %46 = vector.load %arg2[%c6, %c0_35, %c0_36] : memref<9x128x128xbf16, #tpu.memory_space<vmem>>, vector<1x128x128xbf16>
    %47 = vector.shape_cast %46 : vector<1x128x128xbf16> to vector<128x128xbf16>
    %cst_37 = arith.constant dense<0.000000e+00> : vector<288x128xf32>
    %48 = tpu.matmul %45, %47, %cst_37 {dimension_numbers = #tpu.dot_dimension_numbers<[1], [0], [0], [1], [0, 0, 1, 1], [], []>} : vector<288x128xbf16>, vector<128x128xbf16>, vector<288x128xf32> -> vector<288x128xf32>
    %49 = arith.addf %42, %48 : vector<288x128xf32>
    %c0_38 = arith.constant 0 : index
    %c37 = arith.constant 37 : index
    %c0_39 = arith.constant 0 : index
    %50 = vector.load %arg1[%c0_38, %c37, %c0_39] : memref<1x342x128xf32, #tpu.memory_space<vmem>>, vector<1x288x128xf32>
    %51 = vector.shape_cast %50 : vector<1x288x128xf32> to vector<288x128xf32>
    %52 = arith.truncf %51 : vector<288x128xf32> to vector<288x128xbf16>
    %c7 = arith.constant 7 : index
    %c0_40 = arith.constant 0 : index
    %c0_41 = arith.constant 0 : index
    %53 = vector.load %arg2[%c7, %c0_40, %c0_41] : memref<9x128x128xbf16, #tpu.memory_space<vmem>>, vector<1x128x128xbf16>
    %54 = vector.shape_cast %53 : vector<1x128x128xbf16> to vector<128x128xbf16>
    %cst_42 = arith.constant dense<0.000000e+00> : vector<288x128xf32>
    %55 = tpu.matmul %52, %54, %cst_42 {dimension_numbers = #tpu.dot_dimension_numbers<[1], [0], [0], [1], [0, 0, 1, 1], [], []>} : vector<288x128xbf16>, vector<128x128xbf16>, vector<288x128xf32> -> vector<288x128xf32>
    %56 = arith.addf %49, %55 : vector<288x128xf32>
    %c0_43 = arith.constant 0 : index
    %c38 = arith.constant 38 : index
    %c0_44 = arith.constant 0 : index
    %57 = vector.load %arg1[%c0_43, %c38, %c0_44] : memref<1x342x128xf32, #tpu.memory_space<vmem>>, vector<1x288x128xf32>
    %58 = vector.shape_cast %57 : vector<1x288x128xf32> to vector<288x128xf32>
    %59 = arith.truncf %58 : vector<288x128xf32> to vector<288x128xbf16>
    %c8 = arith.constant 8 : index
    %c0_45 = arith.constant 0 : index
    %c0_46 = arith.constant 0 : index
    %60 = vector.load %arg2[%c8, %c0_45, %c0_46] : memref<9x128x128xbf16, #tpu.memory_space<vmem>>, vector<1x128x128xbf16>
    %61 = vector.shape_cast %60 : vector<1x128x128xbf16> to vector<128x128xbf16>
    %cst_47 = arith.constant dense<0.000000e+00> : vector<288x128xf32>
    %62 = tpu.matmul %59, %61, %cst_47 {dimension_numbers = #tpu.dot_dimension_numbers<[1], [0], [0], [1], [0, 0, 1, 1], [], []>} : vector<288x128xbf16>, vector<128x128xbf16>, vector<288x128xf32> -> vector<288x128xf32>
    %63 = arith.addf %56, %62 : vector<288x128xf32>
    %c0_48 = arith.constant 0 : index
    %c0_49 = arith.constant 0 : index
    %64 = vector.load %arg3[%c0_48, %c0_49] : memref<1x128xf32, #tpu.memory_space<vmem>>, vector<1x128xf32>
    %65 = vector.broadcast %64 : vector<1x128xf32> to vector<288x128xf32>
    %66 = arith.addf %63, %65 : vector<288x128xf32>
    %c0_50 = arith.constant 0 : index
    %c0_51 = arith.constant 0 : index
    %c0_52 = arith.constant 0 : index
    %67 = vector.load %arg6[%c0_50, %c0_51, %c0_52] : memref<1x288x128xf32, #tpu.memory_space<vmem>>, vector<1x288x128xf32>
    %68 = vector.shape_cast %67 : vector<1x288x128xf32> to vector<288x128xf32>
    %69 = vector.shape_cast %66 : vector<288x128xf32> to vector<1x288x128xf32>
    tpu.vector_store %arg6[%c0_50, %c0_51, %c0_52], %69 {strides = array<i32>} : memref<1x288x128xf32, #tpu.memory_space<vmem>>, vector<1x288x128xf32>,
    %c0_53 = arith.constant 0 : index
    %c19_54 = arith.constant 19 : index
    %c0_55 = arith.constant 0 : index
    %70 = vector.load %arg1[%c0_53, %c19_54, %c0_55] : memref<1x342x128xf32, #tpu.memory_space<vmem>>, vector<1x288x128xf32>
    %71 = vector.shape_cast %70 : vector<1x288x128xf32> to vector<288x128xf32>
    %72 = arith.truncf %71 : vector<288x128xf32> to vector<288x128xbf16>
    %c0_56 = arith.constant 0 : index
    %c0_57 = arith.constant 0 : index
    %73 = vector.load %arg4[%c0_56, %c0_57] : memref<128x128xbf16, #tpu.memory_space<vmem>>, vector<128x128xbf16>
    %cst_58 = arith.constant dense<0.000000e+00> : vector<288x128xf32>
    %74 = tpu.matmul %72, %73, %cst_58 {dimension_numbers = #tpu.dot_dimension_numbers<[1], [0], [0], [1], [0, 0, 1, 1], [], []>} : vector<288x128xbf16>, vector<128x128xbf16>, vector<288x128xf32> -> vector<288x128xf32>
    %c0_59 = arith.constant 0 : index
    %c0_60 = arith.constant 0 : index
    %c0_61 = arith.constant 0 : index
    %75 = vector.load %arg7[%c0_59, %c0_60, %c0_61] : memref<1x288x128xf32, #tpu.memory_space<vmem>>, vector<1x288x128xf32>
    %76 = vector.shape_cast %75 : vector<1x288x128xf32> to vector<288x128xf32>
    %77 = vector.shape_cast %74 : vector<288x128xf32> to vector<1x288x128xf32>
    tpu.vector_store %arg7[%c0_59, %c0_60, %c0_61], %77 {strides = array<i32>} : memref<1x288x128xf32, #tpu.memory_space<vmem>>, vector<1x288x128xf32>,
    %c0_62 = arith.constant 0 : index
    %c0_63 = arith.constant 0 : index
    %78 = vector.load %arg5[%c0_62, %c0_63] : memref<288x1xf32, #tpu.memory_space<vmem>>, vector<288x1xf32>
    %79 = vector.broadcast %78 : vector<288x1xf32> to vector<288x128xf32>
    %80 = arith.mulf %66, %79 : vector<288x128xf32>
    %81 = vector.broadcast %78 : vector<288x1xf32> to vector<288x128xf32>
    %82 = arith.mulf %74, %81 : vector<288x128xf32>
    %c0_i32 = arith.constant 0 : i32
    %83 = arith.cmpi eq, %arg0, %c0_i32 : i32
    %84 = arith.extui %83 : i1 to i32
    %c0_i32_64 = arith.constant 0 : i32
    %85 = arith.cmpi ne, %84, %c0_i32_64 : i32
    scf.if %85 {
      %cst_85 = arith.constant 0.000000e+00 : f32
      %108 = vector.broadcast %cst_85 : f32 to vector<1x128xf32>
      %c0_86 = arith.constant 0 : index
      %c0_87 = arith.constant 0 : index
      %109 = vector.load %arg8[%c0_86, %c0_87] : memref<1x128xf32, #tpu.memory_space<vmem>>, vector<1x128xf32>
      tpu.vector_store %arg8[%c0_86, %c0_87], %108 {strides = array<i32>} : memref<1x128xf32, #tpu.memory_space<vmem>>, vector<1x128xf32>,
      %cst_88 = arith.constant 0.000000e+00 : f32
      %110 = vector.broadcast %cst_88 : f32 to vector<1x128xf32>
      %c0_89 = arith.constant 0 : index
      %c0_90 = arith.constant 0 : index
      %111 = vector.load %arg9[%c0_89, %c0_90] : memref<1x128xf32, #tpu.memory_space<vmem>>, vector<1x128xf32>
      tpu.vector_store %arg9[%c0_89, %c0_90], %110 {strides = array<i32>} : memref<1x128xf32, #tpu.memory_space<vmem>>, vector<1x128xf32>,
      %cst_91 = arith.constant 0.000000e+00 : f32
      %112 = vector.broadcast %cst_91 : f32 to vector<1x128xf32>
      %c0_92 = arith.constant 0 : index
      %c0_93 = arith.constant 0 : index
      %113 = vector.load %arg10[%c0_92, %c0_93] : memref<1x128xf32, #tpu.memory_space<vmem>>, vector<1x128xf32>
      tpu.vector_store %arg10[%c0_92, %c0_93], %112 {strides = array<i32>} : memref<1x128xf32, #tpu.memory_space<vmem>>, vector<1x128xf32>,
      %cst_94 = arith.constant 0.000000e+00 : f32
      %114 = vector.broadcast %cst_94 : f32 to vector<1x128xf32>
      %c0_95 = arith.constant 0 : index
      %c0_96 = arith.constant 0 : index
      %115 = vector.load %arg11[%c0_95, %c0_96] : memref<1x128xf32, #tpu.memory_space<vmem>>, vector<1x128xf32>
      tpu.vector_store %arg11[%c0_95, %c0_96], %114 {strides = array<i32>} : memref<1x128xf32, #tpu.memory_space<vmem>>, vector<1x128xf32>,
    } else {
    }
    %c0_65 = arith.constant 0 : index
    %c0_66 = arith.constant 0 : index
    %86 = vector.load %arg8[%c0_65, %c0_66] : memref<1x128xf32, #tpu.memory_space<vmem>>, vector<1x128xf32>
    %cst_67 = arith.constant dense<0.000000e+00> : vector<128xf32>
    %87 = vector.multi_reduction <add>, %80, %cst_67 [0] : vector<288x128xf32> to vector<128xf32>
    %88 = vector.shape_cast %87 : vector<128xf32> to vector<1x128xf32>
    %89 = arith.addf %86, %88 : vector<1x128xf32>
    %c0_68 = arith.constant 0 : index
    %c0_69 = arith.constant 0 : index
    %90 = vector.load %arg8[%c0_68, %c0_69] : memref<1x128xf32, #tpu.memory_space<vmem>>, vector<1x128xf32>
    tpu.vector_store %arg8[%c0_68, %c0_69], %89 {strides = array<i32>} : memref<1x128xf32, #tpu.memory_space<vmem>>, vector<1x128xf32>,
    %c0_70 = arith.constant 0 : index
    %c0_71 = arith.constant 0 : index
    %91 = vector.load %arg9[%c0_70, %c0_71] : memref<1x128xf32, #tpu.memory_space<vmem>>, vector<1x128xf32>
    %92 = arith.mulf %66, %80 : vector<288x128xf32>
    %cst_72 = arith.constant dense<0.000000e+00> : vector<128xf32>
    %93 = vector.multi_reduction <add>, %92, %cst_72 [0] : vector<288x128xf32> to vector<128xf32>
    %94 = vector.shape_cast %93 : vector<128xf32> to vector<1x128xf32>
    %95 = arith.addf %91, %94 : vector<1x128xf32>
    %c0_73 = arith.constant 0 : index
    %c0_74 = arith.constant 0 : index
    %96 = vector.load %arg9[%c0_73, %c0_74] : memref<1x128xf32, #tpu.memory_space<vmem>>, vector<1x128xf32>
    tpu.vector_store %arg9[%c0_73, %c0_74], %95 {strides = array<i32>} : memref<1x128xf32, #tpu.memory_space<vmem>>, vector<1x128xf32>,
    %c0_75 = arith.constant 0 : index
    %c0_76 = arith.constant 0 : index
    %97 = vector.load %arg10[%c0_75, %c0_76] : memref<1x128xf32, #tpu.memory_space<vmem>>, vector<1x128xf32>
    %cst_77 = arith.constant dense<0.000000e+00> : vector<128xf32>
    %98 = vector.multi_reduction <add>, %82, %cst_77 [0] : vector<288x128xf32> to vector<128xf32>
    %99 = vector.shape_cast %98 : vector<128xf32> to vector<1x128xf32>
    %100 = arith.addf %97, %99 : vector<1x128xf32>
    %c0_78 = arith.constant 0 : index
    %c0_79 = arith.constant 0 : index
    %101 = vector.load %arg10[%c0_78, %c0_79] : memref<1x128xf32, #tpu.memory_space<vmem>>, vector<1x128xf32>
    tpu.vector_store %arg10[%c0_78, %c0_79], %100 {strides = array<i32>} : memref<1x128xf32, #tpu.memory_space<vmem>>, vector<1x128xf32>,
    %c0_80 = arith.constant 0 : index
    %c0_81 = arith.constant 0 : index
    %102 = vector.load %arg11[%c0_80, %c0_81] : memref<1x128xf32, #tpu.memory_space<vmem>>, vector<1x128xf32>
    %103 = arith.mulf %74, %82 : vector<288x128xf32>
    %cst_82 = arith.constant dense<0.000000e+00> : vector<128xf32>
    %104 = vector.multi_reduction <add>, %103, %cst_82 [0] : vector<288x128xf32> to vector<128xf32>
    %105 = vector.shape_cast %104 : vector<128xf32> to vector<1x128xf32>
    %106 = arith.addf %102, %105 : vector<1x128xf32>
    %c0_83 = arith.constant 0 : index
    %c0_84 = arith.constant 0 : index
    %107 = vector.load %arg11[%c0_83, %c0_84] : memref<1x128xf32, #tpu.memory_space<vmem>>, vector<1x128xf32>
    tpu.vector_store %arg11[%c0_83, %c0_84], %106 {strides = array<i32>} : memref<1x128xf32, #tpu.memory_space<vmem>>, vector<1x128xf32>,
    return
  }
  func.func @transform_0(%arg0: i32) -> (i32, i32, i32) {
    %c0_i32 = arith.constant 0 : i32
    %c0_i32_0 = arith.constant 0 : i32
    %c0_i32_1 = arith.constant 0 : i32
    return %arg0, %c0_i32, %c0_i32_0 : i32, i32, i32
  }
  func.func @transform_1(%arg0: i32) -> (i32, i32, i32) {
    %c0_i32 = arith.constant 0 : i32
    %c0_i32_0 = arith.constant 0 : i32
    %c0_i32_1 = arith.constant 0 : i32
    %c0_i32_2 = arith.constant 0 : i32
    return %c0_i32, %c0_i32_0, %c0_i32_1 : i32, i32, i32
  }
  func.func @transform_2(%arg0: i32) -> (i32, i32) {
    %c0_i32 = arith.constant 0 : i32
    %c0_i32_0 = arith.constant 0 : i32
    %c0_i32_1 = arith.constant 0 : i32
    return %c0_i32, %c0_i32_0 : i32, i32
  }
  func.func @transform_3(%arg0: i32) -> (i32, i32) {
    %c0_i32 = arith.constant 0 : i32
    %c0_i32_0 = arith.constant 0 : i32
    %c0_i32_1 = arith.constant 0 : i32
    return %c0_i32, %c0_i32_0 : i32, i32
  }
  func.func @transform_4(%arg0: i32) -> (i32, i32) {
    %c0_i32 = arith.constant 0 : i32
    %c0_i32_0 = arith.constant 0 : i32
    %c0_i32_1 = arith.constant 0 : i32
    return %c0_i32, %c0_i32_0 : i32, i32
  }
  func.func @transform_5(%arg0: i32) -> (i32, i32, i32) {
    %c0_i32 = arith.constant 0 : i32
    %c0_i32_0 = arith.constant 0 : i32
    %c0_i32_1 = arith.constant 0 : i32
    return %arg0, %c0_i32, %c0_i32_0 : i32, i32, i32
  }
  func.func @transform_6(%arg0: i32) -> (i32, i32, i32) {
    %c0_i32 = arith.constant 0 : i32
    %c0_i32_0 = arith.constant 0 : i32
    %c0_i32_1 = arith.constant 0 : i32
    return %arg0, %c0_i32, %c0_i32_0 : i32, i32, i32
  }
  func.func @transform_7(%arg0: i32) -> (i32, i32) {
    %c0_i32 = arith.constant 0 : i32
    %c0_i32_0 = arith.constant 0 : i32
    %c0_i32_1 = arith.constant 0 : i32
    return %c0_i32, %c0_i32_0 : i32, i32
  }
  func.func @transform_8(%arg0: i32) -> (i32, i32) {
    %c0_i32 = arith.constant 0 : i32
    %c0_i32_0 = arith.constant 0 : i32
    %c0_i32_1 = arith.constant 0 : i32
    return %c0_i32, %c0_i32_0 : i32, i32
  }
  func.func @transform_9(%arg0: i32) -> (i32, i32) {
    %c0_i32 = arith.constant 0 : i32
    %c0_i32_0 = arith.constant 0 : i32
    %c0_i32_1 = arith.constant 0 : i32
    return %c0_i32, %c0_i32_0 : i32, i32
  }
  func.func @transform_10(%arg0: i32) -> (i32, i32) {
    %c0_i32 = arith.constant 0 : i32
    %c0_i32_0 = arith.constant 0 : i32
    %c0_i32_1 = arith.constant 0 : i32
    return %c0_i32, %c0_i32_0 : i32, i32
  }
}

module attributes {stable_mosaic.version = 11 : i64} {
  func.func @pass3_kernel(%arg0: i32, %arg1: memref<1x288x128xf32, #tpu.memory_space<vmem>>, %arg2: memref<1x288x128xf32, #tpu.memory_space<vmem>>, %arg3: memref<1x1x128xf32, #tpu.memory_space<vmem>>, %arg4: memref<1x128xf32, #tpu.memory_space<vmem>>, %arg5: memref<1x128xf32, #tpu.memory_space<vmem>>, %arg6: memref<1x128xf32, #tpu.memory_space<vmem>>, %arg7: memref<1x128xf32, #tpu.memory_space<vmem>>, %arg8: memref<1x288x128xf32, #tpu.memory_space<vmem>>) attributes {dimension_semantics = [#tpu.dimension_semantics<parallel>], iteration_bounds = array<i64: 2>, scalar_prefetch = 0 : i64, scratch_operands = 0 : i64, tpu.core_type = #tpu.core_type<tc>, window_params = [{transform_indices = @transform_0, window_bounds = array<i64: 1, 288, 128>}, {transform_indices = @transform_1, window_bounds = array<i64: 1, 288, 128>}, {transform_indices = @transform_2, window_bounds = array<i64: 1, 1, 128>}, {pipeline_mode = #tpu.pipeline_mode<synchronous>, transform_indices = @transform_3, window_bounds = array<i64: 1, 128>}, {pipeline_mode = #tpu.pipeline_mode<synchronous>, transform_indices = @transform_4, window_bounds = array<i64: 1, 128>}, {pipeline_mode = #tpu.pipeline_mode<synchronous>, transform_indices = @transform_5, window_bounds = array<i64: 1, 128>}, {pipeline_mode = #tpu.pipeline_mode<synchronous>, transform_indices = @transform_6, window_bounds = array<i64: 1, 128>}, {transform_indices = @transform_7, window_bounds = array<i64: 1, 288, 128>}]} {
    %c0 = arith.constant 0 : index
    %c0_0 = arith.constant 0 : index
    %c0_1 = arith.constant 0 : index
    %0 = vector.load %arg1[%c0, %c0_0, %c0_1] : memref<1x288x128xf32, #tpu.memory_space<vmem>>, vector<1x288x128xf32>
    %1 = vector.shape_cast %0 : vector<1x288x128xf32> to vector<288x128xf32>
    %c0_2 = arith.constant 0 : index
    %c0_3 = arith.constant 0 : index
    %2 = vector.load %arg4[%c0_2, %c0_3] : memref<1x128xf32, #tpu.memory_space<vmem>>, vector<1x128xf32>
    %3 = vector.broadcast %2 : vector<1x128xf32> to vector<288x128xf32>
    %4 = arith.mulf %1, %3 : vector<288x128xf32>
    %c0_4 = arith.constant 0 : index
    %c0_5 = arith.constant 0 : index
    %5 = vector.load %arg5[%c0_4, %c0_5] : memref<1x128xf32, #tpu.memory_space<vmem>>, vector<1x128xf32>
    %6 = vector.broadcast %5 : vector<1x128xf32> to vector<288x128xf32>
    %7 = arith.addf %4, %6 : vector<288x128xf32>
    %c0_6 = arith.constant 0 : index
    %c0_7 = arith.constant 0 : index
    %c0_8 = arith.constant 0 : index
    %8 = vector.load %arg3[%c0_6, %c0_7, %c0_8] : memref<1x1x128xf32, #tpu.memory_space<vmem>>, vector<1x1x128xf32>
    %9 = vector.shape_cast %8 : vector<1x1x128xf32> to vector<1x128xf32>
    %10 = vector.broadcast %9 : vector<1x128xf32> to vector<288x128xf32>
    %11 = arith.mulf %7, %10 : vector<288x128xf32>
    %c0_9 = arith.constant 0 : index
    %c0_10 = arith.constant 0 : index
    %c0_11 = arith.constant 0 : index
    %12 = vector.load %arg2[%c0_9, %c0_10, %c0_11] : memref<1x288x128xf32, #tpu.memory_space<vmem>>, vector<1x288x128xf32>
    %13 = vector.shape_cast %12 : vector<1x288x128xf32> to vector<288x128xf32>
    %c0_12 = arith.constant 0 : index
    %c0_13 = arith.constant 0 : index
    %14 = vector.load %arg6[%c0_12, %c0_13] : memref<1x128xf32, #tpu.memory_space<vmem>>, vector<1x128xf32>
    %15 = vector.broadcast %14 : vector<1x128xf32> to vector<288x128xf32>
    %16 = arith.mulf %13, %15 : vector<288x128xf32>
    %c0_14 = arith.constant 0 : index
    %c0_15 = arith.constant 0 : index
    %17 = vector.load %arg7[%c0_14, %c0_15] : memref<1x128xf32, #tpu.memory_space<vmem>>, vector<1x128xf32>
    %18 = vector.broadcast %17 : vector<1x128xf32> to vector<288x128xf32>
    %19 = arith.addf %16, %18 : vector<288x128xf32>
    %20 = arith.addf %11, %19 : vector<288x128xf32>
    %cst = arith.constant 0.000000e+00 : f32
    %21 = vector.broadcast %cst : f32 to vector<288x128xf32>
    %22 = arith.maximumf %20, %21 : vector<288x128xf32>
    %c0_16 = arith.constant 0 : index
    %c0_17 = arith.constant 0 : index
    %c0_18 = arith.constant 0 : index
    %23 = vector.load %arg8[%c0_16, %c0_17, %c0_18] : memref<1x288x128xf32, #tpu.memory_space<vmem>>, vector<1x288x128xf32>
    %24 = vector.shape_cast %23 : vector<1x288x128xf32> to vector<288x128xf32>
    %25 = vector.shape_cast %22 : vector<288x128xf32> to vector<1x288x128xf32>
    tpu.vector_store %arg8[%c0_16, %c0_17, %c0_18], %25 {strides = array<i32>} : memref<1x288x128xf32, #tpu.memory_space<vmem>>, vector<1x288x128xf32>,
    return
  }
  func.func @transform_0(%arg0: i32) -> (i32, i32, i32) {
    %c0_i32 = arith.constant 0 : i32
    %c0_i32_0 = arith.constant 0 : i32
    %c0_i32_1 = arith.constant 0 : i32
    return %arg0, %c0_i32, %c0_i32_0 : i32, i32, i32
  }
  func.func @transform_1(%arg0: i32) -> (i32, i32, i32) {
    %c0_i32 = arith.constant 0 : i32
    %c0_i32_0 = arith.constant 0 : i32
    %c0_i32_1 = arith.constant 0 : i32
    return %arg0, %c0_i32, %c0_i32_0 : i32, i32, i32
  }
  func.func @transform_2(%arg0: i32) -> (i32, i32, i32) {
    %c0_i32 = arith.constant 0 : i32
    %c0_i32_0 = arith.constant 0 : i32
    %c0_i32_1 = arith.constant 0 : i32
    return %arg0, %c0_i32, %c0_i32_0 : i32, i32, i32
  }
  func.func @transform_3(%arg0: i32) -> (i32, i32) {
    %c0_i32 = arith.constant 0 : i32
    %c0_i32_0 = arith.constant 0 : i32
    %c0_i32_1 = arith.constant 0 : i32
    return %c0_i32, %c0_i32_0 : i32, i32
  }
  func.func @transform_4(%arg0: i32) -> (i32, i32) {
    %c0_i32 = arith.constant 0 : i32
    %c0_i32_0 = arith.constant 0 : i32
    %c0_i32_1 = arith.constant 0 : i32
    return %c0_i32, %c0_i32_0 : i32, i32
  }
  func.func @transform_5(%arg0: i32) -> (i32, i32) {
    %c0_i32 = arith.constant 0 : i32
    %c0_i32_0 = arith.constant 0 : i32
    %c0_i32_1 = arith.constant 0 : i32
    return %c0_i32, %c0_i32_0 : i32, i32
  }
  func.func @transform_6(%arg0: i32) -> (i32, i32) {
    %c0_i32 = arith.constant 0 : i32
    %c0_i32_0 = arith.constant 0 : i32
    %c0_i32_1 = arith.constant 0 : i32
    return %c0_i32, %c0_i32_0 : i32, i32
  }
  func.func @transform_7(%arg0: i32) -> (i32, i32, i32) {
    %c0_i32 = arith.constant 0 : i32
    %c0_i32_0 = arith.constant 0 : i32
    %c0_i32_1 = arith.constant 0 : i32
    return %arg0, %c0_i32, %c0_i32_0 : i32, i32, i32
  }
}

</mosaic_0001>

<bundles_post_ra>
// kernel: ice_se_basic_block.6
= control target key start
LH: loop header
LB: loop body
LE: loop exit
PB: predicated region body
PF: predicated region fallthrough
CT: control target
= control target key end

     0   :  { %v352_v0 = vmov 0.0   ;;  %vm353_vm0 = vmmov 0   ;;  %v354_v4 = vmov 0   ;;  %s535_s1 = inlined_call_operand.vmem [shape: f32[128,128], index: 1, kind: input, shape index: {}]   ;;  %s536_s3 = inlined_call_operand.<no memory space> [shape: f32[1,1], index: 3, kind: input, shape index: {}]   ;;  %s537_s4 = inlined_call_operand.vmem [shape: f32[128,128], index: 4, kind: input, shape index: {}]   ;;  %s538_s0 = inlined_call_operand.vmem [shape: f32[2,128], index: 0, kind: input, shape index: {}]   ;;  %s539_s2 = inlined_call_operand.vmem [shape: f32[1,128], index: 2, kind: input, shape index: {}]   ;;  %s540_s5 = inlined_call_operand.vmem [shape: f32[1,128], index: 5, kind: input, shape index: {}]   ;;  %s541_s6 = inlined_call_operand.vmem [shape: f32[2,128], index: 6, kind: output, shape index: {}]  }
   0x1   :  { %274 = vmatprep.subr.mxu0 %v352_v0  ;;  %v41_v1 = vld [vmem:[%s535_s1 + $0x78] sm:$0xff]  ;;  %v40_v2 = vld [vmem:[%s535_s1 + $0x70] sm:$0xff]  ;;  %306 = vmatprep.mubr.msk.f32.mxu0 %vm353_vm0, %v352_v0  ;;  %v11_v3 = vstv %s536_s3  ;;  %v39_v5 = vld [vmem:[%s535_s1 + $0x68] sm:$0xff] }
   0x2   :  { %275 = vmatpush3.msra.mxu0 %v41_v1  ;;  %347 = vset.pattern.permute.xlu0 %v354_v4  ;;  %12 = vst [vmem:[#allocation2] sm:$0x1] %v11_v3  ;;  %v38_v6 = vld [vmem:[%s535_s1 + $0x60] sm:$0xff]  ;;  %v147_v7 = vld [vmem:[%s537_s4 + $0x78] sm:$0xff]  ;;  %v146_v9 = vld [vmem:[%s537_s4 + $0x70] sm:$0xff] }
   0x3   :  { %276 = vmatprep.subr.mxu0 %v352_v0  ;;  %309 = vmatprep.subr.mxu1 %v352_v0  ;;  %v37_v8 = vld [vmem:[%s535_s1 + $0x58] sm:$0xff]  ;;  %v36_v10 = vld [vmem:[%s535_s1 + $0x50] sm:$0xff]  ;;  %v145_v12 = vld [vmem:[%s537_s4 + $0x68] sm:$0xff] }
   0x4   :  { %277 = vmatpush3.msra.mxu0 %v40_v2  ;;  %341 = vmatprep.mubr.msk.f32.mxu1 %vm353_vm0, %v352_v0  ;;  %v35_v13 = vld [vmem:[%s535_s1 + $0x48] sm:$0xff]  ;;  %v144_v14 = vld [vmem:[%s537_s4 + $0x60] sm:$0xff]  ;;  %v143_v16 = vld [vmem:[%s537_s4 + $0x58] sm:$0xff] }
   0x5   :  { %278 = vmatprep.subr.mxu0 %v352_v0  ;;  %310 = vmatpush3.msra.mxu1 %v147_v7  ;;  %v34_v15 = vld [vmem:[%s535_s1 + $0x40] sm:$0xff]  ;;  %v33_v17 = vld [vmem:[%s535_s1 + $0x38] sm:$0xff]  ;;  %v142_v18 = vld [vmem:[%s537_s4 + $0x50] sm:$0xff] }
   0x6   :  { %279 = vmatpush3.msra.mxu0 %v39_v5  ;;  %311 = vmatprep.subr.mxu1 %v352_v0  ;;  %v32_v19 = vld [vmem:[%s535_s1 + $0x30] sm:$0xff]  ;;  %v141_v20 = vld [vmem:[%s537_s4 + $0x48] sm:$0xff]  ;;  %v140_v22 = vld [vmem:[%s537_s4 + $0x40] sm:$0xff] }
   0x7   :  { %280 = vmatprep.subr.mxu0 %v352_v0  ;;  %312 = vmatpush3.msra.mxu1 %v146_v9  ;;  %v31_v21 = vld [vmem:[%s535_s1 + $0x28] sm:$0xff]  ;;  %v30_v23 = vld [vmem:[%s535_s1 + $0x20] sm:$0xff]  ;;  %v139_v24 = vld [vmem:[%s537_s4 + $0x38] sm:$0xff] }
   0x8   :  { %281 = vmatpush3.msra.mxu0 %v38_v6  ;;  %313 = vmatprep.subr.mxu1 %v352_v0  ;;  %v29_v25 = vld [vmem:[%s535_s1 + $0x18] sm:$0xff]  ;;  %v138_v26 = vld [vmem:[%s537_s4 + $0x30] sm:$0xff]  ;;  %v137_v28 = vld [vmem:[%s537_s4 + $0x28] sm:$0xff] }
   0x9   :  { %282 = vmatprep.subr.mxu0 %v352_v0  ;;  %v237_v11 = vld [vmem:[#allocation2] ss:$0 sm:$0xff]  ;;  %314 = vmatpush3.msra.mxu1 %v145_v12  ;;  %v28_v27 = vld [vmem:[%s535_s1 + $0x10] sm:$0xff]  ;;  %v27_v29 = vld [vmem:[%s535_s1 + $0x8] sm:$0xff] }
   0xa   :  { %283 = vmatpush3.msra.mxu0 %v37_v8  ;;  %127 = vperm.xlu0 %347, %v237_v11   ;;  %v136_v30 = vld [vmem:[%s537_s4 + $0x20] sm:$0xff]  ;;  %v135_v32 = vld [vmem:[%s537_s4 + $0x18] sm:$0xff]  ;;  %v134_v34 = vld [vmem:[%s537_s4 + $0x10] sm:$0xff] }
   0xb   :  { %284 = vmatprep.subr.mxu0 %v352_v0  ;;  %315 = vmatprep.subr.mxu1 %v352_v0  ;;  %v26_v31 = vld [vmem:[%s535_s1] sm:$0xff]  ;;  %v133_v35 = vld [vmem:[%s537_s4 + $0x8] sm:$0xff] }
   0xc   :  { %285 = vmatpush3.msra.mxu0 %v36_v10  ;;  %316 = vmatpush3.msra.mxu1 %v144_v14  ;;  %v25_v33 = vld [vmem:[%s538_s0] sm:$0x3] }
   0xd   :  { %286 = vmatprep.subr.mxu0 %v352_v0  ;;  %317 = vmatprep.subr.mxu1 %v352_v0  ;;  %v132_v36 = vld [vmem:[%s537_s4] sm:$0xff] }
   0xe   :  { %287 = vmatpush3.msra.mxu0 %v35_v13  ;;  %318 = vmatpush3.msra.mxu1 %v143_v16  ;;  %v236_v37 = vld [vmem:[%s539_s2] ss:$0 sm:$0xff] }
   0xf   :  { %288 = vmatprep.subr.mxu0 %v352_v0  ;;  %319 = vmatprep.subr.mxu1 %v352_v0  ;;  %v238_v44 = vld [vmem:[%s540_s5] ss:$0 sm:$0xff] }
  0x10   :  { %289 = vmatpush3.msra.mxu0 %v34_v15  ;;  %320 = vmatpush3.msra.mxu1 %v142_v18 }
  0x11   :  { %290 = vmatprep.subr.mxu0 %v352_v0  ;;  %321 = vmatprep.subr.mxu1 %v352_v0 }
  0x12   :  { %291 = vmatpush3.msra.mxu0 %v33_v17  ;;  %322 = vmatpush3.msra.mxu1 %v141_v20 }
  0x13   :  { %292 = vmatprep.subr.mxu0 %v352_v0  ;;  %323 = vmatprep.subr.mxu1 %v352_v0 }
  0x14   :  { %293 = vmatpush3.msra.mxu0 %v32_v19  ;;  %324 = vmatpush3.msra.mxu1 %v140_v22 }
  0x15   :  { %294 = vmatprep.subr.mxu0 %v352_v0  ;;  %325 = vmatprep.subr.mxu1 %v352_v0 }
  0x16   :  { %295 = vmatpush3.msra.mxu0 %v31_v21  ;;  %326 = vmatpush3.msra.mxu1 %v139_v24 }
  0x17   :  { %296 = vmatprep.subr.mxu0 %v352_v0  ;;  %327 = vmatprep.subr.mxu1 %v352_v0 }
  0x18   :  { %297 = vmatpush3.msra.mxu0 %v30_v23  ;;  %328 = vmatpush3.msra.mxu1 %v138_v26 }
  0x19   :  { %298 = vmatprep.subr.mxu0 %v352_v0  ;;  %329 = vmatprep.subr.mxu1 %v352_v0 }
  0x1a   :  { %299 = vmatpush3.msra.mxu0 %v29_v25  ;;  %330 = vmatpush3.msra.mxu1 %v137_v28 }
  0x1b   :  { %300 = vmatprep.subr.mxu0 %v352_v0  ;;  %331 = vmatprep.subr.mxu1 %v352_v0 }
  0x1c   :  { %301 = vmatpush3.msra.mxu0 %v28_v27  ;;  %332 = vmatpush3.msra.mxu1 %v136_v30 }
  0x1d   :  { %302 = vmatprep.subr.mxu0 %v352_v0  ;;  %333 = vmatprep.subr.mxu1 %v352_v0 }
  0x1e   :  { %303 = vmatpush3.msra.mxu0 %v27_v29  ;;  %334 = vmatpush3.msra.mxu1 %v135_v32 }
  0x1f   :  { %304 = vmatprep.subr.mxu0 %v352_v0  ;;  %335 = vmatprep.subr.mxu1 %v352_v0 }
  0x20   :  { %305 = vmatpush3.msra.mxu0 %v26_v31  ;;  %336 = vmatpush3.msra.mxu1 %v134_v34 }
  0x21   :  { %307 = vmatmul.mubr.f32.vlgmr.msra.gmra.mxu0 %v25_v33  ;;  %337 = vmatprep.subr.mxu1 %v352_v0 }
  0x22   :  { %338 = vmatpush3.msra.mxu1 %v133_v35 }
  0x23   :  { %339 = vmatprep.subr.mxu1 %v352_v0 }
  0x24   :  { %340 = vmatpush3.msra.mxu1 %v132_v36 }
  0x85   :  { %v128_v39 = vpop.permute.xlu0 %127 }
  0xe1   :  { %v115_v38 = vpop.f32.mrf.mxu0 }
  0xe2   :  { %v116_v40 = vadd.f32 %v236_v37, %v115_v38 }
  0xe3   :  { %v308_v41 = vpop.f32.mrf.mxu0 }
  0xe4   :  { %v130_v42 = vmul.f32 %v128_v39, %v116_v40  ;;  %vm119_vm1 = vcmp.ge.f32.partialorder %v116_v40, 0.0 }
  0xe6   :  { %v131_v43 = vsel %vm119_vm1, %v116_v40, %v130_v42 }
  0xe7   :  { %342 = vmatmul.mubr.f32.vlgmr.msra.gmra.mxu1 %v131_v43 }
 0x1a7   :  { %v221_v45 = vpop.f32.mrf.mxu1 }
 0x1a8   :  { %v222_v46 = vadd.f32 %v238_v44, %v221_v45 }
 0x1a9   :  { %v343_v47 = vpop.f32.mrf.mxu1 }
 0x1aa   :  { %v239_v48 = vmul.f32 -1.442695, %v222_v46 }
 0x1ac   :  { %348 = vpow2.f32 %v239_v48 }
 0x1b9   :  { %v349_v49 = vpop.eup %348 }
 0x1ba   :  { %v228_v50 = vadd.f32 1.0, %v349_v49 }
 0x1bc   :  { %350 = vrcp.f32 %v228_v50 }
 0x1c9   :  { %v351_v51 = vpop.eup %350 }
 0x1ca   :  { %231 = vst [vmem:[%s541_s6] sm:$0x3] %v351_v51 }

// kernel: ice_se_basic_block.7
= control target key start
LH: loop header
LB: loop body
LE: loop exit
PB: predicated region body
PF: predicated region fallthrough
CT: control target
= control target key end

     0   :  { %s856_s24 = smov 0   ;;  %s1200_s0 = inlined_call_operand.vmem [shape: f32[2,288,128], index: 0, kind: input, shape index: {}]   ;;  %s1201_s1 = inlined_call_operand.vmem [shape: f32[2,288,128], index: 1, kind: input, shape index: {}]   ;;  %s1202_s2 = inlined_call_operand.vmem [shape: f32[2,1,128], index: 2, kind: input, shape index: {}]   ;;  %s1203_s3 = inlined_call_operand.vmem [shape: f32[1,128], index: 3, kind: input, shape index: {}]   ;;  %s1204_s4 = inlined_call_operand.vmem [shape: f32[1,128], index: 4, kind: input, shape index: {}]   ;;  %s1205_s5 = inlined_call_operand.vmem [shape: f32[1,128], index: 5, kind: input, shape index: {}]   ;;  %s1206_s6 = inlined_call_operand.vmem [shape: f32[1,128], index: 6, kind: input, shape index: {}]   ;;  %s1207_s7 = inlined_call_operand.vmem [shape: f32[2,288,128], index: 7, kind: output, shape index: {}]  }
   0x1 LB: > { %s784_s25 = sadd.s32 4294967295, %s814_s24   ;;  %p788_p0 = scmp.ge.s32.totalorder %s814_s24, 1  ;;  %s814_s24 = sphi %s856_s24, %s17_s24  }
   0x2   : > { %p255_p1 = scmp.lt.s32.totalorder %s814_s24, 3 }
   0x4   : > { %p256_p2 = pnand %p788_p0, %p255_p1 }
   0x5   : > { %p295_p3 = scmp.lt.s32.totalorder (!%p256_p2), %s784_s25, 1 }
   0x6   : > { %259 = sbr.rel (%p256_p2) target bundleno = 86 (0x56), region = 48 }
   0xb   : > { %s1209_s25 = smov (!%p295_p3, %s784_s25), 1  ;;  %v872_v0 = vld [vmem:[%s1203_s3] ss:$0 sm:$0xff] }
   0xc   : > { %s864_s26 = smul.u32 288, %s1209_s25  ;;  %s307_s29 = scalar_lea.vmem %s1202_s2, %s1209_s25  ;;  %v877_v1 = vld [vmem:[%s1205_s5] ss:$0 sm:$0xff] }
   0xd   : > { %v894_v2 = vld [vmem:[%s1204_s4] ss:$0 sm:$0xff] }
   0xe   : > { %s883_s13 = scalar_lea.vmem %s1200_s0, %s864_s26  ;;  %s889_s16 = scalar_lea.vmem %s1201_s1, %s864_s26  ;;  %v899_v3 = vld [vmem:[%s1206_s6] ss:$0 sm:$0xff] }
   0xf   : > { %v313_v4 = vld [vmem:[%s883_s13] sm:$0xff]  ;;  %v314_v7 = vld [vmem:[%s883_s13 + $0x8] sm:$0xff]  ;;  %v315_v12 = vld [vmem:[%s883_s13 + $0x10] sm:$0xff]  ;;  %s944_s23 = scalar_lea.vmem %s1207_s7, %s864_s26 }
  0x10   : > { %v902_v5 = vld [vmem:[%s307_s29] ss:$0 sm:$0xff]  ;;  %v356_v8 = vmul.f32 %v872_v0, %v313_v4  ;;  %v357_v10 = vmul.f32 %v872_v0, %v314_v7  ;;  %v479_v11 = vld [vmem:[%s889_s16 + $0x8] sm:$0xff]  ;;  %v480_v13 = vld [vmem:[%s889_s16 + $0x10] sm:$0xff]  ;;  %v358_v15 = vmul.f32 %v872_v0, %v315_v12 }
  0x11   : > { %v478_v6 = vld [vmem:[%s889_s16] sm:$0xff]  ;;  %v522_v14 = vmul.f32 %v877_v1, %v479_v11  ;;  %v523_v16 = vmul.f32 %v877_v1, %v480_v13  ;;  %v316_v17 = vld [vmem:[%s883_s13 + $0x18] sm:$0xff]  ;;  %v318_v25 = vld [vmem:[%s883_s13 + $0x28] sm:$0xff] }
  0x12   : > { %v521_v9 = vmul.f32 %v877_v1, %v478_v6  ;;  %v481_v18 = vld [vmem:[%s889_s16 + $0x18] sm:$0xff]  ;;  %v317_v19 = vld [vmem:[%s883_s13 + $0x20] sm:$0xff]  ;;  %v399_v20 = vadd.f32 %v894_v2, %v356_v8  ;;  %v400_v22 = vadd.f32 %v894_v2, %v357_v10  ;;  %v359_v23 = vmul.f32 %v872_v0, %v316_v17  ;;  %v483_v34 = vld [vmem:[%s889_s16 + $0x28] sm:$0xff] }
  0x13   : > { %v482_v24 = vld [vmem:[%s889_s16 + $0x20] sm:$0xff]  ;;  %v565_v26 = vadd.f32 %v899_v3, %v522_v14  ;;  %v401_v27 = vadd.f32 %v894_v2, %v358_v15  ;;  %v566_v28 = vadd.f32 %v899_v3, %v523_v16  ;;  %v524_v29 = vmul.f32 %v877_v1, %v481_v18  ;;  %v319_v43 = vld [vmem:[%s883_s13 + $0x30] sm:$0xff]  ;;  %v320_v49 = vld [vmem:[%s883_s13 + $0x38] sm:$0xff] }
  0x14   : > { %v564_v21 = vadd.f32 %v899_v3, %v521_v9  ;;  %v442_v30 = vmul.f32 %v902_v5, %v399_v20  ;;  %v443_v31 = vmul.f32 %v902_v5, %v400_v22  ;;  %v402_v32 = vadd.f32 %v894_v2, %v359_v23  ;;  %v484_v48 = vld [vmem:[%s889_s16 + $0x30] sm:$0xff]  ;;  %v485_v54 = vld [vmem:[%s889_s16 + $0x38] sm:$0xff]  ;;  %v321_v55 = vld [vmem:[%s883_s13 + $0x40] sm:$0xff] }
  0x15   : > { %v360_v33 = vmul.f32 %v872_v0, %v317_v19  ;;  %v444_v35 = vmul.f32 %v902_v5, %v401_v27  ;;  %v567_v36 = vadd.f32 %v899_v3, %v524_v29  ;;  %v525_v37 = vmul.f32 %v877_v1, %v482_v24  ;;  %v486_v60 = vld [vmem:[%s889_s16 + $0x40] sm:$0xff]  ;;  %v322_v10 = vld [vmem:[%s883_s13 + $0x48] sm:$0xff]  ;;  %v323_v16 = vld [vmem:[%s883_s13 + $0x50] sm:$0xff] }
  0x16   : > { %v361_v38 = vmul.f32 %v872_v0, %v318_v25  ;;  %v600_v39 = vadd.f32 %v564_v21, %v442_v30  ;;  %v601_v40 = vadd.f32 %v565_v26, %v443_v31  ;;  %v445_v41 = vmul.f32 %v902_v5, %v402_v32  ;;  %v487_v11 = vld [vmem:[%s889_s16 + $0x48] sm:$0xff]  ;;  %v488_v17 = vld [vmem:[%s889_s16 + $0x50] sm:$0xff]  ;;  %v324_v22 = vld [vmem:[%s883_s13 + $0x58] sm:$0xff] }
  0x17   : > { %v403_v42 = vadd.f32 %v894_v2, %v360_v33  ;;  %v602_v44 = vadd.f32 %v566_v28, %v444_v35  ;;  %v568_v45 = vadd.f32 %v899_v3, %v525_v37  ;;  %v526_v47 = vmul.f32 %v877_v1, %v483_v34  ;;  %v489_v31 = vld [vmem:[%s889_s16 + $0x58] sm:$0xff]  ;;  %v490_v37 = vld [vmem:[%s889_s16 + $0x60] sm:$0xff] }
  0x18   : > { %v404_v46 = vadd.f32 %v894_v2, %v361_v38  ;;  %v636_v50 = vmax.f32 %v600_v39, 0.0  ;;  %v637_v51 = vmax.f32 %v601_v40, 0.0  ;;  %v603_v52 = vadd.f32 %v567_v36, %v445_v41  ;;  %v325_v36 = vld [vmem:[%s883_s13 + $0x60] sm:$0xff] }
  0x19   : > { %v446_v53 = vmul.f32 %v902_v5, %v403_v42  ;;  %v638_v56 = vmax.f32 %v602_v44, 0.0  ;;  %v569_v58 = vadd.f32 %v899_v3, %v526_v47  ;;  %v362_v59 = vmul.f32 %v872_v0, %v319_v43  ;;  %v326_v42 = vld [vmem:[%s883_s13 + $0x68] sm:$0xff] }
  0x1a   : > { %v447_v57 = vmul.f32 %v902_v5, %v404_v46  ;;  %672 = vst [vmem:[%s944_s23] sm:$0xff] %v636_v50  ;;  %673 = vst [vmem:[%s944_s23 + $0x8] sm:$0xff] %v637_v51  ;;  %v639_v61 = vmax.f32 %v603_v52, 0.0  ;;  %v527_v63 = vmul.f32 %v877_v1, %v484_v48  ;;  %v363_v4 = vmul.f32 %v872_v0, %v320_v49  ;;  %v491_v47 = vld [vmem:[%s889_s16 + $0x68] sm:$0xff]  ;;  %v327_v52 = vld [vmem:[%s883_s13 + $0x70] sm:$0xff] }
  0x1b   : > { %v604_v62 = vadd.f32 %v568_v45, %v446_v53  ;;  %674 = vst [vmem:[%s944_s23 + $0x10] sm:$0xff] %v638_v56  ;;  %v405_v7 = vadd.f32 %v894_v2, %v362_v59  ;;  %v528_v8 = vmul.f32 %v877_v1, %v485_v54  ;;  %v364_v9 = vmul.f32 %v872_v0, %v321_v55 }
  0x1c   : > { %v605_v6 = vadd.f32 %v569_v58, %v447_v57  ;;  %675 = vst [vmem:[%s944_s23 + $0x18] sm:$0xff] %v639_v61  ;;  %v570_v13 = vadd.f32 %v899_v3, %v527_v63  ;;  %v406_v14 = vadd.f32 %v894_v2, %v363_v4  ;;  %v529_v15 = vmul.f32 %v877_v1, %v486_v60  ;;  %v492_v57 = vld [vmem:[%s889_s16 + $0x70] sm:$0xff] }
  0x1d   : > { %v640_v12 = vmax.f32 %v604_v62, 0.0  ;;  %v448_v19 = vmul.f32 %v902_v5, %v405_v7  ;;  %v571_v20 = vadd.f32 %v899_v3, %v528_v8  ;;  %v407_v21 = vadd.f32 %v894_v2, %v364_v9  ;;  %v328_v62 = vld [vmem:[%s883_s13 + $0x78] sm:$0xff]  ;;  %v329_v9 = vld [vmem:[%s883_s13 + $0x80] sm:$0xff] }
  0x1e   : > { %v641_v18 = vmax.f32 %v605_v6, 0.0  ;;  %v449_v23 = vmul.f32 %v902_v5, %v406_v14  ;;  %v572_v24 = vadd.f32 %v899_v3, %v529_v15  ;;  %v365_v25 = vmul.f32 %v872_v0, %v322_v10  ;;  %v493_v8 = vld [vmem:[%s889_s16 + $0x78] sm:$0xff]  ;;  %v494_v14 = vld [vmem:[%s889_s16 + $0x80] sm:$0xff] }
  0x1f   : > { %676 = vst [vmem:[%s944_s23 + $0x20] sm:$0xff] %v640_v12  ;;  %v530_v26 = vmul.f32 %v877_v1, %v487_v11  ;;  %v606_v27 = vadd.f32 %v570_v13, %v448_v19  ;;  %v450_v28 = vmul.f32 %v902_v5, %v407_v21  ;;  %v366_v29 = vmul.f32 %v872_v0, %v323_v16  ;;  %v330_v19 = vld [vmem:[%s883_s13 + $0x88] sm:$0xff] }
  0x20   : > { %677 = vst [vmem:[%s944_s23 + $0x28] sm:$0xff] %v641_v18  ;;  %v531_v30 = vmul.f32 %v877_v1, %v488_v17  ;;  %v607_v32 = vadd.f32 %v571_v20, %v449_v23  ;;  %v408_v33 = vadd.f32 %v894_v2, %v365_v25  ;;  %v367_v35 = vmul.f32 %v872_v0, %v324_v22 }
  0x21   : > { %v573_v34 = vadd.f32 %v899_v3, %v530_v26  ;;  %v642_v38 = vmax.f32 %v606_v27, 0.0  ;;  %v608_v39 = vadd.f32 %v572_v24, %v450_v28  ;;  %v409_v40 = vadd.f32 %v894_v2, %v366_v29  ;;  %v495_v28 = vld [vmem:[%s889_s16 + $0x88] sm:$0xff]  ;;  %v331_v29 = vld [vmem:[%s883_s13 + $0x90] sm:$0xff] }
  0x22   : > { %v574_v41 = vadd.f32 %v899_v3, %v531_v30  ;;  %v643_v43 = vmax.f32 %v607_v32, 0.0  ;;  %v451_v44 = vmul.f32 %v902_v5, %v408_v33  ;;  %v410_v45 = vadd.f32 %v894_v2, %v367_v35  ;;  %v332_v35 = vld [vmem:[%s883_s13 + $0x98] sm:$0xff] }
  0x23   : > { %v532_v46 = vmul.f32 %v877_v1, %v489_v31  ;;  %678 = vst [vmem:[%s944_s23 + $0x30] sm:$0xff] %v642_v38  ;;  %v644_v48 = vmax.f32 %v608_v39, 0.0  ;;  %v452_v49 = vmul.f32 %v902_v5, %v409_v40  ;;  %v368_v50 = vmul.f32 %v872_v0, %v325_v36 }
  0x24   : > { %v533_v51 = vmul.f32 %v877_v1, %v490_v37  ;;  %679 = vst [vmem:[%s944_s23 + $0x38] sm:$0xff] %v643_v43  ;;  %v609_v53 = vadd.f32 %v573_v34, %v451_v44  ;;  %v453_v54 = vmul.f32 %v902_v5, %v410_v45  ;;  %v369_v56 = vmul.f32 %v872_v0, %v326_v42  ;;  %v496_v34 = vld [vmem:[%s889_s16 + $0x90] sm:$0xff]  ;;  %v497_v44 = vld [vmem:[%s889_s16 + $0x98] sm:$0xff] }
  0x25   : > { %v575_v55 = vadd.f32 %v899_v3, %v532_v46  ;;  %680 = vst [vmem:[%s944_s23 + $0x40] sm:$0xff] %v644_v48  ;;  %v610_v58 = vadd.f32 %v574_v41, %v452_v49  ;;  %v411_v59 = vadd.f32 %v894_v2, %v368_v50  ;;  %v534_v61 = vmul.f32 %v877_v1, %v491_v47  ;;  %v333_v49 = vld [vmem:[%s883_s13 + $0xa0] sm:$0xff] }
  0x26   : > { %v576_v60 = vadd.f32 %v899_v3, %v533_v51  ;;  %v645_v63 = vmax.f32 %v609_v53, 0.0  ;;  %v412_v6 = vadd.f32 %v894_v2, %v369_v56  ;;  %v370_v7 = vmul.f32 %v872_v0, %v327_v52 }
  0x27   : > { %v611_v4 = vadd.f32 %v575_v55, %v453_v54  ;;  %v646_v10 = vmax.f32 %v610_v58, 0.0  ;;  %v454_v11 = vmul.f32 %v902_v5, %v411_v59  ;;  %v577_v12 = vadd.f32 %v899_v3, %v534_v61  ;;  %v498_v54 = vld [vmem:[%s889_s16 + $0xa0] sm:$0xff]  ;;  %v334_v55 = vld [vmem:[%s883_s13 + $0xa8] sm:$0xff] }
  0x28   : > { %v535_v13 = vmul.f32 %v877_v1, %v492_v57  ;;  %681 = vst [vmem:[%s944_s23 + $0x48] sm:$0xff] %v645_v63  ;;  %v455_v16 = vmul.f32 %v902_v5, %v412_v6  ;;  %v413_v17 = vadd.f32 %v894_v2, %v370_v7  ;;  %v371_v18 = vmul.f32 %v872_v0, %v328_v62  ;;  %v335_v6 = vld [vmem:[%s883_s13 + $0xb0] sm:$0xff] }
  0x29   : > { %v647_v15 = vmax.f32 %v611_v4, 0.0  ;;  %682 = vst [vmem:[%s944_s23 + $0x50] sm:$0xff] %v646_v10  ;;  %v612_v20 = vadd.f32 %v576_v60, %v454_v11  ;;  %v536_v22 = vmul.f32 %v877_v1, %v493_v8  ;;  %v372_v23 = vmul.f32 %v872_v0, %v329_v9  ;;  %v499_v60 = vld [vmem:[%s889_s16 + $0xa8] sm:$0xff]  ;;  %v500_v11 = vld [vmem:[%s889_s16 + $0xb0] sm:$0xff] }
  0x2a   : > { %v578_v21 = vadd.f32 %v899_v3, %v535_v13  ;;  %v613_v24 = vadd.f32 %v577_v12, %v455_v16  ;;  %v456_v25 = vmul.f32 %v902_v5, %v413_v17  ;;  %v414_v26 = vadd.f32 %v894_v2, %v371_v18  ;;  %v336_v16 = vld [vmem:[%s883_s13 + $0xb8] sm:$0xff] }
  0x2b   : > { %683 = vst [vmem:[%s944_s23 + $0x58] sm:$0xff] %v647_v15  ;;  %v537_v27 = vmul.f32 %v877_v1, %v494_v14  ;;  %v648_v30 = vmax.f32 %v612_v20, 0.0  ;;  %v579_v31 = vadd.f32 %v899_v3, %v536_v22  ;;  %v415_v32 = vadd.f32 %v894_v2, %v372_v23  ;;  %v337_v22 = vld [vmem:[%s883_s13 + $0xc0] sm:$0xff] }
  0x2c   : > { %v373_v33 = vmul.f32 %v872_v0, %v330_v19  ;;  %v649_v36 = vmax.f32 %v613_v24, 0.0  ;;  %v614_v37 = vadd.f32 %v578_v21, %v456_v25  ;;  %v457_v38 = vmul.f32 %v902_v5, %v414_v26  ;;  %v501_v21 = vld [vmem:[%s889_s16 + $0xb8] sm:$0xff] }
  0x2d   : > { %v580_v39 = vadd.f32 %v899_v3, %v537_v27  ;;  %684 = vst [vmem:[%s944_s23 + $0x60] sm:$0xff] %v648_v30  ;;  %v458_v40 = vmul.f32 %v902_v5, %v415_v32  ;;  %v538_v42 = vmul.f32 %v877_v1, %v495_v28  ;;  %v374_v43 = vmul.f32 %v872_v0, %v331_v29  ;;  %v502_v27 = vld [vmem:[%s889_s16 + $0xc0] sm:$0xff]  ;;  %v338_v32 = vld [vmem:[%s883_s13 + $0xc8] sm:$0xff] }
  0x2e   : > { %v416_v41 = vadd.f32 %v894_v2, %v373_v33  ;;  %685 = vst [vmem:[%s944_s23 + $0x68] sm:$0xff] %v649_v36  ;;  %v650_v45 = vmax.f32 %v614_v37, 0.0  ;;  %v615_v46 = vadd.f32 %v579_v31, %v457_v38  ;;  %v539_v47 = vmul.f32 %v877_v1, %v496_v34 }
  0x2f   : > { %v375_v48 = vmul.f32 %v872_v0, %v332_v35  ;;  %v616_v50 = vadd.f32 %v580_v39, %v458_v40  ;;  %v581_v52 = vadd.f32 %v899_v3, %v538_v42  ;;  %v417_v53 = vadd.f32 %v894_v2, %v374_v43  ;;  %v339_v42 = vld [vmem:[%s883_s13 + $0xd0] sm:$0xff] }
  0x30   : > { %v459_v51 = vmul.f32 %v902_v5, %v416_v41  ;;  %686 = vst [vmem:[%s944_s23 + $0x70] sm:$0xff] %v650_v45  ;;  %v651_v56 = vmax.f32 %v615_v46, 0.0  ;;  %v582_v57 = vadd.f32 %v899_v3, %v539_v47  ;;  %v540_v59 = vmul.f32 %v877_v1, %v497_v44  ;;  %v503_v41 = vld [vmem:[%s889_s16 + $0xc8] sm:$0xff]  ;;  %v504_v47 = vld [vmem:[%s889_s16 + $0xd0] sm:$0xff] }
  0x31   : > { %v418_v58 = vadd.f32 %v894_v2, %v375_v48  ;;  %v652_v61 = vmax.f32 %v616_v50, 0.0  ;;  %v460_v63 = vmul.f32 %v902_v5, %v417_v53  ;;  %v376_v4 = vmul.f32 %v872_v0, %v333_v49  ;;  %v340_v48 = vld [vmem:[%s883_s13 + $0xd8] sm:$0xff] }
  0x32   : > { %v617_v62 = vadd.f32 %v581_v52, %v459_v51  ;;  %687 = vst [vmem:[%s944_s23 + $0x78] sm:$0xff] %v651_v56  ;;  %v583_v8 = vadd.f32 %v899_v3, %v540_v59  ;;  %v541_v9 = vmul.f32 %v877_v1, %v498_v54  ;;  %v377_v10 = vmul.f32 %v872_v0, %v334_v55 }
  0x33   : > { %v461_v7 = vmul.f32 %v902_v5, %v418_v58  ;;  %688 = vst [vmem:[%s944_s23 + $0x80] sm:$0xff] %v652_v61  ;;  %v618_v13 = vadd.f32 %v582_v57, %v460_v63  ;;  %v419_v14 = vadd.f32 %v894_v2, %v376_v4  ;;  %v542_v15 = vmul.f32 %v877_v1, %v499_v60  ;;  %v505_v57 = vld [vmem:[%s889_s16 + $0xd8] sm:$0xff] }
  0x34   : > { %v653_v12 = vmax.f32 %v617_v62, 0.0  ;;  %v584_v18 = vadd.f32 %v899_v3, %v541_v9  ;;  %v420_v19 = vadd.f32 %v894_v2, %v377_v10  ;;  %v378_v20 = vmul.f32 %v872_v0, %v335_v6  ;;  %v341_v62 = vld [vmem:[%s883_s13 + $0xe0] sm:$0xff]  ;;  %v342_v9 = vld [vmem:[%s883_s13 + $0xe8] sm:$0xff] }
  0x35   : > { %v619_v17 = vadd.f32 %v583_v8, %v461_v7  ;;  %v654_v23 = vmax.f32 %v618_v13, 0.0  ;;  %v462_v24 = vmul.f32 %v902_v5, %v419_v14  ;;  %v585_v25 = vadd.f32 %v899_v3, %v542_v15  ;;  %v506_v8 = vld [vmem:[%s889_s16 + $0xe0] sm:$0xff]  ;;  %v507_v14 = vld [vmem:[%s889_s16 + $0xe8] sm:$0xff] }
  0x36   : > { %689 = vst [vmem:[%s944_s23 + $0x88] sm:$0xff] %v653_v12  ;;  %v543_v26 = vmul.f32 %v877_v1, %v500_v11  ;;  %v463_v29 = vmul.f32 %v902_v5, %v420_v19  ;;  %v421_v30 = vadd.f32 %v894_v2, %v378_v20  ;;  %v379_v31 = vmul.f32 %v872_v0, %v336_v16  ;;  %v343_v19 = vld [vmem:[%s883_s13 + $0xf0] sm:$0xff] }
  0x37   : > { %v655_v28 = vmax.f32 %v619_v17, 0.0  ;;  %690 = vst [vmem:[%s944_s23 + $0x90] sm:$0xff] %v654_v23  ;;  %v620_v33 = vadd.f32 %v584_v18, %v462_v24  ;;  %v544_v35 = vmul.f32 %v877_v1, %v501_v21  ;;  %v380_v36 = vmul.f32 %v872_v0, %v337_v22  ;;  %v508_v24 = vld [vmem:[%s889_s16 + $0xf0] sm:$0xff] }
  0x38   : > { %v586_v34 = vadd.f32 %v899_v3, %v543_v26  ;;  %v621_v37 = vadd.f32 %v585_v25, %v463_v29  ;;  %v464_v38 = vmul.f32 %v902_v5, %v421_v30  ;;  %v422_v39 = vadd.f32 %v894_v2, %v379_v31  ;;  %v344_v29 = vld [vmem:[%s883_s13 + $0xf8] sm:$0xff] }
  0x39   : > { %691 = vst [vmem:[%s944_s23 + $0x98] sm:$0xff] %v655_v28  ;;  %v545_v40 = vmul.f32 %v877_v1, %v502_v27  ;;  %v656_v43 = vmax.f32 %v620_v33, 0.0  ;;  %v587_v44 = vadd.f32 %v899_v3, %v544_v35  ;;  %v423_v45 = vadd.f32 %v894_v2, %v380_v36  ;;  %v345_v35 = vld [vmem:[%s883_s13 + $0x100] sm:$0xff] }
  0x3a   : > { %v381_v46 = vmul.f32 %v872_v0, %v338_v32  ;;  %v657_v49 = vmax.f32 %v621_v37, 0.0  ;;  %v622_v50 = vadd.f32 %v586_v34, %v464_v38  ;;  %v465_v51 = vmul.f32 %v902_v5, %v422_v39  ;;  %v509_v34 = vld [vmem:[%s889_s16 + $0xf8] sm:$0xff] }
  0x3b   : > { %v588_v52 = vadd.f32 %v899_v3, %v545_v40  ;;  %692 = vst [vmem:[%s944_s23 + $0xa0] sm:$0xff] %v656_v43  ;;  %v466_v53 = vmul.f32 %v902_v5, %v423_v45  ;;  %v546_v55 = vmul.f32 %v877_v1, %v503_v41  ;;  %v382_v56 = vmul.f32 %v872_v0, %v339_v42  ;;  %v510_v40 = vld [vmem:[%s889_s16 + $0x100] sm:$0xff]  ;;  %v346_v45 = vld [vmem:[%s883_s13 + $0x108] sm:$0xff] }
  0x3c   : > { %v424_v54 = vadd.f32 %v894_v2, %v381_v46  ;;  %693 = vst [vmem:[%s944_s23 + $0xa8] sm:$0xff] %v657_v49  ;;  %v658_v58 = vmax.f32 %v622_v50, 0.0  ;;  %v623_v59 = vadd.f32 %v587_v44, %v465_v51  ;;  %v547_v60 = vmul.f32 %v877_v1, %v504_v47 }
  0x3d   : > { %v383_v61 = vmul.f32 %v872_v0, %v340_v48  ;;  %v624_v63 = vadd.f32 %v588_v52, %v466_v53  ;;  %v589_v6 = vadd.f32 %v899_v3, %v546_v55  ;;  %v425_v7 = vadd.f32 %v894_v2, %v382_v56  ;;  %v347_v55 = vld [vmem:[%s883_s13 + $0x110] sm:$0xff] }
  0x3e   : > { %v467_v4 = vmul.f32 %v902_v5, %v424_v54  ;;  %694 = vst [vmem:[%s944_s23 + $0xb0] sm:$0xff] %v658_v58  ;;  %v659_v10 = vmax.f32 %v623_v59, 0.0  ;;  %v590_v11 = vadd.f32 %v899_v3, %v547_v60  ;;  %v548_v13 = vmul.f32 %v877_v1, %v505_v57  ;;  %v511_v54 = vld [vmem:[%s889_s16 + $0x108] sm:$0xff]  ;;  %v512_v60 = vld [vmem:[%s889_s16 + $0x110] sm:$0xff] }
  0x3f   : > { %v426_v12 = vadd.f32 %v894_v2, %v383_v61  ;;  %v660_v15 = vmax.f32 %v624_v63, 0.0  ;;  %v468_v17 = vmul.f32 %v902_v5, %v425_v7  ;;  %v384_v18 = vmul.f32 %v872_v0, %v341_v62  ;;  %v348_v61 = vld [vmem:[%s883_s13 + $0x118] sm:$0xff] }
  0x40   : > { %v625_v16 = vadd.f32 %v589_v6, %v467_v4  ;;  %695 = vst [vmem:[%s944_s23 + $0xb8] sm:$0xff] %v659_v10  ;;  %v591_v21 = vadd.f32 %v899_v3, %v548_v13  ;;  %v549_v22 = vmul.f32 %v877_v1, %v506_v8  ;;  %v385_v23 = vmul.f32 %v872_v0, %v342_v9 }
  0x41   : > { %v469_v20 = vmul.f32 %v902_v5, %v426_v12  ;;  %696 = vst [vmem:[%s944_s23 + $0xc0] sm:$0xff] %v660_v15  ;;  %v626_v26 = vadd.f32 %v590_v11, %v468_v17  ;;  %v427_v27 = vadd.f32 %v894_v2, %v384_v18  ;;  %v550_v28 = vmul.f32 %v877_v1, %v507_v14  ;;  %v513_v11 = vld [vmem:[%s889_s16 + $0x118] sm:$0xff] }
  0x42   : > { %v661_v25 = vmax.f32 %v625_v16, 0.0  ;;  %v592_v31 = vadd.f32 %v899_v3, %v549_v22  ;;  %v428_v32 = vadd.f32 %v894_v2, %v385_v23  ;;  %v386_v33 = vmul.f32 %v872_v0, %v343_v19 }
  0x43   : > { %v627_v30 = vadd.f32 %v591_v21, %v469_v20  ;;  %v662_v36 = vmax.f32 %v626_v26, 0.0  ;;  %v470_v37 = vmul.f32 %v902_v5, %v427_v27  ;;  %v593_v38 = vadd.f32 %v899_v3, %v550_v28 }
  0x44   : > { %697 = vst [vmem:[%s944_s23 + $0xc8] sm:$0xff] %v661_v25  ;;  %v551_v39 = vmul.f32 %v877_v1, %v508_v24  ;;  %v471_v42 = vmul.f32 %v902_v5, %v428_v32  ;;  %v429_v43 = vadd.f32 %v894_v2, %v386_v33  ;;  %v387_v44 = vmul.f32 %v872_v0, %v344_v29 }
  0x45   : > { %v663_v41 = vmax.f32 %v627_v30, 0.0  ;;  %698 = vst [vmem:[%s944_s23 + $0xd0] sm:$0xff] %v662_v36  ;;  %v628_v46 = vadd.f32 %v592_v31, %v470_v37  ;;  %v552_v48 = vmul.f32 %v877_v1, %v509_v34  ;;  %v388_v49 = vmul.f32 %v872_v0, %v345_v35 }
  0x46   : > { %v594_v47 = vadd.f32 %v899_v3, %v551_v39  ;;  %v629_v50 = vadd.f32 %v593_v38, %v471_v42  ;;  %v472_v51 = vmul.f32 %v902_v5, %v429_v43  ;;  %v430_v52 = vadd.f32 %v894_v2, %v387_v44 }
  0x47   : > { %699 = vst [vmem:[%s944_s23 + $0xd8] sm:$0xff] %v663_v41  ;;  %v553_v53 = vmul.f32 %v877_v1, %v510_v40  ;;  %v664_v56 = vmax.f32 %v628_v46, 0.0  ;;  %v595_v57 = vadd.f32 %v899_v3, %v552_v48  ;;  %v431_v58 = vadd.f32 %v894_v2, %v388_v49 }
  0x48   : > { %v389_v59 = vmul.f32 %v872_v0, %v346_v45  ;;  %v665_v62 = vmax.f32 %v629_v50, 0.0  ;;  %v630_v63 = vadd.f32 %v594_v47, %v472_v51  ;;  %v473_v4 = vmul.f32 %v902_v5, %v430_v52 }
  0x49   : > { %v596_v6 = vadd.f32 %v899_v3, %v553_v53  ;;  %700 = vst [vmem:[%s944_s23 + $0xe0] sm:$0xff] %v664_v56  ;;  %v474_v7 = vmul.f32 %v902_v5, %v431_v58  ;;  %v554_v9 = vmul.f32 %v877_v1, %v511_v54  ;;  %v390_v10 = vmul.f32 %v872_v0, %v347_v55 }
  0x4a   : > { %v432_v8 = vadd.f32 %v894_v2, %v389_v59  ;;  %701 = vst [vmem:[%s944_s23 + $0xe8] sm:$0xff] %v665_v62  ;;  %v666_v12 = vmax.f32 %v630_v63, 0.0  ;;  %v631_v13 = vadd.f32 %v595_v57, %v473_v4  ;;  %v555_v14 = vmul.f32 %v877_v1, %v512_v60 }
  0x4b   : > { %v391_v15 = vmul.f32 %v872_v0, %v348_v61  ;;  %v632_v16 = vadd.f32 %v596_v6, %v474_v7  ;;  %v597_v18 = vadd.f32 %v899_v3, %v554_v9  ;;  %v433_v19 = vadd.f32 %v894_v2, %v390_v10 }
  0x4c   : > { %v475_v17 = vmul.f32 %v902_v5, %v432_v8  ;;  %702 = vst [vmem:[%s944_s23 + $0xf0] sm:$0xff] %v666_v12  ;;  %v667_v20 = vmax.f32 %v631_v13, 0.0  ;;  %v598_v21 = vadd.f32 %v899_v3, %v555_v14  ;;  %v556_v23 = vmul.f32 %v877_v1, %v513_v11 }
  0x4d   : > { %v434_v22 = vadd.f32 %v894_v2, %v391_v15  ;;  %v668_v0 = vmax.f32 %v632_v16, 0.0  ;;  %v476_v25 = vmul.f32 %v902_v5, %v433_v19 }
  0x4e   : > { %v633_v24 = vadd.f32 %v597_v18, %v475_v17  ;;  %703 = vst [vmem:[%s944_s23 + $0xf8] sm:$0xff] %v667_v20  ;;  %v599_v27 = vadd.f32 %v899_v3, %v556_v23 }
  0x4f   : > { %v477_v26 = vmul.f32 %v902_v5, %v434_v22  ;;  %704 = vst [vmem:[%s944_s23 + $0x100] sm:$0xff] %v668_v0  ;;  %v634_v29 = vadd.f32 %v598_v21, %v476_v25 }
  0x50   : > { %v669_v28 = vmax.f32 %v633_v24, 0.0 }
  0x51   : > { %v635_v30 = vadd.f32 %v599_v27, %v477_v26  ;;  %v670_v31 = vmax.f32 %v634_v29, 0.0 }
  0x52   : > { %705 = vst [vmem:[%s944_s23 + $0x108] sm:$0xff] %v669_v28 }
  0x53   : > { %v671_v32 = vmax.f32 %v635_v30, 0.0  ;;  %706 = vst [vmem:[%s944_s23 + $0x110] sm:$0xff] %v670_v31 }
  0x55   : > { %707 = vst [vmem:[%s944_s23 + $0x118] sm:$0xff] %v671_v32 }
  0x56 PF: > { %s17_s24 = sadd.s32 1, %s814_s24  }
  0x57   : > { %p14_p4 = scmp.ge.s32.totalorder %s17_s24, 4  }
  0x59   :  { %16 = sbr.rel (!%p14_p4) target bundleno = 1 (0x1), region = 84 }

// kernel: ice_se_basic_block.5
= control target key start
LH: loop header
LB: loop body
LE: loop exit
PB: predicated region body
PF: predicated region fallthrough
CT: control target
= control target key end

     0   :  { %s5197_s30 = smov 0   ;;  %s6872_s0 = inlined_call_operand.vmem [shape: f32[2,288,128], index: 0, kind: input, shape index: {}]   ;;  %s6873_s1 = inlined_call_operand.vmem [shape: bf16[9,128,128], index: 1, kind: input, shape index: {}]   ;;  %s6874_s2 = inlined_call_operand.vmem [shape: f32[1,128], index: 2, kind: input, shape index: {}]   ;;  %s6875_s3 = inlined_call_operand.vmem [shape: f32[1,128], index: 3, kind: input, shape index: {}]   ;;  %s6876_s4 = inlined_call_operand.vmem [shape: f32[1,128], index: 4, kind: input, shape index: {}]   ;;  %s6877_s5 = inlined_call_operand.vmem [shape: f32[288,1], index: 5, kind: input, shape index: {}]   ;;  %s6878_s6 = inlined_call_operand.vmem [shape: f32[2,288,128], index: 6, kind: output, shape index: {0}]   ;;  %s6879_s7 = inlined_call_operand.vmem [shape: f32[2,1,128], index: 7, kind: output, shape index: {1}]   ;;  %s6880_s8 = inlined_call_operand.vmem [shape: f32[1,128], index: 8, kind: output, shape index: {2}]   ;;  %s6881_s9 = inlined_call_operand.vmem [shape: f32[1,128], index: 9, kind: output, shape index: {3}]  }
   0x1 LB: > { %s5203_s10 = sadd.s32 4294967295, %s5142_s30   ;;  %p4086_p0 = scmp.ge.s32.totalorder %s5142_s30, 1  ;;  %s5142_s30 = sphi %s5197_s30, %s20_s30  }
   0x2   : > { %p284_p1 = scmp.lt.s32.totalorder %s5142_s30, 3 }
   0x4   : > { %p285_p2 = pnand %p4086_p0, %p284_p1 }
   0x6   : > { %288 = sbr.rel (%p285_p2) target bundleno = 899 (0x383), region = 44 }
   0xb   : > { %v339_v0 = vld [vmem:[%s6877_s5 + $0x10] sm:$0xff]  ;;  %v337_v1 = vld [vmem:[%s6877_s5] sm:$0xff]  ;;  %p323_p3 = scmp.lt.s32.totalorder %s5203_s10, 1  ;;  %v5144_v2 = vmov 0   ;;  %v340_v3 = vld [vmem:[%s6877_s5 + $0x18] sm:$0xff]  ;;  %p4091_p4 = scmp.ne.s32.totalorder %s5203_s10, 0 }
   0xc   : > { %5027 = vset.pattern.permute.xlu1 %v5144_v2  ;;  %5026 = vset.pattern.permute.xlu0 %v5144_v2  ;;  %v338_v4 = vld [vmem:[%s6877_s5 + $0x8] sm:$0xff]  ;;  %v341_v6 = vld [vmem:[%s6877_s5 + $0x20] sm:$0xff]  ;;  %v344_v7 = vld [vmem:[%s6877_s5 + $0x38] sm:$0xff] }
   0xd   : > { %543 = vperm.xlu1 %5027, %v339_v0   ;;  %533 = vperm.xlu0 %5026, %v337_v1   ;;  %s5215_s15 = scalar_select %p323_p3, %s5203_s10, 1  ;;  %v342_v5 = vld [vmem:[%s6877_s5 + $0x28] sm:$0xff]  ;;  %v343_v8 = vld [vmem:[%s6877_s5 + $0x30] sm:$0xff]  ;;  %v345_v10 = vld [vmem:[%s6877_s5 + $0x40] sm:$0xff] }
   0xe   : > { %v346_v9 = vld [vmem:[%s6877_s5 + $0x48] sm:$0xff]  ;;  %v348_v11 = vld [vmem:[%s6877_s5 + $0x58] sm:$0xff]  ;;  %v347_v12 = vld [vmem:[%s6877_s5 + $0x50] sm:$0xff] }
   0xf   : > { %s5014_s20 = smul.u32 288, %s5215_s15  ;;  %s335_s23 = scalar_lea.vmem %s6879_s7, %s5215_s15  ;;  %v350_v13 = vld [vmem:[%s6877_s5 + $0x68] sm:$0xff]  ;;  %v349_v14 = vld [vmem:[%s6877_s5 + $0x60] sm:$0xff]  ;;  %v352_v15 = vld [vmem:[%s6877_s5 + $0x78] sm:$0xff] }
  0x10   : > { %v351_v16 = vld [vmem:[%s6877_s5 + $0x70] sm:$0xff]  ;;  %v354_v17 = vld [vmem:[%s6877_s5 + $0x88] sm:$0xff]  ;;  %v353_v18 = vld [vmem:[%s6877_s5 + $0x80] sm:$0xff] }
  0x11   : > { %548 = vperm.xlu1 %5027, %v340_v3   ;;  %538 = vperm.xlu0 %5026, %v338_v4   ;;  %s5233_s26 = scalar_lea.vmem %s6878_s6, %s5014_s20  ;;  %v356_v19 = vld [vmem:[%s6877_s5 + $0x98] sm:$0xff]  ;;  %v355_v20 = vld [vmem:[%s6877_s5 + $0x90] sm:$0xff]  ;;  %v358_v21 = vld [vmem:[%s6877_s5 + $0xa8] sm:$0xff]  ;;  %s5336_s14 = scalar_lea.vmem %s6872_s0, %s5014_s20 }
  0x12   : > { %v357_v22 = vld [vmem:[%s6877_s5 + $0xa0] sm:$0xff]  ;;  %v360_v23 = vld [vmem:[%s6877_s5 + $0xb8] sm:$0xff]  ;;  %v359_v24 = vld [vmem:[%s6877_s5 + $0xb0] sm:$0xff] }
  0x13   : > { %v362_v25 = vld [vmem:[%s6877_s5 + $0xc8] sm:$0xff]  ;;  %v361_v26 = vld [vmem:[%s6877_s5 + $0xc0] sm:$0xff]  ;;  %v364_v27 = vld [vmem:[%s6877_s5 + $0xd8] sm:$0xff] }
  0x14   : > { %v363_v28 = vld [vmem:[%s6877_s5 + $0xd0] sm:$0xff]  ;;  %v366_v29 = vld [vmem:[%s6877_s5 + $0xe8] sm:$0xff]  ;;  %v365_v30 = vld [vmem:[%s6877_s5 + $0xe0] sm:$0xff] }
  0x15   : > { %558 = vperm.xlu1 %5027, %v342_v5   ;;  %553 = vperm.xlu0 %5026, %v341_v6   ;;  %v368_v31 = vld [vmem:[%s6877_s5 + $0xf8] sm:$0xff]  ;;  %v367_v32 = vld [vmem:[%s6877_s5 + $0xf0] sm:$0xff]  ;;  %v370_v33 = vld [vmem:[%s6877_s5 + $0x108] sm:$0xff] }
  0x16   : > { %v369_v34 = vld [vmem:[%s6877_s5 + $0x100] sm:$0xff]  ;;  %v372_v35 = vld [vmem:[%s6877_s5 + $0x118] sm:$0xff]  ;;  %v371_v36 = vld [vmem:[%s6877_s5 + $0x110] sm:$0xff] }
  0x17   : > { %v5341_v37 = vld [vmem:[%s6875_s3] ss:$0 sm:$0xff]  ;;  %v375_v38 = vld [vmem:[%s5336_s14 + $0x10] sm:$0xff]  ;;  %v376_v43 = vld [vmem:[%s5336_s14 + $0x18] sm:$0xff] }
  0x18   : > { %v373_v39 = vld [vmem:[%s5336_s14] sm:$0xff]  ;;  %v418_v40 = vmul.f32 %v5341_v37, %v375_v38  ;;  %v374_v44 = vld [vmem:[%s5336_s14 + $0x8] sm:$0xff]  ;;  %v419_v47 = vmul.f32 %v5341_v37, %v376_v43  ;;  %v380_v57 = vld [vmem:[%s5336_s14 + $0x38] sm:$0xff] }
  0x19   : > { %568 = vperm.xlu1 %5027, %v344_v7   ;;  %563 = vperm.xlu0 %5026, %v343_v8   ;;  %v416_v41 = vmul.f32 %v5341_v37, %v373_v39  ;;  %v5350_v42 = vld [vmem:[%s6876_s4] ss:$0 sm:$0xff]  ;;  %v417_v48 = vmul.f32 %v5341_v37, %v374_v44  ;;  %v378_v49 = vld [vmem:[%s5336_s14 + $0x28] sm:$0xff]  ;;  %v379_v58 = vld [vmem:[%s5336_s14 + $0x30] sm:$0xff]  ;;  %v423_v63 = vmul.f32 %v5341_v37, %v380_v57 }
  0x1a   : > { %v461_v45 = vadd.f32 %v5350_v42, %v418_v40  ;;  %v377_v50 = vld [vmem:[%s5336_s14 + $0x20] sm:$0xff]  ;;  %v421_v51 = vmul.f32 %v5341_v37, %v378_v49  ;;  %v462_v55 = vadd.f32 %v5350_v42, %v419_v47  ;;  %v422_v0 = vmul.f32 %v5341_v37, %v379_v58  ;;  %v382_v5 = vld [vmem:[%s5336_s14 + $0x48] sm:$0xff]  ;;  %v388_v43 = vld [vmem:[%s5336_s14 + $0x78] sm:$0xff] }
  0x1b   : > { %v459_v46 = vadd.f32 %v5350_v42, %v416_v41  ;;  %v420_v52 = vmul.f32 %v5341_v37, %v377_v50  ;;  %v460_v56 = vadd.f32 %v5350_v42, %v417_v48  ;;  %v381_v6 = vld [vmem:[%s5336_s14 + $0x40] sm:$0xff]  ;;  %v387_v44 = vld [vmem:[%s5336_s14 + $0x70] sm:$0xff]  ;;  %v431_v50 = vmul.f32 %v5341_v37, %v388_v43 }
  0x1c   : > { %v497_v53 = vmax.f32 %v461_v45, 0.0  ;;  %v464_v61 = vadd.f32 %v5350_v42, %v421_v51  ;;  %v498_v3 = vmax.f32 %v462_v55, 0.0  ;;  %v390_v55 = vld [vmem:[%s5336_s14 + $0x88] sm:$0xff] }
  0x1d   : > { %578 = vperm.xlu1 %5027, %v346_v9   ;;  %573 = vperm.xlu0 %5026, %v345_v10   ;;  %v495_v54 = vmax.f32 %v459_v46, 0.0  ;;  %v463_v62 = vadd.f32 %v5350_v42, %v420_v52  ;;  %v496_v4 = vmax.f32 %v460_v56, 0.0  ;;  %v389_v56 = vld [vmem:[%s5336_s14 + $0x80] sm:$0xff] }
  0x1e   : > { %v500_v9 = vmax.f32 %v464_v61, 0.0 }
  0x1f   : > { %v499_v10 = vmax.f32 %v463_v62, 0.0 }
  0x21   : > { %588 = vperm.xlu1 %5027, %v348_v11   ;;  %583 = vperm.xlu0 %5026, %v347_v12   ;;  %v466_v11 = vadd.f32 %v5350_v42, %v423_v63  ;;  %v465_v12 = vadd.f32 %v5350_v42, %v422_v0  ;;  %v474_v63 = vadd.f32 %v5350_v42, %v431_v50 }
  0x22   : > { %v433_v0 = vmul.f32 %v5341_v37, %v390_v55 }
  0x25   : > { %598 = vperm.xlu1 %5027, %v350_v13   ;;  %593 = vperm.xlu0 %5026, %v349_v14  }
  0x29   : > { %608 = vperm.xlu1 %5027, %v352_v15   ;;  %603 = vperm.xlu0 %5026, %v351_v16   ;;  %v425_v15 = vmul.f32 %v5341_v37, %v382_v5  ;;  %v424_v16 = vmul.f32 %v5341_v37, %v381_v6  ;;  %v432_v6 = vmul.f32 %v5341_v37, %v389_v56 }
  0x2d   : > { %618 = vperm.xlu1 %5027, %v354_v17   ;;  %613 = vperm.xlu0 %5026, %v353_v18   ;;  %v384_v17 = vld [vmem:[%s5336_s14 + $0x58] sm:$0xff]  ;;  %v383_v18 = vld [vmem:[%s5336_s14 + $0x50] sm:$0xff] }
  0x31   : > { %628 = vperm.xlu1 %5027, %v356_v19   ;;  %623 = vperm.xlu0 %5026, %v355_v20  }
  0x35   : > { %638 = vperm.xlu1 %5027, %v358_v21   ;;  %633 = vperm.xlu0 %5026, %v357_v22   ;;  %v502_v21 = vmax.f32 %v466_v11, 0.0  ;;  %v501_v22 = vmax.f32 %v465_v12, 0.0 }
  0x39   : > { %648 = vperm.xlu1 %5027, %v360_v23   ;;  %643 = vperm.xlu0 %5026, %v359_v24   ;;  %v427_v23 = vmul.f32 %v5341_v37, %v384_v17  ;;  %v426_v24 = vmul.f32 %v5341_v37, %v383_v18 }
  0x3d   : > { %658 = vperm.xlu1 %5027, %v362_v25   ;;  %653 = vperm.xlu0 %5026, %v361_v26  }
  0x41   : > { %668 = vperm.xlu1 %5027, %v364_v27   ;;  %663 = vperm.xlu0 %5026, %v363_v28   ;;  %v468_v27 = vadd.f32 %v5350_v42, %v425_v15  ;;  %v467_v28 = vadd.f32 %v5350_v42, %v424_v16  ;;  %v510_v15 = vmax.f32 %v474_v63, 0.0  ;;  %v476_v16 = vadd.f32 %v5350_v42, %v433_v0 }
  0x43   : > { %v504_v40 = vmax.f32 %v468_v27, 0.0  ;;  %v503_v41 = vmax.f32 %v467_v28, 0.0  ;;  %v394_v27 = vld [vmem:[%s5336_s14 + $0xa8] sm:$0xff]  ;;  %v393_v28 = vld [vmem:[%s5336_s14 + $0xa0] sm:$0xff]  ;;  %v512_v43 = vmax.f32 %v476_v16, 0.0 }
  0x45   : > { %678 = vperm.xlu1 %5027, %v366_v29   ;;  %673 = vperm.xlu0 %5026, %v365_v30   ;;  %v386_v29 = vld [vmem:[%s5336_s14 + $0x68] sm:$0xff]  ;;  %v385_v30 = vld [vmem:[%s5336_s14 + $0x60] sm:$0xff] }
  0x49   : > { %688 = vperm.xlu1 %5027, %v368_v31   ;;  %683 = vperm.xlu0 %5026, %v367_v32  }
  0x4d   : > { %698 = vperm.xlu1 %5027, %v370_v33   ;;  %693 = vperm.xlu0 %5026, %v369_v34   ;;  %v470_v33 = vadd.f32 %v5350_v42, %v427_v23  ;;  %v469_v34 = vadd.f32 %v5350_v42, %v426_v24  ;;  %v475_v24 = vadd.f32 %v5350_v42, %v432_v6  ;;  %v397_v6 = vld [vmem:[%s5336_s14 + $0xc0] sm:$0xff] }
  0x4f   : > { %v506_v47 = vmax.f32 %v470_v33, 0.0 }
  0x51   : > { %708 = vperm.xlu1 %5027, %v372_v35   ;;  %703 = vperm.xlu0 %5026, %v371_v36   ;;  %v429_v35 = vmul.f32 %v5341_v37, %v386_v29  ;;  %v428_v36 = vmul.f32 %v5341_v37, %v385_v30 }
  0x53   : > { %v472_v48 = vadd.f32 %v5350_v42, %v429_v35  ;;  %v471_v49 = vadd.f32 %v5350_v42, %v428_v36  ;;  %v437_v35 = vmul.f32 %v5341_v37, %v394_v27  ;;  %v436_v36 = vmul.f32 %v5341_v37, %v393_v28 }
  0x55   : > { %v508_v61 = vmax.f32 %v472_v48, 0.0  ;;  %v507_v62 = vmax.f32 %v471_v49, 0.0  ;;  %v395_v48 = vld [vmem:[%s5336_s14 + $0xb0] sm:$0xff]  ;;  %v480_v55 = vadd.f32 %v5350_v42, %v437_v35  ;;  %v479_v56 = vadd.f32 %v5350_v42, %v436_v36 }
  0x56   : > { %v438_v0 = vmul.f32 %v5341_v37, %v395_v48 }
  0x57   : > { %v515_v16 = vmax.f32 %v479_v56, 0.0 }
  0x58   : > { %v481_v28 = vadd.f32 %v5350_v42, %v438_v0  ;;  %v401_v0 = vld [vmem:[%s5336_s14 + $0xe0] sm:$0xff] }
  0x5a   : > { %v517_v56 = vmax.f32 %v481_v28, 0.0  ;;  %v444_v28 = vmul.f32 %v5341_v37, %v401_v0 }
  0x88   : > { %v5366_v59 = vpop.permute.xlu1 %543  ;;  %v5368_v60 = vpop.permute.xlu0 %533 }
  0x89   : > { %6938 = vst [vmem:[#allocation3_spill] sm:$0xff] %v5366_v59  ;;  %6939 = vst [vmem:[#allocation4_spill] sm:$0xff] %v5368_v60  ;;  %v5375_v1 = vmul.f32 %v5366_v59, %v497_v53  ;;  %v5378_v2 = vmul.f32 %v5368_v60, %v495_v54  ;;  %v505_v53 = vmax.f32 %v469_v34, 0.0  ;;  %v430_v54 = vmul.f32 %v5341_v37, %v387_v44 }
  0x8a   : > { %v511_v44 = vmax.f32 %v475_v24, 0.0 }
  0x8b   : > { %v473_v5 = vadd.f32 %v5350_v42, %v430_v54 }
  0x8c   : > { %v5382_v7 = vpop.permute.xlu1 %548  ;;  %v5384_v8 = vpop.permute.xlu0 %538 }
  0x8d   : > { %6940 = vst [vmem:[#allocation5_spill] sm:$0xff] %v5382_v7  ;;  %6941 = vst [vmem:[#allocation6_spill] sm:$0xff] %v5384_v8  ;;  %v5389_v13 = vmul.f32 %v5382_v7, %v498_v3  ;;  %v5392_v14 = vmul.f32 %v5384_v8, %v496_v4  ;;  %v509_v23 = vmax.f32 %v473_v5, 0.0  ;;  %v398_v5 = vld [vmem:[%s5336_s14 + $0xc8] sm:$0xff] }
  0x90   : > { %v5398_v19 = vpop.permute.xlu1 %558  ;;  %v5400_v20 = vpop.permute.xlu0 %553 }
  0x91   : > { %6942 = vst [vmem:[#allocation7_spill] sm:$0xff] %v5398_v19  ;;  %6943 = vst [vmem:[#allocation8_spill] sm:$0xff] %v5400_v20  ;;  %v5405_v25 = vmul.f32 %v5398_v19, %v500_v9  ;;  %v5408_v26 = vmul.f32 %v5400_v20, %v499_v10  ;;  %v392_v9 = vld [vmem:[%s5336_s14 + $0x98] sm:$0xff]  ;;  %v391_v10 = vld [vmem:[%s5336_s14 + $0x90] sm:$0xff] }
  0x92   : > { %v435_v17 = vmul.f32 %v5341_v37, %v392_v9  ;;  %v434_v18 = vmul.f32 %v5341_v37, %v391_v10 }
  0x94   : > { %v5414_v31 = vpop.permute.xlu1 %568  ;;  %v5416_v32 = vpop.permute.xlu0 %563  ;;  %v478_v33 = vadd.f32 %v5350_v42, %v435_v17  ;;  %v477_v34 = vadd.f32 %v5350_v42, %v434_v18  ;;  %v441_v17 = vmul.f32 %v5341_v37, %v398_v5  ;;  %v440_v18 = vmul.f32 %v5341_v37, %v397_v6 }
  0x95   : > { %6944 = vst [vmem:[#allocation9_spill] sm:$0xff] %v5414_v31  ;;  %6945 = vst [vmem:[#allocation10_spill] sm:$0xff] %v5416_v32  ;;  %v5423_v38 = vmul.f32 %v5414_v31, %v502_v21  ;;  %v5426_v39 = vmul.f32 %v5416_v32, %v501_v22 }
  0x96   : > { %v513_v54 = vmax.f32 %v477_v34, 0.0  ;;  %v399_v34 = vld [vmem:[%s5336_s14 + $0xd0] sm:$0xff] }
  0x97   : > { %v442_v48 = vmul.f32 %v5341_v37, %v399_v34 }
  0x98   : > { %v5430_v45 = vpop.permute.xlu1 %578  ;;  %v5432_v46 = vpop.permute.xlu0 %573 }
  0x99   : > { %6946 = vst [vmem:[#allocation11_spill] sm:$0xff] %v5430_v45  ;;  %6947 = vst [vmem:[#allocation12_spill] sm:$0xff] %v5432_v46  ;;  %v5438_v51 = vmul.f32 %v5430_v45, %v504_v40  ;;  %v5441_v52 = vmul.f32 %v5432_v46, %v503_v41 }
  0x9c   : > { %v5446_v57 = vpop.permute.xlu1 %588  ;;  %v5448_v58 = vpop.permute.xlu0 %583 }
  0x9d   : > { %6948 = vst [vmem:[#allocation13_spill] sm:$0xff] %v5446_v57  ;;  %6949 = vst [vmem:[#allocation14_spill] sm:$0xff] %v5448_v58  ;;  %v5453_v3 = vmul.f32 %v5446_v57, %v506_v47  ;;  %v5456_v4 = vmul.f32 %v5448_v58, %v505_v53  ;;  %v396_v47 = vld [vmem:[%s5336_s14 + $0xb8] sm:$0xff]  ;;  %v514_v53 = vmax.f32 %v478_v33, 0.0 }
  0x9e   : > { %v439_v63 = vmul.f32 %v5341_v37, %v396_v47  ;;  %v400_v33 = vld [vmem:[%s5336_s14 + $0xd8] sm:$0xff] }
  0x9f   : > { %v443_v47 = vmul.f32 %v5341_v37, %v400_v33 }
  0xa0   : > { %v5462_v11 = vpop.permute.xlu1 %598  ;;  %v5464_v12 = vpop.permute.xlu0 %593  ;;  %v482_v27 = vadd.f32 %v5350_v42, %v439_v63  ;;  %v402_v63 = vld [vmem:[%s5336_s14 + $0xe8] sm:$0xff] }
  0xa1   : > { %6950 = vst [vmem:[#allocation15_spill] sm:$0xff] %v5462_v11  ;;  %6951 = vst [vmem:[#allocation16_spill] sm:$0xff] %v5464_v12  ;;  %v5470_v21 = vmul.f32 %v5462_v11, %v508_v61  ;;  %v5473_v22 = vmul.f32 %v5464_v12, %v507_v62  ;;  %v486_v33 = vadd.f32 %v5350_v42, %v443_v47 }
  0xa3   : > { %v522_v47 = vmax.f32 %v486_v33, 0.0 }
  0xa4   : > { %v5478_v29 = vpop.permute.xlu1 %608  ;;  %v5480_v30 = vpop.permute.xlu0 %603 }
  0xa5   : > { %6952 = vst [vmem:[#allocation17_spill] sm:$0xff] %v5478_v29  ;;  %6953 = vst [vmem:[#allocation18_spill] sm:$0xff] %v5480_v30  ;;  %v5487_v40 = vmul.f32 %v5478_v29, %v510_v15  ;;  %v5490_v41 = vmul.f32 %v5480_v30, %v509_v23  ;;  %v516_v15 = vmax.f32 %v480_v55, 0.0  ;;  %v518_v55 = vmax.f32 %v482_v27, 0.0 }
  0xa6   : > { %v445_v27 = vmul.f32 %v5341_v37, %v402_v63 }
  0xa8   : > { %v5494_v49 = vpop.permute.xlu1 %618  ;;  %v5496_v50 = vpop.permute.xlu0 %613  ;;  %v488_v0 = vadd.f32 %v5350_v42, %v445_v27 }
  0xa9   : > { %6954 = vst [vmem:[#allocation19_spill] sm:$0xff] %v5494_v49  ;;  %6955 = vst [vmem:[#allocation20_spill] sm:$0xff] %v5496_v50  ;;  %v5501_v61 = vmul.f32 %v5494_v49, %v512_v43  ;;  %v5504_v62 = vmul.f32 %v5496_v50, %v511_v44  ;;  %v484_v43 = vadd.f32 %v5350_v42, %v441_v17  ;;  %v408_v49 = vld [vmem:[%s5336_s14 + $0x118] sm:$0xff]  ;;  %v407_v50 = vld [vmem:[%s5336_s14 + $0x110] sm:$0xff] }
  0xaa   : > { %v483_v44 = vadd.f32 %v5350_v42, %v440_v18 }
  0xab   : > { %v520_v17 = vmax.f32 %v484_v43, 0.0 }
  0xac   : > { %v5510_v9 = vpop.permute.xlu1 %628  ;;  %v5512_v10 = vpop.permute.xlu0 %623  ;;  %v519_v18 = vmax.f32 %v483_v44, 0.0 }
  0xad   : > { %6956 = vst [vmem:[#allocation21_spill] sm:$0xff] %v5510_v9  ;;  %6957 = vst [vmem:[#allocation22_spill] sm:$0xff] %v5512_v10  ;;  %v5517_v23 = vmul.f32 %v5510_v9, %v514_v53  ;;  %v5520_v24 = vmul.f32 %v5512_v10, %v513_v54  ;;  %v406_v9 = vld [vmem:[%s5336_s14 + $0x108] sm:$0xff]  ;;  %v405_v10 = vld [vmem:[%s5336_s14 + $0x100] sm:$0xff] }
  0xb0   : > { %v5526_v35 = vpop.permute.xlu1 %638  ;;  %v5528_v36 = vpop.permute.xlu0 %633 }
  0xb1   : > { %6958 = vst [vmem:[#allocation23_spill] sm:$0xff] %v5526_v35  ;;  %6959 = vst [vmem:[#allocation24_spill] sm:$0xff] %v5528_v36  ;;  %v5535_v53 = vmul.f32 %v5526_v35, %v516_v15  ;;  %v5538_v54 = vmul.f32 %v5528_v36, %v515_v16  ;;  %v485_v15 = vadd.f32 %v5350_v42, %v442_v48  ;;  %v404_v35 = vld [vmem:[%s5336_s14 + $0xf8] sm:$0xff]  ;;  %v403_v36 = vld [vmem:[%s5336_s14 + $0xf0] sm:$0xff] }
  0xb3   : > { %v521_v48 = vmax.f32 %v485_v15, 0.0 }
  0xb4   : > { %v5542_v5 = vpop.permute.xlu1 %648  ;;  %v5544_v6 = vpop.permute.xlu0 %643 }
  0xb5   : > { %6960 = vst [vmem:[#allocation25_spill] sm:$0xff] %v5542_v5  ;;  %6961 = vst [vmem:[#allocation26_spill] sm:$0xff] %v5544_v6  ;;  %v5549_v34 = vmul.f32 %v5542_v5, %v518_v55  ;;  %v5552_v16 = vmul.f32 %v5544_v6, %v517_v56  ;;  %v447_v55 = vmul.f32 %v5341_v37, %v404_v35 }
  0xb6   : > { %v446_v5 = vmul.f32 %v5341_v37, %v403_v36  ;;  %v487_v6 = vadd.f32 %v5350_v42, %v444_v28  ;;  %v524_v28 = vmax.f32 %v488_v0, 0.0  ;;  %v450_v0 = vmul.f32 %v5341_v37, %v407_v50 }
  0xb7   : > { %v490_v35 = vadd.f32 %v5350_v42, %v447_v55 }
  0xb8   : > { %v5558_v43 = vpop.permute.xlu1 %658  ;;  %v5560_v44 = vpop.permute.xlu0 %653  ;;  %v489_v36 = vadd.f32 %v5350_v42, %v446_v5 }
  0xb9   : > { %6962 = vst [vmem:[#allocation27_spill] sm:$0xff] %v5558_v43  ;;  %6963 = vst [vmem:[#allocation28_spill] sm:$0xff] %v5560_v44  ;;  %v5565_v56 = vmul.f32 %v5558_v43, %v520_v17  ;;  %v5568_v63 = vmul.f32 %v5560_v44, %v519_v18  ;;  %v449_v17 = vmul.f32 %v5341_v37, %v406_v9  ;;  %v523_v44 = vmax.f32 %v487_v6, 0.0 }
  0xba   : > { %v448_v18 = vmul.f32 %v5341_v37, %v405_v10  ;;  %v526_v55 = vmax.f32 %v490_v35, 0.0  ;;  %v525_v5 = vmax.f32 %v489_v36, 0.0  ;;  %v451_v6 = vmul.f32 %v5341_v37, %v408_v49 }
  0xbb   : > { %v492_v9 = vadd.f32 %v5350_v42, %v449_v17 }
  0xbc   : > { %v5574_v33 = vpop.permute.xlu1 %668  ;;  %v5576_v15 = vpop.permute.xlu0 %663  ;;  %v491_v10 = vadd.f32 %v5350_v42, %v448_v18 }
  0xbd   : > { %6964 = vst [vmem:[#allocation29_spill] sm:$0xff] %v5574_v33  ;;  %6965 = vst [vmem:[#allocation30_spill] sm:$0xff] %v5576_v15  ;;  %v5583_v43 = vmul.f32 %v5574_v33, %v522_v47  ;;  %v5586_v27 = vmul.f32 %v5576_v15, %v521_v48  ;;  %v528_v35 = vmax.f32 %v492_v9, 0.0 }
  0xbe   : > { %v527_v36 = vmax.f32 %v491_v10, 0.0 }
  0xc0   : > { %v5590_v29 = vpop.permute.xlu1 %678  ;;  %v5592_v30 = vpop.permute.xlu0 %673 }
  0xc1   : > { %6966 = vst [vmem:[#allocation31_spill] sm:$0xff] %v5590_v29  ;;  %6967 = vst [vmem:[#allocation32_spill] sm:$0xff] %v5592_v30  ;;  %v5597_v47 = vmul.f32 %v5590_v29, %v524_v28  ;;  %v5600_v48 = vmul.f32 %v5592_v30, %v523_v44  ;;  %v494_v28 = vadd.f32 %v5350_v42, %v451_v6 }
  0xc2   : > { %v493_v44 = vadd.f32 %v5350_v42, %v450_v0 }
  0xc3   : > { %v530_v9 = vmax.f32 %v494_v28, 0.0 }
  0xc4   : > { %v5604_v33 = vpop.permute.xlu1 %688  ;;  %v5606_v15 = vpop.permute.xlu0 %683 }
  0xc5   : > { %6968 = vst [vmem:[#allocation33_spill] sm:$0xff] %v5604_v33  ;;  %6969 = vst [vmem:[#allocation34_spill] sm:$0xff] %v5606_v15  ;;  %v5609_v17 = vmul.f32 %v5604_v33, %v526_v55  ;;  %v5612_v18 = vmul.f32 %v5606_v15, %v525_v5  ;;  %v529_v55 = vmax.f32 %v493_v44, 0.0 }
  0xc8   : > { %v5616_v29 = vpop.permute.xlu1 %698  ;;  %v5618_v49 = vpop.permute.xlu0 %693 }
  0xc9   : > { %6970 = vst [vmem:[#allocation35_spill] sm:$0xff] %v5616_v29  ;;  %6971 = vst [vmem:[#allocation36_spill] sm:$0xff] %v5618_v49  ;;  %v5621_v37 = vmul.f32 %v5616_v29, %v528_v35  ;;  %v5624_v50 = vmul.f32 %v5618_v49, %v527_v36  ;;  %750 = sbr.rel (%p4091_p4) target bundleno = 228 (0xe4), region = 48 }
  0xcc   : > { %v5626_v10 = vpop.permute.xlu1 %708  ;;  %v5628_v5 = vpop.permute.xlu0 %703 }
  0xcd   : > { %6972 = vst [vmem:[#allocation37_spill] sm:$0xff] %v5626_v10  ;;  %6973 = vst [vmem:[#allocation38_spill] sm:$0xff] %v5628_v5  ;;  %v5631_v6 = vmul.f32 %v5626_v10, %v530_v9  ;;  %v5634_v42 = vmul.f32 %v5628_v5, %v529_v55 }
  0xce   : > { %v5145_v0 = vmov 0.0  }
  0xcf   : > { %751 = vst [vmem:[#allocation2] sm:$0xff] %v5145_v0  ;;  %752 = vst [vmem:[#allocation2 + $0x8] sm:$0xff] %v5145_v0 }
  0xd0   : > { %753 = vst [vmem:[#allocation2 + $0x10] sm:$0xff] %v5145_v0  ;;  %754 = vst [vmem:[#allocation2 + $0x18] sm:$0xff] %v5145_v0 }
  0xd1   : > { %755 = vst [vmem:[#allocation2 + $0x20] sm:$0xff] %v5145_v0  ;;  %756 = vst [vmem:[#allocation2 + $0x28] sm:$0xff] %v5145_v0 }
  0xd2   : > { %757 = vst [vmem:[#allocation2 + $0x30] sm:$0xff] %v5145_v0  ;;  %758 = vst [vmem:[#allocation2 + $0x38] sm:$0xff] %v5145_v0 }
  0xd3   : > { %759 = vst [vmem:[#allocation2 + $0x40] sm:$0xff] %v5145_v0  ;;  %760 = vst [vmem:[#allocation2 + $0x48] sm:$0xff] %v5145_v0 }
  0xd4   : > { %761 = vst [vmem:[#allocation2 + $0x50] sm:$0xff] %v5145_v0  ;;  %762 = vst [vmem:[#allocation2 + $0x58] sm:$0xff] %v5145_v0 }
  0xd5   : > { %763 = vst [vmem:[#allocation2 + $0x60] sm:$0xff] %v5145_v0  ;;  %764 = vst [vmem:[#allocation2 + $0x68] sm:$0xff] %v5145_v0 }
  0xd6   : > { %765 = vst [vmem:[#allocation2 + $0x70] sm:$0xff] %v5145_v0  ;;  %766 = vst [vmem:[#allocation2 + $0x78] sm:$0xff] %v5145_v0 }
  0xd7   : > { %767 = vst [vmem:[#allocation2 + $0x80] sm:$0xff] %v5145_v0  ;;  %768 = vst [vmem:[#allocation2 + $0x88] sm:$0xff] %v5145_v0 }
  0xd8   : > { %769 = vst [vmem:[#allocation2 + $0x90] sm:$0xff] %v5145_v0  ;;  %770 = vst [vmem:[#allocation2 + $0x98] sm:$0xff] %v5145_v0 }
  0xd9   : > { %771 = vst [vmem:[#allocation2 + $0xa0] sm:$0xff] %v5145_v0  ;;  %772 = vst [vmem:[#allocation2 + $0xa8] sm:$0xff] %v5145_v0 }
  0xda   : > { %773 = vst [vmem:[#allocation2 + $0xb0] sm:$0xff] %v5145_v0  ;;  %774 = vst [vmem:[#allocation2 + $0xb8] sm:$0xff] %v5145_v0 }
  0xdb   : > { %775 = vst [vmem:[#allocation2 + $0xc0] sm:$0xff] %v5145_v0  ;;  %776 = vst [vmem:[#allocation2 + $0xc8] sm:$0xff] %v5145_v0 }
  0xdc   : > { %777 = vst [vmem:[#allocation2 + $0xd0] sm:$0xff] %v5145_v0  ;;  %778 = vst [vmem:[#allocation2 + $0xd8] sm:$0xff] %v5145_v0 }
  0xdd   : > { %779 = vst [vmem:[#allocation2 + $0xe0] sm:$0xff] %v5145_v0  ;;  %780 = vst [vmem:[#allocation2 + $0xe8] sm:$0xff] %v5145_v0 }
  0xde   : > { %781 = vst [vmem:[#allocation2 + $0xf0] sm:$0xff] %v5145_v0  ;;  %782 = vst [vmem:[#allocation2 + $0xf8] sm:$0xff] %v5145_v0 }
  0xdf   : > { %783 = vst [vmem:[#allocation2 + $0x100] sm:$0xff] %v5145_v0  ;;  %784 = vst [vmem:[#allocation2 + $0x108] sm:$0xff] %v5145_v0 }
  0xe0   : > { %785 = vst [vmem:[#allocation2 + $0x110] sm:$0xff] %v5145_v0  ;;  %786 = vst [vmem:[#allocation2 + $0x118] sm:$0xff] %v5145_v0 }
  0xe1   : > { %787 = vst [vmem:[#allocation2 + $0x120] sm:$0xff] %v5145_v0  ;;  %788 = vst [vmem:[#allocation2 + $0x128] sm:$0xff] %v5145_v0 }
  0xe2   : > { %789 = vst [vmem:[#allocation2 + $0x130] sm:$0xff] %v5145_v0  ;;  %790 = vst [vmem:[#allocation2 + $0x138] sm:$0xff] %v5145_v0 }
  0xe3   : > { %791 = vst [vmem:[#allocation2 + $0x140] sm:$0xff] %v5145_v0 }
  0xe4 PF: > { %v5028_v35 = vld [vmem:[%s6873_s1 + $0x78] sm:$0xff]   ;;  %807 = vst [vmem:[#allocation2 + $0x7b] sm:$0xff] %v5470_v21  ;;  %808 = vst [vmem:[#allocation2 + $0x83] sm:$0xff] %v5490_v41  ;;  %v5035_v21 = vld [vmem:[%s6873_s1 + $0x40] sm:$0xff]  }
  0xe5   : > { %809 = vst [vmem:[#allocation2 + $0x8b] sm:$0xff] %v5487_v40  ;;  %810 = vst [vmem:[#allocation2 + $0x93] sm:$0xff] %v5504_v62  ;;  %4998 = vmatprep.subr.bf16.mxu1 %v5028_v35  ;;  %4530 = vmatprep.subr.bf16.mxu0 %v5028_v35  ;;  %v5036_v41 = vld [vmem:[%s6873_s1 + $0x38] sm:$0xff]   ;;  %v5040_v28 = vld [vmem:[%s6873_s1 + $0x28] sm:$0xff]  }
  0xe6   : > { %811 = vst [vmem:[#allocation2 + $0x9b] sm:$0xff] %v5501_v61  ;;  %794 = vst [vmem:[#allocation2 + $0x13] sm:$0xff] %v5378_v2  ;;  %5006 = vmatpush3.bf16.msra.mxu1 %v5028_v35  ;;  %4531 = vmatpush3.bf16.msra.mxu0 %v5028_v35  ;;  %v5030_v2 = vld [vmem:[%s6873_s1 + $0x68] sm:$0xff]   ;;  %v5042_v35 = vld [vmem:[%s6873_s1 + $0x20] sm:$0xff]  }
  0xe7   : > { %795 = vst [vmem:[#allocation2 + $0x1b] sm:$0xff] %v5392_v14  ;;  %812 = vst [vmem:[#allocation2 + $0xa3] sm:$0xff] %v5520_v24  ;;  %v5041_v44 = vld [vmem:[%s6873_s1 + $0xa8] sm:$0xff]  }
  0xe8   : > { %813 = vst [vmem:[#allocation2 + $0xab] sm:$0xff] %v5517_v23  ;;  %814 = vst [vmem:[#allocation2 + $0xb3] sm:$0xff] %v5538_v54  ;;  %v5038_v23 = vld [vmem:[%s6873_s1 + $0xb8] sm:$0xff]  }
  0xe9   : > { %815 = vst [vmem:[#allocation2 + $0xbb] sm:$0xff] %v5535_v53  ;;  %796 = vst [vmem:[#allocation2 + $0x23] sm:$0xff] %v5375_v1  ;;  %v5029_v1 = vld [vmem:[%s6873_s1 + $0x70] sm:$0xff]  }
  0xea   : > { %797 = vst [vmem:[#allocation2 + $0x2b] sm:$0xff] %v5389_v13  ;;  %798 = vst [vmem:[#allocation2 + $0x33] sm:$0xff] %v5408_v26  ;;  %4999 = vmatprep.subr.bf16.mxu1 %v5029_v1  ;;  %4532 = vmatprep.subr.bf16.mxu0 %v5029_v1  ;;  %v5031_v13 = vld [vmem:[%s6873_s1 + $0x60] sm:$0xff]   ;;  %v2783_v57 = vld [vmem:[#allocation2 + $0x134] sm:$0xff] }
  0xeb   : > { %799 = vst [vmem:[#allocation2 + $0x3b] sm:$0xff] %v5405_v25  ;;  %816 = vst [vmem:[#allocation2 + $0xc3] sm:$0xff] %v5552_v16  ;;  %5007 = vmatpush3.bf16.msra.mxu1 %v5029_v1  ;;  %4533 = vmatpush3.bf16.msra.mxu0 %v5029_v1  ;;  %v916_v14 = vld [vmem:[#allocation2 + $0x81] sm:$0xff] }
  0xec   : > { %817 = vst [vmem:[#allocation2 + $0xcb] sm:$0xff] %v5549_v34  ;;  %818 = vst [vmem:[#allocation2 + $0xd3] sm:$0xff] %v5568_v63  ;;  %5000 = vmatprep.subr.bf16.mxu1 %v5030_v2  ;;  %4534 = vmatprep.subr.bf16.mxu0 %v5030_v2  ;;  %v917_v25 = vld [vmem:[#allocation2 + $0x89] sm:$0xff]  ;;  %v2784_v58 = vld [vmem:[#allocation2 + $0x13c] sm:$0xff] }
  0xed   : > { %819 = vst [vmem:[#allocation2 + $0xdb] sm:$0xff] %v5565_v56  ;;  %800 = vst [vmem:[#allocation2 + $0x43] sm:$0xff] %v5426_v39  ;;  %v944_v26 = vpack.c.bf16 %v917_v25, %v916_v14  ;;  %v901_v39 = vld [vmem:[#allocation2 + $0x9] sm:$0xff]  ;;  %v919_v40 = vld [vmem:[#allocation2 + $0x99] sm:$0xff]  ;;  %v2802_v19 = vpack.c.bf16 %v2784_v58, %v2783_v57 }
  0xee   : > { %801 = vst [vmem:[#allocation2 + $0x4b] sm:$0xff] %v5423_v38  ;;  %802 = vst [vmem:[#allocation2 + $0x53] sm:$0xff] %v5441_v52  ;;  %v900_v38 = vld [vmem:[#allocation2 + $0x1] sm:$0xff]  ;;  %v5032_v52 = vld [vmem:[%s6873_s1 + $0x58] sm:$0xff]  }
  0xef   : > { %803 = vst [vmem:[#allocation2 + $0x5b] sm:$0xff] %v5438_v51  ;;  %820 = vst [vmem:[#allocation2 + $0xe3] sm:$0xff] %v5586_v27  ;;  %5008 = vmatpush3.bf16.msra.mxu1 %v5030_v2  ;;  %4535 = vmatpush3.bf16.msra.mxu0 %v5030_v2  ;;  %v936_v51 = vpack.c.bf16 %v901_v39, %v900_v38  ;;  %v902_v61 = vld [vmem:[#allocation2 + $0x11] sm:$0xff]  ;;  %v903_v62 = vld [vmem:[#allocation2 + $0x19] sm:$0xff] }
  0xf0   : > { %821 = vst [vmem:[#allocation2 + $0xeb] sm:$0xff] %v5583_v43  ;;  %822 = vst [vmem:[#allocation2 + $0xf3] sm:$0xff] %v5600_v48  ;;  %5001 = vmatprep.subr.bf16.mxu1 %v5031_v13  ;;  %4536 = vmatprep.subr.bf16.mxu0 %v5031_v13  ;;  %v920_v24 = vld [vmem:[#allocation2 + $0xa1] sm:$0xff]  ;;  %v921_v53 = vld [vmem:[#allocation2 + $0xa9] sm:$0xff]  ;;  %v937_v34 = vpack.c.bf16 %v903_v62, %v902_v61 }
  0xf1   : > { %823 = vst [vmem:[#allocation2 + $0xfb] sm:$0xff] %v5597_v47  ;;  %804 = vst [vmem:[#allocation2 + $0x63] sm:$0xff] %v5456_v4  ;;  %4562 = vmatprep.mubr.bf16.mxu1 %v944_v26  ;;  %4546 = vmatprep.mubr.bf16.mxu0 %v936_v51  ;;  %v5034_v4 = vld [vmem:[%s6873_s1 + $0x48] sm:$0xff]   ;;  %v5037_v56 = vld [vmem:[%s6873_s1 + $0x30] sm:$0xff]   ;;  %v946_v63 = vpack.c.bf16 %v921_v53, %v920_v24 }
  0xf2   : > { %805 = vst [vmem:[#allocation2 + $0x6b] sm:$0xff] %v5453_v3  ;;  %806 = vst [vmem:[#allocation2 + $0x73] sm:$0xff] %v5473_v22  ;;  %v5033_v3 = vld [vmem:[%s6873_s1 + $0x50] sm:$0xff]   ;;  %v904_v16 = vld [vmem:[#allocation2 + $0x21] sm:$0xff] }
  0xf3   : > { %824 = vst [vmem:[#allocation2 + $0x103] sm:$0xff] %v5612_v18  ;;  %825 = vst [vmem:[#allocation2 + $0x10b] sm:$0xff] %v5609_v17  ;;  %5009 = vmatpush3.bf16.msra.mxu1 %v5031_v13  ;;  %4537 = vmatpush3.bf16.msra.mxu0 %v5031_v13  ;;  %v918_v22 = vld [vmem:[#allocation2 + $0x91] sm:$0xff]  ;;  %v905_v43 = vld [vmem:[#allocation2 + $0x29] sm:$0xff] }
  0xf4   : > { %826 = vst [vmem:[#allocation2 + $0x113] sm:$0xff] %v5624_v50  ;;  %827 = vst [vmem:[#allocation2 + $0x11b] sm:$0xff] %v5621_v37  ;;  %5002 = vmatprep.subr.bf16.mxu1 %v5032_v52  ;;  %4538 = vmatprep.subr.bf16.mxu0 %v5032_v52  ;;  %v945_v54 = vpack.c.bf16 %v919_v40, %v918_v22  ;;  %v922_v27 = vld [vmem:[#allocation2 + $0xb1] sm:$0xff]  ;;  %v923_v47 = vld [vmem:[#allocation2 + $0xb9] sm:$0xff]  ;;  %v938_v36 = vpack.c.bf16 %v905_v43, %v904_v16 }
  0xf5   : > { %828 = vst [vmem:[#allocation2 + $0x123] sm:$0xff] %v5634_v42  ;;  %829 = vst [vmem:[#allocation2 + $0x12b] sm:$0xff] %v5631_v6  ;;  %v5039_v48 = vld [vmem:[%s6873_s1 + $0xb0] sm:$0xff]   ;;  %v907_v18 = vld [vmem:[#allocation2 + $0x39] sm:$0xff]  ;;  %v947_v9 = vpack.c.bf16 %v923_v47, %v922_v27 }
  0xf6   : > { %v906_v17 = vld [vmem:[#allocation2 + $0x31] sm:$0xff]  ;;  %v924_v37 = vld [vmem:[#allocation2 + $0xc1] sm:$0xff]  ;;  %v925_v50 = vld [vmem:[#allocation2 + $0xc9] sm:$0xff] }
  0xf7   : > { %5010 = vmatpush3.bf16.msra.mxu1 %v5032_v52  ;;  %4539 = vmatpush3.bf16.msra.mxu0 %v5032_v52  ;;  %v939_v55 = vpack.c.bf16 %v907_v18, %v906_v17  ;;  %v908_v6 = vld [vmem:[#allocation2 + $0x41] sm:$0xff]  ;;  %v909_v42 = vld [vmem:[#allocation2 + $0x49] sm:$0xff]  ;;  %v948_v0 = vpack.c.bf16 %v925_v50, %v924_v37  ;;  %v926_v1 = vld [vmem:[#allocation2 + $0xd1] sm:$0xff] }
  0xf8   : > { %5003 = vmatprep.subr.bf16.mxu1 %v5033_v3  ;;  %4540 = vmatprep.subr.bf16.mxu0 %v5033_v3  ;;  %v5043_v2 = vld [vmem:[%s6873_s1 + $0xa0] sm:$0xff]   ;;  %v940_v13 = vpack.c.bf16 %v909_v42, %v908_v6  ;;  %v5044_v25 = vld [vmem:[%s6873_s1 + $0x18] sm:$0xff]   ;;  %v929_v52 = vld [vmem:[#allocation2 + $0xe9] sm:$0xff] }
  0xf9   : > { %v927_v14 = vld [vmem:[#allocation2 + $0xd9] sm:$0xff]  ;;  %v910_v26 = vld [vmem:[#allocation2 + $0x51] sm:$0xff]  ;;  %v928_v51 = vld [vmem:[#allocation2 + $0xe1] sm:$0xff] }
  0xfa   : > { %v911_v38 = vld [vmem:[#allocation2 + $0x59] sm:$0xff]  ;;  %v913_v22 = vld [vmem:[#allocation2 + $0x69] sm:$0xff]  ;;  %v950_v40 = vpack.c.bf16 %v929_v52, %v928_v51  ;;  %v930_v61 = vld [vmem:[#allocation2 + $0xf1] sm:$0xff] }
  0xfb   : > { %5011 = vmatpush3.bf16.msra.mxu1 %v5033_v3  ;;  %4541 = vmatpush3.bf16.msra.mxu0 %v5033_v3  ;;  %v5045_v39 = vld [vmem:[%s6873_s1 + $0x98] sm:$0xff]   ;;  %v949_v3 = vpack.c.bf16 %v927_v14, %v926_v1  ;;  %v5047_v62 = vld [vmem:[%s6873_s1 + $0x90] sm:$0xff]   ;;  %v5049_v16 = vld [vmem:[%s6873_s1 + $0x8] sm:$0xff]  }
  0xfc   : > { %5004 = vmatprep.subr.bf16.mxu1 %v5034_v4  ;;  %4542 = vmatprep.subr.bf16.mxu0 %v5034_v4  ;;  %v931_v24 = vld [vmem:[#allocation2 + $0xf9] sm:$0xff]  ;;  %v914_v53 = vld [vmem:[#allocation2 + $0x71] sm:$0xff]  ;;  %v932_v43 = vld [vmem:[#allocation2 + $0x101] sm:$0xff] }
  0xfd   : > { %v1421_v47 = vld [vmem:[#allocation2 + $0x2] sm:$0xff]  ;;  %v934_v18 = vld [vmem:[#allocation2 + $0x111] sm:$0xff]  ;;  %v1428_v52 = vld [vmem:[#allocation2 + $0x3a] sm:$0xff] }
  0xfe   : > { %v5050_v17 = vld [vmem:[%s6873_s1 + $0x80] sm:$0xff]   ;;  %v1423_v50 = vld [vmem:[#allocation2 + $0x12] sm:$0xff]  ;;  %v831_v6 = vld [vmem:[#allocation2 + $0x8] sm:$0xff] }
  0xff   : > { %5012 = vmatpush3.bf16.msra.mxu1 %v5034_v4  ;;  %4543 = vmatpush3.bf16.msra.mxu0 %v5034_v4  ;;  %v941_v4 = vpack.c.bf16 %v911_v38, %v910_v26  ;;  %v5053_v42 = vld [vmem:[%s6873_s1 + $0x138] sm:$0xff]   ;;  %v1426_v1 = vld [vmem:[#allocation2 + $0x2a] sm:$0xff] }
 0x100   : > { %5005 = vmatprep.subr.bf16.mxu1 %v5035_v21  ;;  %4544 = vmatprep.subr.bf16.mxu0 %v5035_v21  ;;  %v5055_v26 = vld [vmem:[%s6873_s1 + $0x130] sm:$0xff]   ;;  %v2780_v5 = vld [vmem:[#allocation2 + $0x11c] sm:$0xff]  ;;  %v2781_v33 = vld [vmem:[#allocation2 + $0x124] sm:$0xff] }
 0x101   : > { %v832_v38 = vld [vmem:[#allocation2 + $0x10] sm:$0xff]  ;;  %v3413_v31 = vld [vmem:[#allocation2 + $0x26] sm:$0xff]  ;;  %v3416_v58 = vld [vmem:[#allocation2 + $0x3e] sm:$0xff] }
 0x102   : > { %v1427_v51 = vld [vmem:[#allocation2 + $0x32] sm:$0xff] }
 0x103   : > { %5013 = vmatpush3.bf16.msra.mxu1 %v5035_v21  ;;  %4545 = vmatpush3.bf16.msra.mxu0 %v5035_v21  ;;  %v912_v21 = vld [vmem:[#allocation2 + $0x61] sm:$0xff]  ;;  %v2779_v10 = vld [vmem:[#allocation2 + $0x114] sm:$0xff]  ;;  %v2782_v15 = vld [vmem:[#allocation2 + $0x12c] sm:$0xff] }
 0x104   : > { %4582 = vmatprep.subr.bf16.mxu1 %v5036_v41  ;;  %4634 = vmatprep.subr.bf16.mxu0 %v5038_v23  ;;  %v3414_v32 = vld [vmem:[#allocation2 + $0x2e] sm:$0xff]  ;;  %v3415_v57 = vld [vmem:[#allocation2 + $0x36] sm:$0xff] }
 0x105   : > { %v3449_v20 = vpack.c.bf16 %v3414_v32, %v3413_v31 }
 0x106   : > { %4563 = vmatmul.mubr.bf16.vlgmr.msra.gmra.mxu1 %v945_v54  ;;  %4547 = vmatmul.mubr.bf16.vlgmr.msra.gmra.mxu0 %v937_v34  ;;  %v915_v54 = vld [vmem:[#allocation2 + $0x79] sm:$0xff]  ;;  %v5048_v34 = vld [vmem:[%s6873_s1 + $0x88] sm:$0xff]  }
 0x107   : > { %4583 = vmatpush3.bf16.msra.mxu1 %v5036_v41  ;;  %4635 = vmatpush3.bf16.msra.mxu0 %v5038_v23  ;;  %v5046_v41 = vld [vmem:[%s6873_s1 + $0x10] sm:$0xff]   ;;  %v942_v23 = vpack.c.bf16 %v913_v22, %v912_v21  ;;  %v943_v27 = vpack.c.bf16 %v915_v54, %v914_v53  ;;  %v5057_v21 = vld [vmem:[%s6873_s1 + $0x128] sm:$0xff]   ;;  %v837_v54 = vld [vmem:[#allocation2 + $0x38] sm:$0xff] }
 0x108   : > { %4584 = vmatprep.subr.bf16.mxu1 %v5037_v56  ;;  %4566 = vmatprep.mubr.bf16.mxu1 %v946_v63  ;;  %v951_v63 = vpack.c.bf16 %v931_v24, %v930_v61  ;;  %v1429_v22 = vld [vmem:[#allocation2 + $0x42] sm:$0xff]  ;;  %v5765_v61 = vpack.c.bf16 %v1428_v52, %v1427_v51  ;;  %v836_v53 = vld [vmem:[#allocation2 + $0x30] sm:$0xff] }
 0x109   : > { %4636 = vmatprep.subr.bf16.mxu0 %v5039_v48  ;;  %4550 = vmatprep.mubr.bf16.mxu0 %v938_v36  ;;  %v5062_v52 = vld [vmem:[%s6873_s1 + $0xd0] sm:$0xff]  }
 0x10b   : > { %4585 = vmatpush3.bf16.msra.mxu1 %v5037_v56  ;;  %4637 = vmatpush3.bf16.msra.mxu0 %v5039_v48  ;;  %v933_v56 = vld [vmem:[#allocation2 + $0x109] sm:$0xff] }
 0x10c   : > { %4586 = vmatprep.subr.bf16.mxu1 %v5040_v28  ;;  %4638 = vmatprep.subr.bf16.mxu0 %v5041_v44  ;;  %v1422_v48 = vld [vmem:[#allocation2 + $0xa] sm:$0xff]  ;;  %v952_v36 = vpack.c.bf16 %v933_v56, %v932_v43  ;;  %v838_v43 = vld [vmem:[#allocation2 + $0x40] sm:$0xff] }
 0x10d   : > { %v1457_v37 = vpack.c.bf16 %v1422_v48, %v1421_v47  ;;  %v839_v56 = vld [vmem:[#allocation2 + $0x48] sm:$0xff] }
 0x10e   : > { %4567 = vmatmul.mubr.bf16.gmra.mxu1 %v947_v9  ;;  %4551 = vmatmul.mubr.bf16.gmra.mxu0 %v939_v55  ;;  %v1424_v9 = vld [vmem:[#allocation2 + $0x1a] sm:$0xff]  ;;  %v1433_v47 = vld [vmem:[#allocation2 + $0x62] sm:$0xff]  ;;  %v1434_v48 = vld [vmem:[#allocation2 + $0x6a] sm:$0xff] }
 0x10f   : > { %4587 = vmatpush3.bf16.msra.mxu1 %v5040_v28  ;;  %4639 = vmatpush3.bf16.msra.mxu0 %v5041_v44  ;;  %v935_v28 = vld [vmem:[#allocation2 + $0x119] sm:$0xff] }
 0x110   : > { %4570 = vmatprep.mubr.bf16.mxu1 %v948_v0  ;;  %4588 = vmatprep.subr.bf16.mxu1 %v5042_v35  ;;  %v5051_v44 = vld [vmem:[%s6873_s1] sm:$0xff]   ;;  %v5052_v0 = vld [vmem:[%s6873_s1 + $0xf8] sm:$0xff]  }
 0x111   : > { %4640 = vmatprep.subr.bf16.mxu0 %v5043_v2  ;;  %4554 = vmatprep.mubr.bf16.mxu0 %v940_v13  ;;  %v830_v55 = vld [vmem:[#allocation2] sm:$0xff]  ;;  %v5753_v13 = vpack.c.bf16 %v1424_v9, %v1423_v50  ;;  %v841_v50 = vld [vmem:[#allocation2 + $0x58] sm:$0xff] }
 0x112   : > { %v866_v14 = vpack.c.bf16 %v831_v6, %v830_v55  ;;  %v1435_v9 = vld [vmem:[#allocation2 + $0x72] sm:$0xff]  ;;  %v1436_v55 = vld [vmem:[#allocation2 + $0x7a] sm:$0xff] }
 0x113   : > { %4589 = vmatpush3.bf16.msra.mxu1 %v5042_v35  ;;  %4641 = vmatpush3.bf16.msra.mxu0 %v5043_v2  ;;  %v1425_v35 = vld [vmem:[#allocation2 + $0x22] sm:$0xff]  ;;  %v953_v2 = vpack.c.bf16 %v935_v28, %v934_v18  ;;  %v870_v18 = vpack.c.bf16 %v839_v56, %v838_v43  ;;  %v5782_v28 = vpack.c.bf16 %v1434_v48, %v1433_v47  ;;  %v5061_v6 = vld [vmem:[%s6873_s1 + $0x118] sm:$0xff]  }
 0x114   : > { %4590 = vmatprep.subr.bf16.mxu1 %v5044_v25  ;;  %4642 = vmatprep.subr.bf16.mxu0 %v5045_v39  ;;  %v849_v47 = vld [vmem:[#allocation2 + $0x98] sm:$0xff] }
 0x115   : > { %v1443_v48 = vld [vmem:[#allocation2 + $0xb2] sm:$0xff] }
 0x116   : > { %4571 = vmatmul.mubr.bf16.gmra.mxu1 %v949_v3  ;;  %4555 = vmatmul.mubr.bf16.gmra.mxu0 %v941_v4  ;;  %v834_v3 = vld [vmem:[#allocation2 + $0x20] sm:$0xff]  ;;  %v835_v4 = vld [vmem:[#allocation2 + $0x28] sm:$0xff] }
 0x117   : > { %4591 = vmatpush3.bf16.msra.mxu1 %v5044_v25  ;;  %4643 = vmatpush3.bf16.msra.mxu0 %v5045_v39  ;;  %v5755_v25 = vpack.c.bf16 %v1426_v1, %v1425_v35  ;;  %v833_v39 = vld [vmem:[#allocation2 + $0x18] sm:$0xff]  ;;  %v1437_v35 = vld [vmem:[#allocation2 + $0x82] sm:$0xff]  ;;  %v1438_v1 = vld [vmem:[#allocation2 + $0x8a] sm:$0xff] }
 0x118   : > { %4574 = vmatprep.mubr.bf16.mxu1 %v950_v40  ;;  %4592 = vmatprep.subr.bf16.mxu1 %v5046_v41  ;;  %v1430_v40 = vld [vmem:[#allocation2 + $0x4a] sm:$0xff]  ;;  %v5800_v51 = vpack.c.bf16 %v1438_v1, %v1437_v35 }
 0x119   : > { %4644 = vmatprep.subr.bf16.mxu0 %v5047_v62  ;;  %4558 = vmatprep.mubr.bf16.mxu0 %v942_v23  ;;  %v5054_v23 = vld [vmem:[%s6873_s1 + $0xf0] sm:$0xff]   ;;  %v5770_v24 = vpack.c.bf16 %v1430_v40, %v1429_v22  ;;  %v5065_v22 = vld [vmem:[%s6873_s1 + $0x108] sm:$0xff]   ;;  %v1440_v40 = vld [vmem:[#allocation2 + $0x9a] sm:$0xff] }
 0x11b   : > { %4593 = vmatpush3.bf16.msra.mxu1 %v5046_v41  ;;  %4645 = vmatpush3.bf16.msra.mxu0 %v5047_v62  ;;  %v867_v41 = vpack.c.bf16 %v833_v39, %v832_v38  ;;  %v868_v62 = vpack.c.bf16 %v835_v4, %v834_v3  ;;  %v5798_v38 = vpack.c.bf16 %v1436_v55, %v1435_v9  ;;  %v844_v3 = vld [vmem:[#allocation2 + $0x70] sm:$0xff]  ;;  %v845_v4 = vld [vmem:[#allocation2 + $0x78] sm:$0xff]  ;;  %v1445_v9 = vld [vmem:[#allocation2 + $0xc2] sm:$0xff] }
 0x11c   : > { %4646 = vmatprep.subr.bf16.mxu0 %v5048_v34  ;;  %4594 = vmatprep.subr.bf16.mxu1 %v5049_v16  ;;  %v1446_v55 = vld [vmem:[#allocation2 + $0xca] sm:$0xff] }
 0x11d   : > { %v5838_v1 = vpack.c.bf16 %v1446_v55, %v1445_v9  ;;  %v861_v9 = vld [vmem:[#allocation2 + $0xf8] sm:$0xff] }
 0x11e   : > { %4575 = vmatmul.mubr.bf16.gmra.mxu1 %v951_v63  ;;  %4559 = vmatmul.mubr.bf16.gmra.mxu0 %v943_v27  ;;  %v5059_v63 = vld [vmem:[%s6873_s1 + $0x120] sm:$0xff]   ;;  %v5056_v27 = vld [vmem:[%s6873_s1 + $0xe8] sm:$0xff]   ;;  %v1455_v55 = vld [vmem:[#allocation2 + $0x112] sm:$0xff] }
 0x11f   : > { %4647 = vmatpush3.bf16.msra.mxu0 %v5048_v34  ;;  %4578 = vmatprep.mubr.bf16.mxu1 %v952_v36  ;;  %v1431_v34 = vld [vmem:[#allocation2 + $0x52] sm:$0xff]  ;;  %v869_v36 = vpack.c.bf16 %v837_v54, %v836_v53  ;;  %v1442_v53 = vld [vmem:[#allocation2 + $0xaa] sm:$0xff] }
 0x120   : > { %4595 = vmatpush3.bf16.msra.mxu1 %v5049_v16  ;;  %4648 = vmatprep.subr.bf16.mxu0 %v5050_v17  ;;  %v1432_v16 = vld [vmem:[#allocation2 + $0x5a] sm:$0xff]  ;;  %v5064_v54 = vld [vmem:[%s6873_s1 + $0xc8] sm:$0xff]  }
 0x121   : > { %4596 = vmatprep.subr.bf16.mxu1 %v5051_v44  ;;  %4650 = vmatprep.mubr.bf16.mxu0 %v1457_v37  ;;  %v840_v37 = vld [vmem:[#allocation2 + $0x50] sm:$0xff] }
 0x123   : > { %4649 = vmatpush3.bf16.msra.mxu0 %v5050_v17  ;;  %v5780_v17 = vpack.c.bf16 %v1432_v16, %v1431_v34  ;;  %v5067_v34 = vld [vmem:[%s6873_s1 + $0x100] sm:$0xff]   ;;  %v873_v16 = vpack.c.bf16 %v845_v4, %v844_v3  ;;  %v855_v3 = vld [vmem:[#allocation2 + $0xc8] sm:$0xff] }
 0x124   : > { %4597 = vmatpush3.bf16.msra.mxu1 %v5051_v44  ;;  %4738 = vmatprep.subr.bf16.mxu0 %v5053_v42  ;;  %v5058_v44 = vld [vmem:[%s6873_s1 + $0xe0] sm:$0xff]  }
 0x125   : > { %4686 = vmatprep.subr.bf16.mxu1 %v5052_v0  ;;  %v1449_v4 = vld [vmem:[#allocation2 + $0xe2] sm:$0xff] }
 0x126   : > { %4579 = vmatmul.mubr.bf16.gmra.mxu1 %v953_v2  ;;  %4651 = vmatmul.mubr.bf16.vlgmr.msra.gmra.mxu0 %v5753_v13  ;;  %v5063_v2 = vld [vmem:[%s6873_s1 + $0x110] sm:$0xff]  }
 0x127   : > { %4598 = vmatprep.mubr.bf16.mxu1 %v866_v14  ;;  %4739 = vmatpush3.bf16.msra.mxu0 %v5053_v42  ;;  %v842_v42 = vld [vmem:[#allocation2 + $0x60] sm:$0xff]  ;;  %v5060_v14 = vld [vmem:[%s6873_s1 + $0xd8] sm:$0xff]  }
 0x128   : > { %4654 = vmatprep.mubr.bf16.mxu0 %v5755_v25  ;;  %4740 = vmatprep.subr.bf16.mxu0 %v5055_v26 }
 0x12b   : > { %4741 = vmatpush3.bf16.msra.mxu0 %v5055_v26  ;;  %v871_v26 = vpack.c.bf16 %v841_v50, %v840_v37  ;;  %v850_v37 = vld [vmem:[#allocation2 + $0xa0] sm:$0xff]  ;;  %v851_v50 = vld [vmem:[#allocation2 + $0xa8] sm:$0xff] }
 0x12c   : > { %4742 = vmatprep.subr.bf16.mxu0 %v5057_v21  ;;  %v876_v35 = vpack.c.bf16 %v851_v50, %v850_v37  ;;  %v860_v50 = vld [vmem:[#allocation2 + $0xf0] sm:$0xff] }
 0x12e   : > { %4599 = vmatmul.mubr.bf16.vlgmr.msra.gmra.mxu1 %v867_v41  ;;  %4655 = vmatmul.mubr.bf16.gmra.mxu0 %v5765_v61  ;;  %v846_v41 = vld [vmem:[#allocation2 + $0x80] sm:$0xff] }
 0x12f   : > { %4687 = vmatpush3.bf16.msra.mxu1 %v5052_v0  ;;  %4602 = vmatprep.mubr.bf16.mxu1 %v868_v62  ;;  %v843_v0 = vld [vmem:[#allocation2 + $0x68] sm:$0xff] }
 0x130   : > { %4688 = vmatprep.subr.bf16.mxu1 %v5054_v23  ;;  %4658 = vmatprep.mubr.bf16.mxu0 %v5770_v24  ;;  %v872_v39 = vpack.c.bf16 %v843_v0, %v842_v42  ;;  %v847_v62 = vld [vmem:[#allocation2 + $0x88] sm:$0xff] }
 0x131   : > { %4743 = vmatpush3.bf16.msra.mxu0 %v5057_v21  ;;  %v1439_v21 = vld [vmem:[#allocation2 + $0x92] sm:$0xff]  ;;  %v874_v56 = vpack.c.bf16 %v847_v62, %v846_v41 }
 0x132   : > { %4744 = vmatprep.subr.bf16.mxu0 %v5059_v63  ;;  %v5816_v43 = vpack.c.bf16 %v1440_v40, %v1439_v21  ;;  %v1450_v21 = vld [vmem:[#allocation2 + $0xea] sm:$0xff] }
 0x133   : > { %4689 = vmatpush3.bf16.msra.mxu1 %v5054_v23  ;;  %v1441_v23 = vld [vmem:[#allocation2 + $0xa2] sm:$0xff]  ;;  %v5845_v62 = vpack.c.bf16 %v1450_v21, %v1449_v4  ;;  %v864_v21 = vld [vmem:[#allocation2 + $0x110] sm:$0xff] }
 0x134   : > { %4690 = vmatprep.subr.bf16.mxu1 %v5056_v27 }
 0x135   : > { %4745 = vmatpush3.bf16.msra.mxu0 %v5059_v63  ;;  %v5818_v63 = vpack.c.bf16 %v1442_v53, %v1441_v23  ;;  %v856_v23 = vld [vmem:[#allocation2 + $0xd0] sm:$0xff]  ;;  %v857_v53 = vld [vmem:[#allocation2 + $0xd8] sm:$0xff] }
 0x136   : > { %4603 = vmatmul.mubr.bf16.gmra.mxu1 %v869_v36  ;;  %4659 = vmatmul.mubr.bf16.gmra.mxu0 %v5780_v17  ;;  %v5066_v36 = vld [vmem:[%s6873_s1 + $0xc0] sm:$0xff]  }
 0x137   : > { %4606 = vmatprep.mubr.bf16.mxu1 %v870_v18  ;;  %4691 = vmatpush3.bf16.msra.mxu1 %v5056_v27  ;;  %v848_v27 = vld [vmem:[#allocation2 + $0x90] sm:$0xff]  ;;  %v5826_v18 = vld [vmem:[%s6873_s1 + $0x1b8] sm:$0xff]  }
 0x138   : > { %4662 = vmatprep.mubr.bf16.mxu0 %v5782_v28  ;;  %4692 = vmatprep.subr.bf16.mxu1 %v5058_v44  ;;  %v875_v42 = vpack.c.bf16 %v849_v47, %v848_v27  ;;  %v1453_v27 = vld [vmem:[#allocation2 + $0x102] sm:$0xff]  ;;  %v1454_v47 = vld [vmem:[#allocation2 + $0x10a] sm:$0xff] }
 0x139   : > { %4746 = vmatprep.subr.bf16.mxu0 %v5061_v6  ;;  %v5851_v37 = vpack.c.bf16 %v1454_v47, %v1453_v27  ;;  %v5071_v27 = vld [vmem:[%s6873_s1 + $0x1b0] sm:$0xff]   ;;  %v5073_v47 = vld [vmem:[%s6873_s1 + $0x1a8] sm:$0xff]  }
 0x13a   : > { %4747 = vmatpush3.bf16.msra.mxu0 %v5061_v6  ;;  %v5833_v6 = vld [vmem:[%s6873_s1 + $0x178] sm:$0xff]  }
 0x13b   : > { %4693 = vmatpush3.bf16.msra.mxu1 %v5058_v44  ;;  %4748 = vmatprep.subr.bf16.mxu0 %v5063_v2  ;;  %v1444_v44 = vld [vmem:[#allocation2 + $0xba] sm:$0xff] }
 0x13c   : > { %4694 = vmatprep.subr.bf16.mxu1 %v5060_v14  ;;  %v5836_v0 = vpack.c.bf16 %v1444_v44, %v1443_v48  ;;  %v879_v48 = vpack.c.bf16 %v857_v53, %v856_v23  ;;  %v5102_v23 = vld [vmem:[#allocation2 + $0x23] sm:$0xff]  ;;  %v5103_v53 = vld [vmem:[#allocation2 + $0x2b] sm:$0xff] }
 0x13e   : > { %4607 = vmatmul.mubr.bf16.gmra.mxu1 %v871_v26  ;;  %4663 = vmatmul.mubr.bf16.gmra.mxu0 %v5798_v38  ;;  %v1447_v26 = vld [vmem:[#allocation2 + $0xd2] sm:$0xff] }
 0x13f   : > { %4610 = vmatprep.mubr.bf16.mxu1 %v872_v39  ;;  %4666 = vmatprep.mubr.bf16.mxu0 %v5800_v51  ;;  %v1448_v39 = vld [vmem:[#allocation2 + $0xda] sm:$0xff] }
 0x140   : > { %4695 = vmatpush3.bf16.msra.mxu1 %v5060_v14  ;;  %4749 = vmatpush3.bf16.msra.mxu0 %v5063_v2  ;;  %v852_v2 = vld [vmem:[#allocation2 + $0xb0] sm:$0xff]  ;;  %v853_v14 = vld [vmem:[#allocation2 + $0xb8] sm:$0xff]  ;;  %v5843_v40 = vpack.c.bf16 %v1448_v39, %v1447_v26 }
 0x141   : > { %4696 = vmatprep.subr.bf16.mxu1 %v5062_v52  ;;  %4750 = vmatprep.subr.bf16.mxu0 %v5065_v22 }
 0x144   : > { %4697 = vmatpush3.bf16.msra.mxu1 %v5062_v52  ;;  %4751 = vmatpush3.bf16.msra.mxu0 %v5065_v22  ;;  %v854_v52 = vld [vmem:[#allocation2 + $0xc0] sm:$0xff]  ;;  %v877_v22 = vpack.c.bf16 %v853_v14, %v852_v2  ;;  %v863_v2 = vld [vmem:[#allocation2 + $0x108] sm:$0xff]  ;;  %v881_v14 = vpack.c.bf16 %v861_v9, %v860_v50  ;;  %v5070_v9 = vld [vmem:[%s6873_s1 + $0x170] sm:$0xff]  }
 0x145   : > { %4698 = vmatprep.subr.bf16.mxu1 %v5064_v54  ;;  %4752 = vmatprep.subr.bf16.mxu0 %v5067_v34  ;;  %v878_v41 = vpack.c.bf16 %v855_v3, %v854_v52  ;;  %v5100_v52 = vld [vmem:[#allocation2 + $0x13] sm:$0xff]  ;;  %v5101_v3 = vld [vmem:[#allocation2 + $0x1b] sm:$0xff] }
 0x146   : > { %4611 = vmatmul.mubr.bf16.gmra.mxu1 %v873_v16  ;;  %4667 = vmatmul.mubr.bf16.gmra.mxu0 %v5816_v43  ;;  %v858_v16 = vld [vmem:[#allocation2 + $0xe0] sm:$0xff]  ;;  %v2121_v4 = vpack.c.bf16 %v5101_v3, %v5100_v52  ;;  %v5113_v52 = vld [vmem:[#allocation2 + $0x73] sm:$0xff] }
 0x147   : > { %4614 = vmatprep.mubr.bf16.mxu1 %v874_v56  ;;  %4670 = vmatprep.mubr.bf16.mxu0 %v5818_v63  ;;  %v859_v56 = vld [vmem:[#allocation2 + $0xe8] sm:$0xff] }
 0x148   : > { %4699 = vmatpush3.bf16.msra.mxu1 %v5064_v54  ;;  %4753 = vmatpush3.bf16.msra.mxu0 %v5067_v34  ;;  %v1451_v54 = vld [vmem:[#allocation2 + $0xf2] sm:$0xff]  ;;  %v1452_v34 = vld [vmem:[#allocation2 + $0xfa] sm:$0xff]  ;;  %v880_v44 = vpack.c.bf16 %v859_v56, %v858_v16 }
 0x149   : > { %4700 = vmatprep.subr.bf16.mxu1 %v5066_v36  ;;  %4842 = vmatprep.subr.bf16.mxu0 %v5826_v18  ;;  %v5105_v16 = vld [vmem:[#allocation2 + $0x3b] sm:$0xff] }
 0x14c   : > { %4701 = vmatpush3.bf16.msra.mxu1 %v5066_v36  ;;  %v5849_v36 = vpack.c.bf16 %v1452_v34, %v1451_v54  ;;  %v2122_v54 = vpack.c.bf16 %v5103_v53, %v5102_v23  ;;  %v5104_v34 = vld [vmem:[#allocation2 + $0x33] sm:$0xff]  ;;  %v5117_v53 = vld [vmem:[#allocation2 + $0x9b] sm:$0xff] }
 0x14d   : > { %4790 = vmatprep.subr.bf16.mxu1 %v5833_v6  ;;  %v2123_v56 = vpack.c.bf16 %v5105_v16, %v5104_v34  ;;  %v5081_v34 = vld [vmem:[%s6873_s1 + $0x188] sm:$0xff]  }
 0x14e   : > { %4615 = vmatmul.mubr.bf16.gmra.mxu1 %v875_v42  ;;  %4671 = vmatmul.mubr.bf16.gmra.mxu0 %v5836_v0  ;;  %v1456_v42 = vld [vmem:[#allocation2 + $0x11a] sm:$0xff]  ;;  %v5080_v16 = vld [vmem:[%s6873_s1 + $0x148] sm:$0xff]  }
 0x14f   : > { %4618 = vmatprep.mubr.bf16.mxu1 %v876_v35  ;;  %4674 = vmatprep.mubr.bf16.mxu0 %v5838_v1  ;;  %v862_v35 = vld [vmem:[#allocation2 + $0x100] sm:$0xff]  ;;  %v5855_v26 = vpack.c.bf16 %v1456_v42, %v1455_v55  ;;  %v5108_v55 = vld [vmem:[#allocation2 + $0x53] sm:$0xff] }
 0x150   : > { %v882_v39 = vpack.c.bf16 %v863_v2, %v862_v35  ;;  %v5109_v42 = vld [vmem:[#allocation2 + $0x5b] sm:$0xff]  ;;  %v5110_v2 = vld [vmem:[#allocation2 + $0x63] sm:$0xff] }
 0x151   : > { %v2125_v35 = vpack.c.bf16 %v5109_v42, %v5108_v55  ;;  %v5919_v55 = vld [vmem:[%s6873_s1 + $0x1f8] sm:$0xff]   ;;  %v5122_v42 = vld [vmem:[#allocation2 + $0xc3] sm:$0xff] }
 0x156   : > { %4619 = vmatmul.mubr.bf16.gmra.mxu1 %v877_v22  ;;  %4675 = vmatmul.mubr.bf16.gmra.mxu0 %v5843_v40  ;;  %v865_v22 = vld [vmem:[#allocation2 + $0x118] sm:$0xff] }
 0x157   : > { %4622 = vmatprep.mubr.bf16.mxu1 %v878_v41  ;;  %4678 = vmatprep.mubr.bf16.mxu0 %v5845_v62  ;;  %v883_v41 = vpack.c.bf16 %v865_v22, %v864_v21  ;;  %v5076_v21 = vld [vmem:[%s6873_s1 + $0x158] sm:$0xff]   ;;  %v5114_v22 = vld [vmem:[#allocation2 + $0x83] sm:$0xff] }
 0x15e   : > { %4623 = vmatmul.mubr.bf16.gmra.mxu1 %v879_v48  ;;  %4679 = vmatmul.mubr.bf16.gmra.mxu0 %v5849_v36  ;;  %v5106_v48 = vld [vmem:[#allocation2 + $0x43] sm:$0xff] }
 0x15f   : > { %4626 = vmatprep.mubr.bf16.mxu1 %v880_v44  ;;  %4682 = vmatprep.mubr.bf16.mxu0 %v5851_v37  ;;  %v5107_v44 = vld [vmem:[#allocation2 + $0x4b] sm:$0xff] }
 0x160   : > { %v2124_v50 = vpack.c.bf16 %v5107_v44, %v5106_v48  ;;  %v5121_v44 = vld [vmem:[#allocation2 + $0xbb] sm:$0xff] }
 0x166   : > { %4627 = vmatmul.mubr.bf16.gmra.mxu1 %v881_v14  ;;  %4683 = vmatmul.mubr.bf16.gmra.mxu0 %v5855_v26  ;;  %v5111_v14 = vld [vmem:[#allocation2 + $0x6b] sm:$0xff] }
 0x167   : > { %4630 = vmatprep.mubr.bf16.mxu1 %v882_v39  ;;  %4754 = vmatprep.mubr.bf16.mxu0 %v2121_v4  ;;  %v2126_v39 = vpack.c.bf16 %v5111_v14, %v5110_v2  ;;  %v5079_v4 = vld [vmem:[%s6873_s1 + $0x190] sm:$0xff]   ;;  %v5125_v2 = vld [vmem:[#allocation2 + $0xdb] sm:$0xff] }
 0x168   : > { %v5127_v14 = vld [vmem:[#allocation2 + $0xeb] sm:$0xff] }
 0x16e   : > { %4631 = vmatmul.mubr.bf16.gmra.mxu1 %v883_v41  ;;  %4755 = vmatmul.mubr.bf16.vlgmr.msra.gmra.mxu0 %v2122_v54  ;;  %v5115_v41 = vld [vmem:[#allocation2 + $0x8b] sm:$0xff] }
 0x16f   : > { %4702 = vmatprep.mubr.bf16.mxu1 %v5753_v13  ;;  %4843 = vmatpush3.bf16.msra.mxu0 %v5826_v18  ;;  %v5075_v13 = vld [vmem:[%s6873_s1 + $0x1a0] sm:$0xff]   ;;  %v5072_v18 = vld [vmem:[%s6873_s1 + $0x168] sm:$0xff]   ;;  %v2128_v23 = vpack.c.bf16 %v5115_v41, %v5114_v22 }
 0x170   : > { %4758 = vmatprep.mubr.bf16.mxu0 %v2123_v56  ;;  %4844 = vmatprep.subr.bf16.mxu0 %v5071_v27  ;;  %v5083_v56 = vld [vmem:[%s6873_s1 + $0x180] sm:$0xff]   ;;  %v2750_v41 = vld [vmem:[#allocation2 + $0x2c] sm:$0xff] }
 0x173   : > { %4845 = vmatpush3.bf16.msra.mxu0 %v5071_v27  ;;  %v5118_v27 = vld [vmem:[#allocation2 + $0xa3] sm:$0xff] }
 0x174   : > { %4846 = vmatprep.subr.bf16.mxu0 %v5073_v47 }
 0x176   : > { %4703 = vmatmul.mubr.bf16.vlgmr.msra.gmra.mxu1 %v5755_v25  ;;  %4759 = vmatmul.mubr.bf16.gmra.mxu0 %v2124_v50  ;;  %v5112_v25 = vld [vmem:[#allocation2 + $0x7b] sm:$0xff] }
 0x177   : > { %4791 = vmatpush3.bf16.msra.mxu1 %v5833_v6  ;;  %4706 = vmatprep.mubr.bf16.mxu1 %v5765_v61  ;;  %v2127_v3 = vpack.c.bf16 %v5112_v25, %v5113_v52  ;;  %v5074_v61 = vld [vmem:[%s6873_s1 + $0x160] sm:$0xff]   ;;  %v5077_v6 = vld [vmem:[%s6873_s1 + $0x198] sm:$0xff]  }
 0x178   : > { %4792 = vmatprep.subr.bf16.mxu1 %v5070_v9  ;;  %4762 = vmatprep.mubr.bf16.mxu0 %v2125_v35  ;;  %v5123_v35 = vld [vmem:[#allocation2 + $0xcb] sm:$0xff]  ;;  %v5128_v25 = vld [vmem:[#allocation2 + $0xf3] sm:$0xff]  ;;  %v5129_v52 = vld [vmem:[#allocation2 + $0xfb] sm:$0xff] }
 0x179   : > { %4847 = vmatpush3.bf16.msra.mxu0 %v5073_v47  ;;  %v5119_v47 = vld [vmem:[#allocation2 + $0xab] sm:$0xff] }
 0x17a   : > { %4848 = vmatprep.subr.bf16.mxu0 %v5075_v13  ;;  %v2130_v48 = vpack.c.bf16 %v5119_v47, %v5118_v27 }
 0x17b   : > { %4793 = vmatpush3.bf16.msra.mxu1 %v5070_v9  ;;  %v5912_v9 = vld [vmem:[%s6873_s1 + $0x238] sm:$0xff]  }
 0x17c   : > { %4794 = vmatprep.subr.bf16.mxu1 %v5072_v18 }
 0x17d   : > { %4849 = vmatpush3.bf16.msra.mxu0 %v5075_v13  ;;  %v2132_v13 = vpack.c.bf16 %v5123_v35, %v5122_v42  ;;  %v2758_v42 = vld [vmem:[#allocation2 + $0x6c] sm:$0xff] }
 0x17e   : > { %4707 = vmatmul.mubr.bf16.gmra.mxu1 %v5770_v24  ;;  %4763 = vmatmul.mubr.bf16.gmra.mxu0 %v2126_v39  ;;  %v5116_v24 = vld [vmem:[#allocation2 + $0x93] sm:$0xff] }
 0x17f   : > { %4710 = vmatprep.mubr.bf16.mxu1 %v5780_v17  ;;  %4795 = vmatpush3.bf16.msra.mxu1 %v5072_v18  ;;  %v2129_v54 = vpack.c.bf16 %v5117_v53, %v5116_v24  ;;  %v5078_v17 = vld [vmem:[%s6873_s1 + $0x150] sm:$0xff]  }
 0x180   : > { %4766 = vmatprep.mubr.bf16.mxu0 %v2127_v3  ;;  %4796 = vmatprep.subr.bf16.mxu1 %v5074_v61  ;;  %v5124_v18 = vld [vmem:[#allocation2 + $0xd3] sm:$0xff]  ;;  %v2135_v3 = vpack.c.bf16 %v5129_v52, %v5128_v25 }
 0x181   : > { %4850 = vmatprep.subr.bf16.mxu0 %v5077_v6 }
 0x182   : > { %4851 = vmatpush3.bf16.msra.mxu0 %v5077_v6  ;;  %v5131_v6 = vld [vmem:[#allocation2 + $0x10b] sm:$0xff] }
 0x183   : > { %4797 = vmatpush3.bf16.msra.mxu1 %v5074_v61  ;;  %4852 = vmatprep.subr.bf16.mxu0 %v5079_v4  ;;  %v5130_v61 = vld [vmem:[#allocation2 + $0x103] sm:$0xff] }
 0x184   : > { %4798 = vmatprep.subr.bf16.mxu1 %v5076_v21 }
 0x186   : > { %4711 = vmatmul.mubr.bf16.gmra.mxu1 %v5782_v28  ;;  %4767 = vmatmul.mubr.bf16.gmra.mxu0 %v2128_v23  ;;  %v5120_v28 = vld [vmem:[#allocation2 + $0xb3] sm:$0xff]  ;;  %v5134_v23 = vld [vmem:[#allocation2 + $0x123] sm:$0xff] }
 0x187   : > { %4714 = vmatprep.mubr.bf16.mxu1 %v5798_v38  ;;  %4770 = vmatprep.mubr.bf16.mxu0 %v2129_v54  ;;  %v2131_v50 = vpack.c.bf16 %v5121_v44, %v5120_v28  ;;  %v5082_v38 = vld [vmem:[%s6873_s1 + $0x140] sm:$0xff]   ;;  %v1788_v54 = vld [vmem:[#allocation2 + $0x12a] sm:$0xff] }
 0x188   : > { %4799 = vmatpush3.bf16.msra.mxu1 %v5076_v21  ;;  %4853 = vmatpush3.bf16.msra.mxu0 %v5079_v4  ;;  %v2136_v4 = vpack.c.bf16 %v5131_v6, %v5130_v61  ;;  %v5133_v21 = vld [vmem:[#allocation2 + $0x11b] sm:$0xff] }
 0x189   : > { %4800 = vmatprep.subr.bf16.mxu1 %v5078_v17  ;;  %4854 = vmatprep.subr.bf16.mxu0 %v5081_v34  ;;  %v2756_v44 = vld [vmem:[#allocation2 + $0x5c] sm:$0xff] }
 0x18c   : > { %4801 = vmatpush3.bf16.msra.mxu1 %v5078_v17  ;;  %4855 = vmatpush3.bf16.msra.mxu0 %v5081_v34  ;;  %v2751_v17 = vld [vmem:[#allocation2 + $0x34] sm:$0xff] }
 0x18d   : > { %4802 = vmatprep.subr.bf16.mxu1 %v5080_v16  ;;  %4856 = vmatprep.subr.bf16.mxu0 %v5083_v56  ;;  %v2417_v34 = vld [vmem:[#allocation2 + $0x14] sm:$0xff] }
 0x18e   : > { %4715 = vmatmul.mubr.bf16.gmra.mxu1 %v5800_v51  ;;  %4771 = vmatmul.mubr.bf16.gmra.mxu0 %v2130_v48  ;;  %v2133_v51 = vpack.c.bf16 %v5125_v2, %v5124_v18  ;;  %v2759_v2 = vld [vmem:[#allocation2 + $0x74] sm:$0xff] }
 0x18f   : > { %4718 = vmatprep.mubr.bf16.mxu1 %v5816_v43  ;;  %4774 = vmatprep.mubr.bf16.mxu0 %v2131_v50  ;;  %v5126_v43 = vld [vmem:[#allocation2 + $0xe3] sm:$0xff] }
 0x190   : > { %4803 = vmatpush3.bf16.msra.mxu1 %v5080_v16  ;;  %4857 = vmatpush3.bf16.msra.mxu0 %v5083_v56  ;;  %v2134_v39 = vpack.c.bf16 %v5127_v14, %v5126_v43  ;;  %v2418_v16 = vld [vmem:[#allocation2 + $0x1c] sm:$0xff]  ;;  %v2754_v56 = vld [vmem:[#allocation2 + $0x4c] sm:$0xff]  ;;  %v2761_v14 = vld [vmem:[#allocation2 + $0x84] sm:$0xff] }
 0x191   : > { %4804 = vmatprep.subr.bf16.mxu1 %v5082_v38  ;;  %4946 = vmatprep.subr.bf16.mxu0 %v5912_v9  ;;  %v2453_v48 = vpack.c.bf16 %v2418_v16, %v2417_v34  ;;  %v5089_v50 = vld [vmem:[%s6873_s1 + $0x228] sm:$0xff]   ;;  %v5094_v34 = vld [vmem:[%s6873_s1 + $0x1d0] sm:$0xff]  }
 0x192   : > { %v5088_v43 = vld [vmem:[%s6873_s1 + $0x1e8] sm:$0xff]  }
 0x193   : > { %v5097_v16 = vld [vmem:[%s6873_s1 + $0x208] sm:$0xff]  }
 0x194   : > { %4805 = vmatpush3.bf16.msra.mxu1 %v5082_v38  ;;  %v2757_v38 = vld [vmem:[#allocation2 + $0x64] sm:$0xff] }
 0x195   : > { %4894 = vmatprep.subr.bf16.mxu1 %v5919_v55  ;;  %v2789_v18 = vpack.c.bf16 %v2758_v42, %v2757_v38 }
 0x196   : > { %4719 = vmatmul.mubr.bf16.gmra.mxu1 %v5818_v63  ;;  %4775 = vmatmul.mubr.bf16.gmra.mxu0 %v2132_v13  ;;  %v5132_v63 = vld [vmem:[#allocation2 + $0x113] sm:$0xff] }
 0x197   : > { %4722 = vmatprep.mubr.bf16.mxu1 %v5836_v0  ;;  %4778 = vmatprep.mubr.bf16.mxu0 %v2133_v51  ;;  %v2137_v22 = vpack.c.bf16 %v5133_v21, %v5132_v63  ;;  %v2749_v0 = vld [vmem:[#allocation2 + $0x24] sm:$0xff]  ;;  %v5086_v13 = vld [vmem:[%s6873_s1 + $0x1f0] sm:$0xff]   ;;  %v2760_v51 = vld [vmem:[#allocation2 + $0x7c] sm:$0xff] }
 0x198   : > { %v2785_v53 = vpack.c.bf16 %v2750_v41, %v2749_v0  ;;  %v2790_v25 = vpack.c.bf16 %v2760_v51, %v2759_v2  ;;  %v2764_v63 = vld [vmem:[#allocation2 + $0x9c] sm:$0xff]  ;;  %v5095_v21 = vld [vmem:[%s6873_s1 + $0x210] sm:$0xff]   ;;  %v2765_v41 = vld [vmem:[#allocation2 + $0xa4] sm:$0xff] }
 0x199   : > { %v5098_v2 = vld [vmem:[%s6873_s1 + $0x1c0] sm:$0xff]  }
 0x19e   : > { %4723 = vmatmul.mubr.bf16.gmra.mxu1 %v5838_v1  ;;  %4779 = vmatmul.mubr.bf16.gmra.mxu0 %v2134_v39  ;;  %v5135_v1 = vld [vmem:[#allocation2 + $0x12b] sm:$0xff] }
 0x19f   : > { %4726 = vmatprep.mubr.bf16.mxu1 %v5843_v40  ;;  %4782 = vmatprep.mubr.bf16.mxu0 %v2135_v3  ;;  %v2138_v24 = vpack.c.bf16 %v5135_v1, %v5134_v23  ;;  %v1787_v40 = vld [vmem:[#allocation2 + $0x122] sm:$0xff]  ;;  %v2762_v39 = vld [vmem:[#allocation2 + $0x8c] sm:$0xff]  ;;  %v5093_v3 = vld [vmem:[%s6873_s1 + $0x218] sm:$0xff]  }
 0x1a0   : > { %v1806_v27 = vpack.c.bf16 %v1788_v54, %v1787_v40  ;;  %v2791_v52 = vpack.c.bf16 %v2762_v39, %v2761_v14  ;;  %v2766_v23 = vld [vmem:[#allocation2 + $0xac] sm:$0xff]  ;;  %v5092_v1 = vld [vmem:[%s6873_s1 + $0x1d8] sm:$0xff]  }
 0x1a1   : > { %v2793_v54 = vpack.c.bf16 %v2766_v23, %v2765_v41  ;;  %v2771_v14 = vld [vmem:[#allocation2 + $0xd4] sm:$0xff]  ;;  %v2772_v39 = vld [vmem:[#allocation2 + $0xdc] sm:$0xff] }
 0x1a6   : > { %4727 = vmatmul.mubr.bf16.gmra.mxu1 %v5845_v62  ;;  %4783 = vmatmul.mubr.bf16.gmra.mxu0 %v2136_v4  ;;  %v2752_v62 = vld [vmem:[#allocation2 + $0x3c] sm:$0xff]  ;;  %v2763_v4 = vld [vmem:[#allocation2 + $0x94] sm:$0xff] }
 0x1a7   : > { %4730 = vmatprep.mubr.bf16.mxu1 %v5849_v36  ;;  %4786 = vmatprep.mubr.bf16.mxu0 %v2137_v22  ;;  %v2753_v36 = vld [vmem:[#allocation2 + $0x44] sm:$0xff]  ;;  %v2786_v47 = vpack.c.bf16 %v2752_v62, %v2751_v17  ;;  %v2792_v40 = vpack.c.bf16 %v2764_v63, %v2763_v4  ;;  %v2774_v4 = vld [vmem:[#allocation2 + $0xec] sm:$0xff] }
 0x1a8   : > { %v2787_v28 = vpack.c.bf16 %v2754_v56, %v2753_v36 }
 0x1ae   : > { %4731 = vmatmul.mubr.bf16.gmra.mxu1 %v5851_v37  ;;  %4787 = vmatmul.mubr.bf16.gmra.mxu0 %v2138_v24  ;;  %v5087_v37 = vld [vmem:[%s6873_s1 + $0x230] sm:$0xff]  }
 0x1af   : > { %4734 = vmatprep.mubr.bf16.mxu1 %v5855_v26  ;;  %4858 = vmatprep.mubr.bf16.mxu0 %v2785_v53  ;;  %v2755_v26 = vld [vmem:[#allocation2 + $0x54] sm:$0xff] }
 0x1b0   : > { %v2788_v35 = vpack.c.bf16 %v2756_v44, %v2755_v26  ;;  %v2770_v26 = vld [vmem:[#allocation2 + $0xcc] sm:$0xff] }
 0x1b1   : > { %v5096_v44 = vld [vmem:[%s6873_s1 + $0x1c8] sm:$0xff]  }
 0x1b6   : > { %4735 = vmatmul.mubr.bf16.gmra.mxu1 %v1806_v27  ;;  %4859 = vmatmul.mubr.bf16.vlgmr.msra.gmra.mxu0 %v2786_v47  ;;  %v2767_v27 = vld [vmem:[#allocation2 + $0xb4] sm:$0xff] }
 0x1b7   : > { %4806 = vmatprep.mubr.bf16.mxu1 %v2453_v48  ;;  %4947 = vmatpush3.bf16.msra.mxu0 %v5912_v9  ;;  %v5091_v9 = vld [vmem:[%s6873_s1 + $0x220] sm:$0xff]  }
 0x1b8   : > { %4862 = vmatprep.mubr.bf16.mxu0 %v2787_v28  ;;  %4948 = vmatprep.subr.bf16.mxu0 %v5087_v37 }
 0x1bb   : > { %4949 = vmatpush3.bf16.msra.mxu0 %v5087_v37  ;;  %v2769_v37 = vld [vmem:[#allocation2 + $0xc4] sm:$0xff] }
 0x1bc   : > { %4950 = vmatprep.subr.bf16.mxu0 %v5089_v50 }
 0x1be   : > { %4807 = vmatmul.mubr.bf16.vlgmr.msra.gmra.mxu1 %v2785_v53  ;;  %4863 = vmatmul.mubr.bf16.gmra.mxu0 %v2788_v35 }
 0x1bf   : > { %4895 = vmatpush3.bf16.msra.mxu1 %v5919_v55  ;;  %4810 = vmatprep.mubr.bf16.mxu1 %v2786_v47  ;;  %v5090_v55 = vld [vmem:[%s6873_s1 + $0x1e0] sm:$0xff]  }
 0x1c0   : > { %4896 = vmatprep.subr.bf16.mxu1 %v5086_v13  ;;  %4866 = vmatprep.mubr.bf16.mxu0 %v2789_v18  ;;  %v2768_v47 = vld [vmem:[#allocation2 + $0xbc] sm:$0xff] }
 0x1c1   : > { %4951 = vmatpush3.bf16.msra.mxu0 %v5089_v50  ;;  %v5099_v50 = vld [vmem:[%s6873_s1 + $0x200] sm:$0xff]  }
 0x1c2   : > { %4952 = vmatprep.subr.bf16.mxu0 %v5091_v9 }
 0x1c3   : > { %4897 = vmatpush3.bf16.msra.mxu1 %v5086_v13  ;;  %v2795_v13 = vpack.c.bf16 %v2770_v26, %v2769_v37  ;;  %v2777_v26 = vld [vmem:[#allocation2 + $0x104] sm:$0xff] }
 0x1c4   : > { %4898 = vmatprep.subr.bf16.mxu1 %v5088_v43 }
 0x1c5   : > { %4953 = vmatpush3.bf16.msra.mxu0 %v5091_v9 }
 0x1c6   : > { %v5954_v61 = vpop.f32.mrf.mxu1  ;;  %4811 = vmatmul.mubr.bf16.gmra.mxu1 %v2787_v28  ;;  %v5956_v6 = vpop.f32.mrf.mxu0  ;;  %4867 = vmatmul.mubr.bf16.gmra.mxu0 %v2790_v25 }
 0x1c7   : > { %4814 = vmatprep.mubr.bf16.mxu1 %v2788_v35  ;;  %4899 = vmatpush3.bf16.msra.mxu1 %v5088_v43  ;;  %v2794_v35 = vpack.c.bf16 %v2768_v47, %v2767_v27  ;;  %v2776_v27 = vld [vmem:[#allocation2 + $0xfc] sm:$0xff] }
 0x1c8   : > { %v5961_v22 = vpop.f32.mrf.mxu1  ;;  %v5963_v0 = vpop.f32.mrf.mxu0  ;;  %4870 = vmatprep.mubr.bf16.mxu0 %v2791_v52  ;;  %4900 = vmatprep.subr.bf16.mxu1 %v5090_v55 }
 0x1c9   : > { %4954 = vmatprep.subr.bf16.mxu0 %v5093_v3 }
 0x1ca   : > { %v5968_v24 = vpop.f32.mrf.mxu1  ;;  %v5970_v53 = vpop.f32.mrf.mxu0  ;;  %4955 = vmatpush3.bf16.msra.mxu0 %v5093_v3  ;;  %v2773_v3 = vld [vmem:[#allocation2 + $0xe4] sm:$0xff] }
 0x1cb   : > { %4901 = vmatpush3.bf16.msra.mxu1 %v5090_v55  ;;  %4956 = vmatprep.subr.bf16.mxu0 %v5095_v21  ;;  %v2797_v41 = vpack.c.bf16 %v2774_v4, %v2773_v3 }
 0x1cc   : > { %v5972_v17 = vpop.f32.mrf.mxu1  ;;  %v5974_v62 = vpop.f32.mrf.mxu0  ;;  %4902 = vmatprep.subr.bf16.mxu1 %v5092_v1 }
 0x1ce   : > { %v5982_v36 = vpop.f32.mrf.mxu1  ;;  %4815 = vmatmul.mubr.bf16.gmra.mxu1 %v2789_v18  ;;  %v5984_v56 = vpop.f32.mrf.mxu0  ;;  %4871 = vmatmul.mubr.bf16.gmra.mxu0 %v2792_v40 }
 0x1cf   : > { %4818 = vmatprep.mubr.bf16.mxu1 %v2790_v25  ;;  %4874 = vmatprep.mubr.bf16.mxu0 %v2793_v54 }
 0x1d0   : > { %v5986_v48 = vpop.f32.mrf.mxu1  ;;  %v5988_v28 = vpop.f32.mrf.mxu0  ;;  %4903 = vmatpush3.bf16.msra.mxu1 %v5092_v1  ;;  %4957 = vmatpush3.bf16.msra.mxu0 %v5095_v21 }
 0x1d1   : > { %4904 = vmatprep.subr.bf16.mxu1 %v5094_v34  ;;  %4958 = vmatprep.subr.bf16.mxu0 %v5097_v16 }
 0x1d2   : > { %v5996_v38 = vpop.f32.mrf.mxu1  ;;  %v5998_v42 = vpop.f32.mrf.mxu0 }
 0x1d4   : > { %v6000_v18 = vpop.f32.mrf.mxu1  ;;  %v6002_v9 = vpop.f32.mrf.mxu0  ;;  %4905 = vmatpush3.bf16.msra.mxu1 %v5094_v34  ;;  %4959 = vmatpush3.bf16.msra.mxu0 %v5097_v16  ;;  %v2775_v16 = vld [vmem:[#allocation2 + $0xf4] sm:$0xff] }
 0x1d5   : > { %4906 = vmatprep.subr.bf16.mxu1 %v5096_v44  ;;  %4960 = vmatprep.subr.bf16.mxu0 %v5099_v50 }
 0x1d6   : > { %v6007_v51 = vpop.f32.mrf.mxu1  ;;  %4819 = vmatmul.mubr.bf16.gmra.mxu1 %v2791_v52  ;;  %v6009_v43 = vpop.f32.mrf.mxu0  ;;  %4875 = vmatmul.mubr.bf16.gmra.mxu0 %v2794_v35  ;;  %v2796_v52 = vpack.c.bf16 %v2772_v39, %v2771_v14 }
 0x1d7   : > { %4822 = vmatprep.mubr.bf16.mxu1 %v2792_v40  ;;  %4878 = vmatprep.mubr.bf16.mxu0 %v2795_v13 }
 0x1d8   : > { %v6011_v25 = vpop.f32.mrf.mxu1  ;;  %v6013_v55 = vpop.f32.mrf.mxu0  ;;  %4907 = vmatpush3.bf16.msra.mxu1 %v5096_v44  ;;  %4961 = vmatpush3.bf16.msra.mxu0 %v5099_v50  ;;  %v2778_v44 = vld [vmem:[#allocation2 + $0x10c] sm:$0xff] }
 0x1d9   : > { %4908 = vmatprep.subr.bf16.mxu1 %v5098_v2  ;;  %v2799_v39 = vpack.c.bf16 %v2778_v44, %v2777_v26  ;;  %v2800_v26 = vpack.c.bf16 %v2780_v5, %v2779_v10  ;;  %v2801_v44 = vpack.c.bf16 %v2782_v15, %v2781_v33 }
 0x1da   : > { %v6015_v63 = vpop.f32.mrf.mxu1  ;;  %v6017_v21 = vpop.f32.mrf.mxu0 }
 0x1dc   : > { %v6019_v23 = vpop.f32.mrf.mxu1  ;;  %v6021_v1 = vpop.f32.mrf.mxu0  ;;  %4909 = vmatpush3.bf16.msra.mxu1 %v5098_v2  ;;  %v2798_v2 = vpack.c.bf16 %v2776_v27, %v2775_v16 }
 0x1de   : > { %v6023_v40 = vpop.f32.mrf.mxu1  ;;  %4823 = vmatmul.mubr.bf16.gmra.mxu1 %v2793_v54  ;;  %v6025_v34 = vpop.f32.mrf.mxu0  ;;  %4879 = vmatmul.mubr.bf16.gmra.mxu0 %v2796_v52 }
 0x1df   : > { %4826 = vmatprep.mubr.bf16.mxu1 %v2794_v35  ;;  %4882 = vmatprep.mubr.bf16.mxu0 %v2797_v41 }
 0x1e0   : > { %v6027_v47 = vpop.f32.mrf.mxu1  ;;  %v6029_v37 = vpop.f32.mrf.mxu0 }
 0x1e2   : > { %v6031_v50 = vpop.f32.mrf.mxu1  ;;  %v6033_v14 = vpop.f32.mrf.mxu0 }
 0x1e4   : > { %v6035_v54 = vpop.f32.mrf.mxu1  ;;  %v6037_v3 = vpop.f32.mrf.mxu0 }
 0x1e6   : > { %v6039_v35 = vpop.f32.mrf.mxu1  ;;  %4827 = vmatmul.mubr.bf16.gmra.mxu1 %v2795_v13  ;;  %v4652_v4 = vpop.f32.mrf.mxu0  ;;  %4883 = vmatmul.mubr.bf16.gmra.mxu0 %v2798_v2 }
 0x1e7   : > { %4830 = vmatprep.mubr.bf16.mxu1 %v2796_v52  ;;  %4886 = vmatprep.mubr.bf16.mxu0 %v2799_v39 }
 0x1e8   : > { %v6041_v29 = vpop.f32.mrf.mxu1  ;;  %v1574_v49 = vpop.f32.mrf.mxu0 }
 0x1ea   : > { %v6043_v16 = vpop.f32.mrf.mxu1  ;;  %v4653_v27 = vpop.f32.mrf.mxu0 }
 0x1ec   : > { %v6045_v30 = vpop.f32.mrf.mxu1  ;;  %v1577_v11 = vpop.f32.mrf.mxu0 }
 0x1ee   : > { %v4600_v13 = vpop.f32.mrf.mxu1  ;;  %4831 = vmatmul.mubr.bf16.gmra.mxu1 %v2797_v41  ;;  %v4656_v12 = vpop.f32.mrf.mxu0  ;;  %4887 = vmatmul.mubr.bf16.gmra.mxu0 %v2800_v26 }
 0x1ef   : > { %v1287_v52 = vadd.f32 %v4600_v13, %v5956_v6  ;;  %4834 = vmatprep.mubr.bf16.mxu1 %v2798_v2  ;;  %4890 = vmatprep.mubr.bf16.mxu0 %v2801_v44 }
 0x1f0   : > { %v1278_v45 = vpop.f32.mrf.mxu1  ;;  %v1590_v46 = vpop.f32.mrf.mxu0 }
 0x1f1   : > { %v1279_v10 = vadd.f32 %v1278_v45, %v5963_v0  ;;  %v6049_v33 = vadd.f32 %v4652_v4, %v1287_v52  ;;  %v3081_v0 = vld [vmem:[#allocation2 + $0x25] sm:$0xff] }
 0x1f2   : > { %v4601_v15 = vpop.f32.mrf.mxu1  ;;  %v4657_v5 = vpop.f32.mrf.mxu0  ;;  %v3417_v4 = vld [vmem:[#allocation2 + $0x46] sm:$0xff] }
 0x1f3   : > { %v1290_v41 = vadd.f32 %v4601_v15, %v5970_v53  ;;  %v6052_v7 = vadd.f32 %v1574_v49, %v1279_v10  ;;  %v3082_v53 = vld [vmem:[#allocation2 + $0x2d] sm:$0xff]  ;;  %v3450_v10 = vpack.c.bf16 %v3416_v58, %v3415_v57  ;;  %v3420_v58 = vld [vmem:[#allocation2 + $0x5e] sm:$0xff] }
 0x1f4   : > { %v1281_v6 = vpop.f32.mrf.mxu1  ;;  %v1593_v2 = vpop.f32.mrf.mxu0 }
 0x1f5   : > { %v1282_v13 = vadd.f32 %v1281_v6, %v5974_v62  ;;  %v6055_v59 = vadd.f32 %v4653_v27, %v1290_v41  ;;  %v3418_v62 = vld [vmem:[#allocation2 + $0x4e] sm:$0xff] }
 0x1f6   : > { %v4604_v8 = vpop.f32.mrf.mxu1  ;;  %4835 = vmatmul.mubr.bf16.gmra.mxu1 %v2799_v39  ;;  %v4660_v60 = vpop.f32.mrf.mxu0  ;;  %4891 = vmatmul.mubr.bf16.gmra.mxu0 %v2802_v19 }
 0x1f7   : > { %v1303_v45 = vadd.f32 %v4604_v8, %v5984_v56  ;;  %4838 = vmatprep.mubr.bf16.mxu1 %v2800_v26  ;;  %4962 = vmatprep.mubr.bf16.mxu0 %v3449_v20  ;;  %v6058_v31 = vadd.f32 %v1577_v11, %v1282_v13  ;;  %v3117_v20 = vpack.c.bf16 %v3082_v53, %v3081_v0 }
 0x1f8   : > { %v1294_v32 = vpop.f32.mrf.mxu1  ;;  %v1606_v49 = vpop.f32.mrf.mxu0  ;;  %v3451_v56 = vpack.c.bf16 %v3418_v62, %v3417_v4  ;;  %v3422_v4 = vld [vmem:[#allocation2 + $0x6e] sm:$0xff] }
 0x1f9   : > { %v1295_v27 = vadd.f32 %v1294_v32, %v5988_v28  ;;  %v6061_v52 = vadd.f32 %v4656_v12, %v1303_v45  ;;  %v3083_v12 = vld [vmem:[#allocation2 + $0x35] sm:$0xff]  ;;  %v3084_v45 = vld [vmem:[#allocation2 + $0x3d] sm:$0xff] }
 0x1fa   : > { %v4605_v39 = vpop.f32.mrf.mxu1  ;;  %v4661_v19 = vpop.f32.mrf.mxu0 }
 0x1fb   : > { %v1306_v8 = vadd.f32 %v4605_v39, %v5998_v42  ;;  %v6064_v26 = vadd.f32 %v1590_v46, %v1295_v27  ;;  %v3419_v42 = vld [vmem:[#allocation2 + $0x56] sm:$0xff]  ;;  %v3085_v46 = vld [vmem:[#allocation2 + $0x45] sm:$0xff]  ;;  %v3118_v39 = vpack.c.bf16 %v3084_v45, %v3083_v12 }
 0x1fc   : > { %v1297_v11 = vpop.f32.mrf.mxu1  ;;  %v1609_v15 = vpop.f32.mrf.mxu0  ;;  %v3088_v12 = vld [vmem:[#allocation2 + $0x5d] sm:$0xff] }
 0x1fd   : > { %v1298_v41 = vadd.f32 %v1297_v11, %v6002_v9  ;;  %v6067_v6 = vadd.f32 %v4657_v5, %v1306_v8  ;;  %v3086_v9 = vld [vmem:[#allocation2 + $0x4d] sm:$0xff] }
 0x1fe   : > { %v4608_v13 = vpop.f32.mrf.mxu1  ;;  %4839 = vmatmul.mubr.bf16.gmra.mxu1 %v2801_v44  ;;  %v4664_v28 = vpop.f32.mrf.mxu0  ;;  %4963 = vmatmul.mubr.bf16.vlgmr.msra.gmra.mxu0 %v3450_v10  ;;  %v3421_v5 = vld [vmem:[#allocation2 + $0x66] sm:$0xff] }
 0x1ff   : > { %6974 = vst [vmem:[#allocation39_spill] sm:$0xff] %v6067_v6  ;;  %v1319_v57 = vadd.f32 %v4608_v13, %v6009_v43  ;;  %4910 = vmatprep.mubr.bf16.mxu1 %v3117_v20  ;;  %4966 = vmatprep.mubr.bf16.mxu0 %v3451_v56  ;;  %v6070_v0 = vadd.f32 %v1593_v2, %v1298_v41 }
 0x200   : > { %v1310_v32 = vpop.f32.mrf.mxu1  ;;  %v1622_v53 = vpop.f32.mrf.mxu0  ;;  %v3452_v43 = vpack.c.bf16 %v3420_v58, %v3419_v42  ;;  %v3119_v20 = vpack.c.bf16 %v3086_v9, %v3085_v46  ;;  %v3453_v56 = vpack.c.bf16 %v3422_v4, %v3421_v5 }
 0x201   : > { %6975 = vst [vmem:[#allocation40_spill] sm:$0xff] %v6070_v0  ;;  %v1311_v44 = vadd.f32 %v1310_v32, %v6013_v55  ;;  %v6073_v62 = vadd.f32 %v4660_v60, %v1319_v57  ;;  %v3087_v55 = vld [vmem:[#allocation2 + $0x55] sm:$0xff]  ;;  %v3424_v57 = vld [vmem:[#allocation2 + $0x7e] sm:$0xff] }
 0x202   : > { %v4609_v27 = vpop.f32.mrf.mxu1  ;;  %v4665_v10 = vpop.f32.mrf.mxu0  ;;  %v3426_v32 = vld [vmem:[#allocation2 + $0x8e] sm:$0xff] }
 0x203   : > { %v1322_v8 = vadd.f32 %v4609_v27, %v6017_v21  ;;  %v6076_v11 = vadd.f32 %v1606_v49, %v1311_v44  ;;  %v3423_v21 = vld [vmem:[#allocation2 + $0x76] sm:$0xff]  ;;  %v3089_v49 = vld [vmem:[#allocation2 + $0x65] sm:$0xff]  ;;  %v3120_v44 = vpack.c.bf16 %v3088_v12, %v3087_v55 }
 0x204   : > { %v1313_v2 = vpop.f32.mrf.mxu1  ;;  %v1625_v41 = vpop.f32.mrf.mxu0  ;;  %v3092_v55 = vld [vmem:[#allocation2 + $0x7d] sm:$0xff] }
 0x205   : > { %v1314_v13 = vadd.f32 %v1313_v2, %v6021_v1  ;;  %v6079_v0 = vadd.f32 %v4661_v19, %v1322_v8  ;;  %v3090_v1 = vld [vmem:[#allocation2 + $0x6d] sm:$0xff] }
 0x206   : > { %v4612_v6 = vpop.f32.mrf.mxu1  ;;  %4911 = vmatmul.mubr.bf16.vlgmr.msra.gmra.mxu1 %v3118_v39  ;;  %v4668_v60 = vpop.f32.mrf.mxu0  ;;  %4967 = vmatmul.mubr.bf16.gmra.mxu0 %v3452_v43  ;;  %v3425_v19 = vld [vmem:[#allocation2 + $0x86] sm:$0xff]  ;;  %v3121_v39 = vpack.c.bf16 %v3090_v1, %v3089_v49 }
 0x207   : > { %v1335_v45 = vadd.f32 %v4612_v6, %v6025_v34  ;;  %4914 = vmatprep.mubr.bf16.mxu1 %v3119_v20  ;;  %4970 = vmatprep.mubr.bf16.mxu0 %v3453_v56  ;;  %v6082_v42 = vadd.f32 %v1609_v15, %v1314_v13  ;;  %v3454_v34 = vpack.c.bf16 %v3424_v57, %v3423_v21 }
 0x208   : > { %v1326_v58 = vpop.f32.mrf.mxu1  ;;  %v1638_v46 = vpop.f32.mrf.mxu0  ;;  %v3455_v43 = vpack.c.bf16 %v3426_v32, %v3425_v19 }
 0x209   : > { %v1327_v9 = vadd.f32 %v1326_v58, %v6029_v37  ;;  %v6085_v5 = vadd.f32 %v4664_v28, %v1335_v45  ;;  %v3091_v28 = vld [vmem:[#allocation2 + $0x75] sm:$0xff]  ;;  %v3428_v45 = vld [vmem:[#allocation2 + $0x9e] sm:$0xff] }
 0x20a   : > { %v4613_v4 = vpop.f32.mrf.mxu1  ;;  %v4669_v27 = vpop.f32.mrf.mxu0  ;;  %v3430_v58 = vld [vmem:[#allocation2 + $0xae] sm:$0xff] }
 0x20b   : > { %v1338_v6 = vadd.f32 %v4613_v4, %v6033_v14  ;;  %v6088_v8 = vadd.f32 %v1622_v53, %v1327_v9  ;;  %v3427_v14 = vld [vmem:[#allocation2 + $0x96] sm:$0xff]  ;;  %v3093_v53 = vld [vmem:[#allocation2 + $0x85] sm:$0xff]  ;;  %v3122_v9 = vpack.c.bf16 %v3092_v55, %v3091_v28 }
 0x20c   : > { %v1329_v15 = vpop.f32.mrf.mxu1  ;;  %v1641_v20 = vpop.f32.mrf.mxu0  ;;  %v3096_v28 = vld [vmem:[#allocation2 + $0x9d] sm:$0xff] }
 0x20d   : > { %v1330_v56 = vadd.f32 %v1329_v15, %v6037_v3  ;;  %v6091_v2 = vadd.f32 %v4665_v10, %v1338_v6  ;;  %v3094_v3 = vld [vmem:[#allocation2 + $0x8d] sm:$0xff] }
 0x20e   : > { %v4616_v13 = vpop.f32.mrf.mxu1  ;;  %4915 = vmatmul.mubr.bf16.gmra.mxu1 %v3120_v44  ;;  %v4672_v37 = vpop.f32.mrf.mxu0  ;;  %4971 = vmatmul.mubr.bf16.gmra.mxu0 %v3454_v34  ;;  %v3429_v10 = vld [vmem:[#allocation2 + $0xa6] sm:$0xff]  ;;  %v3123_v34 = vpack.c.bf16 %v3094_v3, %v3093_v53 }
 0x20f   : > { %v1351_v12 = vadd.f32 %v4616_v13, %v5954_v61  ;;  %4918 = vmatprep.mubr.bf16.mxu1 %v3121_v39  ;;  %4974 = vmatprep.mubr.bf16.mxu0 %v3455_v43  ;;  %v6094_v21 = vadd.f32 %v1625_v41, %v1330_v56  ;;  %v3456_v61 = vpack.c.bf16 %v3428_v45, %v3427_v14 }
 0x210   : > { %v1342_v57 = vpop.f32.mrf.mxu1  ;;  %v1654_v49 = vpop.f32.mrf.mxu0  ;;  %v3457_v6 = vpack.c.bf16 %v3430_v58, %v3429_v10 }
 0x211   : > { %v1343_v1 = vadd.f32 %v1342_v57, %v5961_v22  ;;  %v6097_v19 = vadd.f32 %v4668_v60, %v1351_v12  ;;  %v3095_v60 = vld [vmem:[#allocation2 + $0x95] sm:$0xff]  ;;  %v3432_v12 = vld [vmem:[#allocation2 + $0xbe] sm:$0xff] }
 0x212   : > { %v4617_v32 = vpop.f32.mrf.mxu1  ;;  %v4673_v4 = vpop.f32.mrf.mxu0  ;;  %v3434_v57 = vld [vmem:[#allocation2 + $0xce] sm:$0xff] }
 0x213   : > { %v1354_v44 = vadd.f32 %v4617_v32, %v5968_v24  ;;  %v6100_v39 = vadd.f32 %v1638_v46, %v1343_v1  ;;  %v3431_v24 = vld [vmem:[#allocation2 + $0xb6] sm:$0xff]  ;;  %v3097_v46 = vld [vmem:[#allocation2 + $0xa5] sm:$0xff]  ;;  %v3124_v1 = vpack.c.bf16 %v3096_v28, %v3095_v60 }
 0x214   : > { %v1345_v41 = vpop.f32.mrf.mxu1  ;;  %v1657_v43 = vpop.f32.mrf.mxu0  ;;  %v3100_v60 = vld [vmem:[#allocation2 + $0xbd] sm:$0xff] }
 0x215   : > { %v1346_v15 = vadd.f32 %v1345_v41, %v5972_v17  ;;  %v6103_v56 = vadd.f32 %v4669_v27, %v1354_v44  ;;  %v3098_v17 = vld [vmem:[#allocation2 + $0xad] sm:$0xff] }
 0x216   : > { %v4620_v13 = vpop.f32.mrf.mxu1  ;;  %4919 = vmatmul.mubr.bf16.gmra.mxu1 %v3122_v9  ;;  %v4676_v22 = vpop.f32.mrf.mxu0  ;;  %4975 = vmatmul.mubr.bf16.gmra.mxu0 %v3456_v61  ;;  %v3433_v27 = vld [vmem:[#allocation2 + $0xc6] sm:$0xff]  ;;  %v3125_v61 = vpack.c.bf16 %v3098_v17, %v3097_v46 }
 0x217   : > { %v1367_v55 = vadd.f32 %v4620_v13, %v5982_v36  ;;  %4922 = vmatprep.mubr.bf16.mxu1 %v3123_v34  ;;  %4978 = vmatprep.mubr.bf16.mxu0 %v3457_v6  ;;  %v6106_v14 = vadd.f32 %v1641_v20, %v1346_v15  ;;  %v3458_v36 = vpack.c.bf16 %v3432_v12, %v3431_v24 }
 0x218   : > { %v1358_v45 = vpop.f32.mrf.mxu1  ;;  %v1670_v53 = vpop.f32.mrf.mxu0  ;;  %v3459_v44 = vpack.c.bf16 %v3434_v57, %v3433_v27 }
 0x219   : > { %v1359_v3 = vadd.f32 %v1358_v45, %v5986_v48  ;;  %v6109_v10 = vadd.f32 %v4672_v37, %v1367_v55  ;;  %v3099_v37 = vld [vmem:[#allocation2 + $0xb5] sm:$0xff]  ;;  %v3436_v55 = vld [vmem:[#allocation2 + $0xde] sm:$0xff] }
 0x21a   : > { %v4621_v58 = vpop.f32.mrf.mxu1  ;;  %v4677_v32 = vpop.f32.mrf.mxu0  ;;  %v3438_v45 = vld [vmem:[#allocation2 + $0xee] sm:$0xff] }
 0x21b   : > { %v1370_v9 = vadd.f32 %v4621_v58, %v5996_v38  ;;  %v6112_v34 = vadd.f32 %v1654_v49, %v1359_v3  ;;  %v3435_v38 = vld [vmem:[#allocation2 + $0xd6] sm:$0xff]  ;;  %v3101_v49 = vld [vmem:[#allocation2 + $0xc5] sm:$0xff]  ;;  %v3126_v3 = vpack.c.bf16 %v3100_v60, %v3099_v37 }
 0x21c   : > { %v1361_v20 = vpop.f32.mrf.mxu1  ;;  %v1673_v6 = vpop.f32.mrf.mxu0  ;;  %v3104_v37 = vld [vmem:[#allocation2 + $0xdd] sm:$0xff] }
 0x21d   : > { %v1362_v41 = vadd.f32 %v1361_v20, %v6000_v18  ;;  %v6115_v15 = vadd.f32 %v4673_v4, %v1370_v9  ;;  %v3102_v18 = vld [vmem:[#allocation2 + $0xcd] sm:$0xff] }
 0x21e   : > { %v4624_v13 = vpop.f32.mrf.mxu1  ;;  %4923 = vmatmul.mubr.bf16.gmra.mxu1 %v3124_v1  ;;  %v4680_v48 = vpop.f32.mrf.mxu0  ;;  %4979 = vmatmul.mubr.bf16.gmra.mxu0 %v3458_v36  ;;  %v3437_v4 = vld [vmem:[#allocation2 + $0xe6] sm:$0xff]  ;;  %v3127_v36 = vpack.c.bf16 %v3102_v18, %v3101_v49 }
 0x21f   : > { %v1383_v28 = vadd.f32 %v4624_v13, %v6007_v51  ;;  %4926 = vmatprep.mubr.bf16.mxu1 %v3125_v61  ;;  %4982 = vmatprep.mubr.bf16.mxu0 %v3459_v44  ;;  %v6118_v24 = vadd.f32 %v1657_v43, %v1362_v41  ;;  %v3460_v51 = vpack.c.bf16 %v3436_v55, %v3435_v38 }
 0x220   : > { %v1374_v12 = vpop.f32.mrf.mxu1  ;;  %v1686_v46 = vpop.f32.mrf.mxu0  ;;  %v3461_v9 = vpack.c.bf16 %v3438_v45, %v3437_v4 }
 0x221   : > { %v1375_v17 = vadd.f32 %v1374_v12, %v6011_v25  ;;  %v6121_v27 = vadd.f32 %v4676_v22, %v1383_v28  ;;  %v3103_v22 = vld [vmem:[#allocation2 + $0xd5] sm:$0xff]  ;;  %v3440_v28 = vld [vmem:[#allocation2 + $0xfe] sm:$0xff] }
 0x222   : > { %v4625_v57 = vpop.f32.mrf.mxu1  ;;  %v4681_v58 = vpop.f32.mrf.mxu0  ;;  %v3442_v12 = vld [vmem:[#allocation2 + $0x10e] sm:$0xff] }
 0x223   : > { %v1386_v1 = vadd.f32 %v4625_v57, %v6015_v63  ;;  %v6124_v61 = vadd.f32 %v1670_v53, %v1375_v17  ;;  %v3439_v63 = vld [vmem:[#allocation2 + $0xf6] sm:$0xff]  ;;  %v3105_v53 = vld [vmem:[#allocation2 + $0xe5] sm:$0xff]  ;;  %v3128_v17 = vpack.c.bf16 %v3104_v37, %v3103_v22 }
 0x224   : > { %v1377_v43 = vpop.f32.mrf.mxu1  ;;  %v1689_v44 = vpop.f32.mrf.mxu0  ;;  %v3108_v22 = vld [vmem:[#allocation2 + $0xfd] sm:$0xff] }
 0x225   : > { %v1378_v20 = vadd.f32 %v1377_v43, %v6019_v23  ;;  %v6127_v41 = vadd.f32 %v4677_v32, %v1386_v1  ;;  %v3106_v23 = vld [vmem:[#allocation2 + $0xed] sm:$0xff] }
 0x226   : > { %v4628_v13 = vpop.f32.mrf.mxu1  ;;  %4927 = vmatmul.mubr.bf16.gmra.mxu1 %v3126_v3  ;;  %v4684_v25 = vpop.f32.mrf.mxu0  ;;  %4983 = vmatmul.mubr.bf16.gmra.mxu0 %v3460_v51  ;;  %v3441_v32 = vld [vmem:[#allocation2 + $0x106] sm:$0xff]  ;;  %v3129_v51 = vpack.c.bf16 %v3106_v23, %v3105_v53 }
 0x227   : > { %v1399_v60 = vadd.f32 %v4628_v13, %v6023_v40  ;;  %4930 = vmatprep.mubr.bf16.mxu1 %v3127_v36  ;;  %4986 = vmatprep.mubr.bf16.mxu0 %v3461_v9  ;;  %v6130_v38 = vadd.f32 %v1673_v6, %v1378_v20  ;;  %v3462_v40 = vpack.c.bf16 %v3440_v28, %v3439_v63 }
 0x228   : > { %v1390_v55 = vpop.f32.mrf.mxu1  ;;  %v1702_v49 = vpop.f32.mrf.mxu0  ;;  %v3463_v1 = vpack.c.bf16 %v3442_v12, %v3441_v32 }
 0x229   : > { %v1391_v18 = vadd.f32 %v1390_v55, %v6027_v47  ;;  %v6133_v4 = vadd.f32 %v4680_v48, %v1399_v60  ;;  %v3107_v48 = vld [vmem:[#allocation2 + $0xf5] sm:$0xff]  ;;  %v3444_v60 = vld [vmem:[#allocation2 + $0x11e] sm:$0xff] }
 0x22a   : > { %v4629_v45 = vpop.f32.mrf.mxu1  ;;  %v4685_v57 = vpop.f32.mrf.mxu0  ;;  %v3446_v55 = vld [vmem:[#allocation2 + $0x12e] sm:$0xff] }
 0x22b   : > { %v1402_v3 = vadd.f32 %v4629_v45, %v6031_v50  ;;  %v6136_v36 = vadd.f32 %v1686_v46, %v1391_v18  ;;  %v3443_v50 = vld [vmem:[#allocation2 + $0x116] sm:$0xff]  ;;  %v3109_v46 = vld [vmem:[#allocation2 + $0x105] sm:$0xff]  ;;  %v3130_v18 = vpack.c.bf16 %v3108_v22, %v3107_v48 }
 0x22c   : > { %v1393_v6 = vpop.f32.mrf.mxu1  ;;  %v1705_v9 = vpop.f32.mrf.mxu0  ;;  %v3112_v22 = vld [vmem:[#allocation2 + $0x11d] sm:$0xff] }
 0x22d   : > { %v1394_v43 = vadd.f32 %v1393_v6, %v6035_v54  ;;  %v6139_v20 = vadd.f32 %v4681_v58, %v1402_v3  ;;  %v3110_v54 = vld [vmem:[#allocation2 + $0x10d] sm:$0xff] }
 0x22e   : > { %v4632_v13 = vpop.f32.mrf.mxu1  ;;  %4931 = vmatmul.mubr.bf16.gmra.mxu1 %v3128_v17  ;;  %v4756_v47 = vpop.f32.mrf.mxu0  ;;  %4987 = vmatmul.mubr.bf16.gmra.mxu0 %v3462_v40  ;;  %v3445_v58 = vld [vmem:[#allocation2 + $0x126] sm:$0xff]  ;;  %v3131_v40 = vpack.c.bf16 %v3110_v54, %v3109_v46 }
 0x22f   : > { %v1415_v37 = vadd.f32 %v4632_v13, %v6039_v35  ;;  %4934 = vmatprep.mubr.bf16.mxu1 %v3129_v51  ;;  %4990 = vmatprep.mubr.bf16.mxu0 %v3463_v1  ;;  %v6142_v63 = vadd.f32 %v1689_v44, %v1394_v43  ;;  %v3464_v35 = vpack.c.bf16 %v3444_v60, %v3443_v50  ;;  %v3113_v46 = vld [vmem:[#allocation2 + $0x125] sm:$0xff] }
 0x230   : > { %v1406_v28 = vpop.f32.mrf.mxu1  ;;  %v2238_v53 = vpop.f32.mrf.mxu0  ;;  %v3465_v3 = vpack.c.bf16 %v3446_v55, %v3445_v58 }
 0x231   : > { %v1407_v23 = vadd.f32 %v1406_v28, %v6041_v29  ;;  %v6145_v32 = vadd.f32 %v4684_v25, %v1415_v37  ;;  %v3111_v25 = vld [vmem:[#allocation2 + $0x115] sm:$0xff]  ;;  %v3448_v37 = vld [vmem:[#allocation2 + $0x13e] sm:$0xff] }
 0x232   : > { %v4633_v12 = vpop.f32.mrf.mxu1  ;;  %v4757_v45 = vpop.f32.mrf.mxu0  ;;  %v3132_v58 = vpack.c.bf16 %v3112_v22, %v3111_v25 }
 0x233   : > { %v1418_v17 = vadd.f32 %v4633_v12, %v6043_v16  ;;  %v6148_v51 = vadd.f32 %v1702_v49, %v1407_v23  ;;  %v3447_v16 = vld [vmem:[#allocation2 + $0x136] sm:$0xff] }
 0x234   : > { %v1409_v44 = vpop.f32.mrf.mxu1  ;;  %v2241_v1 = vpop.f32.mrf.mxu0  ;;  %v3466_v23 = vpack.c.bf16 %v3448_v37, %v3447_v16  ;;  %v6976_v16 = vld [vmem:[#allocation39_spill] sm:$0xff] }
 0x235   : > { %v1410_v6 = vadd.f32 %v1409_v44, %v6045_v30  ;;  %v6151_v43 = vadd.f32 %v4685_v57, %v1418_v17  ;;  %v3114_v30 = vld [vmem:[#allocation2 + $0x12d] sm:$0xff]  ;;  %v3115_v44 = vld [vmem:[#allocation2 + $0x135] sm:$0xff] }
 0x236   : > { %v4704_v13 = vpop.f32.mrf.mxu1  ;;  %4935 = vmatmul.mubr.bf16.gmra.mxu1 %v3130_v18  ;;  %v4760_v29 = vpop.f32.mrf.mxu0  ;;  %4991 = vmatmul.mubr.bf16.gmra.mxu0 %v3464_v35  ;;  %v3133_v12 = vpack.c.bf16 %v3114_v30, %v3113_v46  ;;  %v6977_v30 = vld [vmem:[#allocation40_spill] sm:$0xff] }
 0x237   : > { %v2051_v48 = vadd.f32 %v4704_v13, %v6049_v33  ;;  %4938 = vmatprep.mubr.bf16.mxu1 %v3131_v40  ;;  %4994 = vmatprep.mubr.bf16.mxu0 %v3465_v3  ;;  %v6154_v49 = vadd.f32 %v1705_v9, %v1410_v6  ;;  %v3116_v6 = vld [vmem:[#allocation2 + $0x13d] sm:$0xff] }
 0x238   : > { %v1906_v50 = vpop.f32.mrf.mxu1  ;;  %v2254_v60 = vpop.f32.mrf.mxu0 }
 0x239   : > { %v2049_v57 = vadd.f32 %v1906_v50, %v6052_v7  ;;  %v6157_v28 = vadd.f32 %v4756_v47, %v2051_v48 }
 0x23a   : > { %v4705_v54 = vpop.f32.mrf.mxu1  ;;  %v4761_v55 = vpop.f32.mrf.mxu0 }
 0x23b   : > { %v2052_v33 = vadd.f32 %v4705_v54, %v6055_v59  ;;  %v6160_v18 = vadd.f32 %v2238_v53, %v2049_v57 }
 0x23c   : > { %v1909_v35 = vpop.f32.mrf.mxu1  ;;  %v2257_v9 = vpop.f32.mrf.mxu0 }
 0x23d   : > { %v2050_v17 = vadd.f32 %v1909_v35, %v6058_v31  ;;  %v6163_v40 = vadd.f32 %v4757_v45, %v2052_v33  ;;  %v3134_v45 = vpack.c.bf16 %v3116_v6, %v3115_v44 }
 0x23e   : > { %v4708_v3 = vpop.f32.mrf.mxu1  ;;  %4939 = vmatmul.mubr.bf16.gmra.mxu1 %v3132_v58  ;;  %v4764_v7 = vpop.f32.mrf.mxu0  ;;  %4995 = vmatmul.mubr.bf16.gmra.mxu0 %v3466_v23 }
 0x23f   : > { %v2055_v47 = vadd.f32 %v4708_v3, %v6061_v52  ;;  %4942 = vmatprep.mubr.bf16.mxu1 %v3133_v12  ;;  %v6166_v13 = vadd.f32 %v2241_v1, %v2050_v17 }
 0x240   : > { %v1922_v59 = vpop.f32.mrf.mxu1  ;;  %v2270_v53 = vpop.f32.mrf.mxu0 }
 0x241   : > { %v2053_v25 = vadd.f32 %v1922_v59, %v6064_v26  ;;  %v6169_v48 = vadd.f32 %v4760_v29, %v2055_v47 }
 0x242   : > { %v4709_v31 = vpop.f32.mrf.mxu1  ;;  %v4765_v22 = vpop.f32.mrf.mxu0 }
 0x243   : > { %v2056_v37 = vadd.f32 %v4709_v31, %v6976_v16  ;;  %v6172_v50 = vadd.f32 %v2254_v60, %v2053_v25 }
 0x244   : > { %v1925_v46 = vpop.f32.mrf.mxu1  ;;  %v2273_v52 = vpop.f32.mrf.mxu0 }
 0x245   : > { %v2054_v57 = vadd.f32 %v1925_v46, %v6977_v30  ;;  %v6175_v54 = vadd.f32 %v4761_v55, %v2056_v37 }
 0x246   : > { %v4712_v1 = vpop.f32.mrf.mxu1  ;;  %4943 = vmatmul.mubr.bf16.gmra.mxu1 %v3134_v45  ;;  %v4768_v58 = vpop.f32.mrf.mxu0 }
 0x247   : > { %v2059_v26 = vadd.f32 %v4712_v1, %v6073_v62  ;;  %v6178_v29 = vadd.f32 %v2257_v9, %v2054_v57 }
 0x248   : > { %v1938_v23 = vpop.f32.mrf.mxu1  ;;  %v2286_v33 = vpop.f32.mrf.mxu0 }
 0x249   : > { %v2057_v12 = vadd.f32 %v1938_v23, %v6076_v11  ;;  %v6181_v35 = vadd.f32 %v4764_v7, %v2059_v26 }
 0x24a   : > { %v4713_v60 = vpop.f32.mrf.mxu1  ;;  %v4769_v17 = vpop.f32.mrf.mxu0 }
 0x24b   : > { %v2060_v3 = vadd.f32 %v4713_v60, %v6079_v0  ;;  %v6184_v47 = vadd.f32 %v2270_v53, %v2057_v12 }
 0x24c   : > { %v1941_v55 = vpop.f32.mrf.mxu1  ;;  %v2289_v44 = vpop.f32.mrf.mxu0 }
 0x24d   : > { %v2058_v6 = vadd.f32 %v1941_v55, %v6082_v42  ;;  %v6187_v59 = vadd.f32 %v4765_v22, %v2060_v3 }
 0x24e   : > { %v4716_v62 = vpop.f32.mrf.mxu1  ;;  %v4772_v9 = vpop.f32.mrf.mxu0 }
 0x24f   : > { %v2063_v25 = vadd.f32 %v4716_v62, %v6085_v5  ;;  %v6190_v31 = vadd.f32 %v2273_v52, %v2058_v6 }
 0x250   : > { %v1954_v11 = vpop.f32.mrf.mxu1  ;;  %v2302_v7 = vpop.f32.mrf.mxu0 }
 0x251   : > { %v2061_v45 = vadd.f32 %v1954_v11, %v6088_v8  ;;  %v6193_v16 = vadd.f32 %v4768_v58, %v2063_v25 }
 0x252   : > { %v4717_v0 = vpop.f32.mrf.mxu1  ;;  %v4773_v53 = vpop.f32.mrf.mxu0 }
 0x253   : > { %v2064_v37 = vadd.f32 %v4717_v0, %v6091_v2  ;;  %v6196_v46 = vadd.f32 %v2286_v33, %v2061_v45 }
 0x254   : > { %v1957_v42 = vpop.f32.mrf.mxu1  ;;  %v2305_v22 = vpop.f32.mrf.mxu0 }
 0x255   : > { %v2062_v30 = vadd.f32 %v1957_v42, %v6094_v21  ;;  %v6199_v57 = vadd.f32 %v4769_v17, %v2064_v37 }
 0x256   : > { %v4720_v5 = vpop.f32.mrf.mxu1  ;;  %v4776_v52 = vpop.f32.mrf.mxu0 }
 0x257   : > { %v2067_v1 = vadd.f32 %v4720_v5, %v6097_v19  ;;  %v6202_v26 = vadd.f32 %v2289_v44, %v2062_v30 }
 0x258   : > { %v1970_v8 = vpop.f32.mrf.mxu1  ;;  %v2318_v58 = vpop.f32.mrf.mxu0 }
 0x259   : > { %v2065_v23 = vadd.f32 %v1970_v8, %v6100_v39  ;;  %v6205_v12 = vadd.f32 %v4772_v9, %v2067_v1 }
 0x25a   : > { %v4721_v2 = vpop.f32.mrf.mxu1  ;;  %v4777_v33 = vpop.f32.mrf.mxu0 }
 0x25b   : > { %v2068_v60 = vadd.f32 %v4721_v2, %v6103_v56  ;;  %v6208_v3 = vadd.f32 %v2302_v7, %v2065_v23 }
 0x25c   : > { %v1973_v21 = vpop.f32.mrf.mxu1  ;;  %v2321_v17 = vpop.f32.mrf.mxu0 }
 0x25d   : > { %v2066_v55 = vadd.f32 %v1973_v21, %v6106_v14  ;;  %v6211_v6 = vadd.f32 %v4773_v53, %v2068_v60 }
 0x25e   : > { %v4724_v19 = vpop.f32.mrf.mxu1  ;;  %v4780_v44 = vpop.f32.mrf.mxu0 }
 0x25f   : > { %v2071_v62 = vadd.f32 %v4724_v19, %v6109_v10  ;;  %v6214_v25 = vadd.f32 %v2305_v22, %v2066_v55 }
 0x260   : > { %v1986_v39 = vpop.f32.mrf.mxu1  ;;  %v2334_v9 = vpop.f32.mrf.mxu0 }
 0x261   : > { %v2069_v11 = vadd.f32 %v1986_v39, %v6112_v34  ;;  %v6217_v45 = vadd.f32 %v4776_v52, %v2071_v62 }
 0x262   : > { %v4725_v56 = vpop.f32.mrf.mxu1  ;;  %v4781_v7 = vpop.f32.mrf.mxu0 }
 0x263   : > { %v2072_v0 = vadd.f32 %v4725_v56, %v6115_v15  ;;  %v6220_v37 = vadd.f32 %v2318_v58, %v2069_v11 }
 0x264   : > { %v1989_v14 = vpop.f32.mrf.mxu1  ;;  %v2337_v53 = vpop.f32.mrf.mxu0 }
 0x265   : > { %v2070_v42 = vadd.f32 %v1989_v14, %v6118_v24  ;;  %v6223_v30 = vadd.f32 %v4777_v33, %v2072_v0 }
 0x266   : > { %v4728_v10 = vpop.f32.mrf.mxu1  ;;  %v4784_v22 = vpop.f32.mrf.mxu0 }
 0x267   : > { %v2075_v5 = vadd.f32 %v4728_v10, %v6121_v27  ;;  %v6226_v1 = vadd.f32 %v2321_v17, %v2070_v42 }
 0x268   : > { %v2002_v34 = vpop.f32.mrf.mxu1  ;;  %v2350_v52 = vpop.f32.mrf.mxu0 }
 0x269   : > { %v2073_v8 = vadd.f32 %v2002_v34, %v6124_v61  ;;  %v6229_v23 = vadd.f32 %v4780_v44, %v2075_v5 }
 0x26a   : > { %v4729_v15 = vpop.f32.mrf.mxu1  ;;  %v4785_v58 = vpop.f32.mrf.mxu0 }
 0x26b   : > { %v2076_v2 = vadd.f32 %v4729_v15, %v6127_v41  ;;  %v6232_v60 = vadd.f32 %v2334_v9, %v2073_v8 }
 0x26c   : > { %v2005_v24 = vpop.f32.mrf.mxu1  ;;  %v2353_v33 = vpop.f32.mrf.mxu0 }
 0x26d   : > { %v2074_v21 = vadd.f32 %v2005_v24, %v6130_v38  ;;  %v6235_v55 = vadd.f32 %v4781_v7, %v2076_v2 }
 0x26e   : > { %v4732_v27 = vpop.f32.mrf.mxu1  ;;  %v4788_v17 = vpop.f32.mrf.mxu0 }
 0x26f   : > { %v2079_v19 = vadd.f32 %v4732_v27, %v6133_v4  ;;  %v6238_v62 = vadd.f32 %v2337_v53, %v2074_v21 }
 0x270   : > { %v2018_v61 = vpop.f32.mrf.mxu1  ;;  %v2366_v44 = vpop.f32.mrf.mxu0 }
 0x271   : > { %v2077_v39 = vadd.f32 %v2018_v61, %v6136_v36  ;;  %v6241_v11 = vadd.f32 %v4784_v22, %v2079_v19 }
 0x272   : > { %v4733_v41 = vpop.f32.mrf.mxu1  ;;  %v4789_v9 = vpop.f32.mrf.mxu0 }
 0x273   : > { %v2080_v56 = vadd.f32 %v4733_v41, %v6139_v20  ;;  %v6244_v0 = vadd.f32 %v2350_v52, %v2077_v39 }
 0x274   : > { %v2021_v38 = vpop.f32.mrf.mxu1  ;;  %v2369_v7 = vpop.f32.mrf.mxu0 }
 0x275   : > { %v2078_v14 = vadd.f32 %v2021_v38, %v6142_v63  ;;  %v6247_v42 = vadd.f32 %v4785_v58, %v2080_v56 }
 0x276   : > { %v4736_v4 = vpop.f32.mrf.mxu1  ;;  %v4860_v53 = vpop.f32.mrf.mxu0 }
 0x277   : > { %v2083_v10 = vadd.f32 %v4736_v4, %v6145_v32  ;;  %v6250_v5 = vadd.f32 %v2353_v33, %v2078_v14 }
 0x278   : > { %v2034_v36 = vpop.f32.mrf.mxu1  ;;  %v2902_v22 = vpop.f32.mrf.mxu0 }
 0x279   : > { %v2081_v34 = vadd.f32 %v2034_v36, %v6148_v51  ;;  %v6253_v8 = vadd.f32 %v4788_v17, %v2083_v10 }
 0x27a   : > { %v4737_v20 = vpop.f32.mrf.mxu1  ;;  %v4861_v52 = vpop.f32.mrf.mxu0 }
 0x27b   : > { %v2084_v15 = vadd.f32 %v4737_v20, %v6151_v43  ;;  %v6256_v2 = vadd.f32 %v2366_v44, %v2081_v34 }
 0x27c   : > { %v2037_v63 = vpop.f32.mrf.mxu1  ;;  %v2905_v58 = vpop.f32.mrf.mxu0 }
 0x27d   : > { %v2082_v24 = vadd.f32 %v2037_v63, %v6154_v49  ;;  %v6259_v21 = vadd.f32 %v4789_v9, %v2084_v15 }
 0x27e   : > { %v4808_v32 = vpop.f32.mrf.mxu1  ;;  %v4864_v33 = vpop.f32.mrf.mxu0 }
 0x27f   : > { %v2715_v27 = vadd.f32 %v4808_v32, %v6157_v28  ;;  %v6262_v19 = vadd.f32 %v2369_v7, %v2082_v24 }
 0x280   : > { %v2570_v51 = vpop.f32.mrf.mxu1  ;;  %v2918_v17 = vpop.f32.mrf.mxu0 }
 0x281   : > { %v2713_v61 = vadd.f32 %v2570_v51, %v6160_v18  ;;  %v6265_v39 = vadd.f32 %v4860_v53, %v2715_v27 }
 0x282   : > { %v4809_v43 = vpop.f32.mrf.mxu1  ;;  %v4865_v44 = vpop.f32.mrf.mxu0 }
 0x283   : > { %v2716_v41 = vadd.f32 %v4809_v43, %v6163_v40  ;;  %v6268_v56 = vadd.f32 %v2902_v22, %v2713_v61 }
 0x284   : > { %v2573_v49 = vpop.f32.mrf.mxu1  ;;  %v2921_v9 = vpop.f32.mrf.mxu0 }
 0x285   : > { %v2714_v38 = vadd.f32 %v2573_v49, %v6166_v13  ;;  %v6271_v14 = vadd.f32 %v4861_v52, %v2716_v41 }
 0x286   : > { %v4812_v28 = vpop.f32.mrf.mxu1  ;;  %v4868_v7 = vpop.f32.mrf.mxu0 }
 0x287   : > { %v2719_v4 = vadd.f32 %v4812_v28, %v6169_v48  ;;  %v6274_v10 = vadd.f32 %v2905_v58, %v2714_v38 }
 0x288   : > { %v2586_v18 = vpop.f32.mrf.mxu1  ;;  %v2934_v53 = vpop.f32.mrf.mxu0 }
 0x289   : > { %v2717_v36 = vadd.f32 %v2586_v18, %v6172_v50  ;;  %v6277_v34 = vadd.f32 %v4864_v33, %v2719_v4 }
 0x28a   : > { %v4813_v40 = vpop.f32.mrf.mxu1  ;;  %v4869_v22 = vpop.f32.mrf.mxu0 }
 0x28b   : > { %v2720_v20 = vadd.f32 %v4813_v40, %v6175_v54  ;;  %v6280_v15 = vadd.f32 %v2918_v17, %v2717_v36 }
 0x28c   : > { %v2589_v13 = vpop.f32.mrf.mxu1  ;;  %v2937_v52 = vpop.f32.mrf.mxu0 }
 0x28d   : > { %v2718_v63 = vadd.f32 %v2589_v13, %v6178_v29  ;;  %v6283_v24 = vadd.f32 %v4865_v44, %v2720_v20 }
 0x28e   : > { %v4816_v48 = vpop.f32.mrf.mxu1  ;;  %v4872_v58 = vpop.f32.mrf.mxu0 }
 0x28f   : > { %v2723_v32 = vadd.f32 %v4816_v48, %v6181_v35  ;;  %v6286_v27 = vadd.f32 %v2921_v9, %v2718_v63 }
 0x290   : > { %v2602_v50 = vpop.f32.mrf.mxu1  ;;  %v2950_v33 = vpop.f32.mrf.mxu0 }
 0x291   : > { %v2721_v51 = vadd.f32 %v2602_v50, %v6184_v47  ;;  %v6289_v61 = vadd.f32 %v4868_v7, %v2723_v32 }
 0x292   : > { %v4817_v54 = vpop.f32.mrf.mxu1  ;;  %v4873_v17 = vpop.f32.mrf.mxu0 }
 0x293   : > { %v2724_v43 = vadd.f32 %v4817_v54, %v6187_v59  ;;  %v6292_v41 = vadd.f32 %v2934_v53, %v2721_v51 }
 0x294   : > { %v2605_v29 = vpop.f32.mrf.mxu1  ;;  %v2953_v44 = vpop.f32.mrf.mxu0 }
 0x295   : > { %v2722_v49 = vadd.f32 %v2605_v29, %v6190_v31  ;;  %v6295_v38 = vadd.f32 %v4869_v22, %v2724_v43 }
 0x296   : > { %v4820_v35 = vpop.f32.mrf.mxu1  ;;  %v4876_v9 = vpop.f32.mrf.mxu0 }
 0x297   : > { %v2727_v28 = vadd.f32 %v4820_v35, %v6193_v16  ;;  %v6298_v4 = vadd.f32 %v2937_v52, %v2722_v49 }
 0x298   : > { %v2618_v47 = vpop.f32.mrf.mxu1  ;;  %v2966_v7 = vpop.f32.mrf.mxu0 }
 0x299   : > { %v2725_v18 = vadd.f32 %v2618_v47, %v6196_v46  ;;  %v6301_v36 = vadd.f32 %v4872_v58, %v2727_v28 }
 0x29a   : > { %v4821_v59 = vpop.f32.mrf.mxu1  ;;  %v4877_v53 = vpop.f32.mrf.mxu0 }
 0x29b   : > { %v2728_v40 = vadd.f32 %v4821_v59, %v6199_v57  ;;  %v6304_v20 = vadd.f32 %v2950_v33, %v2725_v18 }
 0x29c   : > { %v2621_v31 = vpop.f32.mrf.mxu1  ;;  %v2969_v22 = vpop.f32.mrf.mxu0 }
 0x29d   : > { %v2726_v13 = vadd.f32 %v2621_v31, %v6202_v26  ;;  %v6307_v63 = vadd.f32 %v4873_v17, %v2728_v40 }
 0x29e   : > { %v4824_v16 = vpop.f32.mrf.mxu1  ;;  %v4880_v52 = vpop.f32.mrf.mxu0 }
 0x29f   : > { %v2731_v48 = vadd.f32 %v4824_v16, %v6205_v12  ;;  %v6310_v32 = vadd.f32 %v2953_v44, %v2726_v13 }
 0x2a0   : > { %v2634_v46 = vpop.f32.mrf.mxu1  ;;  %v2982_v58 = vpop.f32.mrf.mxu0 }
 0x2a1   : > { %v2729_v50 = vadd.f32 %v2634_v46, %v6208_v3  ;;  %v6313_v51 = vadd.f32 %v4876_v9, %v2731_v48 }
 0x2a2   : > { %v4825_v57 = vpop.f32.mrf.mxu1  ;;  %v4881_v33 = vpop.f32.mrf.mxu0 }
 0x2a3   : > { %v2732_v54 = vadd.f32 %v4825_v57, %v6211_v6  ;;  %v6316_v43 = vadd.f32 %v2966_v7, %v2729_v50 }
 0x2a4   : > { %v2637_v26 = vpop.f32.mrf.mxu1  ;;  %v2985_v17 = vpop.f32.mrf.mxu0 }
 0x2a5   : > { %v2730_v29 = vadd.f32 %v2637_v26, %v6214_v25  ;;  %v6319_v49 = vadd.f32 %v4877_v53, %v2732_v54 }
 0x2a6   : > { %v4828_v12 = vpop.f32.mrf.mxu1  ;;  %v4884_v44 = vpop.f32.mrf.mxu0 }
 0x2a7   : > { %v2735_v35 = vadd.f32 %v4828_v12, %v6217_v45  ;;  %v6322_v28 = vadd.f32 %v2969_v22, %v2730_v29 }
 0x2a8   : > { %v2650_v3 = vpop.f32.mrf.mxu1  ;;  %v2998_v9 = vpop.f32.mrf.mxu0 }
 0x2a9   : > { %v2733_v47 = vadd.f32 %v2650_v3, %v6220_v37  ;;  %v6325_v18 = vadd.f32 %v4880_v52, %v2735_v35 }
 0x2aa   : > { %v4829_v6 = vpop.f32.mrf.mxu1  ;;  %v4885_v7 = vpop.f32.mrf.mxu0 }
 0x2ab   : > { %v2736_v59 = vadd.f32 %v4829_v6, %v6223_v30  ;;  %v6328_v40 = vadd.f32 %v2982_v58, %v2733_v47 }
 0x2ac   : > { %v2653_v25 = vpop.f32.mrf.mxu1  ;;  %v3001_v53 = vpop.f32.mrf.mxu0 }
 0x2ad   : > { %v2734_v31 = vadd.f32 %v2653_v25, %v6226_v1  ;;  %v6331_v13 = vadd.f32 %v4881_v33, %v2736_v59 }
 0x2ae   : > { %v4832_v45 = vpop.f32.mrf.mxu1  ;;  %v4888_v22 = vpop.f32.mrf.mxu0 }
 0x2af   : > { %v2739_v16 = vadd.f32 %v4832_v45, %v6229_v23  ;;  %v6334_v48 = vadd.f32 %v2985_v17, %v2734_v31 }
 0x2b0   : > { %v2666_v37 = vpop.f32.mrf.mxu1  ;;  %v3014_v52 = vpop.f32.mrf.mxu0 }
 0x2b1   : > { %v2737_v46 = vadd.f32 %v2666_v37, %v6232_v60  ;;  %v6337_v50 = vadd.f32 %v4884_v44, %v2739_v16 }
 0x2b2   : > { %v4833_v30 = vpop.f32.mrf.mxu1  ;;  %v4889_v58 = vpop.f32.mrf.mxu0 }
 0x2b3   : > { %v2740_v57 = vadd.f32 %v4833_v30, %v6235_v55  ;;  %v6340_v54 = vadd.f32 %v2998_v9, %v2737_v46 }
 0x2b4   : > { %v2669_v1 = vpop.f32.mrf.mxu1  ;;  %v3017_v33 = vpop.f32.mrf.mxu0 }
 0x2b5   : > { %v2738_v26 = vadd.f32 %v2669_v1, %v6238_v62  ;;  %v6343_v29 = vadd.f32 %v4885_v7, %v2740_v57 }
 0x2b6   : > { %v4836_v23 = vpop.f32.mrf.mxu1  ;;  %v4892_v17 = vpop.f32.mrf.mxu0 }
 0x2b7   : > { %v2743_v12 = vadd.f32 %v4836_v23, %v6241_v11  ;;  %v6346_v35 = vadd.f32 %v3001_v53, %v2738_v26 }
 0x2b8   : > { %v2682_v60 = vpop.f32.mrf.mxu1  ;;  %v3030_v44 = vpop.f32.mrf.mxu0 }
 0x2b9   : > { %v2741_v3 = vadd.f32 %v2682_v60, %v6244_v0  ;;  %v6349_v47 = vadd.f32 %v4888_v22, %v2743_v12 }
 0x2ba   : > { %v4837_v55 = vpop.f32.mrf.mxu1  ;;  %v4893_v9 = vpop.f32.mrf.mxu0 }
 0x2bb   : > { %v2744_v6 = vadd.f32 %v4837_v55, %v6247_v42  ;;  %v6352_v59 = vadd.f32 %v3014_v52, %v2741_v3 }
 0x2bc   : > { %v2685_v62 = vpop.f32.mrf.mxu1  ;;  %v3033_v7 = vpop.f32.mrf.mxu0 }
 0x2bd   : > { %v2742_v25 = vadd.f32 %v2685_v62, %v6250_v5  ;;  %v6355_v31 = vadd.f32 %v4889_v58, %v2744_v6 }
 0x2be   : > { %v4840_v11 = vpop.f32.mrf.mxu1  ;;  %v4964_v53 = vpop.f32.mrf.mxu0 }
 0x2bf   : > { %v2747_v45 = vadd.f32 %v4840_v11, %v6253_v8  ;;  %v6358_v16 = vadd.f32 %v3017_v33, %v2742_v25 }
 0x2c0   : > { %v2698_v0 = vpop.f32.mrf.mxu1  ;;  %v3566_v22 = vpop.f32.mrf.mxu0 }
 0x2c1   : > { %v2745_v37 = vadd.f32 %v2698_v0, %v6256_v2  ;;  %v6361_v46 = vadd.f32 %v4892_v17, %v2747_v45  ;;  %v6375_v17 = vld [vmem:[%s6874_s2] ss:$0 sm:$0xff] }
 0x2c2   : > { %v4841_v42 = vpop.f32.mrf.mxu1  ;;  %v4965_v52 = vpop.f32.mrf.mxu0 }
 0x2c3   : > { %v2748_v30 = vadd.f32 %v4841_v42, %v6259_v21  ;;  %v6364_v57 = vadd.f32 %v3030_v44, %v2745_v37 }
 0x2c4   : > { %v2701_v5 = vpop.f32.mrf.mxu1  ;;  %v3569_v58 = vpop.f32.mrf.mxu0 }
 0x2c5   : > { %v2746_v1 = vadd.f32 %v2701_v5, %v6262_v19  ;;  %v6367_v26 = vadd.f32 %v4893_v9, %v2748_v30  ;;  %v6978_v30 = vld [vmem:[#allocation4_spill] sm:$0xff] }
 0x2c6   : > { %v4912_v8 = vpop.f32.mrf.mxu1  ;;  %v4968_v33 = vpop.f32.mrf.mxu0 }
 0x2c7   : > { %v3379_v23 = vadd.f32 %v4912_v8, %v6265_v39  ;;  %v6370_v2 = vadd.f32 %v3033_v7, %v2746_v1 }
 0x2c8   : > { %v3234_v21 = vpop.f32.mrf.mxu1  ;;  %v3582_v12 = vpop.f32.mrf.mxu0 }
 0x2c9   : > { %v3711_v60 = vadd.f32 %v4964_v53, %v3379_v23  ;;  %v3377_v19 = vadd.f32 %v3234_v21, %v6268_v56 }
 0x2ca   : > { %v4913_v44 = vpop.f32.mrf.mxu1  ;;  %v4969_v3 = vpop.f32.mrf.mxu0 }
 0x2cb   : > { %v6379_v55 = vadd.f32 %v6375_v17, %v3711_v60  ;;  %v3709_v9 = vadd.f32 %v3566_v22, %v3377_v19  ;;  %v3380_v39 = vadd.f32 %v4913_v44, %v6271_v14  ;;  %v6980_v19 = vld [vmem:[#allocation3_spill] sm:$0xff] }
 0x2cc   : > { %v3237_v6 = vpop.f32.mrf.mxu1  ;;  %v3585_v62 = vpop.f32.mrf.mxu0 }
 0x2cd   : > { %3790 = vst [vmem:[%s5233_s26 + $0x10] sm:$0xff] %v6379_v55  ;;  %v6385_v7 = vadd.f32 %v6375_v17, %v3709_v9  ;;  %v3712_v25 = vadd.f32 %v4965_v52, %v3380_v39  ;;  %v3378_v11 = vadd.f32 %v3237_v6, %v6274_v10  ;;  %v6416_v44 = vmul.f32 %v6379_v55, %v6980_v19 }
 0x2ce   : > { %v4916_v56 = vpop.f32.mrf.mxu1  ;;  %v4972_v53 = vpop.f32.mrf.mxu0 }
 0x2cf   : > { %3788 = vst [vmem:[%s5233_s26] sm:$0xff] %v6385_v7  ;;  %v6391_v45 = vadd.f32 %v6375_v17, %v3712_v25  ;;  %v3710_v0 = vadd.f32 %v3569_v58, %v3378_v11  ;;  %v3383_v14 = vadd.f32 %v4916_v56, %v6277_v34  ;;  %v6402_v5 = vmul.f32 %v6385_v7, %v6978_v30  ;;  %v6979_v34 = vld [vmem:[#allocation6_spill] sm:$0xff]  ;;  %v6981_v11 = vld [vmem:[#allocation5_spill] sm:$0xff] }
 0x2d0   : > { %v3250_v22 = vpop.f32.mrf.mxu1  ;;  %v3598_v37 = vpop.f32.mrf.mxu0 }
 0x2d1   : > { %3791 = vst [vmem:[%s5233_s26 + $0x18] sm:$0xff] %v6391_v45  ;;  %v6397_v42 = vadd.f32 %v6375_v17, %v3710_v0  ;;  %v3715_v10 = vadd.f32 %v4968_v33, %v3383_v14  ;;  %v3381_v52 = vadd.f32 %v3250_v22, %v6280_v15  ;;  %v6428_v56 = vmul.f32 %v6391_v45, %v6981_v11 }
 0x2d2   : > { %v4917_v1 = vpop.f32.mrf.mxu1  ;;  %v4973_v8 = vpop.f32.mrf.mxu0 }
 0x2d3   : > { %3789 = vst [vmem:[%s5233_s26 + $0x8] sm:$0xff] %v6397_v42  ;;  %v6408_v58 = vmul.f32 %v6397_v42, %v6979_v34  ;;  %v6411_v23 = vadd.f32 %v6375_v17, %v3715_v10  ;;  %v3713_v21 = vadd.f32 %v3582_v12, %v3381_v52  ;;  %v3384_v33 = vadd.f32 %v4917_v1, %v6283_v24 }
 0x2d4   : > { %v3253_v15 = vpop.f32.mrf.mxu1  ;;  %v3601_v60 = vpop.f32.mrf.mxu0 }
 0x2d5   : > { %v3860_v9 = vadd.f32 %v6408_v58, %v6402_v5  ;;  %3794 = vst [vmem:[%s5233_s26 + $0x30] sm:$0xff] %v6411_v23  ;;  %v6423_v39 = vadd.f32 %v6375_v17, %v3713_v21  ;;  %v3716_v6 = vadd.f32 %v4969_v3, %v3384_v33  ;;  %v3382_v12 = vadd.f32 %v3253_v15, %v6286_v27  ;;  %v6982_v27 = vld [vmem:[#allocation8_spill] sm:$0xff] }
 0x2d6   : > { %v4920_v25 = vpop.f32.mrf.mxu1  ;;  %v4976_v24 = vpop.f32.mrf.mxu0 }
 0x2d7   : > { %v3861_v0 = vadd.f32 %v3860_v9, %v6416_v44  ;;  %3792 = vst [vmem:[%s5233_s26 + $0x20] sm:$0xff] %v6423_v39  ;;  %v6434_v14 = vadd.f32 %v6375_v17, %v3716_v6  ;;  %v3387_v22 = vadd.f32 %v4920_v25, %v6289_v61  ;;  %v3714_v10 = vadd.f32 %v3585_v62, %v3382_v12  ;;  %v6984_v12 = vld [vmem:[#allocation7_spill] sm:$0xff] }
 0x2d8   : > { %v3266_v3 = vpop.f32.mrf.mxu1  ;;  %v3614_v52 = vpop.f32.mrf.mxu0  ;;  %v6439_v30 = vmul.f32 %v6423_v39, %v6982_v27 }
 0x2d9   : > { %v3862_v1 = vadd.f32 %v3861_v0, %v6428_v56  ;;  %3795 = vst [vmem:[%s5233_s26 + $0x38] sm:$0xff] %v6434_v14  ;;  %v3719_v34 = vadd.f32 %v4972_v53, %v3387_v22  ;;  %v3385_v21 = vadd.f32 %v3266_v3, %v6292_v41  ;;  %v6446_v33 = vadd.f32 %v6375_v17, %v3714_v10 }
 0x2da   : > { %v4921_v61 = vpop.f32.mrf.mxu1  ;;  %v4977_v15 = vpop.f32.mrf.mxu0 }
 0x2db   : > { %v3863_v62 = vadd.f32 %v3862_v1, %v6439_v30  ;;  %v6450_v19 = vadd.f32 %v6375_v17, %v3719_v34  ;;  %v3717_v9 = vadd.f32 %v3598_v37, %v3385_v21  ;;  %v3388_v6 = vadd.f32 %v4921_v61, %v6295_v38  ;;  %3793 = vst [vmem:[%s5233_s26 + $0x28] sm:$0xff] %v6446_v33  ;;  %v6985_v37 = vld [vmem:[#allocation10_spill] sm:$0xff] }
 0x2dc   : > { %v6457_v53 = vmul.f32 %v6446_v33, %v6984_v12  ;;  %v3269_v41 = vpop.f32.mrf.mxu1  ;;  %v3617_v25 = vpop.f32.mrf.mxu0  ;;  %v6467_v38 = vmul.f32 %v6411_v23, %v6985_v37 }
 0x2dd   : > { %6983 = vst [vmem:[#allocation39_spill] sm:$0xff] %v6450_v19  ;;  %3798 = vst [vmem:[%s5233_s26 + $0x50] sm:$0xff] %v6450_v19  ;;  %v6462_v11 = vadd.f32 %v6375_v17, %v3717_v9  ;;  %v3720_v0 = vadd.f32 %v4973_v8, %v3388_v6  ;;  %v3386_v22 = vadd.f32 %v3269_v41, %v6298_v4  ;;  %v6987_v8 = vld [vmem:[#allocation9_spill] sm:$0xff] }
 0x2de   : > { %v3864_v10 = vadd.f32 %v3863_v62, %v6457_v53  ;;  %v4924_v3 = vpop.f32.mrf.mxu1  ;;  %v4980_v27 = vpop.f32.mrf.mxu0  ;;  %v6478_v4 = vmul.f32 %v6434_v14, %v6987_v8 }
 0x2df   : > { %3796 = vst [vmem:[%s5233_s26 + $0x40] sm:$0xff] %v6462_v11  ;;  %v6473_v1 = vadd.f32 %v6375_v17, %v3720_v0  ;;  %v3718_v34 = vadd.f32 %v3601_v60, %v3386_v22  ;;  %v3391_v21 = vadd.f32 %v4924_v3, %v6301_v36  ;;  %v6989_v60 = vld [vmem:[#allocation12_spill] sm:$0xff] }
 0x2e0   : > { %v3865_v61 = vadd.f32 %v3864_v10, %v6467_v38  ;;  %v3282_v9 = vpop.f32.mrf.mxu1  ;;  %v3630_v6 = vpop.f32.mrf.mxu0  ;;  %v6489_v36 = vmul.f32 %v6462_v11, %v6989_v60  ;;  %v6990_v10 = vld [vmem:[#allocation11_spill] sm:$0xff] }
 0x2e1   : > { %6986 = vst [vmem:[#allocation40_spill] sm:$0xff] %v6473_v1  ;;  %3799 = vst [vmem:[%s5233_s26 + $0x58] sm:$0xff] %v6473_v1  ;;  %v6484_v62 = vadd.f32 %v6375_v17, %v3718_v34  ;;  %v3723_v12 = vadd.f32 %v4976_v24, %v3391_v21  ;;  %v3389_v41 = vadd.f32 %v3282_v9, %v6304_v20 }
 0x2e2   : > { %v3866_v0 = vadd.f32 %v3865_v61, %v6478_v4  ;;  %v4925_v22 = vpop.f32.mrf.mxu1  ;;  %v4981_v37 = vpop.f32.mrf.mxu0 }
 0x2e3   : > { %6988 = vst [vmem:[#allocation4_spill] sm:$0xff] %v6484_v62  ;;  %3797 = vst [vmem:[%s5233_s26 + $0x48] sm:$0xff] %v6484_v62  ;;  %v6496_v3 = vmul.f32 %v6484_v62, %v6990_v10  ;;  %v6499_v34 = vadd.f32 %v6375_v17, %v3723_v12  ;;  %v3721_v24 = vadd.f32 %v3614_v52, %v3389_v41  ;;  %v6993_v62 = vld [vmem:[#allocation14_spill] sm:$0xff] }
 0x2e4   : > { %v3392_v20 = vadd.f32 %v4925_v22, %v6307_v63  ;;  %v3867_v21 = vadd.f32 %v3866_v0, %v6489_v36  ;;  %v3285_v8 = vpop.f32.mrf.mxu1  ;;  %v3633_v9 = vpop.f32.mrf.mxu0  ;;  %v6511_v12 = vmul.f32 %v6450_v19, %v6993_v62 }
 0x2e5   : > { %6991 = vst [vmem:[#allocation6_spill] sm:$0xff] %v6499_v34  ;;  %3802 = vst [vmem:[%s5233_s26 + $0x70] sm:$0xff] %v6499_v34  ;;  %v6506_v61 = vadd.f32 %v6375_v17, %v3721_v24  ;;  %v3390_v10 = vadd.f32 %v3285_v8, %v6310_v32 }
 0x2e6   : > { %v3724_v60 = vadd.f32 %v4977_v15, %v3392_v20  ;;  %v3868_v52 = vadd.f32 %v3867_v21, %v6496_v3  ;;  %v4928_v63 = vpop.f32.mrf.mxu1  ;;  %v4984_v41 = vpop.f32.mrf.mxu0  ;;  %v6995_v15 = vld [vmem:[#allocation13_spill] sm:$0xff] }
 0x2e7   : > { %6992 = vst [vmem:[#allocation3_spill] sm:$0xff] %v6506_v61  ;;  %3800 = vst [vmem:[%s5233_s26 + $0x60] sm:$0xff] %v6506_v61  ;;  %v3722_v22 = vadd.f32 %v3617_v25, %v3390_v10  ;;  %v3395_v24 = vadd.f32 %v4928_v63, %v6313_v51  ;;  %v6522_v32 = vmul.f32 %v6473_v1, %v6995_v15  ;;  %v6997_v25 = vld [vmem:[#allocation16_spill] sm:$0xff] }
 0x2e8   : > { %v6517_v0 = vadd.f32 %v6375_v17, %v3724_v60  ;;  %v3869_v62 = vadd.f32 %v3868_v52, %v6511_v12  ;;  %v3298_v20 = vpop.f32.mrf.mxu1  ;;  %v3646_v8 = vpop.f32.mrf.mxu0  ;;  %v6533_v51 = vmul.f32 %v6506_v61, %v6997_v25  ;;  %v6998_v52 = vld [vmem:[#allocation15_spill] sm:$0xff] }
 0x2e9   : > { %v6528_v21 = vadd.f32 %v6375_v17, %v3722_v22  ;;  %v3727_v19 = vadd.f32 %v4980_v27, %v3395_v24  ;;  %v3393_v60 = vadd.f32 %v3298_v20, %v6316_v43 }
 0x2ea   : > { %6994 = vst [vmem:[#allocation5_spill] sm:$0xff] %v6517_v0  ;;  %3803 = vst [vmem:[%s5233_s26 + $0x78] sm:$0xff] %v6517_v0  ;;  %v3870_v10 = vadd.f32 %v3869_v62, %v6522_v32  ;;  %v4929_v63 = vpop.f32.mrf.mxu1  ;;  %v4985_v15 = vpop.f32.mrf.mxu0 }
 0x2eb   : > { %6996 = vst [vmem:[#allocation8_spill] sm:$0xff] %v6528_v21  ;;  %3801 = vst [vmem:[%s5233_s26 + $0x68] sm:$0xff] %v6528_v21  ;;  %v6540_v1 = vmul.f32 %v6528_v21, %v6998_v52  ;;  %v6543_v22 = vadd.f32 %v6375_v17, %v3727_v19  ;;  %v3725_v27 = vadd.f32 %v3630_v6, %v3393_v60  ;;  %v7001_v21 = vld [vmem:[#allocation18_spill] sm:$0xff] }
 0x2ec   : > { %v3396_v43 = vadd.f32 %v4929_v63, %v6319_v49  ;;  %v3871_v24 = vadd.f32 %v3870_v10, %v6533_v51  ;;  %v3301_v20 = vpop.f32.mrf.mxu1  ;;  %v3649_v25 = vpop.f32.mrf.mxu0  ;;  %v6555_v19 = vmul.f32 %v6499_v34, %v7001_v21 }
 0x2ed   : > { %6999 = vst [vmem:[#allocation7_spill] sm:$0xff] %v6543_v22  ;;  %3806 = vst [vmem:[%s5233_s26 + $0x90] sm:$0xff] %v6543_v22  ;;  %v6550_v62 = vadd.f32 %v6375_v17, %v3725_v27  ;;  %v3394_v52 = vadd.f32 %v3301_v20, %v6322_v28 }
 0x2ee   : > { %v3728_v61 = vadd.f32 %v4981_v37, %v3396_v43  ;;  %v3872_v6 = vadd.f32 %v3871_v24, %v6540_v1  ;;  %v4932_v49 = vpop.f32.mrf.mxu1  ;;  %v4988_v60 = vpop.f32.mrf.mxu0  ;;  %v7003_v37 = vld [vmem:[#allocation17_spill] sm:$0xff] }
 0x2ef   : > { %7000 = vst [vmem:[#allocation10_spill] sm:$0xff] %v6550_v62  ;;  %3804 = vst [vmem:[%s5233_s26 + $0x80] sm:$0xff] %v6550_v62  ;;  %v3726_v63 = vadd.f32 %v3633_v9, %v3394_v52  ;;  %v3399_v27 = vadd.f32 %v4932_v49, %v6325_v18  ;;  %v6566_v28 = vmul.f32 %v6517_v0, %v7003_v37  ;;  %v7005_v9 = vld [vmem:[#allocation20_spill] sm:$0xff] }
 0x2f0   : > { %v6561_v10 = vadd.f32 %v6375_v17, %v3728_v61  ;;  %v3873_v21 = vadd.f32 %v3872_v6, %v6555_v19  ;;  %v3314_v43 = vpop.f32.mrf.mxu1  ;;  %v3662_v20 = vpop.f32.mrf.mxu0  ;;  %v6577_v18 = vmul.f32 %v6550_v62, %v7005_v9  ;;  %v7006_v6 = vld [vmem:[#allocation19_spill] sm:$0xff] }
 0x2f1   : > { %v6572_v24 = vadd.f32 %v6375_v17, %v3726_v63  ;;  %v3731_v34 = vadd.f32 %v4984_v41, %v3399_v27  ;;  %v3397_v61 = vadd.f32 %v3314_v43, %v6328_v40 }
 0x2f2   : > { %7002 = vst [vmem:[#allocation9_spill] sm:$0xff] %v6561_v10  ;;  %3807 = vst [vmem:[%s5233_s26 + $0x98] sm:$0xff] %v6561_v10  ;;  %v3874_v52 = vadd.f32 %v3873_v21, %v6566_v28  ;;  %v4933_v49 = vpop.f32.mrf.mxu1  ;;  %v4989_v37 = vpop.f32.mrf.mxu0 }
 0x2f3   : > { %7004 = vst [vmem:[#allocation12_spill] sm:$0xff] %v6572_v24  ;;  %3805 = vst [vmem:[%s5233_s26 + $0x88] sm:$0xff] %v6572_v24  ;;  %v6584_v0 = vmul.f32 %v6572_v24, %v7006_v6  ;;  %v6587_v63 = vadd.f32 %v6375_v17, %v3731_v34  ;;  %v3729_v41 = vadd.f32 %v3646_v8, %v3397_v61  ;;  %v7008_v24 = vld [vmem:[#allocation22_spill] sm:$0xff] }
 0x2f4   : > { %v3400_v40 = vadd.f32 %v4933_v49, %v6331_v13  ;;  %v3875_v27 = vadd.f32 %v3874_v52, %v6577_v18  ;;  %v3317_v43 = vpop.f32.mrf.mxu1  ;;  %v3665_v9 = vpop.f32.mrf.mxu0  ;;  %v6599_v34 = vmul.f32 %v6543_v22, %v7008_v24 }
 0x2f5   : > { %3810 = vst [vmem:[%s5233_s26 + $0xb0] sm:$0xff] %v6587_v63  ;;  %v6594_v21 = vadd.f32 %v6375_v17, %v3729_v41  ;;  %v3398_v6 = vadd.f32 %v3317_v43, %v6334_v48 }
 0x2f6   : > { %v3732_v62 = vadd.f32 %v4985_v15, %v3400_v40  ;;  %v3876_v8 = vadd.f32 %v3875_v27, %v6584_v0  ;;  %v4936_v13 = vpop.f32.mrf.mxu1  ;;  %v4992_v61 = vpop.f32.mrf.mxu0  ;;  %v7009_v15 = vld [vmem:[#allocation21_spill] sm:$0xff] }
 0x2f7   : > { %7007 = vst [vmem:[#allocation11_spill] sm:$0xff] %v6594_v21  ;;  %3808 = vst [vmem:[%s5233_s26 + $0xa0] sm:$0xff] %v6594_v21  ;;  %v3730_v49 = vadd.f32 %v3649_v25, %v3398_v6  ;;  %v3403_v41 = vadd.f32 %v4936_v13, %v6337_v50  ;;  %v6610_v48 = vmul.f32 %v6561_v10, %v7009_v15  ;;  %v7011_v25 = vld [vmem:[#allocation24_spill] sm:$0xff] }
 0x2f8   : > { %v6605_v52 = vadd.f32 %v6375_v17, %v3732_v62  ;;  %v3877_v24 = vadd.f32 %v3876_v8, %v6599_v34  ;;  %v3330_v40 = vpop.f32.mrf.mxu1  ;;  %v3678_v43 = vpop.f32.mrf.mxu0  ;;  %v6621_v50 = vmul.f32 %v6594_v21, %v7011_v25  ;;  %v7012_v8 = vld [vmem:[#allocation23_spill] sm:$0xff] }
 0x2f9   : > { %v6616_v27 = vadd.f32 %v6375_v17, %v3730_v49  ;;  %v3735_v22 = vadd.f32 %v4988_v60, %v3403_v41  ;;  %v3401_v62 = vadd.f32 %v3330_v40, %v6340_v54 }
 0x2fa   : > { %3811 = vst [vmem:[%s5233_s26 + $0xb8] sm:$0xff] %v6605_v52  ;;  %v3878_v6 = vadd.f32 %v3877_v24, %v6610_v48  ;;  %v4937_v13 = vpop.f32.mrf.mxu1  ;;  %v4993_v15 = vpop.f32.mrf.mxu0 }
 0x2fb   : > { %7010 = vst [vmem:[#allocation14_spill] sm:$0xff] %v6616_v27  ;;  %3809 = vst [vmem:[%s5233_s26 + $0xa8] sm:$0xff] %v6616_v27  ;;  %v6628_v10 = vmul.f32 %v6616_v27, %v7012_v8  ;;  %v6631_v49 = vadd.f32 %v6375_v17, %v3735_v22  ;;  %v3733_v60 = vadd.f32 %v3662_v20, %v3401_v62  ;;  %v7014_v8 = vld [vmem:[#allocation26_spill] sm:$0xff] }
 0x2fc   : > { %v3404_v54 = vadd.f32 %v4937_v13, %v6343_v29  ;;  %v3879_v41 = vadd.f32 %v3878_v6, %v6621_v50  ;;  %v3333_v40 = vpop.f32.mrf.mxu1  ;;  %v6643_v27 = vmul.f32 %v6587_v63, %v7014_v8  ;;  %v3681_v29 = vpop.f32.mrf.mxu0  ;;  %v7017_v8 = vld [vmem:[#allocation28_spill] sm:$0xff] }
 0x2fd   : > { %3814 = vst [vmem:[%s5233_s26 + $0xd0] sm:$0xff] %v6631_v49  ;;  %v6638_v24 = vadd.f32 %v6375_v17, %v3733_v60  ;;  %v3402_v21 = vadd.f32 %v3333_v40, %v6346_v35 }
 0x2fe   : > { %v3736_v25 = vadd.f32 %v4989_v37, %v3404_v54  ;;  %v3880_v22 = vadd.f32 %v3879_v41, %v6628_v10  ;;  %v4940_v20 = vpop.f32.mrf.mxu1  ;;  %v7015_v37 = vld [vmem:[#allocation25_spill] sm:$0xff] }
 0x2ff   : > { %7013 = vst [vmem:[#allocation13_spill] sm:$0xff] %v6638_v24  ;;  %3812 = vst [vmem:[%s5233_s26 + $0xc0] sm:$0xff] %v6638_v24  ;;  %v3734_v6 = vadd.f32 %v3665_v9, %v3402_v21  ;;  %v3407_v13 = vadd.f32 %v4940_v20, %v6349_v47  ;;  %v6654_v35 = vmul.f32 %v6605_v52, %v7015_v37  ;;  %v4996_v20 = vpop.f32.mrf.mxu0 }
 0x300   : > { %v6649_v62 = vadd.f32 %v6375_v17, %v3736_v25  ;;  %v3881_v60 = vadd.f32 %v3880_v22, %v6643_v27  ;;  %v3346_v54 = vpop.f32.mrf.mxu1  ;;  %v6665_v9 = vmul.f32 %v6638_v24, %v7017_v8  ;;  %v7018_v22 = vld [vmem:[#allocation27_spill] sm:$0xff] }
 0x301   : > { %v6660_v41 = vadd.f32 %v6375_v17, %v3734_v6  ;;  %v3739_v40 = vadd.f32 %v4992_v61, %v3407_v13  ;;  %v3405_v25 = vadd.f32 %v3346_v54, %v6352_v59 }
 0x302   : > { %3815 = vst [vmem:[%s5233_s26 + $0xd8] sm:$0xff] %v6649_v62  ;;  %v3882_v47 = vadd.f32 %v3881_v60, %v6654_v35  ;;  %v4941_v21 = vpop.f32.mrf.mxu1 }
 0x303   : > { %7016 = vst [vmem:[#allocation16_spill] sm:$0xff] %v6660_v41  ;;  %3813 = vst [vmem:[%s5233_s26 + $0xc8] sm:$0xff] %v6660_v41  ;;  %v6672_v37 = vmul.f32 %v6660_v41, %v7018_v22  ;;  %v6675_v6 = vadd.f32 %v6375_v17, %v3739_v40  ;;  %v3737_v61 = vadd.f32 %v3678_v43, %v3405_v25  ;;  %v7019_v22 = vld [vmem:[#allocation30_spill] sm:$0xff]  ;;  %v3694_v40 = vpop.f32.mrf.mxu0 }
 0x304   : > { %v3408_v59 = vadd.f32 %v4941_v21, %v6355_v31  ;;  %v3883_v13 = vadd.f32 %v3882_v47, %v6665_v9  ;;  %v3349_v54 = vpop.f32.mrf.mxu1  ;;  %v6687_v41 = vmul.f32 %v6631_v49, %v7019_v22  ;;  %v7023_v22 = vld [vmem:[#allocation32_spill] sm:$0xff] }
 0x305   : > { %3818 = vst [vmem:[%s5233_s26 + $0xf0] sm:$0xff] %v6675_v6  ;;  %v6682_v60 = vadd.f32 %v6375_v17, %v3737_v61  ;;  %v3406_v24 = vadd.f32 %v3349_v54, %v6358_v16 }
 0x306   : > { %v3740_v8 = vadd.f32 %v4993_v15, %v3408_v59  ;;  %v3884_v43 = vadd.f32 %v3883_v13, %v6672_v37  ;;  %v4944_v31 = vpop.f32.mrf.mxu1  ;;  %v7021_v15 = vld [vmem:[#allocation29_spill] sm:$0xff] }
 0x307   : > { %3816 = vst [vmem:[%s5233_s26 + $0xe0] sm:$0xff] %v6682_v60  ;;  %v3738_v47 = vadd.f32 %v3681_v29, %v3406_v24  ;;  %v3411_v21 = vadd.f32 %v4944_v31, %v6361_v46  ;;  %v6698_v16 = vmul.f32 %v6649_v62, %v7021_v15  ;;  %v6709_v24 = vmul.f32 %v6682_v60, %v7023_v22  ;;  %v4997_v29 = vpop.f32.mrf.mxu0 }
 0x308   : > { %v6693_v25 = vadd.f32 %v6375_v17, %v3740_v8  ;;  %v3885_v61 = vadd.f32 %v3884_v43, %v6687_v41  ;;  %v3362_v59 = vpop.f32.mrf.mxu1  ;;  %v7024_v43 = vld [vmem:[#allocation31_spill] sm:$0xff] }
 0x309   : > { %v6704_v13 = vadd.f32 %v6375_v17, %v3738_v47  ;;  %v3743_v54 = vadd.f32 %v4996_v20, %v3411_v21  ;;  %v3409_v8 = vadd.f32 %v3362_v59, %v6364_v57 }
 0x30a   : > { %7020 = vst [vmem:[#allocation15_spill] sm:$0xff] %v6693_v25  ;;  %3819 = vst [vmem:[%s5233_s26 + $0xf8] sm:$0xff] %v6693_v25  ;;  %v3886_v46 = vadd.f32 %v3885_v61, %v6698_v16  ;;  %v4945_v31 = vpop.f32.mrf.mxu1 }
 0x30b   : > { %7022 = vst [vmem:[#allocation18_spill] sm:$0xff] %v6704_v13  ;;  %3817 = vst [vmem:[%s5233_s26 + $0xe8] sm:$0xff] %v6704_v13  ;;  %v6716_v15 = vmul.f32 %v6704_v13, %v7024_v43  ;;  %v6719_v47 = vadd.f32 %v6375_v17, %v3743_v54  ;;  %v3741_v20 = vadd.f32 %v3694_v40, %v3409_v8  ;;  %v7026_v13 = vld [vmem:[#allocation34_spill] sm:$0xff]  ;;  %v3697_v8 = vpop.f32.mrf.mxu0 }
 0x30c   : > { %v3412_v57 = vadd.f32 %v4945_v31, %v6367_v26  ;;  %v3887_v21 = vadd.f32 %v3886_v46, %v6709_v24  ;;  %v3365_v59 = vpop.f32.mrf.mxu1  ;;  %v6731_v54 = vmul.f32 %v6675_v6, %v7026_v13  ;;  %v7027_v31 = vld [vmem:[#allocation33_spill] sm:$0xff]  ;;  %v7030_v13 = vld [vmem:[#allocation36_spill] sm:$0xff] }
 0x30d   : > { %3822 = vst [vmem:[%s5233_s26 + $0x110] sm:$0xff] %v6719_v47  ;;  %v6726_v61 = vadd.f32 %v6375_v17, %v3741_v20  ;;  %v3410_v43 = vadd.f32 %v3365_v59, %v6370_v2  ;;  %v6741_v20 = vmul.f32 %v6693_v25, %v7027_v31  ;;  %v7031_v59 = vld [vmem:[#allocation35_spill] sm:$0xff] }
 0x30e   : > { %v3744_v22 = vadd.f32 %v4997_v29, %v3412_v57  ;;  %v3888_v40 = vadd.f32 %v3887_v21, %v6716_v15 }
 0x30f   : > { %7025 = vst [vmem:[#allocation17_spill] sm:$0xff] %v6726_v61  ;;  %3820 = vst [vmem:[%s5233_s26 + $0x100] sm:$0xff] %v6726_v61  ;;  %v3742_v46 = vadd.f32 %v3697_v8, %v3410_v43  ;;  %v6751_v57 = vmul.f32 %v6726_v61, %v7030_v13 }
 0x310   : > { %v6737_v26 = vadd.f32 %v6375_v17, %v3744_v22  ;;  %7028 = vst [vmem:[#allocation20_spill] sm:$0xff] %v6741_v20  ;;  %v3889_v29 = vadd.f32 %v3888_v40, %v6731_v54  ;;  %v7032_v40 = vld [vmem:[#allocation38_spill] sm:$0xff] }
 0x311   : > { %v6747_v2 = vadd.f32 %v6375_v17, %v3742_v46  ;;  %v6763_v8 = vmul.f32 %v6719_v47, %v7032_v40  ;;  %v7033_v46 = vld [vmem:[#allocation37_spill] sm:$0xff] }
 0x312   : > { %3823 = vst [vmem:[%s5233_s26 + $0x118] sm:$0xff] %v6737_v26  ;;  %v3890_v21 = vadd.f32 %v3889_v29, %v6741_v20  ;;  %v6768_v31 = vmul.f32 %v6737_v26, %v7033_v46 }
 0x313   : > { %7029 = vst [vmem:[#allocation19_spill] sm:$0xff] %v6747_v2  ;;  %3821 = vst [vmem:[%s5233_s26 + $0x108] sm:$0xff] %v6747_v2  ;;  %v6758_v22 = vmul.f32 %v6747_v2, %v7031_v59 }
 0x314   : > { %v3891_v43 = vadd.f32 %v3890_v21, %v6751_v57 }
 0x316   : > { %v3892_v17 = vadd.f32 %v3891_v43, %v6758_v22 }
 0x318   : > { %v3893_v29 = vadd.f32 %v3892_v17, %v6763_v8 }
 0x31a   : > { %v3894_v13 = vadd.f32 %v3893_v29, %v6768_v31 }
 0x31c   : > { %v3895_v61 = vrot.slane %v3894_v13, 4 }
 0x31e   : > { %v3896_v20 = vadd.f32 %v3895_v61, %v3894_v13 }
 0x320   : > { %v3897_v59 = vrot.slane %v3896_v20, 2 }
 0x322   : > { %v3898_v2 = vadd.f32 %v3897_v59, %v3896_v20 }
 0x324   : > { %v3899_v25 = vrot.slane %v3898_v2, 1  ;;  %3904 = sbr.rel (%p4091_p4) target bundleno = 811 (0x32b), region = 52 }
 0x326   : > { %v3900_v21 = vadd.f32 %v3899_v25, %v3898_v2 }
 0x328   : > { %3901 = vst [vmem:[%s335_s23] sm:$0x1] %v3900_v21 }
 0x329   : > { %v5146_v43 = vmov 0.0  }
 0x32a   : > { %3905 = vst [vmem:[%s6880_s8] sm:$0x1] %v5146_v43  ;;  %3906 = vst [vmem:[%s6881_s9] sm:$0x1] %v5146_v43 }
 0x32b PF: > { %v3911_v20 = vmul.f32 %v6402_v5, %v6385_v7  ;;  %v3912_v2 = vmul.f32 %v6408_v58, %v6397_v42  ;;  %v3913_v40 = vmul.f32 %v6416_v44, %v6379_v55  ;;  %v3914_v17 = vmul.f32 %v6428_v56, %v6391_v45  ;;  %v7034_v44 = vld [vmem:[#allocation4_spill] sm:$0xff] }
 0x32c   : > { %v3915_v29 = vmul.f32 %v6439_v30, %v6423_v39  ;;  %v3916_v59 = vmul.f32 %v6457_v53, %v6446_v33  ;;  %v3917_v7 = vmul.f32 %v6467_v38, %v6411_v23  ;;  %v3918_v42 = vmul.f32 %v6478_v4, %v6434_v14  ;;  %v7035_v30 = vld [vmem:[#allocation39_spill] sm:$0xff]  ;;  %v7036_v43 = vld [vmem:[#allocation40_spill] sm:$0xff] }
 0x32d   : > { %v3947_v46 = vadd.f32 %v3912_v2, %v3911_v20  ;;  %v3919_v45 = vmul.f32 %v6489_v36, %v6462_v11  ;;  %v3920_v39 = vmul.f32 %v6496_v3, %v7034_v44  ;;  %v3921_v33 = vmul.f32 %v6511_v12, %v7035_v30  ;;  %v7039_v20 = vld [vmem:[#allocation6_spill] sm:$0xff]  ;;  %v7047_v30 = vld [vmem:[#allocation13_spill] sm:$0xff] }
 0x32e   : > { %v3922_v23 = vmul.f32 %v6522_v32, %v7036_v43  ;;  %v3925_v3 = vmul.f32 %v6555_v19, %v7039_v20 }
 0x32f   : > { %v3948_v13 = vadd.f32 %v3947_v46, %v3913_v40  ;;  %v7040_v40 = vld [vmem:[#allocation5_spill] sm:$0xff]  ;;  %v7041_v46 = vld [vmem:[#allocation10_spill] sm:$0xff] }
 0x330   : > { %v3926_v12 = vmul.f32 %v6566_v28, %v7040_v40  ;;  %v3927_v32 = vmul.f32 %v6577_v18, %v7041_v46 }
 0x331   : > { %v3907_v25 = vld [vmem:[%s6880_s8] sm:$0x1] }
 0x332   : > { %v3908_v61 = vadd.f32 %v3907_v25, %v3900_v21  ;;  %v3949_v21 = vadd.f32 %v3948_v13, %v3914_v17  ;;  %v7037_v25 = vld [vmem:[#allocation3_spill] sm:$0xff]  ;;  %v7042_v13 = vld [vmem:[#allocation12_spill] sm:$0xff] }
 0x333   : > { %v3923_v14 = vmul.f32 %v6533_v51, %v7037_v25  ;;  %v3928_v51 = vmul.f32 %v6584_v0, %v7042_v13  ;;  %v3933_v0 = vmul.f32 %v6643_v27, %v6587_v63  ;;  %v3938_v63 = vmul.f32 %v6698_v16, %v6649_v62 }
 0x334   : > { %3909 = vst [vmem:[%s6880_s8] sm:$0x1] %v3908_v61  ;;  %v3950_v5 = vadd.f32 %v3949_v21, %v3915_v29  ;;  %v7038_v61 = vld [vmem:[#allocation8_spill] sm:$0xff]  ;;  %v7043_v21 = vld [vmem:[#allocation7_spill] sm:$0xff] }
 0x335   : > { %v3924_v11 = vmul.f32 %v6540_v1, %v7038_v61  ;;  %v3929_v1 = vmul.f32 %v6599_v34, %v7043_v21  ;;  %v3934_v34 = vmul.f32 %v6654_v35, %v6605_v52  ;;  %v3939_v52 = vmul.f32 %v6709_v24, %v6682_v60  ;;  %v7051_v61 = vld [vmem:[#allocation20_spill] sm:$0xff] }
 0x336   : > { %v3951_v55 = vadd.f32 %v3950_v5, %v3916_v59  ;;  %v7044_v5 = vld [vmem:[#allocation9_spill] sm:$0xff] }
 0x337   : > { %v3930_v19 = vmul.f32 %v6610_v48, %v7044_v5  ;;  %v3935_v48 = vmul.f32 %v6665_v9, %v7047_v30 }
 0x338   : > { %v3952_v58 = vadd.f32 %v3951_v55, %v3917_v7  ;;  %v7045_v55 = vld [vmem:[#allocation11_spill] sm:$0xff] }
 0x339   : > { %v3931_v28 = vmul.f32 %v6621_v50, %v7045_v55 }
 0x33a   : > { %v3953_v56 = vadd.f32 %v3952_v58, %v3918_v42  ;;  %v7046_v58 = vld [vmem:[#allocation14_spill] sm:$0xff] }
 0x33b   : > { %v3932_v18 = vmul.f32 %v6628_v10, %v7046_v58  ;;  %v3937_v10 = vmul.f32 %v6687_v41, %v6631_v49 }
 0x33c   : > { %v3954_v53 = vadd.f32 %v3953_v56, %v3919_v45 }
 0x33e   : > { %v3955_v38 = vadd.f32 %v3954_v53, %v3920_v39  ;;  %v7048_v53 = vld [vmem:[#allocation16_spill] sm:$0xff] }
 0x33f   : > { %v3936_v50 = vmul.f32 %v6672_v37, %v7048_v53  ;;  %v3941_v37 = vmul.f32 %v6731_v54, %v6675_v6  ;;  %v3946_v6 = vmul.f32 %v6768_v31, %v6737_v26 }
 0x340   : > { %v3956_v4 = vadd.f32 %v3955_v38, %v3921_v33  ;;  %v7049_v38 = vld [vmem:[#allocation18_spill] sm:$0xff] }
 0x341   : > { %v3940_v9 = vmul.f32 %v6716_v15, %v7049_v38  ;;  %v3945_v15 = vmul.f32 %v6763_v8, %v6719_v47 }
 0x342   : > { %v3957_v36 = vadd.f32 %v3956_v4, %v3922_v23  ;;  %v7050_v4 = vld [vmem:[#allocation15_spill] sm:$0xff] }
 0x343   : > { %v3942_v49 = vmul.f32 %v7051_v61, %v7050_v4 }
 0x344   : > { %v3958_v2 = vadd.f32 %v3957_v36, %v3923_v14  ;;  %v7053_v36 = vld [vmem:[#allocation19_spill] sm:$0xff] }
 0x345   : > { %v3944_v60 = vmul.f32 %v6758_v22, %v7053_v36  ;;  %v3910_v22 = vld [vmem:[%s6881_s9] sm:$0x1] }
 0x346   : > { %v3959_v17 = vadd.f32 %v3958_v2, %v3924_v11  ;;  %v7052_v11 = vld [vmem:[#allocation17_spill] sm:$0xff] }
 0x347   : > { %v3943_v62 = vmul.f32 %v6751_v57, %v7052_v11 }
 0x348   : > { %v3960_v29 = vadd.f32 %v3959_v17, %v3925_v3 }
 0x34a   : > { %v3961_v59 = vadd.f32 %v3960_v29, %v3926_v12 }
 0x34c   : > { %v3962_v7 = vadd.f32 %v3961_v59, %v3927_v32 }
 0x34e   : > { %v3963_v42 = vadd.f32 %v3962_v7, %v3928_v51 }
 0x350   : > { %v3964_v45 = vadd.f32 %v3963_v42, %v3929_v1 }
 0x352   : > { %v3965_v44 = vadd.f32 %v3964_v45, %v3930_v19 }
 0x354   : > { %v3966_v39 = vadd.f32 %v3965_v44, %v3931_v28 }
 0x356   : > { %v3967_v56 = vadd.f32 %v3966_v39, %v3932_v18 }
 0x358   : > { %v3968_v33 = vadd.f32 %v3967_v56, %v3933_v0 }
 0x35a   : > { %v3969_v43 = vadd.f32 %v3968_v33, %v3934_v34 }
 0x35c   : > { %v3970_v23 = vadd.f32 %v3969_v43, %v3935_v48 }
 0x35e   : > { %v3971_v27 = vadd.f32 %v3970_v23, %v3936_v50 }
 0x360   : > { %v3972_v35 = vadd.f32 %v3971_v27, %v3937_v10 }
 0x362   : > { %v3973_v25 = vadd.f32 %v3972_v35, %v3938_v63 }
 0x364   : > { %v3974_v14 = vadd.f32 %v3973_v25, %v3939_v52 }
 0x366   : > { %v3975_v41 = vadd.f32 %v3974_v14, %v3940_v9 }
 0x368   : > { %v3976_v16 = vadd.f32 %v3975_v41, %v3941_v37 }
 0x36a   : > { %v3977_v24 = vadd.f32 %v3976_v16, %v3942_v49 }
 0x36c   : > { %v3978_v20 = vadd.f32 %v3977_v24, %v3943_v62 }
 0x36e   : > { %v3979_v54 = vadd.f32 %v3978_v20, %v3944_v60 }
 0x370   : > { %v3980_v3 = vadd.f32 %v3979_v54, %v3945_v15 }
 0x372   : > { %v3981_v2 = vadd.f32 %v3980_v3, %v3946_v6 }
 0x374   : > { %v3982_v40 = vrot.slane %v3981_v2, 4 }
 0x376   : > { %v3983_v12 = vadd.f32 %v3982_v40, %v3981_v2 }
 0x378   : > { %v3984_v17 = vrot.slane %v3983_v12, 2 }
 0x37a   : > { %v3985_v46 = vadd.f32 %v3984_v17, %v3983_v12 }
 0x37c   : > { %v3986_v57 = vrot.slane %v3985_v46, 1 }
 0x37e   : > { %v3987_v32 = vadd.f32 %v3986_v57, %v3985_v46 }
 0x380   : > { %v3988_v29 = vadd.f32 %v3987_v32, %v3910_v22 }
 0x382   : > { %3989 = vst [vmem:[%s6881_s9] sm:$0x1] %v3988_v29 }
 0x383 PF: > { %s20_s30 = sadd.s32 1, %s5142_s30  }
 0x384   : > { %p17_p5 = scmp.ge.s32.totalorder %s20_s30, 4  }
 0x386   :  { %19 = sbr.rel (!%p17_p5) target bundleno = 1 (0x1), region = 118 }

// kernel: ice_se_basic_block.4
= control target key start
LH: loop header
LB: loop body
LE: loop exit
PB: predicated region body
PF: predicated region fallthrough
CT: control target
= control target key end

     0   :  { %s5502_s13 = smov 0   ;;  %s7610_s0 = inlined_call_operand.vmem [shape: f32[2,342,128], index: 0, kind: input, shape index: {}]   ;;  %s7611_s1 = inlined_call_operand.vmem [shape: bf16[9,128,128], index: 1, kind: input, shape index: {}]   ;;  %s7612_s2 = inlined_call_operand.vmem [shape: f32[1,128], index: 2, kind: input, shape index: {}]   ;;  %s7613_s3 = inlined_call_operand.vmem [shape: bf16[128,128], index: 3, kind: input, shape index: {}]   ;;  %s7614_s4 = inlined_call_operand.vmem [shape: f32[288,1], index: 4, kind: input, shape index: {}]   ;;  %s7615_s5 = inlined_call_operand.vmem [shape: f32[2,288,128], index: 5, kind: output, shape index: {0}]   ;;  %s7616_s6 = inlined_call_operand.vmem [shape: f32[2,288,128], index: 6, kind: output, shape index: {1}]   ;;  %s7617_s7 = inlined_call_operand.vmem [shape: f32[1,128], index: 7, kind: output, shape index: {2}]   ;;  %s7618_s8 = inlined_call_operand.vmem [shape: f32[1,128], index: 8, kind: output, shape index: {3}]   ;;  %s7619_s9 = inlined_call_operand.vmem [shape: f32[1,128], index: 9, kind: output, shape index: {4}]   ;;  %s7620_s10 = inlined_call_operand.vmem [shape: f32[1,128], index: 10, kind: output, shape index: {5}]  }
   0x1 LB: > { %s5508_s14 = sadd.s32 4294967295, %s5443_s13   ;;  %p4347_p0 = scmp.ge.s32.totalorder %s5443_s13, 1  ;;  %s5443_s13 = sphi %s5502_s13, %s21_s13  }
   0x2   : > { %p303_p1 = scmp.lt.s32.totalorder %s5443_s13, 3 }
   0x4   : > { %p304_p2 = pnand %p4347_p0, %p303_p1 }
   0x6   : > { %307 = sbr.rel (%p304_p2) target bundleno = 719 (0x2cf), region = 40 }
   0xb   : > { %v5357_v0 = vld [vmem:[%s7611_s1 + $0x78] sm:$0xff]   ;;  %p346_p3 = scmp.lt.s32.totalorder %s5508_s14, 1  ;;  %v5359_v2 = vld [vmem:[%s7611_s1 + $0x70] sm:$0xff]   ;;  %v5361_v4 = vld [vmem:[%s7611_s1 + $0x68] sm:$0xff]   ;;  %p4560_p4 = scmp.ne.s32.totalorder %s5508_s14, 0 }
   0xc   : > { %v5358_v1 = vld [vmem:[%s7611_s1 + $0x38] sm:$0xff]   ;;  %4823 = vmatprep.subr.bf16.mxu0 %v5357_v0  ;;  %v5360_v3 = vld [vmem:[%s7611_s1 + $0x30] sm:$0xff]   ;;  %v5362_v5 = vld [vmem:[%s7611_s1 + $0x28] sm:$0xff]  }
   0xd   : > { %4875 = vmatprep.subr.bf16.mxu1 %v5358_v1  ;;  %4824 = vmatpush3.bf16.msra.mxu0 %v5357_v0  ;;  %s5532_s27 = scalar_select %p346_p3, %s5508_s14, 1  ;;  %v5363_v6 = vld [vmem:[%s7611_s1 + $0x60] sm:$0xff]   ;;  %v5365_v8 = vld [vmem:[%s7611_s1 + $0x58] sm:$0xff]   ;;  %v5367_v10 = vld [vmem:[%s7611_s1 + $0x50] sm:$0xff]  }
   0xe   : > { %4876 = vmatpush3.bf16.msra.mxu1 %v5358_v1  ;;  %4825 = vmatprep.subr.bf16.mxu0 %v5359_v2  ;;  %v5364_v7 = vld [vmem:[%s7611_s1 + $0x20] sm:$0xff]   ;;  %v5366_v9 = vld [vmem:[%s7611_s1 + $0x18] sm:$0xff]   ;;  %v5368_v14 = vld [vmem:[%s7611_s1 + $0x10] sm:$0xff]  }
   0xf   : > { %4877 = vmatprep.subr.bf16.mxu1 %v5360_v3  ;;  %s5343_s12 = smul.u32 344, %s5532_s27  ;;  %v5369_v18 = vld [vmem:[%s7611_s1 + $0x48] sm:$0xff]   ;;  %v5371_v20 = vld [vmem:[%s7611_s1 + $0x40] sm:$0xff]   ;;  %v5373_v26 = vld [vmem:[%s7611_s1 + $0xb8] sm:$0xff]  }
  0x10   : > { %v5370_v19 = vld [vmem:[%s7611_s1 + $0x8] sm:$0xff]   ;;  %v5372_v21 = vld [vmem:[%s7611_s1] sm:$0xff]   ;;  %v5374_v27 = vld [vmem:[%s7611_s1 + $0xf8] sm:$0xff]  }
  0x11   : > { %4826 = vmatpush3.bf16.msra.mxu0 %v5359_v2  ;;  %s5550_s21 = scalar_lea.vmem %s7610_s0, %s5343_s12  ;;  %v5375_v38 = vld [vmem:[%s7611_s1 + $0xb0] sm:$0xff]   ;;  %v5377_v46 = vld [vmem:[%s7611_s1 + $0xa8] sm:$0xff]   ;;  %v5379_v53 = vld [vmem:[%s7611_s1 + $0xa0] sm:$0xff]  }
  0x12   : > { %4878 = vmatpush3.bf16.msra.mxu1 %v5360_v3  ;;  %4827 = vmatprep.subr.bf16.mxu0 %v5361_v4  ;;  %v432_v11 = vld [vmem:[%s5550_s21 + $0x1] sm:$0xff]  ;;  %v433_v12 = vld [vmem:[%s5550_s21 + $0x9] sm:$0xff]  ;;  %v434_v22 = vld [vmem:[%s5550_s21 + $0x11] sm:$0xff] }
  0x13   : > { %4879 = vmatprep.subr.bf16.mxu1 %v5362_v5  ;;  %v362_v13 = vld [vmem:[%s5550_s21] sm:$0xff]  ;;  %v468_v15 = vpack.c.bf16 %v433_v12, %v432_v11  ;;  %v363_v16 = vld [vmem:[%s5550_s21 + $0x8] sm:$0xff]  ;;  %v364_v24 = vld [vmem:[%s5550_s21 + $0x10] sm:$0xff] }
  0x14   : > { %v398_v17 = vpack.c.bf16 %v363_v16, %v362_v13  ;;  %v435_v23 = vld [vmem:[%s5550_s21 + $0x19] sm:$0xff]  ;;  %v436_v28 = vld [vmem:[%s5550_s21 + $0x21] sm:$0xff]  ;;  %v437_v29 = vld [vmem:[%s5550_s21 + $0x29] sm:$0xff] }
  0x15   : > { %4828 = vmatpush3.bf16.msra.mxu0 %v5361_v4  ;;  %4839 = vmatprep.mubr.bf16.mxu0 %v468_v15  ;;  %v365_v25 = vld [vmem:[%s5550_s21 + $0x18] sm:$0xff]  ;;  %v469_v30 = vpack.c.bf16 %v435_v23, %v434_v22  ;;  %v366_v31 = vld [vmem:[%s5550_s21 + $0x20] sm:$0xff]  ;;  %v367_v32 = vld [vmem:[%s5550_s21 + $0x28] sm:$0xff]  ;;  %v470_v34 = vpack.c.bf16 %v437_v29, %v436_v28 }
  0x16   : > { %4880 = vmatpush3.bf16.msra.mxu1 %v5362_v5  ;;  %4829 = vmatprep.subr.bf16.mxu0 %v5363_v6  ;;  %v399_v33 = vpack.c.bf16 %v365_v25, %v364_v24  ;;  %v400_v35 = vpack.c.bf16 %v367_v32, %v366_v31  ;;  %v438_v36 = vld [vmem:[%s5550_s21 + $0x31] sm:$0xff]  ;;  %v439_v37 = vld [vmem:[%s5550_s21 + $0x39] sm:$0xff]  ;;  %v440_v42 = vld [vmem:[%s5550_s21 + $0x41] sm:$0xff] }
  0x17   : > { %4881 = vmatprep.subr.bf16.mxu1 %v5364_v7  ;;  %4891 = vmatprep.mubr.bf16.mxu1 %v398_v17  ;;  %v368_v39 = vld [vmem:[%s5550_s21 + $0x30] sm:$0xff]  ;;  %v369_v40 = vld [vmem:[%s5550_s21 + $0x38] sm:$0xff]  ;;  %v370_v44 = vld [vmem:[%s5550_s21 + $0x40] sm:$0xff]  ;;  %v471_v48 = vpack.c.bf16 %v439_v37, %v438_v36 }
  0x18   : > { %v5376_v41 = vld [vmem:[%s7611_s1 + $0xf0] sm:$0xff]   ;;  %v371_v45 = vld [vmem:[%s5550_s21 + $0x48] sm:$0xff]  ;;  %v401_v49 = vpack.c.bf16 %v369_v40, %v368_v39  ;;  %v5380_v54 = vld [vmem:[%s7611_s1 + $0xe0] sm:$0xff]  }
  0x19   : > { %4830 = vmatpush3.bf16.msra.mxu0 %v5363_v6  ;;  %v441_v43 = vld [vmem:[%s5550_s21 + $0x49] sm:$0xff]  ;;  %v402_v51 = vpack.c.bf16 %v371_v45, %v370_v44  ;;  %v442_v52 = vld [vmem:[%s5550_s21 + $0x51] sm:$0xff]  ;;  %v443_v55 = vld [vmem:[%s5550_s21 + $0x59] sm:$0xff] }
  0x1a   : > { %4882 = vmatpush3.bf16.msra.mxu1 %v5364_v7  ;;  %4831 = vmatprep.subr.bf16.mxu0 %v5365_v8  ;;  %v5378_v47 = vld [vmem:[%s7611_s1 + $0xe8] sm:$0xff]   ;;  %v472_v50 = vpack.c.bf16 %v441_v43, %v440_v42  ;;  %v372_v56 = vld [vmem:[%s5550_s21 + $0x50] sm:$0xff]  ;;  %v373_v57 = vld [vmem:[%s5550_s21 + $0x58] sm:$0xff]  ;;  %v473_v63 = vpack.c.bf16 %v443_v55, %v442_v52 }
  0x1b   : > { %4883 = vmatprep.subr.bf16.mxu1 %v5366_v9  ;;  %v444_v58 = vld [vmem:[%s5550_s21 + $0x61] sm:$0xff]  ;;  %v445_v59 = vld [vmem:[%s5550_s21 + $0x69] sm:$0xff]  ;;  %v5381_v62 = vld [vmem:[%s7611_s1 + $0x98] sm:$0xff]   ;;  %v403_v1 = vpack.c.bf16 %v373_v57, %v372_v56 }
  0x1c   : > { %v374_v60 = vld [vmem:[%s5550_s21 + $0x60] sm:$0xff]  ;;  %v375_v61 = vld [vmem:[%s5550_s21 + $0x68] sm:$0xff]  ;;  %v5382_v0 = vld [vmem:[%s7611_s1 + $0xd8] sm:$0xff]   ;;  %v474_v2 = vpack.c.bf16 %v445_v59, %v444_v58 }
  0x1d   : > { %4832 = vmatpush3.bf16.msra.mxu0 %v5365_v8  ;;  %v404_v3 = vpack.c.bf16 %v375_v61, %v374_v60  ;;  %v446_v4 = vld [vmem:[%s5550_s21 + $0x71] sm:$0xff]  ;;  %v447_v5 = vld [vmem:[%s5550_s21 + $0x79] sm:$0xff]  ;;  %v449_v11 = vld [vmem:[%s5550_s21 + $0x89] sm:$0xff] }
  0x1e   : > { %4884 = vmatpush3.bf16.msra.mxu1 %v5366_v9  ;;  %4833 = vmatprep.subr.bf16.mxu0 %v5367_v10  ;;  %v5383_v6 = vld [vmem:[%s7611_s1 + $0x90] sm:$0xff]   ;;  %v377_v9 = vld [vmem:[%s5550_s21 + $0x78] sm:$0xff]  ;;  %v378_v12 = vld [vmem:[%s5550_s21 + $0x80] sm:$0xff]  ;;  %v475_v15 = vpack.c.bf16 %v447_v5, %v446_v4 }
  0x1f   : > { %4885 = vmatprep.subr.bf16.mxu1 %v5368_v14  ;;  %v5384_v7 = vld [vmem:[%s7611_s1 + $0xd0] sm:$0xff]   ;;  %v379_v13 = vld [vmem:[%s5550_s21 + $0x88] sm:$0xff]  ;;  %v5387_v22 = vld [vmem:[%s7611_s1 + $0x80] sm:$0xff]  }
  0x20   : > { %v376_v8 = vld [vmem:[%s5550_s21 + $0x70] sm:$0xff]  ;;  %v5386_v16 = vld [vmem:[%s7611_s1 + $0xc8] sm:$0xff]   ;;  %v381_v24 = vld [vmem:[%s5550_s21 + $0x98] sm:$0xff] }
  0x21   : > { %4834 = vmatpush3.bf16.msra.mxu0 %v5367_v10  ;;  %v448_v10 = vld [vmem:[%s5550_s21 + $0x81] sm:$0xff]  ;;  %v405_v17 = vpack.c.bf16 %v377_v9, %v376_v8  ;;  %v380_v23 = vld [vmem:[%s5550_s21 + $0x90] sm:$0xff]  ;;  %v5670_v32 = vld [vmem:[%s7611_s1 + $0x178] sm:$0xff]  }
  0x22   : > { %4886 = vmatpush3.bf16.msra.mxu1 %v5368_v14  ;;  %4835 = vmatprep.subr.bf16.mxu0 %v5369_v18  ;;  %v5385_v14 = vld [vmem:[%s7611_s1 + $0x88] sm:$0xff]   ;;  %v5388_v25 = vld [vmem:[%s7611_s1 + $0xc0] sm:$0xff]   ;;  %v454_v36 = vld [vmem:[%s5550_s21 + $0xb1] sm:$0xff] }
  0x23   : > { %4887 = vmatprep.subr.bf16.mxu1 %v5370_v19  ;;  %v382_v28 = vld [vmem:[%s5550_s21 + $0xa0] sm:$0xff]  ;;  %v383_v29 = vld [vmem:[%s5550_s21 + $0xa8] sm:$0xff]  ;;  %v385_v39 = vld [vmem:[%s5550_s21 + $0xb8] sm:$0xff] }
  0x24   : > { %v455_v37 = vld [vmem:[%s5550_s21 + $0xb9] sm:$0xff]  ;;  %v456_v40 = vld [vmem:[%s5550_s21 + $0xc1] sm:$0xff]  ;;  %v462_v60 = vld [vmem:[%s5550_s21 + $0xf1] sm:$0xff] }
  0x25   : > { %4836 = vmatpush3.bf16.msra.mxu0 %v5369_v18  ;;  %v476_v18 = vpack.c.bf16 %v449_v11, %v448_v10  ;;  %v386_v42 = vld [vmem:[%s5550_s21 + $0xc0] sm:$0xff]  ;;  %v387_v43 = vld [vmem:[%s5550_s21 + $0xc8] sm:$0xff]  ;;  %v479_v44 = vpack.c.bf16 %v455_v37, %v454_v36  ;;  %v466_v8 = vld [vmem:[%s5550_s21 + $0x111] sm:$0xff] }
  0x26   : > { %4888 = vmatpush3.bf16.msra.mxu1 %v5370_v19  ;;  %4837 = vmatprep.subr.bf16.mxu0 %v5371_v20  ;;  %v406_v19 = vpack.c.bf16 %v379_v13, %v378_v12  ;;  %v460_v52 = vld [vmem:[%s5550_s21 + $0xe1] sm:$0xff]  ;;  %v463_v61 = vld [vmem:[%s5550_s21 + $0xf9] sm:$0xff]  ;;  %v396_v10 = vld [vmem:[%s5550_s21 + $0x110] sm:$0xff] }
  0x27   : > { %4889 = vmatprep.subr.bf16.mxu1 %v5372_v21  ;;  %v391_v55 = vld [vmem:[%s5550_s21 + $0xe8] sm:$0xff]  ;;  %v483_v4 = vpack.c.bf16 %v463_v61, %v462_v60  ;;  %v467_v9 = vld [vmem:[%s5550_s21 + $0x119] sm:$0xff] }
  0x28   : > { %v397_v11 = vld [vmem:[%s5550_s21 + $0x118] sm:$0xff]  ;;  %v953_v12 = vld [vmem:[%s5550_s21 + $0x2] sm:$0xff]  ;;  %v954_v13 = vld [vmem:[%s5550_s21 + $0xa] sm:$0xff] }
  0x29   : > { %4838 = vmatpush3.bf16.msra.mxu0 %v5371_v20  ;;  %v450_v20 = vld [vmem:[%s5550_s21 + $0x91] sm:$0xff]  ;;  %v5395_v36 = vld [vmem:[%s7611_s1 + $0x120] sm:$0xff]  }
  0x2a   : > { %4890 = vmatpush3.bf16.msra.mxu1 %v5372_v21  ;;  %4927 = vmatprep.subr.bf16.mxu0 %v5373_v26  ;;  %v451_v21 = vld [vmem:[%s5550_s21 + $0x99] sm:$0xff] }
  0x2b   : > { %4979 = vmatprep.subr.bf16.mxu1 %v5374_v27  ;;  %v477_v31 = vpack.c.bf16 %v451_v21, %v450_v20  ;;  %v1287_v20 = vld [vmem:[%s5550_s21 + $0x22] sm:$0xff]  ;;  %v1288_v21 = vld [vmem:[%s5550_s21 + $0x2a] sm:$0xff]  ;;  %v1305_v60 = vld [vmem:[%s5550_s21 + $0xb2] sm:$0xff] }
  0x2c   : > { %4840 = vmatmul.mubr.bf16.vlgmr.msra.gmra.mxu0 %v469_v30  ;;  %v5665_v30 = vld [vmem:[%s7611_s1 + $0x138] sm:$0xff]   ;;  %v5396_v37 = vld [vmem:[%s7611_s1 + $0x160] sm:$0xff]  }
  0x2d   : > { %4892 = vmatmul.mubr.bf16.vlgmr.msra.gmra.mxu1 %v399_v33  ;;  %4928 = vmatpush3.bf16.msra.mxu0 %v5373_v26  ;;  %v452_v26 = vld [vmem:[%s5550_s21 + $0xa1] sm:$0xff]  ;;  %v407_v33 = vpack.c.bf16 %v381_v24, %v380_v23  ;;  %v1322_v24 = vpack.c.bf16 %v1288_v21, %v1287_v20  ;;  %v1320_v21 = vld [vmem:[%s5550_s21 + $0x12a] sm:$0xff] }
  0x2e   : > { %4980 = vmatpush3.bf16.msra.mxu1 %v5374_v27  ;;  %4843 = vmatprep.mubr.bf16.mxu0 %v470_v34  ;;  %v453_v27 = vld [vmem:[%s5550_s21 + $0xa9] sm:$0xff]  ;;  %v1290_v23 = vld [vmem:[%s5550_s21 + $0x3a] sm:$0xff] }
  0x2f   : > { %4895 = vmatprep.mubr.bf16.mxu1 %v400_v35  ;;  %4929 = vmatprep.subr.bf16.mxu0 %v5375_v38  ;;  %v478_v34 = vpack.c.bf16 %v453_v27, %v452_v26  ;;  %v408_v35 = vpack.c.bf16 %v383_v29, %v382_v28  ;;  %v5391_v26 = vld [vmem:[%s7611_s1 + $0x130] sm:$0xff]   ;;  %v1291_v28 = vld [vmem:[%s5550_s21 + $0x42] sm:$0xff]  ;;  %v1306_v61 = vld [vmem:[%s5550_s21 + $0xba] sm:$0xff] }
  0x30   : > { %4981 = vmatprep.subr.bf16.mxu1 %v5376_v41  ;;  %v5392_v27 = vld [vmem:[%s7611_s1 + $0x170] sm:$0xff]   ;;  %v1319_v20 = vld [vmem:[%s5550_s21 + $0x122] sm:$0xff] }
  0x31   : > { %4930 = vmatpush3.bf16.msra.mxu0 %v5375_v38  ;;  %v384_v38 = vld [vmem:[%s5550_s21 + $0xb0] sm:$0xff] }
  0x32   : > { %4982 = vmatpush3.bf16.msra.mxu1 %v5376_v41  ;;  %4931 = vmatprep.subr.bf16.mxu0 %v5377_v46  ;;  %v457_v41 = vld [vmem:[%s5550_s21 + $0xc9] sm:$0xff]  ;;  %v409_v45 = vpack.c.bf16 %v385_v39, %v384_v38 }
  0x33   : > { %4983 = vmatprep.subr.bf16.mxu1 %v5378_v47  ;;  %v1292_v29 = vld [vmem:[%s5550_s21 + $0x4a] sm:$0xff]  ;;  %v1295_v38 = vld [vmem:[%s5550_s21 + $0x62] sm:$0xff] }
  0x34   : > { %4844 = vmatmul.mubr.bf16.gmra.mxu0 %v471_v48  ;;  %v458_v48 = vld [vmem:[%s5550_s21 + $0xd1] sm:$0xff] }
  0x35   : > { %4896 = vmatmul.mubr.bf16.gmra.mxu1 %v401_v49  ;;  %4847 = vmatprep.mubr.bf16.mxu0 %v472_v50  ;;  %v459_v49 = vld [vmem:[%s5550_s21 + $0xd9] sm:$0xff]  ;;  %v388_v50 = vld [vmem:[%s5550_s21 + $0xd0] sm:$0xff] }
  0x36   : > { %4899 = vmatprep.mubr.bf16.mxu1 %v402_v51  ;;  %4932 = vmatpush3.bf16.msra.mxu0 %v5377_v46  ;;  %v480_v46 = vpack.c.bf16 %v457_v41, %v456_v40  ;;  %v389_v51 = vld [vmem:[%s5550_s21 + $0xd8] sm:$0xff]  ;;  %v481_v56 = vpack.c.bf16 %v459_v49, %v458_v48  ;;  %v1296_v39 = vld [vmem:[%s5550_s21 + $0x6a] sm:$0xff]  ;;  %v1299_v48 = vld [vmem:[%s5550_s21 + $0x82] sm:$0xff] }
  0x37   : > { %4984 = vmatpush3.bf16.msra.mxu1 %v5378_v47  ;;  %4933 = vmatprep.subr.bf16.mxu0 %v5379_v53  ;;  %v410_v47 = vpack.c.bf16 %v387_v43, %v386_v42  ;;  %v411_v57 = vpack.c.bf16 %v389_v51, %v388_v50  ;;  %v1297_v40 = vld [vmem:[%s5550_s21 + $0x72] sm:$0xff]  ;;  %v1298_v41 = vld [vmem:[%s5550_s21 + $0x7a] sm:$0xff]  ;;  %v1300_v49 = vld [vmem:[%s5550_s21 + $0x8a] sm:$0xff] }
  0x38   : > { %4985 = vmatprep.subr.bf16.mxu1 %v5380_v54  ;;  %v5397_v42 = vld [vmem:[%s7611_s1 + $0x118] sm:$0xff]  }
  0x39   : > { %v5398_v43 = vld [vmem:[%s7611_s1 + $0x158] sm:$0xff]  }
  0x3a   : > { %4934 = vmatpush3.bf16.msra.mxu0 %v5379_v53  ;;  %v461_v53 = vld [vmem:[%s5550_s21 + $0xe9] sm:$0xff]  ;;  %v1301_v50 = vld [vmem:[%s5550_s21 + $0x92] sm:$0xff]  ;;  %v1302_v51 = vld [vmem:[%s5550_s21 + $0x9a] sm:$0xff] }
  0x3b   : > { %4986 = vmatpush3.bf16.msra.mxu1 %v5380_v54  ;;  %4935 = vmatprep.subr.bf16.mxu0 %v5381_v62  ;;  %v390_v54 = vld [vmem:[%s5550_s21 + $0xe0] sm:$0xff]  ;;  %v482_v58 = vpack.c.bf16 %v461_v53, %v460_v52  ;;  %v5401_v52 = vld [vmem:[%s7611_s1 + $0x108] sm:$0xff]  }
  0x3c   : > { %4848 = vmatmul.mubr.bf16.gmra.mxu0 %v473_v63  ;;  %4987 = vmatprep.subr.bf16.mxu1 %v5382_v0  ;;  %v412_v59 = vpack.c.bf16 %v391_v55, %v390_v54  ;;  %v393_v63 = vld [vmem:[%s5550_s21 + $0xf8] sm:$0xff]  ;;  %v5402_v53 = vld [vmem:[%s7611_s1 + $0x148] sm:$0xff]   ;;  %v1328_v54 = vpack.c.bf16 %v1300_v49, %v1299_v48  ;;  %v1329_v55 = vpack.c.bf16 %v1302_v51, %v1301_v50 }
  0x3d   : > { %4900 = vmatmul.mubr.bf16.gmra.mxu1 %v403_v1  ;;  %4851 = vmatprep.mubr.bf16.mxu0 %v474_v2  ;;  %v465_v1 = vld [vmem:[%s5550_s21 + $0x109] sm:$0xff]  ;;  %v394_v2 = vld [vmem:[%s5550_s21 + $0x100] sm:$0xff]  ;;  %v1957_v50 = vld [vmem:[%s5550_s21 + $0x54] sm:$0xff] }
  0x3e   : > { %4903 = vmatprep.mubr.bf16.mxu1 %v404_v3  ;;  %4936 = vmatpush3.bf16.msra.mxu0 %v5381_v62  ;;  %v392_v62 = vld [vmem:[%s5550_s21 + $0xf0] sm:$0xff]  ;;  %v395_v3 = vld [vmem:[%s5550_s21 + $0x108] sm:$0xff]  ;;  %v1626_v48 = vld [vmem:[%s5550_s21 + $0x5b] sm:$0xff] }
  0x3f   : > { %4988 = vmatpush3.bf16.msra.mxu1 %v5382_v0  ;;  %4937 = vmatprep.subr.bf16.mxu0 %v5383_v6  ;;  %v464_v0 = vld [vmem:[%s5550_s21 + $0x101] sm:$0xff]  ;;  %v413_v5 = vpack.c.bf16 %v393_v63, %v392_v62  ;;  %v5773_v62 = vld [vmem:[%s7611_s1 + $0x1b8] sm:$0xff]  }
  0x40   : > { %4989 = vmatprep.subr.bf16.mxu1 %v5384_v7  ;;  %v5778_v63 = vld [vmem:[%s7611_s1 + $0x1f8] sm:$0xff]   ;;  %v5409_v49 = vld [vmem:[%s7611_s1 + $0x1a8] sm:$0xff]  }
  0x41   : > { %v1958_v51 = vld [vmem:[%s5550_s21 + $0x5c] sm:$0xff] }
  0x42   : > { %4938 = vmatpush3.bf16.msra.mxu0 %v5383_v6  ;;  %v484_v6 = vpack.c.bf16 %v465_v1, %v464_v0  ;;  %v1331_v1 = vpack.c.bf16 %v1306_v61, %v1305_v60  ;;  %v1628_v60 = vld [vmem:[%s5550_s21 + $0x6b] sm:$0xff] }
  0x43   : > { %4990 = vmatpush3.bf16.msra.mxu1 %v5384_v7  ;;  %4939 = vmatprep.subr.bf16.mxu0 %v5385_v14  ;;  %v414_v7 = vpack.c.bf16 %v395_v3, %v394_v2  ;;  %v1307_v2 = vld [vmem:[%s5550_s21 + $0xc2] sm:$0xff]  ;;  %v1308_v3 = vld [vmem:[%s5550_s21 + $0xca] sm:$0xff] }
  0x44   : > { %4852 = vmatmul.mubr.bf16.gmra.mxu0 %v475_v15  ;;  %4991 = vmatprep.subr.bf16.mxu1 %v5386_v16  ;;  %v1286_v15 = vld [vmem:[%s5550_s21 + $0x1a] sm:$0xff]  ;;  %v1959_v61 = vld [vmem:[%s5550_s21 + $0x64] sm:$0xff] }
  0x45   : > { %4904 = vmatmul.mubr.bf16.gmra.mxu1 %v405_v17  ;;  %4855 = vmatprep.mubr.bf16.mxu0 %v476_v18  ;;  %v415_v17 = vpack.c.bf16 %v397_v11, %v396_v10  ;;  %v989_v18 = vpack.c.bf16 %v954_v13, %v953_v12  ;;  %v1313_v10 = vld [vmem:[%s5550_s21 + $0xf2] sm:$0xff]  ;;  %v1314_v11 = vld [vmem:[%s5550_s21 + $0xfa] sm:$0xff] }
  0x46   : > { %4907 = vmatprep.mubr.bf16.mxu1 %v406_v19  ;;  %4940 = vmatpush3.bf16.msra.mxu0 %v5385_v14  ;;  %v1285_v14 = vld [vmem:[%s5550_s21 + $0x12] sm:$0xff]  ;;  %v1335_v13 = vpack.c.bf16 %v1314_v11, %v1313_v10  ;;  %v1631_v11 = vld [vmem:[%s5550_s21 + $0x83] sm:$0xff] }
  0x47   : > { %4992 = vmatpush3.bf16.msra.mxu1 %v5386_v16  ;;  %4941 = vmatprep.subr.bf16.mxu0 %v5387_v22  ;;  %v485_v16 = vpack.c.bf16 %v467_v9, %v466_v8  ;;  %v1321_v19 = vpack.c.bf16 %v1286_v15, %v1285_v14  ;;  %v1311_v8 = vld [vmem:[%s5550_s21 + $0xe2] sm:$0xff]  ;;  %v1312_v9 = vld [vmem:[%s5550_s21 + $0xea] sm:$0xff] }
  0x48   : > { %4993 = vmatprep.subr.bf16.mxu1 %v5388_v25  ;;  %v1334_v12 = vpack.c.bf16 %v1312_v9, %v1311_v8  ;;  %v1315_v14 = vld [vmem:[%s5550_s21 + $0x102] sm:$0xff]  ;;  %v1316_v15 = vld [vmem:[%s5550_s21 + $0x10a] sm:$0xff] }
  0x49   : > { %v5415_v9 = vld [vmem:[%s7611_s1 + $0x190] sm:$0xff]  }
  0x4a   : > { %4942 = vmatpush3.bf16.msra.mxu0 %v5387_v22  ;;  %v1289_v22 = vld [vmem:[%s5550_s21 + $0x32] sm:$0xff] }
  0x4b   : > { %4994 = vmatpush3.bf16.msra.mxu1 %v5388_v25  ;;  %5031 = vmatprep.subr.bf16.mxu0 %v5665_v30  ;;  %v1323_v25 = vpack.c.bf16 %v1290_v23, %v1289_v22  ;;  %v1617_v22 = vld [vmem:[%s5550_s21 + $0x13] sm:$0xff]  ;;  %v1618_v23 = vld [vmem:[%s5550_s21 + $0x1b] sm:$0xff] }
  0x4c   : > { %4856 = vmatmul.mubr.bf16.gmra.mxu0 %v477_v31  ;;  %5083 = vmatprep.subr.bf16.mxu1 %v5670_v32  ;;  %v1293_v31 = vld [vmem:[%s5550_s21 + $0x52] sm:$0xff] }
  0x4d   : > { %4908 = vmatmul.mubr.bf16.gmra.mxu1 %v407_v33  ;;  %4859 = vmatprep.mubr.bf16.mxu0 %v478_v34  ;;  %v5393_v33 = vld [vmem:[%s7611_s1 + $0x128] sm:$0xff]   ;;  %v1294_v34 = vld [vmem:[%s5550_s21 + $0x5a] sm:$0xff]  ;;  %v5416_v10 = vld [vmem:[%s7611_s1 + $0x1d0] sm:$0xff]  }
  0x4e   : > { %4911 = vmatprep.mubr.bf16.mxu1 %v408_v35  ;;  %v5394_v35 = vld [vmem:[%s7611_s1 + $0x168] sm:$0xff]  }
  0x54   : > { %4860 = vmatmul.mubr.bf16.gmra.mxu0 %v479_v44  ;;  %v1326_v44 = vpack.c.bf16 %v1296_v39, %v1295_v38 }
  0x55   : > { %4912 = vmatmul.mubr.bf16.gmra.mxu1 %v409_v45  ;;  %4863 = vmatprep.mubr.bf16.mxu0 %v480_v46  ;;  %v1327_v45 = vpack.c.bf16 %v1298_v41, %v1297_v40  ;;  %v5399_v46 = vld [vmem:[%s7611_s1 + $0x110] sm:$0xff]  }
  0x56   : > { %4915 = vmatprep.mubr.bf16.mxu1 %v410_v47  ;;  %v5400_v47 = vld [vmem:[%s7611_s1 + $0x150] sm:$0xff]  }
  0x57   : > { %v5407_v41 = vld [vmem:[%s7611_s1 + $0x1b0] sm:$0xff]  }
  0x5c   : > { %4864 = vmatmul.mubr.bf16.gmra.mxu0 %v481_v56  ;;  %v5403_v56 = vld [vmem:[%s7611_s1 + $0x100] sm:$0xff]  }
  0x5d   : > { %4916 = vmatmul.mubr.bf16.gmra.mxu1 %v411_v57  ;;  %4867 = vmatprep.mubr.bf16.mxu0 %v482_v58  ;;  %v5404_v57 = vld [vmem:[%s7611_s1 + $0x140] sm:$0xff]  }
  0x5e   : > { %4919 = vmatprep.mubr.bf16.mxu1 %v412_v59  ;;  %v1303_v58 = vld [vmem:[%s5550_s21 + $0xa2] sm:$0xff]  ;;  %v1304_v59 = vld [vmem:[%s5550_s21 + $0xaa] sm:$0xff] }
  0x5f   : > { %v1330_v0 = vpack.c.bf16 %v1304_v59, %v1303_v58  ;;  %v5412_v58 = vld [vmem:[%s7611_s1 + $0x1e0] sm:$0xff]  }
  0x60   : > { %v1627_v59 = vld [vmem:[%s5550_s21 + $0x63] sm:$0xff] }
  0x64   : > { %4868 = vmatmul.mubr.bf16.gmra.mxu0 %v483_v4  ;;  %v1309_v4 = vld [vmem:[%s5550_s21 + $0xd2] sm:$0xff] }
  0x65   : > { %4920 = vmatmul.mubr.bf16.gmra.mxu1 %v413_v5  ;;  %4871 = vmatprep.mubr.bf16.mxu0 %v484_v6  ;;  %v1310_v5 = vld [vmem:[%s5550_s21 + $0xda] sm:$0xff]  ;;  %v1332_v6 = vpack.c.bf16 %v1308_v3, %v1307_v2 }
  0x66   : > { %4923 = vmatprep.mubr.bf16.mxu1 %v414_v7  ;;  %v1333_v7 = vpack.c.bf16 %v1310_v5, %v1309_v4  ;;  %v1962_v2 = vld [vmem:[%s5550_s21 + $0x7c] sm:$0xff]  ;;  %v1658_v4 = vpack.c.bf16 %v1628_v60, %v1627_v59 }
  0x67   : > { %v5413_v3 = vld [vmem:[%s7611_s1 + $0x198] sm:$0xff]   ;;  %v3691_v60 = vld [vmem:[%s7614_s4 + $0x20] sm:$0xff] }
  0x68   : > { %v5414_v5 = vld [vmem:[%s7611_s1 + $0x1d8] sm:$0xff]  }
  0x6c   : > { %4872 = vmatmul.mubr.bf16.gmra.mxu0 %v485_v16  ;;  %v1317_v16 = vld [vmem:[%s5550_s21 + $0x112] sm:$0xff] }
  0x6d   : > { %4924 = vmatmul.mubr.bf16.gmra.mxu1 %v415_v17  ;;  %4943 = vmatprep.mubr.bf16.mxu0 %v989_v18  ;;  %v1318_v17 = vld [vmem:[%s5550_s21 + $0x11a] sm:$0xff]  ;;  %v1336_v18 = vpack.c.bf16 %v1316_v15, %v1315_v14  ;;  %v1964_v14 = vld [vmem:[%s5550_s21 + $0x8c] sm:$0xff] }
  0x6e   : > { %4995 = vmatprep.mubr.bf16.mxu1 %v1321_v19  ;;  %v1633_v15 = vld [vmem:[%s5550_s21 + $0x93] sm:$0xff] }
  0x74   : > { %4944 = vmatmul.mubr.bf16.vlgmr.msra.gmra.mxu0 %v1321_v19  ;;  %v1337_v19 = vpack.c.bf16 %v1318_v17, %v1317_v16  ;;  %v1634_v16 = vld [vmem:[%s5550_s21 + $0x9b] sm:$0xff] }
  0x75   : > { %4996 = vmatmul.mubr.bf16.vlgmr.msra.gmra.mxu1 %v1322_v24  ;;  %5032 = vmatpush3.bf16.msra.mxu0 %v5665_v30  ;;  %v1324_v30 = vpack.c.bf16 %v1292_v29, %v1291_v28  ;;  %v1619_v29 = vld [vmem:[%s5550_s21 + $0x23] sm:$0xff]  ;;  %v1965_v17 = vld [vmem:[%s5550_s21 + $0x94] sm:$0xff] }
  0x76   : > { %5084 = vmatpush3.bf16.msra.mxu1 %v5670_v32  ;;  %4947 = vmatprep.mubr.bf16.mxu0 %v1322_v24  ;;  %v1325_v32 = vpack.c.bf16 %v1294_v34, %v1293_v31  ;;  %v1949_v24 = vld [vmem:[%s5550_s21 + $0x14] sm:$0xff]  ;;  %v1620_v31 = vld [vmem:[%s5550_s21 + $0x2b] sm:$0xff] }
  0x77   : > { %4999 = vmatprep.mubr.bf16.mxu1 %v1323_v25  ;;  %5033 = vmatprep.subr.bf16.mxu0 %v5391_v26  ;;  %v1952_v34 = vld [vmem:[%s5550_s21 + $0x2c] sm:$0xff] }
  0x78   : > { %5085 = vmatprep.subr.bf16.mxu1 %v5392_v27 }
  0x79   : > { %5034 = vmatpush3.bf16.msra.mxu0 %v5391_v26  ;;  %v1338_v26 = vpack.c.bf16 %v1320_v21, %v1319_v20  ;;  %v5418_v21 = vld [vmem:[%s7611_s1 + $0x1c8] sm:$0xff]  }
  0x7a   : > { %5086 = vmatpush3.bf16.msra.mxu1 %v5392_v27  ;;  %5035 = vmatprep.subr.bf16.mxu0 %v5393_v33  ;;  %v1653_v27 = vpack.c.bf16 %v1618_v23, %v1617_v22  ;;  %v1661_v23 = vpack.c.bf16 %v1634_v16, %v1633_v15 }
  0x7b   : > { %5087 = vmatprep.subr.bf16.mxu1 %v5394_v35 }
  0x7c   : > { %4948 = vmatmul.mubr.bf16.gmra.mxu0 %v1323_v25  ;;  %v1950_v25 = vld [vmem:[%s5550_s21 + $0x1c] sm:$0xff] }
  0x7d   : > { %5000 = vmatmul.mubr.bf16.gmra.mxu1 %v1324_v30  ;;  %4951 = vmatprep.mubr.bf16.mxu0 %v1324_v30  ;;  %v1985_v28 = vpack.c.bf16 %v1950_v25, %v1949_v24  ;;  %v1622_v30 = vld [vmem:[%s5550_s21 + $0x3b] sm:$0xff] }
  0x7e   : > { %5003 = vmatprep.mubr.bf16.mxu1 %v1325_v32  ;;  %5036 = vmatpush3.bf16.msra.mxu0 %v5393_v33  ;;  %v1951_v33 = vld [vmem:[%s5550_s21 + $0x24] sm:$0xff] }
  0x7f   : > { %5088 = vmatpush3.bf16.msra.mxu1 %v5394_v35  ;;  %5037 = vmatprep.subr.bf16.mxu0 %v5395_v36  ;;  %v1621_v35 = vld [vmem:[%s5550_s21 + $0x33] sm:$0xff]  ;;  %v5808_v38 = vpack.c.bf16 %v1952_v34, %v1951_v33  ;;  %v5419_v25 = vld [vmem:[%s7611_s1 + $0x180] sm:$0xff]  }
  0x80   : > { %5089 = vmatprep.subr.bf16.mxu1 %v5396_v37  ;;  %v1655_v39 = vpack.c.bf16 %v1622_v30, %v1621_v35  ;;  %v1637_v33 = vld [vmem:[%s5550_s21 + $0xb3] sm:$0xff]  ;;  %v1638_v34 = vld [vmem:[%s5550_s21 + $0xbb] sm:$0xff] }
  0x81   : > { %v1969_v35 = vld [vmem:[%s5550_s21 + $0xb4] sm:$0xff] }
  0x82   : > { %5038 = vmatpush3.bf16.msra.mxu0 %v5395_v36  ;;  %v1953_v36 = vld [vmem:[%s5550_s21 + $0x34] sm:$0xff] }
  0x83   : > { %5090 = vmatpush3.bf16.msra.mxu1 %v5396_v37  ;;  %5039 = vmatprep.subr.bf16.mxu0 %v5397_v42  ;;  %v1954_v37 = vld [vmem:[%s5550_s21 + $0x3c] sm:$0xff]  ;;  %v3689_v30 = vld [vmem:[%s7614_s4 + $0x10] sm:$0xff] }
  0x84   : > { %4952 = vmatmul.mubr.bf16.gmra.mxu0 %v1325_v32  ;;  %5091 = vmatprep.subr.bf16.mxu1 %v5398_v43  ;;  %v1654_v32 = vpack.c.bf16 %v1620_v31, %v1619_v29  ;;  %v5810_v40 = vpack.c.bf16 %v1954_v37, %v1953_v36  ;;  %v1967_v29 = vld [vmem:[%s5550_s21 + $0xa4] sm:$0xff]  ;;  %v1968_v31 = vld [vmem:[%s5550_s21 + $0xac] sm:$0xff]  ;;  %v5914_v36 = vld [vmem:[%s7611_s1 + $0x238] sm:$0xff]  }
  0x85   : > { %5004 = vmatmul.mubr.bf16.gmra.mxu1 %v1326_v44  ;;  %4955 = vmatprep.mubr.bf16.mxu0 %v1326_v44  ;;  %v1624_v44 = vld [vmem:[%s5550_s21 + $0x4b] sm:$0xff]  ;;  %v3687_v37 = vld [vmem:[%s7614_s4] sm:$0xff] }
  0x86   : > { %5007 = vmatprep.mubr.bf16.mxu1 %v1327_v45  ;;  %5040 = vmatpush3.bf16.msra.mxu0 %v5397_v42  ;;  %v1623_v42 = vld [vmem:[%s5550_s21 + $0x43] sm:$0xff] }
  0x87   : > { %5092 = vmatpush3.bf16.msra.mxu1 %v5398_v43  ;;  %5041 = vmatprep.subr.bf16.mxu0 %v5399_v46  ;;  %v5408_v43 = vld [vmem:[%s7611_s1 + $0x1f0] sm:$0xff]  }
  0x88   : > { %5093 = vmatprep.subr.bf16.mxu1 %v5400_v47 }
  0x8a   : > { %5042 = vmatpush3.bf16.msra.mxu0 %v5399_v46  ;;  %v1956_v46 = vld [vmem:[%s5550_s21 + $0x4c] sm:$0xff] }
  0x8b   : > { %5094 = vmatpush3.bf16.msra.mxu1 %v5400_v47  ;;  %5043 = vmatprep.subr.bf16.mxu0 %v5401_v52  ;;  %v1625_v47 = vld [vmem:[%s5550_s21 + $0x53] sm:$0xff] }
  0x8c   : > { %4956 = vmatmul.mubr.bf16.gmra.mxu0 %v1327_v45  ;;  %5095 = vmatprep.subr.bf16.mxu1 %v5402_v53  ;;  %v1955_v45 = vld [vmem:[%s5550_s21 + $0x44] sm:$0xff] }
  0x8d   : > { %5008 = vmatmul.mubr.bf16.gmra.mxu1 %v1328_v54  ;;  %4959 = vmatprep.mubr.bf16.mxu0 %v1328_v54  ;;  %v5836_v54 = vpack.c.bf16 %v1956_v46, %v1955_v45  ;;  %v3690_v46 = vld [vmem:[%s7614_s4 + $0x18] sm:$0xff] }
  0x8e   : > { %5011 = vmatprep.mubr.bf16.mxu1 %v1329_v55  ;;  %5044 = vmatpush3.bf16.msra.mxu0 %v5401_v52  ;;  %v5410_v52 = vld [vmem:[%s7611_s1 + $0x1e8] sm:$0xff]  }
  0x8f   : > { %5096 = vmatpush3.bf16.msra.mxu1 %v5402_v53  ;;  %5045 = vmatprep.subr.bf16.mxu0 %v5403_v56  ;;  %v1656_v53 = vpack.c.bf16 %v1624_v44, %v1623_v42  ;;  %v5445_v42 = vmov 0   ;;  %v1663_v44 = vpack.c.bf16 %v1638_v34, %v1637_v33  ;;  %v1650_v33 = vld [vmem:[%s5550_s21 + $0x11b] sm:$0xff] }
  0x90   : > { %5097 = vmatprep.subr.bf16.mxu1 %v5404_v57  ;;  %5356 = vset.pattern.permute.xlu1 %v5445_v42 }
  0x91   : > { %5355 = vset.pattern.permute.xlu0 %v5445_v42  ;;  %3735 = vperm.xlu1 %5356, %v3689_v30   ;;  %v1982_v30 = vld [vmem:[%s5550_s21 + $0x11c] sm:$0xff] }
  0x92   : > { %5046 = vmatpush3.bf16.msra.mxu0 %v5403_v56  ;;  %v5838_v56 = vpack.c.bf16 %v1958_v51, %v1957_v50  ;;  %3725 = vperm.xlu0 %5355, %v3687_v37   ;;  %v1971_v50 = vld [vmem:[%s5550_s21 + $0xc4] sm:$0xff]  ;;  %v1972_v51 = vld [vmem:[%s5550_s21 + $0xcc] sm:$0xff] }
  0x93   : > { %5098 = vmatpush3.bf16.msra.mxu1 %v5404_v57  ;;  %5135 = vmatprep.subr.bf16.mxu0 %v5773_v62  ;;  %v5411_v57 = vld [vmem:[%s7611_s1 + $0x1a0] sm:$0xff]  }
  0x94   : > { %4960 = vmatmul.mubr.bf16.gmra.mxu0 %v1329_v55  ;;  %5187 = vmatprep.subr.bf16.mxu1 %v5778_v63  ;;  %v1657_v55 = vpack.c.bf16 %v1626_v48, %v1625_v47  ;;  %v3688_v47 = vld [vmem:[%s7614_s4 + $0x8] sm:$0xff] }
  0x95   : > { %5012 = vmatmul.mubr.bf16.gmra.mxu1 %v1330_v0  ;;  %4963 = vmatprep.mubr.bf16.mxu0 %v1330_v0  ;;  %v1630_v0 = vld [vmem:[%s5550_s21 + $0x7b] sm:$0xff]  ;;  %v1639_v48 = vld [vmem:[%s5550_s21 + $0xc3] sm:$0xff] }
  0x96   : > { %5015 = vmatprep.mubr.bf16.mxu1 %v1331_v1  ;;  %3740 = vperm.xlu1 %5356, %v3690_v46  }
  0x97   : > { %3730 = vperm.xlu0 %5355, %v3688_v47  }
  0x9b   : > { %3745 = vperm.xlu0 %5355, %v3691_v60   ;;  %v1651_v60 = vld [vmem:[%s5550_s21 + $0x123] sm:$0xff] }
  0x9c   : > { %4964 = vmatmul.mubr.bf16.gmra.mxu0 %v1331_v1  ;;  %v1961_v1 = vld [vmem:[%s5550_s21 + $0x74] sm:$0xff] }
  0x9d   : > { %5016 = vmatmul.mubr.bf16.gmra.mxu1 %v1332_v6  ;;  %4967 = vmatprep.mubr.bf16.mxu0 %v1332_v6  ;;  %v5864_v8 = vpack.c.bf16 %v1962_v2, %v1961_v1  ;;  %v3693_v1 = vld [vmem:[%s7614_s4 + $0x30] sm:$0xff]  ;;  %v1643_v2 = vld [vmem:[%s5550_s21 + $0xe3] sm:$0xff] }
  0x9e   : > { %5019 = vmatprep.mubr.bf16.mxu1 %v1333_v7 }
  0x9f   : > { %3755 = vperm.xlu0 %5355, %v3693_v1  }
  0xa4   : > { %4968 = vmatmul.mubr.bf16.gmra.mxu0 %v1333_v7 }
  0xa5   : > { %5020 = vmatmul.mubr.bf16.gmra.mxu1 %v1334_v12  ;;  %4971 = vmatprep.mubr.bf16.mxu0 %v1334_v12  ;;  %v1632_v12 = vld [vmem:[%s5550_s21 + $0x8b] sm:$0xff] }
  0xa6   : > { %5023 = vmatprep.mubr.bf16.mxu1 %v1335_v13  ;;  %v1660_v20 = vpack.c.bf16 %v1632_v12, %v1631_v11  ;;  %v1978_v11 = vld [vmem:[%s5550_s21 + $0xfc] sm:$0xff]  ;;  %v3696_v12 = vld [vmem:[%s7614_s4 + $0x48] sm:$0xff] }
  0xac   : > { %4972 = vmatmul.mubr.bf16.gmra.mxu0 %v1335_v13  ;;  %v1963_v13 = vld [vmem:[%s5550_s21 + $0x84] sm:$0xff] }
  0xad   : > { %5024 = vmatmul.mubr.bf16.gmra.mxu1 %v1336_v18  ;;  %4975 = vmatprep.mubr.bf16.mxu0 %v1336_v18  ;;  %v1966_v18 = vld [vmem:[%s5550_s21 + $0x9c] sm:$0xff]  ;;  %v5888_v22 = vpack.c.bf16 %v1964_v14, %v1963_v13 }
  0xae   : > { %5027 = vmatprep.mubr.bf16.mxu1 %v1337_v19  ;;  %v5890_v24 = vpack.c.bf16 %v1966_v18, %v1965_v17  ;;  %v3695_v14 = vld [vmem:[%s7614_s4 + $0x40] sm:$0xff]  ;;  %v3698_v18 = vld [vmem:[%s7614_s4 + $0x58] sm:$0xff] }
  0xaf   : > { %3765 = vperm.xlu0 %5355, %v3695_v14  }
  0xb4   : > { %4976 = vmatmul.mubr.bf16.gmra.mxu0 %v1337_v19  ;;  %v5417_v19 = vld [vmem:[%s7611_s1 + $0x188] sm:$0xff]  }
  0xb5   : > { %5028 = vmatmul.mubr.bf16.gmra.mxu1 %v1338_v26  ;;  %5047 = vmatprep.mubr.bf16.mxu0 %v1653_v27  ;;  %v1635_v26 = vld [vmem:[%s5550_s21 + $0xa3] sm:$0xff]  ;;  %v1636_v27 = vld [vmem:[%s5550_s21 + $0xab] sm:$0xff] }
  0xb6   : > { %5099 = vmatprep.mubr.bf16.mxu1 %v1985_v28  ;;  %v5420_v28 = vld [vmem:[%s7611_s1 + $0x1c0] sm:$0xff]  }
  0xbc   : > { %5048 = vmatmul.mubr.bf16.vlgmr.msra.gmra.mxu0 %v1654_v32  ;;  %v1970_v32 = vld [vmem:[%s5550_s21 + $0xbc] sm:$0xff] }
  0xbd   : > { %5100 = vmatmul.mubr.bf16.vlgmr.msra.gmra.mxu1 %v5808_v38  ;;  %5136 = vmatpush3.bf16.msra.mxu0 %v5773_v62  ;;  %v1960_v62 = vld [vmem:[%s5550_s21 + $0x6c] sm:$0xff]  ;;  %v5926_v45 = vpack.c.bf16 %v1970_v32, %v1969_v35  ;;  %v1981_v35 = vld [vmem:[%s5550_s21 + $0x114] sm:$0xff] }
  0xbe   : > { %5188 = vmatpush3.bf16.msra.mxu1 %v5778_v63  ;;  %5051 = vmatprep.mubr.bf16.mxu0 %v1655_v39  ;;  %v1629_v63 = vld [vmem:[%s5550_s21 + $0x73] sm:$0xff]  ;;  %v5862_v6 = vpack.c.bf16 %v1960_v62, %v1959_v61  ;;  %v1662_v39 = vpack.c.bf16 %v1636_v27, %v1635_v26  ;;  %v5952_v61 = vpack.c.bf16 %v1972_v51, %v1971_v50  ;;  %v1979_v26 = vld [vmem:[%s5550_s21 + $0x104] sm:$0xff] }
  0xbf   : > { %5103 = vmatprep.mubr.bf16.mxu1 %v5810_v40  ;;  %5137 = vmatprep.subr.bf16.mxu0 %v5407_v41  ;;  %v1659_v7 = vpack.c.bf16 %v1630_v0, %v1629_v63  ;;  %v3694_v0 = vld [vmem:[%s7614_s4 + $0x38] sm:$0xff]  ;;  %v3700_v32 = vld [vmem:[%s7614_s4 + $0x68] sm:$0xff]  ;;  %v6012_v51 = vpack.c.bf16 %v1982_v30, %v1981_v35 }
  0xc0   : > { %5189 = vmatprep.subr.bf16.mxu1 %v5408_v43  ;;  %v2616_v35 = vld [vmem:[%s5550_s21 + $0x3d] sm:$0xff] }
  0xc1   : > { %5138 = vmatpush3.bf16.msra.mxu0 %v5407_v41  ;;  %v5922_v41 = vld [vmem:[%s7613_s3 + $0x38] sm:$0xff]  }
  0xc2   : > { %5190 = vmatpush3.bf16.msra.mxu1 %v5408_v43  ;;  %5139 = vmatprep.subr.bf16.mxu0 %v5409_v49  ;;  %v5924_v43 = vpack.c.bf16 %v1968_v31, %v1967_v29  ;;  %v1980_v29 = vld [vmem:[%s5550_s21 + $0x10c] sm:$0xff] }
  0xc3   : > { %5191 = vmatprep.subr.bf16.mxu1 %v5410_v52  ;;  %v1649_v31 = vld [vmem:[%s5550_s21 + $0x113] sm:$0xff]  ;;  %v6008_v47 = vpack.c.bf16 %v1980_v29, %v1979_v26 }
  0xc4   : > { %5052 = vmatmul.mubr.bf16.gmra.mxu0 %v1656_v53  ;;  %v1642_v53 = vld [vmem:[%s5550_s21 + $0xdb] sm:$0xff] }
  0xc5   : > { %5104 = vmatmul.mubr.bf16.gmra.mxu1 %v5836_v54  ;;  %5055 = vmatprep.mubr.bf16.mxu0 %v1657_v55  ;;  %v1973_v55 = vld [vmem:[%s5550_s21 + $0xd4] sm:$0xff] }
  0xc6   : > { %5107 = vmatprep.mubr.bf16.mxu1 %v5838_v56  ;;  %5140 = vmatpush3.bf16.msra.mxu0 %v5409_v49  ;;  %v1640_v49 = vld [vmem:[%s5550_s21 + $0xcb] sm:$0xff] }
  0xc7   : > { %5192 = vmatpush3.bf16.msra.mxu1 %v5410_v52  ;;  %5141 = vmatprep.subr.bf16.mxu0 %v5411_v57  ;;  %v1641_v52 = vld [vmem:[%s5550_s21 + $0xd3] sm:$0xff]  ;;  %v1664_v59 = vpack.c.bf16 %v1640_v49, %v1639_v48  ;;  %v1669_v48 = vpack.c.bf16 %v1650_v33, %v1649_v31 }
  0xc8   : > { %5193 = vmatprep.subr.bf16.mxu1 %v5412_v58  ;;  %v1665_v62 = vpack.c.bf16 %v1642_v53, %v1641_v52  ;;  %v3702_v53 = vld [vmem:[%s7614_s4 + $0x78] sm:$0xff] }
  0xca   : > { %5142 = vmatpush3.bf16.msra.mxu0 %v5411_v57  ;;  %v1974_v57 = vld [vmem:[%s5550_s21 + $0xdc] sm:$0xff] }
  0xcb   : > { %5194 = vmatpush3.bf16.msra.mxu1 %v5412_v58  ;;  %5143 = vmatprep.subr.bf16.mxu0 %v5413_v3  ;;  %v3692_v58 = vld [vmem:[%s7614_s4 + $0x28] sm:$0xff]  ;;  %v5954_v63 = vpack.c.bf16 %v1974_v57, %v1973_v55 }
  0xcc   : > { %5056 = vmatmul.mubr.bf16.gmra.mxu0 %v1658_v4  ;;  %5195 = vmatprep.subr.bf16.mxu1 %v5414_v5  ;;  %v1975_v4 = vld [vmem:[%s5550_s21 + $0xe4] sm:$0xff] }
  0xcd   : > { %5108 = vmatmul.mubr.bf16.gmra.mxu1 %v5862_v6  ;;  %5059 = vmatprep.mubr.bf16.mxu0 %v1659_v7  ;;  %v1645_v7 = vld [vmem:[%s5550_s21 + $0xf3] sm:$0xff] }
  0xce   : > { %5111 = vmatprep.mubr.bf16.mxu1 %v5864_v8  ;;  %5144 = vmatpush3.bf16.msra.mxu0 %v5413_v3  ;;  %v1644_v3 = vld [vmem:[%s5550_s21 + $0xeb] sm:$0xff] }
  0xcf   : > { %5196 = vmatpush3.bf16.msra.mxu1 %v5414_v5  ;;  %5145 = vmatprep.subr.bf16.mxu0 %v5415_v9  ;;  %v1976_v5 = vld [vmem:[%s5550_s21 + $0xec] sm:$0xff]  ;;  %v1666_v13 = vpack.c.bf16 %v1644_v3, %v1643_v2  ;;  %v1983_v2 = vld [vmem:[%s5550_s21 + $0x124] sm:$0xff] }
  0xd0   : > { %5197 = vmatprep.subr.bf16.mxu1 %v5416_v10  ;;  %3750 = vperm.xlu1 %5356, %v3692_v58   ;;  %v5978_v15 = vpack.c.bf16 %v1976_v5, %v1975_v4  ;;  %v3701_v58 = vld [vmem:[%s7614_s4 + $0x70] sm:$0xff]  ;;  %v2613_v5 = vld [vmem:[%s5550_s21 + $0x25] sm:$0xff] }
  0xd1   : > { %v1984_v3 = vld [vmem:[%s5550_s21 + $0x12c] sm:$0xff] }
  0xd2   : > { %5146 = vmatpush3.bf16.msra.mxu0 %v5415_v9  ;;  %v1646_v9 = vld [vmem:[%s5550_s21 + $0xfb] sm:$0xff] }
  0xd3   : > { %5198 = vmatpush3.bf16.msra.mxu1 %v5416_v10  ;;  %5147 = vmatprep.subr.bf16.mxu0 %v5417_v19  ;;  %v1977_v10 = vld [vmem:[%s5550_s21 + $0xf4] sm:$0xff]  ;;  %v1667_v16 = vpack.c.bf16 %v1646_v9, %v1645_v7  ;;  %v3704_v9 = vld [vmem:[%s7614_s4 + $0x88] sm:$0xff] }
  0xd4   : > { %5060 = vmatmul.mubr.bf16.gmra.mxu0 %v1660_v20  ;;  %5199 = vmatprep.subr.bf16.mxu1 %v5418_v21  ;;  %v5980_v17 = vpack.c.bf16 %v1978_v11, %v1977_v10  ;;  %v3697_v20 = vld [vmem:[%s7614_s4 + $0x50] sm:$0xff] }
  0xd5   : > { %5112 = vmatmul.mubr.bf16.gmra.mxu1 %v5888_v22  ;;  %5063 = vmatprep.mubr.bf16.mxu0 %v1661_v23  ;;  %v1647_v23 = vld [vmem:[%s5550_s21 + $0x103] sm:$0xff]  ;;  %v2614_v7 = vld [vmem:[%s5550_s21 + $0x2d] sm:$0xff] }
  0xd6   : > { %5115 = vmatprep.mubr.bf16.mxu1 %v5890_v24  ;;  %5148 = vmatpush3.bf16.msra.mxu0 %v5417_v19 }
  0xd7   : > { %5200 = vmatpush3.bf16.msra.mxu1 %v5418_v21  ;;  %5149 = vmatprep.subr.bf16.mxu0 %v5419_v25 }
  0xd8   : > { %5201 = vmatprep.subr.bf16.mxu1 %v5420_v28  ;;  %3760 = vperm.xlu1 %5356, %v3694_v0  }
  0xd9   : > { %3775 = vperm.xlu0 %5355, %v3697_v20   ;;  %v2649_v20 = vpack.c.bf16 %v2614_v7, %v2613_v5 }
  0xda   : > { %5150 = vmatpush3.bf16.msra.mxu0 %v5419_v25  ;;  %v1648_v25 = vld [vmem:[%s5550_s21 + $0x10b] sm:$0xff] }
  0xdb   : > { %5202 = vmatpush3.bf16.msra.mxu1 %v5420_v28  ;;  %5239 = vmatprep.subr.bf16.mxu0 %v5914_v36  ;;  %v1668_v42 = vpack.c.bf16 %v1648_v25, %v1647_v23  ;;  %v3706_v23 = vld [vmem:[%s7614_s4 + $0x98] sm:$0xff] }
  0xdc   : > { %5064 = vmatmul.mubr.bf16.gmra.mxu0 %v1662_v39  ;;  %5291 = vmatprep.subr.bf16.mxu1 %v5922_v41 }
  0xdd   : > { %5116 = vmatmul.mubr.bf16.gmra.mxu1 %v5924_v43  ;;  %5067 = vmatprep.mubr.bf16.mxu0 %v1663_v44  ;;  %v3699_v44 = vld [vmem:[%s7614_s4 + $0x60] sm:$0xff] }
  0xde   : > { %5119 = vmatprep.mubr.bf16.mxu1 %v5926_v45  ;;  %3770 = vperm.xlu1 %5356, %v3696_v12  }
  0xdf   : > { %3785 = vperm.xlu0 %5355, %v3699_v44   ;;  %v2617_v44 = vld [vmem:[%s5550_s21 + $0x45] sm:$0xff] }
  0xe2   : > { %3780 = vperm.xlu1 %5356, %v3698_v18  }
  0xe3   : > { %3795 = vperm.xlu0 %5355, %v3701_v58  }
  0xe4   : > { %5068 = vmatmul.mubr.bf16.gmra.mxu0 %v1664_v59 }
  0xe5   : > { %5120 = vmatmul.mubr.bf16.gmra.mxu1 %v5952_v61  ;;  %5071 = vmatprep.mubr.bf16.mxu0 %v1665_v62  ;;  %v1652_v62 = vld [vmem:[%s5550_s21 + $0x12b] sm:$0xff] }
  0xe6   : > { %5123 = vmatprep.mubr.bf16.mxu1 %v5954_v63  ;;  %3790 = vperm.xlu1 %5356, %v3700_v32   ;;  %v1670_v12 = vpack.c.bf16 %v1652_v62, %v1651_v60  ;;  %v3708_v32 = vld [vmem:[%s7614_s4 + $0xa8] sm:$0xff] }
  0xea   : > { %3800 = vperm.xlu1 %5356, %v3702_v53  }
  0xec   : > { %v4841_v19 = vpop.f32.mrf.mxu0  ;;  %5072 = vmatmul.mubr.bf16.gmra.mxu0 %v1666_v13  ;;  %v3703_v13 = vld [vmem:[%s7614_s4 + $0x80] sm:$0xff] }
  0xed   : > { %v4893_v21 = vpop.f32.mrf.mxu1  ;;  %5124 = vmatmul.mubr.bf16.gmra.mxu1 %v5978_v15  ;;  %5075 = vmatprep.mubr.bf16.mxu0 %v1667_v16  ;;  %v6040_v16 = vpack.c.bf16 %v1984_v3, %v1983_v2  ;;  %v2619_v3 = vld [vmem:[%s5550_s21 + $0x55] sm:$0xff] }
  0xee   : > { %v5992_v27 = vadd.f32 %v4893_v21, %v4841_v19  ;;  %v585_v28 = vpop.f32.mrf.mxu0  ;;  %5127 = vmatprep.mubr.bf16.mxu1 %v5980_v17  ;;  %3810 = vperm.xlu1 %5356, %v3704_v9   ;;  %v5425_v9 = vld [vmem:[%s7611_s1 + $0x228] sm:$0xff]  }
  0xef   : > { %v810_v34 = vpop.f32.mrf.mxu1  ;;  %3805 = vperm.xlu0 %5355, %v3703_v13   ;;  %v2622_v13 = vld [vmem:[%s5550_s21 + $0x6d] sm:$0xff] }
  0xf0   : > { %v6003_v37 = vadd.f32 %v810_v34, %v585_v28  ;;  %v4842_v39 = vpop.f32.mrf.mxu0  ;;  %v3705_v28 = vld [vmem:[%s7614_s4 + $0x90] sm:$0xff] }
  0xf1   : > { %v4894_v46 = vpop.f32.mrf.mxu1  ;;  %v2615_v34 = vld [vmem:[%s5550_s21 + $0x35] sm:$0xff] }
  0xf2   : > { %v6010_v49 = vadd.f32 %v4894_v46, %v4842_v39  ;;  %v588_v50 = vpop.f32.mrf.mxu0  ;;  %3820 = vperm.xlu1 %5356, %v3706_v23   ;;  %v2618_v46 = vld [vmem:[%s5550_s21 + $0x4d] sm:$0xff] }
  0xf3   : > { %v813_v52 = vpop.f32.mrf.mxu1  ;;  %3815 = vperm.xlu0 %5355, %v3705_v28   ;;  %v2651_v58 = vpack.c.bf16 %v2618_v46, %v2617_v44 }
  0xf4   : > { %v6017_v55 = vadd.f32 %v813_v52, %v588_v50  ;;  %v4845_v57 = vpop.f32.mrf.mxu0  ;;  %5076 = vmatmul.mubr.bf16.gmra.mxu0 %v1668_v42  ;;  %v2650_v50 = vpack.c.bf16 %v2616_v35, %v2615_v34 }
  0xf5   : > { %v4897_v59 = vpop.f32.mrf.mxu1  ;;  %5128 = vmatmul.mubr.bf16.gmra.mxu1 %v6008_v47  ;;  %5079 = vmatprep.mubr.bf16.mxu0 %v1669_v48 }
  0xf6   : > { %v6025_v0 = vadd.f32 %v4897_v59, %v4845_v57  ;;  %v601_v1 = vpop.f32.mrf.mxu0  ;;  %5131 = vmatprep.mubr.bf16.mxu1 %v6012_v51  ;;  %3830 = vperm.xlu1 %5356, %v3708_v32   ;;  %v5423_v59 = vld [vmem:[%s7611_s1 + $0x230] sm:$0xff]  }
  0xf7   : > { %v826_v4 = vpop.f32.mrf.mxu1 }
  0xf8   : > { %v6035_v10 = vadd.f32 %v826_v4, %v601_v1  ;;  %v4846_v11 = vpop.f32.mrf.mxu0  ;;  %v5424_v1 = vld [vmem:[%s7613_s3 + $0x30] sm:$0xff]   ;;  %v3710_v4 = vld [vmem:[%s7614_s4 + $0xb8] sm:$0xff] }
  0xf9   : > { %v4898_v14 = vpop.f32.mrf.mxu1 }
  0xfa   : > { %v6042_v18 = vadd.f32 %v4898_v14, %v4846_v11  ;;  %v604_v19 = vpop.f32.mrf.mxu0  ;;  %3840 = vperm.xlu1 %5356, %v3710_v4  }
  0xfb   : > { %v829_v21 = vpop.f32.mrf.mxu1 }
  0xfc   : > { %v6047_v25 = vadd.f32 %v829_v21, %v604_v19  ;;  %v4849_v26 = vpop.f32.mrf.mxu0  ;;  %5080 = vmatmul.mubr.bf16.gmra.mxu0 %v1670_v12  ;;  %v2621_v12 = vld [vmem:[%s5550_s21 + $0x65] sm:$0xff] }
  0xfd   : > { %v4901_v29 = vpop.f32.mrf.mxu1  ;;  %5132 = vmatmul.mubr.bf16.gmra.mxu1 %v6040_v16  ;;  %5151 = vmatprep.mubr.bf16.mxu0 %v5808_v38  ;;  %v3707_v38 = vld [vmem:[%s7614_s4 + $0xa0] sm:$0xff]  ;;  %v3712_v21 = vld [vmem:[%s7614_s4 + $0xc8] sm:$0xff]  ;;  %v2653_v28 = vpack.c.bf16 %v2622_v13, %v2621_v12  ;;  %v5432_v12 = vld [vmem:[%s7613_s3 + $0x10] sm:$0xff]  }
  0xfe   : > { %v6054_v31 = vadd.f32 %v4901_v29, %v4849_v26  ;;  %v617_v33 = vpop.f32.mrf.mxu0  ;;  %5203 = vmatprep.mubr.bf16.mxu1 %v2649_v20  ;;  %3825 = vperm.xlu0 %5355, %v3707_v38   ;;  %v2623_v38 = vld [vmem:[%s5550_s21 + $0x75] sm:$0xff] }
  0xff   : > { %v842_v30 = vpop.f32.mrf.mxu1  ;;  %3850 = vperm.xlu1 %5356, %v3712_v21   ;;  %v3716_v21 = vld [vmem:[%s7614_s4 + $0xe8] sm:$0xff] }
 0x100   : > { %v6061_v39 = vadd.f32 %v842_v30, %v617_v33  ;;  %v4850_v42 = vpop.f32.mrf.mxu0  ;;  %v5427_v33 = vld [vmem:[%s7611_s1 + $0x220] sm:$0xff]  }
 0x101   : > { %v4902_v48 = vpop.f32.mrf.mxu1  ;;  %v5428_v30 = vld [vmem:[%s7613_s3 + $0x20] sm:$0xff]  }
 0x102   : > { %v6068_v52 = vadd.f32 %v4902_v48, %v4850_v42  ;;  %v620_v53 = vpop.f32.mrf.mxu0  ;;  %v3711_v42 = vld [vmem:[%s7614_s4 + $0xc0] sm:$0xff]  ;;  %v3714_v48 = vld [vmem:[%s7614_s4 + $0xd8] sm:$0xff] }
 0x103   : > { %v845_v57 = vpop.f32.mrf.mxu1  ;;  %3860 = vperm.xlu1 %5356, %v3714_v48  }
 0x104   : > { %v6073_v60 = vadd.f32 %v845_v57, %v620_v53  ;;  %v4853_v62 = vpop.f32.mrf.mxu0  ;;  %5152 = vmatmul.mubr.bf16.vlgmr.msra.gmra.mxu0 %v5810_v40  ;;  %v2620_v40 = vld [vmem:[%s5550_s21 + $0x5d] sm:$0xff]  ;;  %v2625_v53 = vld [vmem:[%s5550_s21 + $0x85] sm:$0xff]  ;;  %v2626_v57 = vld [vmem:[%s5550_s21 + $0x8d] sm:$0xff] }
 0x105   : > { %v4905_v2 = vpop.f32.mrf.mxu1  ;;  %5204 = vmatmul.mubr.bf16.vlgmr.msra.gmra.mxu1 %v2650_v50  ;;  %5240 = vmatpush3.bf16.msra.mxu0 %v5914_v36  ;;  %v3709_v36 = vld [vmem:[%s7614_s4 + $0xb0] sm:$0xff]  ;;  %v2652_v20 = vpack.c.bf16 %v2620_v40, %v2619_v3 }
 0x106   : > { %v6084_v5 = vadd.f32 %v4905_v2, %v4853_v62  ;;  %v633_v7 = vpop.f32.mrf.mxu0  ;;  %5292 = vmatpush3.bf16.msra.mxu1 %v5922_v41  ;;  %5155 = vmatprep.mubr.bf16.mxu0 %v5836_v54  ;;  %v5426_v41 = vld [vmem:[%s7613_s3 + $0x28] sm:$0xff]   ;;  %v5430_v62 = vld [vmem:[%s7613_s3 + $0x18] sm:$0xff]  }
 0x107   : > { %v858_v11 = vpop.f32.mrf.mxu1  ;;  %5207 = vmatprep.mubr.bf16.mxu1 %v2651_v58  ;;  %5241 = vmatprep.subr.bf16.mxu0 %v5423_v59 }
 0x108   : > { %v6100_v14 = vadd.f32 %v858_v11, %v633_v7  ;;  %v4854_v54 = vpop.f32.mrf.mxu0  ;;  %5293 = vmatprep.subr.bf16.mxu1 %v5424_v1  ;;  %3835 = vperm.xlu0 %5355, %v3709_v36   ;;  %v2655_v7 = vpack.c.bf16 %v2626_v57, %v2625_v53 }
 0x109   : > { %v4906_v19 = vpop.f32.mrf.mxu1  ;;  %5242 = vmatpush3.bf16.msra.mxu0 %v5423_v59  ;;  %3870 = vperm.xlu1 %5356, %v3716_v21  }
 0x10a   : > { %v6105_v23 = vadd.f32 %v4906_v19, %v4854_v54  ;;  %v636_v26 = vpop.f32.mrf.mxu0  ;;  %5294 = vmatpush3.bf16.msra.mxu1 %v5424_v1  ;;  %5243 = vmatprep.subr.bf16.mxu0 %v5425_v9 }
 0x10b   : > { %v861_v29 = vpop.f32.mrf.mxu1  ;;  %5295 = vmatprep.subr.bf16.mxu1 %v5426_v41 }
 0x10c   : > { %v6110_v34 = vadd.f32 %v861_v29, %v636_v26  ;;  %v4857_v35 = vpop.f32.mrf.mxu0  ;;  %5156 = vmatmul.mubr.bf16.gmra.mxu0 %v5838_v56  ;;  %v2624_v56 = vld [vmem:[%s5550_s21 + $0x7d] sm:$0xff]  ;;  %3845 = vperm.xlu0 %5355, %v3711_v42   ;;  %v2630_v29 = vld [vmem:[%s5550_s21 + $0xad] sm:$0xff] }
 0x10d   : > { %v4909_v32 = vpop.f32.mrf.mxu1  ;;  %5208 = vmatmul.mubr.bf16.gmra.mxu1 %v2652_v20  ;;  %5159 = vmatprep.mubr.bf16.mxu0 %v5862_v6  ;;  %v5429_v6 = vld [vmem:[%s7611_s1 + $0x218] sm:$0xff]   ;;  %v2654_v2 = vpack.c.bf16 %v2624_v56, %v2623_v38 }
 0x10e   : > { %v6120_v44 = vadd.f32 %v4909_v32, %v4857_v35  ;;  %v649_v46 = vpop.f32.mrf.mxu0  ;;  %5211 = vmatprep.mubr.bf16.mxu1 %v2653_v28  ;;  %5244 = vmatpush3.bf16.msra.mxu0 %v5425_v9  ;;  %v5431_v9 = vld [vmem:[%s7611_s1 + $0x210] sm:$0xff]   ;;  %v2629_v28 = vld [vmem:[%s5550_s21 + $0xa5] sm:$0xff] }
 0x10f   : > { %v874_v50 = vpop.f32.mrf.mxu1  ;;  %5296 = vmatpush3.bf16.msra.mxu1 %v5426_v41  ;;  %5245 = vmatprep.subr.bf16.mxu0 %v5427_v33  ;;  %v3713_v41 = vld [vmem:[%s7614_s4 + $0xd0] sm:$0xff]  ;;  %v2657_v56 = vpack.c.bf16 %v2630_v29, %v2629_v28  ;;  %v3720_v28 = vld [vmem:[%s7614_s4 + $0x108] sm:$0xff] }
 0x110   : > { %v6132_v58 = vadd.f32 %v874_v50, %v649_v46  ;;  %v4858_v59 = vpop.f32.mrf.mxu0  ;;  %5297 = vmatprep.subr.bf16.mxu1 %v5428_v30  ;;  %v2627_v20 = vld [vmem:[%s5550_s21 + $0x95] sm:$0xff]  ;;  %3855 = vperm.xlu0 %5355, %v3713_v41   ;;  %v5435_v50 = vld [vmem:[%s7611_s1 + $0x200] sm:$0xff]  }
 0x111   : > { %v4910_v1 = vpop.f32.mrf.mxu1 }
 0x112   : > { %v6137_v3 = vadd.f32 %v4910_v1, %v4858_v59  ;;  %v652_v4 = vpop.f32.mrf.mxu0  ;;  %5246 = vmatpush3.bf16.msra.mxu0 %v5427_v33 }
 0x113   : > { %v877_v40 = vpop.f32.mrf.mxu1  ;;  %5298 = vmatpush3.bf16.msra.mxu1 %v5428_v30  ;;  %5247 = vmatprep.subr.bf16.mxu0 %v5429_v6  ;;  %v5434_v30 = vld [vmem:[%s7613_s3 + $0x8] sm:$0xff]  }
 0x114   : > { %v6142_v36 = vadd.f32 %v877_v40, %v652_v4  ;;  %v4861_v11 = vpop.f32.mrf.mxu0  ;;  %5160 = vmatmul.mubr.bf16.gmra.mxu0 %v5864_v8  ;;  %5299 = vmatprep.subr.bf16.mxu1 %v5430_v62  ;;  %v2628_v8 = vld [vmem:[%s5550_s21 + $0x9d] sm:$0xff]  ;;  %v2631_v4 = vld [vmem:[%s5550_s21 + $0xb5] sm:$0xff] }
 0x115   : > { %v4913_v13 = vpop.f32.mrf.mxu1  ;;  %5212 = vmatmul.mubr.bf16.gmra.mxu1 %v2654_v2  ;;  %5163 = vmatprep.mubr.bf16.mxu0 %v5888_v22  ;;  %v5433_v22 = vld [vmem:[%s7611_s1 + $0x208] sm:$0xff]   ;;  %v2656_v42 = vpack.c.bf16 %v2628_v8, %v2627_v20 }
 0x116   : > { %v6152_v54 = vadd.f32 %v4913_v13, %v4861_v11  ;;  %v665_v19 = vpop.f32.mrf.mxu0  ;;  %5215 = vmatprep.mubr.bf16.mxu1 %v2655_v7  ;;  %5248 = vmatpush3.bf16.msra.mxu0 %v5429_v6  ;;  %v5436_v6 = vld [vmem:[%s7613_s3] sm:$0xff]   ;;  %v3718_v7 = vld [vmem:[%s7614_s4 + $0xf8] sm:$0xff]  ;;  %v2634_v11 = vld [vmem:[%s5550_s21 + $0xcd] sm:$0xff] }
 0x117   : > { %v890_v26 = vpop.f32.mrf.mxu1  ;;  %5300 = vmatpush3.bf16.msra.mxu1 %v5430_v62  ;;  %5249 = vmatprep.subr.bf16.mxu0 %v5431_v9  ;;  %v3715_v62 = vld [vmem:[%s7614_s4 + $0xe0] sm:$0xff] }
 0x118   : > { %v6164_v33 = vadd.f32 %v890_v26, %v665_v19  ;;  %v4862_v35 = vpop.f32.mrf.mxu0  ;;  %5301 = vmatprep.subr.bf16.mxu1 %v5432_v12  ;;  %3865 = vperm.xlu0 %5355, %v3715_v62   ;;  %v3717_v19 = vld [vmem:[%s7614_s4 + $0xf0] sm:$0xff] }
 0x119   : > { %v4914_v32 = vpop.f32.mrf.mxu1  ;;  %3880 = vperm.xlu1 %5356, %v3718_v7  }
 0x11a   : > { %v6169_v46 = vadd.f32 %v4914_v32, %v4862_v35  ;;  %v668_v38 = vpop.f32.mrf.mxu0  ;;  %5250 = vmatpush3.bf16.msra.mxu0 %v5431_v9  ;;  %v2633_v9 = vld [vmem:[%s5550_s21 + $0xc5] sm:$0xff] }
 0x11b   : > { %v893_v48 = vpop.f32.mrf.mxu1  ;;  %5302 = vmatpush3.bf16.msra.mxu1 %v5432_v12  ;;  %5251 = vmatprep.subr.bf16.mxu0 %v5433_v22  ;;  %v2659_v21 = vpack.c.bf16 %v2634_v11, %v2633_v9 }
 0x11c   : > { %v6174_v53 = vadd.f32 %v893_v48, %v668_v38  ;;  %v4865_v57 = vpop.f32.mrf.mxu0  ;;  %5164 = vmatmul.mubr.bf16.gmra.mxu0 %v5890_v24  ;;  %5303 = vmatprep.subr.bf16.mxu1 %v5434_v30  ;;  %v2632_v24 = vld [vmem:[%s5550_s21 + $0xbd] sm:$0xff]  ;;  %v2635_v38 = vld [vmem:[%s5550_s21 + $0xd5] sm:$0xff] }
 0x11d   : > { %v4917_v59 = vpop.f32.mrf.mxu1  ;;  %5216 = vmatmul.mubr.bf16.gmra.mxu1 %v2656_v42  ;;  %5167 = vmatprep.mubr.bf16.mxu0 %v5924_v43  ;;  %v2658_v41 = vpack.c.bf16 %v2632_v24, %v2631_v4 }
 0x11e   : > { %v6184_v1 = vadd.f32 %v4917_v59, %v4865_v57  ;;  %v681_v2 = vpop.f32.mrf.mxu0  ;;  %5219 = vmatprep.mubr.bf16.mxu1 %v2657_v56  ;;  %5252 = vmatpush3.bf16.msra.mxu0 %v5433_v22  ;;  %v2636_v56 = vld [vmem:[%s5550_s21 + $0xdd] sm:$0xff]  ;;  %v2638_v57 = vld [vmem:[%s5550_s21 + $0xed] sm:$0xff] }
 0x11f   : > { %v906_v40 = vpop.f32.mrf.mxu1  ;;  %5304 = vmatpush3.bf16.msra.mxu1 %v5434_v30  ;;  %5253 = vmatprep.subr.bf16.mxu0 %v5435_v50  ;;  %v3719_v30 = vld [vmem:[%s7614_s4 + $0x100] sm:$0xff]  ;;  %v2660_v62 = vpack.c.bf16 %v2636_v56, %v2635_v38 }
 0x120   : > { %v6193_v43 = vadd.f32 %v906_v40, %v681_v2  ;;  %v4866_v12 = vpop.f32.mrf.mxu0  ;;  %5305 = vmatprep.subr.bf16.mxu1 %v5436_v6  ;;  %3875 = vperm.xlu0 %5355, %v3717_v19   ;;  %v3721_v2 = vld [vmem:[%s7614_s4 + $0x110] sm:$0xff] }
 0x121   : > { %v4918_v13 = vpop.f32.mrf.mxu1  ;;  %3890 = vperm.xlu1 %5356, %v3720_v28   ;;  %v2639_v19 = vld [vmem:[%s5550_s21 + $0xf5] sm:$0xff]  ;;  %v2642_v28 = vld [vmem:[%s5550_s21 + $0x10d] sm:$0xff] }
 0x122   : > { %v6198_v20 = vadd.f32 %v4918_v13, %v4866_v12  ;;  %v684_v8 = vpop.f32.mrf.mxu0  ;;  %5254 = vmatpush3.bf16.msra.mxu0 %v5435_v50  ;;  %v2637_v50 = vld [vmem:[%s5550_s21 + $0xe5] sm:$0xff] }
 0x123   : > { %v909_v26 = vpop.f32.mrf.mxu1  ;;  %5306 = vmatpush3.bf16.msra.mxu1 %v5436_v6  ;;  %v2661_v7 = vpack.c.bf16 %v2638_v57, %v2637_v50 }
 0x124   : > { %v6203_v29 = vadd.f32 %v909_v26, %v684_v8  ;;  %v4869_v22 = vpop.f32.mrf.mxu0  ;;  %5168 = vmatmul.mubr.bf16.gmra.mxu0 %v5926_v45  ;;  %v3722_v45 = vld [vmem:[%s7614_s4 + $0x118] sm:$0xff]  ;;  %3885 = vperm.xlu0 %5355, %v3719_v30   ;;  %v2641_v26 = vld [vmem:[%s5550_s21 + $0x105] sm:$0xff] }
 0x125   : > { %v4921_v35 = vpop.f32.mrf.mxu1  ;;  %5220 = vmatmul.mubr.bf16.gmra.mxu1 %v2658_v41  ;;  %5171 = vmatprep.mubr.bf16.mxu0 %v5952_v61  ;;  %v2640_v8 = vld [vmem:[%s5550_s21 + $0xfd] sm:$0xff] }
 0x126   : > { %v6210_v32 = vadd.f32 %v4921_v35, %v4869_v22  ;;  %v697_v42 = vpop.f32.mrf.mxu0  ;;  %5223 = vmatprep.mubr.bf16.mxu1 %v2659_v21  ;;  %3900 = vperm.xlu1 %5356, %v3722_v45  }
 0x127   : > { %v922_v48 = vpop.f32.mrf.mxu1 }
 0x128   : > { %v6219_v6 = vadd.f32 %v922_v48, %v697_v42  ;;  %v4870_v61 = vpop.f32.mrf.mxu0  ;;  %3895 = vperm.xlu0 %5355, %v3721_v2  }
 0x129   : > { %v4922_v59 = vpop.f32.mrf.mxu1 }
 0x12a   : > { %v6224_v4 = vadd.f32 %v4922_v59, %v4870_v61  ;;  %v700_v24 = vpop.f32.mrf.mxu0  ;;  %v2643_v59 = vld [vmem:[%s5550_s21 + $0x115] sm:$0xff] }
 0x12b   : > { %v925_v40 = vpop.f32.mrf.mxu1 }
 0x12c   : > { %v6226_v9 = vadd.f32 %v925_v40, %v700_v24  ;;  %v4873_v11 = vpop.f32.mrf.mxu0  ;;  %5172 = vmatmul.mubr.bf16.gmra.mxu0 %v5954_v63  ;;  %v2662_v63 = vpack.c.bf16 %v2640_v8, %v2639_v19  ;;  %v2645_v40 = vld [vmem:[%s5550_s21 + $0x125] sm:$0xff] }
 0x12d   : > { %v4925_v12 = vpop.f32.mrf.mxu1  ;;  %5224 = vmatmul.mubr.bf16.gmra.mxu1 %v2660_v62  ;;  %5175 = vmatprep.mubr.bf16.mxu0 %v5978_v15  ;;  %v2663_v15 = vpack.c.bf16 %v2642_v28, %v2641_v26  ;;  %v2644_v62 = vld [vmem:[%s5550_s21 + $0x11d] sm:$0xff] }
 0x12e   : > { %v6230_v13 = vadd.f32 %v4925_v12, %v4873_v11  ;;  %v713_v41 = vpop.f32.mrf.mxu0  ;;  %5227 = vmatprep.mubr.bf16.mxu1 %v2661_v7  ;;  %v2646_v11 = vld [vmem:[%s5550_s21 + $0x12d] sm:$0xff] }
 0x12f   : > { %v938_v21 = vpop.f32.mrf.mxu1  ;;  %v2665_v8 = vpack.c.bf16 %v2646_v11, %v2645_v40 }
 0x130   : > { %v6236_v22 = vadd.f32 %v938_v21, %v713_v41  ;;  %v4874_v35 = vpop.f32.mrf.mxu0 }
 0x131   : > { %v4926_v30 = vpop.f32.mrf.mxu1 }
 0x132   : > { %v6238_v42 = vadd.f32 %v4926_v30, %v4874_v35  ;;  %v716_v38 = vpop.f32.mrf.mxu0 }
 0x133   : > { %v941_v56 = vpop.f32.mrf.mxu1 }
 0x134   : > { %v6240_v48 = vadd.f32 %v941_v56, %v716_v38  ;;  %v4945_v50 = vpop.f32.mrf.mxu0  ;;  %5176 = vmatmul.mubr.bf16.gmra.mxu0 %v5980_v17  ;;  %v2316_v38 = vld [vmem:[%s5550_s21 + $0x13c] sm:$0xff] }
 0x135   : > { %v1251_v57 = vadd.f32 %v4945_v50, %v5992_v27  ;;  %v4997_v45 = vpop.f32.mrf.mxu1  ;;  %5228 = vmatmul.mubr.bf16.gmra.mxu1 %v2662_v63  ;;  %5179 = vmatprep.mubr.bf16.mxu0 %v6008_v47  ;;  %v2664_v47 = vpack.c.bf16 %v2644_v62, %v2643_v59  ;;  %v2315_v63 = vld [vmem:[%s5550_s21 + $0x134] sm:$0xff]  ;;  %v2945_v50 = vld [vmem:[%s5550_s21 + $0x26] sm:$0xff] }
 0x136   : > { %v1106_v61 = vpop.f32.mrf.mxu0  ;;  %5231 = vmatprep.mubr.bf16.mxu1 %v2663_v15  ;;  %v2647_v15 = vld [vmem:[%s5550_s21 + $0x135] sm:$0xff] }
 0x137   : > { %v6247_v2 = vadd.f32 %v4997_v45, %v1251_v57  ;;  %v1249_v24 = vadd.f32 %v1106_v61, %v6003_v37  ;;  %v1438_v7 = vpop.f32.mrf.mxu1  ;;  %v2946_v57 = vld [vmem:[%s5550_s21 + $0x2e] sm:$0xff] }
 0x138   : > { %v4946_v12 = vpop.f32.mrf.mxu0  ;;  %v3356_v59 = vld [vmem:[%s5550_s21 + $0x13] sm:$0xff] }
 0x139   : > { %v6252_v41 = vadd.f32 %v1438_v7, %v1249_v24  ;;  %v1252_v17 = vadd.f32 %v4946_v12, %v6010_v49  ;;  %v4998_v27 = vpop.f32.mrf.mxu1  ;;  %v2334_v24 = vpack.c.bf16 %v2316_v38, %v2315_v63  ;;  %v2981_v12 = vpack.c.bf16 %v2946_v57, %v2945_v50  ;;  %v3359_v38 = vld [vmem:[%s5550_s21 + $0x2b] sm:$0xff]  ;;  %v3360_v57 = vld [vmem:[%s5550_s21 + $0x33] sm:$0xff] }
 0x13a   : > { %v1109_v19 = vpop.f32.mrf.mxu0 }
 0x13b   : > { %v6255_v21 = vadd.f32 %v4998_v27, %v1252_v17  ;;  %v1250_v37 = vadd.f32 %v1109_v19, %v6017_v55  ;;  %v1441_v26 = vpop.f32.mrf.mxu1  ;;  %v2648_v55 = vld [vmem:[%s5550_s21 + $0x13d] sm:$0xff] }
 0x13c   : > { %v4949_v28 = vpop.f32.mrf.mxu0  ;;  %5180 = vmatmul.mubr.bf16.gmra.mxu0 %v6012_v51  ;;  %v2666_v11 = vpack.c.bf16 %v2648_v55, %v2647_v15  ;;  %v2950_v15 = vld [vmem:[%s5550_s21 + $0x4e] sm:$0xff] }
 0x13d   : > { %v6259_v35 = vadd.f32 %v1441_v26, %v1250_v37  ;;  %v1255_v49 = vadd.f32 %v4949_v28, %v6025_v0  ;;  %v5001_v30 = vpop.f32.mrf.mxu1  ;;  %5232 = vmatmul.mubr.bf16.gmra.mxu1 %v2664_v47  ;;  %5183 = vmatprep.mubr.bf16.mxu0 %v6040_v16  ;;  %v3357_v0 = vld [vmem:[%s5550_s21 + $0x1b] sm:$0xff] }
 0x13e   : > { %v1122_v56 = vpop.f32.mrf.mxu0  ;;  %5235 = vmatprep.mubr.bf16.mxu1 %v2665_v8  ;;  %v3392_v27 = vpack.c.bf16 %v3357_v0, %v3356_v59  ;;  %v2947_v28 = vld [vmem:[%s5550_s21 + $0x36] sm:$0xff] }
 0x13f   : > { %v6269_v45 = vadd.f32 %v5001_v30, %v1255_v49  ;;  %v1253_v51 = vadd.f32 %v1122_v56, %v6035_v10  ;;  %v1454_v61 = vpop.f32.mrf.mxu1  ;;  %v2948_v49 = vld [vmem:[%s5550_s21 + $0x3e] sm:$0xff] }
 0x140   : > { %v4950_v62 = vpop.f32.mrf.mxu0  ;;  %v3358_v30 = vld [vmem:[%s5550_s21 + $0x23] sm:$0xff] }
 0x141   : > { %v6274_v7 = vadd.f32 %v1454_v61, %v1253_v51  ;;  %v1256_v16 = vadd.f32 %v4950_v62, %v6042_v18  ;;  %v5002_v40 = vpop.f32.mrf.mxu1  ;;  %v3361_v51 = vld [vmem:[%s5550_s21 + $0x3b] sm:$0xff]  ;;  %v2982_v61 = vpack.c.bf16 %v2948_v49, %v2947_v28  ;;  %v3363_v49 = vld [vmem:[%s5550_s21 + $0x4b] sm:$0xff] }
 0x142   : > { %v1125_v17 = vpop.f32.mrf.mxu0 }
 0x143   : > { %v6277_v47 = vadd.f32 %v5002_v40, %v1256_v16  ;;  %v1254_v10 = vadd.f32 %v1125_v17, %v6047_v25  ;;  %v1457_v19 = vpop.f32.mrf.mxu1  ;;  %v2949_v25 = vld [vmem:[%s5550_s21 + $0x46] sm:$0xff] }
 0x144   : > { %v4953_v8 = vpop.f32.mrf.mxu0  ;;  %5184 = vmatmul.mubr.bf16.gmra.mxu0 %v2334_v24  ;;  %v3393_v24 = vpack.c.bf16 %v3359_v38, %v3358_v30  ;;  %v2983_v16 = vpack.c.bf16 %v2950_v15, %v2949_v25  ;;  %v2954_v30 = vld [vmem:[%s5550_s21 + $0x6e] sm:$0xff] }
 0x145   : > { %v6280_v37 = vadd.f32 %v1457_v19, %v1254_v10  ;;  %v1259_v18 = vadd.f32 %v4953_v8, %v6054_v31  ;;  %v5005_v26 = vpop.f32.mrf.mxu1  ;;  %5236 = vmatmul.mubr.bf16.gmra.mxu1 %v2666_v11  ;;  %5255 = vmatprep.mubr.bf16.mxu0 %v2981_v12  ;;  %v3394_v11 = vpack.c.bf16 %v3361_v51, %v3360_v57  ;;  %v2951_v8 = vld [vmem:[%s5550_s21 + $0x56] sm:$0xff] }
 0x146   : > { %v1138_v63 = vpop.f32.mrf.mxu0  ;;  %5307 = vmatprep.mubr.bf16.mxu1 %v3392_v27  ;;  %v3364_v15 = vld [vmem:[%s5550_s21 + $0x53] sm:$0xff] }
 0x147   : > { %v6289_v56 = vadd.f32 %v5005_v26, %v1259_v18  ;;  %v1257_v55 = vadd.f32 %v1138_v63, %v6061_v39  ;;  %v1470_v50 = vpop.f32.mrf.mxu1  ;;  %v2952_v18 = vld [vmem:[%s5550_s21 + $0x5e] sm:$0xff] }
 0x148   : > { %v4954_v31 = vpop.f32.mrf.mxu0  ;;  %v3362_v26 = vld [vmem:[%s5550_s21 + $0x43] sm:$0xff] }
 0x149   : > { %v6294_v59 = vadd.f32 %v1470_v50, %v1257_v55  ;;  %v1260_v0 = vadd.f32 %v4954_v31, %v6068_v52  ;;  %v5006_v62 = vpop.f32.mrf.mxu1  ;;  %v3365_v55 = vld [vmem:[%s5550_s21 + $0x5b] sm:$0xff]  ;;  %v2984_v50 = vpack.c.bf16 %v2952_v18, %v2951_v8  ;;  %v3367_v18 = vld [vmem:[%s5550_s21 + $0x6b] sm:$0xff] }
 0x14a   : > { %v1141_v40 = vpop.f32.mrf.mxu0 }
 0x14b   : > { %v6297_v12 = vadd.f32 %v5006_v62, %v1260_v0  ;;  %v1258_v39 = vadd.f32 %v1141_v40, %v6073_v60  ;;  %v1473_v17 = vpop.f32.mrf.mxu1  ;;  %v2953_v60 = vld [vmem:[%s5550_s21 + $0x66] sm:$0xff] }
 0x14c   : > { %v4957_v27 = vpop.f32.mrf.mxu0  ;;  %5256 = vmatmul.mubr.bf16.vlgmr.msra.gmra.mxu0 %v2982_v61  ;;  %v3395_v61 = vpack.c.bf16 %v3363_v49, %v3362_v26  ;;  %v2985_v0 = vpack.c.bf16 %v2954_v30, %v2953_v60  ;;  %v2958_v26 = vld [vmem:[%s5550_s21 + $0x8e] sm:$0xff] }
 0x14d   : > { %v6300_v10 = vadd.f32 %v1473_v17, %v1258_v39  ;;  %v1263_v52 = vadd.f32 %v4957_v27, %v6084_v5  ;;  %v5009_v19 = vpop.f32.mrf.mxu1  ;;  %5308 = vmatmul.mubr.bf16.vlgmr.msra.gmra.mxu1 %v3393_v24  ;;  %5259 = vmatprep.mubr.bf16.mxu0 %v2983_v16  ;;  %v3396_v24 = vpack.c.bf16 %v3365_v55, %v3364_v15  ;;  %v2955_v27 = vld [vmem:[%s5550_s21 + $0x76] sm:$0xff] }
 0x14e   : > { %v1154_v28 = vpop.f32.mrf.mxu0  ;;  %5311 = vmatprep.mubr.bf16.mxu1 %v3394_v11  ;;  %v3368_v30 = vld [vmem:[%s5550_s21 + $0x73] sm:$0xff] }
 0x14f   : > { %v6309_v63 = vadd.f32 %v5009_v19, %v1263_v52  ;;  %v1261_v38 = vadd.f32 %v1154_v28, %v6100_v14  ;;  %v1486_v25 = vpop.f32.mrf.mxu1  ;;  %v2956_v52 = vld [vmem:[%s5550_s21 + $0x7e] sm:$0xff] }
 0x150   : > { %v4958_v5 = vpop.f32.mrf.mxu0  ;;  %v3366_v19 = vld [vmem:[%s5550_s21 + $0x63] sm:$0xff] }
 0x151   : > { %v6314_v57 = vadd.f32 %v1486_v25, %v1261_v38  ;;  %v1264_v51 = vadd.f32 %v4958_v5, %v6105_v23  ;;  %v5010_v31 = vpop.f32.mrf.mxu1  ;;  %v3369_v38 = vld [vmem:[%s5550_s21 + $0x7b] sm:$0xff]  ;;  %v2986_v25 = vpack.c.bf16 %v2956_v52, %v2955_v27  ;;  %v3371_v52 = vld [vmem:[%s5550_s21 + $0x8b] sm:$0xff] }
 0x152   : > { %v1157_v62 = vpop.f32.mrf.mxu0 }
 0x153   : > { %v6317_v16 = vadd.f32 %v5010_v31, %v1264_v51  ;;  %v1262_v14 = vadd.f32 %v1157_v62, %v6110_v34  ;;  %v1489_v40 = vpop.f32.mrf.mxu1  ;;  %v2957_v34 = vld [vmem:[%s5550_s21 + $0x86] sm:$0xff] }
 0x154   : > { %v4961_v11 = vpop.f32.mrf.mxu0  ;;  %5260 = vmatmul.mubr.bf16.gmra.mxu0 %v2984_v50  ;;  %v3397_v50 = vpack.c.bf16 %v3367_v18, %v3366_v19  ;;  %v2987_v51 = vpack.c.bf16 %v2958_v26, %v2957_v34  ;;  %v2962_v19 = vld [vmem:[%s5550_s21 + $0xae] sm:$0xff] }
 0x155   : > { %v6320_v39 = vadd.f32 %v1489_v40, %v1262_v14  ;;  %v1267_v23 = vadd.f32 %v4961_v11, %v6120_v44  ;;  %v5013_v17 = vpop.f32.mrf.mxu1  ;;  %5312 = vmatmul.mubr.bf16.gmra.mxu1 %v3395_v61  ;;  %5263 = vmatprep.mubr.bf16.mxu0 %v2985_v0  ;;  %v3398_v61 = vpack.c.bf16 %v3369_v38, %v3368_v30  ;;  %v2959_v11 = vld [vmem:[%s5550_s21 + $0x96] sm:$0xff] }
 0x156   : > { %v1170_v8 = vpop.f32.mrf.mxu0  ;;  %5315 = vmatprep.mubr.bf16.mxu1 %v3396_v24  ;;  %v3372_v26 = vld [vmem:[%s5550_s21 + $0x93] sm:$0xff] }
 0x157   : > { %v6329_v28 = vadd.f32 %v5013_v17, %v1267_v23  ;;  %v1265_v49 = vadd.f32 %v1170_v8, %v6132_v58  ;;  %v1502_v60 = vpop.f32.mrf.mxu1  ;;  %v2960_v23 = vld [vmem:[%s5550_s21 + $0x9e] sm:$0xff] }
 0x158   : > { %v4962_v44 = vpop.f32.mrf.mxu0  ;;  %v3370_v17 = vld [vmem:[%s5550_s21 + $0x83] sm:$0xff] }
 0x159   : > { %v6334_v15 = vadd.f32 %v1502_v60, %v1265_v49  ;;  %v1268_v55 = vadd.f32 %v4962_v44, %v6137_v3  ;;  %v5014_v5 = vpop.f32.mrf.mxu1  ;;  %v3373_v49 = vld [vmem:[%s5550_s21 + $0x9b] sm:$0xff]  ;;  %v2988_v60 = vpack.c.bf16 %v2960_v23, %v2959_v11  ;;  %v3375_v23 = vld [vmem:[%s5550_s21 + $0xab] sm:$0xff] }
 0x15a   : > { %v1173_v31 = vpop.f32.mrf.mxu0 }
 0x15b   : > { %v6337_v0 = vadd.f32 %v5014_v5, %v1268_v55  ;;  %v1266_v58 = vadd.f32 %v1173_v31, %v6142_v36  ;;  %v1505_v62 = vpop.f32.mrf.mxu1  ;;  %v2961_v36 = vld [vmem:[%s5550_s21 + $0xa6] sm:$0xff] }
 0x15c   : > { %v4965_v24 = vpop.f32.mrf.mxu0  ;;  %5264 = vmatmul.mubr.bf16.gmra.mxu0 %v2986_v25  ;;  %v3399_v25 = vpack.c.bf16 %v3371_v52, %v3370_v17  ;;  %v2989_v55 = vpack.c.bf16 %v2962_v19, %v2961_v36  ;;  %v2966_v17 = vld [vmem:[%s5550_s21 + $0xce] sm:$0xff] }
 0x15d   : > { %v6340_v14 = vadd.f32 %v1505_v62, %v1266_v58  ;;  %v1271_v3 = vadd.f32 %v4965_v24, %v6152_v54  ;;  %v5017_v40 = vpop.f32.mrf.mxu1  ;;  %5316 = vmatmul.mubr.bf16.gmra.mxu1 %v3397_v50  ;;  %5267 = vmatprep.mubr.bf16.mxu0 %v2987_v51  ;;  %v3400_v50 = vpack.c.bf16 %v3373_v49, %v3372_v26  ;;  %v2963_v24 = vld [vmem:[%s5550_s21 + $0xb6] sm:$0xff] }
 0x15e   : > { %v1186_v27 = vpop.f32.mrf.mxu0  ;;  %5319 = vmatprep.mubr.bf16.mxu1 %v3398_v61  ;;  %v3376_v19 = vld [vmem:[%s5550_s21 + $0xb3] sm:$0xff] }
 0x15f   : > { %v6349_v8 = vadd.f32 %v5017_v40, %v1271_v3  ;;  %v1269_v18 = vadd.f32 %v1186_v27, %v6164_v33  ;;  %v1518_v34 = vpop.f32.mrf.mxu1  ;;  %v2964_v3 = vld [vmem:[%s5550_s21 + $0xbe] sm:$0xff] }
 0x160   : > { %v4966_v54 = vpop.f32.mrf.mxu0  ;;  %v3374_v40 = vld [vmem:[%s5550_s21 + $0xa3] sm:$0xff] }
 0x161   : > { %v6354_v30 = vadd.f32 %v1518_v34, %v1269_v18  ;;  %v1272_v38 = vadd.f32 %v4966_v54, %v6169_v46  ;;  %v5018_v44 = vpop.f32.mrf.mxu1  ;;  %v3377_v18 = vld [vmem:[%s5550_s21 + $0xbb] sm:$0xff]  ;;  %v2990_v34 = vpack.c.bf16 %v2964_v3, %v2963_v24  ;;  %v3379_v3 = vld [vmem:[%s5550_s21 + $0xcb] sm:$0xff] }
 0x162   : > { %v1189_v5 = vpop.f32.mrf.mxu0 }
 0x163   : > { %v6357_v51 = vadd.f32 %v5018_v44, %v1272_v38  ;;  %v1270_v33 = vadd.f32 %v1189_v5, %v6174_v53  ;;  %v1521_v31 = vpop.f32.mrf.mxu1  ;;  %v2965_v53 = vld [vmem:[%s5550_s21 + $0xc6] sm:$0xff] }
 0x164   : > { %v4969_v61 = vpop.f32.mrf.mxu0  ;;  %5268 = vmatmul.mubr.bf16.gmra.mxu0 %v2988_v60  ;;  %v3401_v60 = vpack.c.bf16 %v3375_v23, %v3374_v40  ;;  %v2991_v38 = vpack.c.bf16 %v2966_v17, %v2965_v53  ;;  %v2970_v40 = vld [vmem:[%s5550_s21 + $0xee] sm:$0xff] }
 0x165   : > { %v6360_v58 = vadd.f32 %v1521_v31, %v1270_v33  ;;  %v1275_v46 = vadd.f32 %v4969_v61, %v6184_v1  ;;  %v5021_v62 = vpop.f32.mrf.mxu1  ;;  %5320 = vmatmul.mubr.bf16.gmra.mxu1 %v3399_v25  ;;  %5271 = vmatprep.mubr.bf16.mxu0 %v2989_v55  ;;  %v3402_v25 = vpack.c.bf16 %v3377_v18, %v3376_v19  ;;  %v2967_v61 = vld [vmem:[%s5550_s21 + $0xd6] sm:$0xff] }
 0x166   : > { %v1202_v11 = vpop.f32.mrf.mxu0  ;;  %5323 = vmatprep.mubr.bf16.mxu1 %v3400_v50  ;;  %v3380_v17 = vld [vmem:[%s5550_s21 + $0xd3] sm:$0xff] }
 0x167   : > { %v6369_v27 = vadd.f32 %v5021_v62, %v1275_v46  ;;  %v1273_v52 = vadd.f32 %v1202_v11, %v6193_v43  ;;  %v1534_v36 = vpop.f32.mrf.mxu1  ;;  %v2968_v46 = vld [vmem:[%s5550_s21 + $0xde] sm:$0xff] }
 0x168   : > { %v4970_v1 = vpop.f32.mrf.mxu0  ;;  %v3378_v62 = vld [vmem:[%s5550_s21 + $0xc3] sm:$0xff] }
 0x169   : > { %v6374_v26 = vadd.f32 %v1534_v36, %v1273_v52  ;;  %v1276_v49 = vadd.f32 %v4970_v1, %v6198_v20  ;;  %v5022_v54 = vpop.f32.mrf.mxu1  ;;  %v3381_v52 = vld [vmem:[%s5550_s21 + $0xdb] sm:$0xff]  ;;  %v2992_v36 = vpack.c.bf16 %v2968_v46, %v2967_v61  ;;  %v3383_v46 = vld [vmem:[%s5550_s21 + $0xeb] sm:$0xff] }
 0x16a   : > { %v1205_v44 = vpop.f32.mrf.mxu0 }
 0x16b   : > { %v6377_v55 = vadd.f32 %v5022_v54, %v1276_v49  ;;  %v1274_v43 = vadd.f32 %v1205_v44, %v6203_v29  ;;  %v1537_v5 = vpop.f32.mrf.mxu1  ;;  %v2969_v29 = vld [vmem:[%s5550_s21 + $0xe6] sm:$0xff] }
 0x16c   : > { %v4973_v50 = vpop.f32.mrf.mxu0  ;;  %5272 = vmatmul.mubr.bf16.gmra.mxu0 %v2990_v34  ;;  %v3403_v34 = vpack.c.bf16 %v3379_v3, %v3378_v62  ;;  %v2993_v49 = vpack.c.bf16 %v2970_v40, %v2969_v29  ;;  %v2974_v62 = vld [vmem:[%s5550_s21 + $0x10e] sm:$0xff] }
 0x16d   : > { %v6380_v33 = vadd.f32 %v1537_v5, %v1274_v43  ;;  %v1279_v20 = vadd.f32 %v4973_v50, %v6210_v32  ;;  %v5025_v31 = vpop.f32.mrf.mxu1  ;;  %5324 = vmatmul.mubr.bf16.gmra.mxu1 %v3401_v60  ;;  %5275 = vmatprep.mubr.bf16.mxu0 %v2991_v38  ;;  %v3404_v60 = vpack.c.bf16 %v3381_v52, %v3380_v17  ;;  %v2971_v50 = vld [vmem:[%s5550_s21 + $0xf6] sm:$0xff] }
 0x16e   : > { %v1218_v24 = vpop.f32.mrf.mxu0  ;;  %5327 = vmatprep.mubr.bf16.mxu1 %v3402_v25  ;;  %v3384_v40 = vld [vmem:[%s5550_s21 + $0xf3] sm:$0xff] }
 0x16f   : > { %v6389_v11 = vadd.f32 %v5025_v31, %v1279_v20  ;;  %v1277_v23 = vadd.f32 %v1218_v24, %v6219_v6  ;;  %v1550_v53 = vpop.f32.mrf.mxu1  ;;  %v2972_v20 = vld [vmem:[%s5550_s21 + $0xfe] sm:$0xff] }
 0x170   : > { %v4974_v32 = vpop.f32.mrf.mxu0  ;;  %v3382_v31 = vld [vmem:[%s5550_s21 + $0xe3] sm:$0xff] }
 0x171   : > { %v6394_v19 = vadd.f32 %v1550_v53, %v1277_v23  ;;  %v1280_v18 = vadd.f32 %v4974_v32, %v6224_v4  ;;  %v5026_v1 = vpop.f32.mrf.mxu1  ;;  %v3385_v23 = vld [vmem:[%s5550_s21 + $0xfb] sm:$0xff]  ;;  %v2994_v53 = vpack.c.bf16 %v2972_v20, %v2971_v50  ;;  %v3387_v20 = vld [vmem:[%s5550_s21 + $0x10b] sm:$0xff] }
 0x172   : > { %v1221_v54 = vpop.f32.mrf.mxu0 }
 0x173   : > { %v6397_v38 = vadd.f32 %v5026_v1, %v1280_v18  ;;  %v1278_v6 = vadd.f32 %v1221_v54, %v6226_v9  ;;  %v1553_v44 = vpop.f32.mrf.mxu1  ;;  %v2973_v9 = vld [vmem:[%s5550_s21 + $0x106] sm:$0xff] }
 0x174   : > { %v4977_v25 = vpop.f32.mrf.mxu0  ;;  %5276 = vmatmul.mubr.bf16.gmra.mxu0 %v2992_v36  ;;  %v3405_v36 = vpack.c.bf16 %v3383_v46, %v3382_v31  ;;  %v2995_v18 = vpack.c.bf16 %v2974_v62, %v2973_v9  ;;  %v2978_v31 = vld [vmem:[%s5550_s21 + $0x12e] sm:$0xff] }
 0x175   : > { %v6400_v43 = vadd.f32 %v1553_v44, %v1278_v6  ;;  %v1283_v4 = vadd.f32 %v4977_v25, %v6230_v13  ;;  %v5029_v5 = vpop.f32.mrf.mxu1  ;;  %5328 = vmatmul.mubr.bf16.gmra.mxu1 %v3403_v34  ;;  %5279 = vmatprep.mubr.bf16.mxu0 %v2993_v49  ;;  %v3406_v34 = vpack.c.bf16 %v3385_v23, %v3384_v40  ;;  %v2975_v25 = vld [vmem:[%s5550_s21 + $0x116] sm:$0xff] }
 0x176   : > { %v1234_v61 = vpop.f32.mrf.mxu0  ;;  %5331 = vmatprep.mubr.bf16.mxu1 %v3404_v60  ;;  %v3388_v62 = vld [vmem:[%s5550_s21 + $0x113] sm:$0xff] }
 0x177   : > { %v6409_v24 = vadd.f32 %v5029_v5, %v1283_v4  ;;  %v1281_v3 = vadd.f32 %v1234_v61, %v6236_v22  ;;  %v1566_v29 = vpop.f32.mrf.mxu1  ;;  %v2976_v4 = vld [vmem:[%s5550_s21 + $0x11e] sm:$0xff] }
 0x178   : > { %v4978_v13 = vpop.f32.mrf.mxu0  ;;  %v3386_v5 = vld [vmem:[%s5550_s21 + $0x103] sm:$0xff] }
 0x179   : > { %v6414_v17 = vadd.f32 %v1566_v29, %v1281_v3  ;;  %v1284_v52 = vadd.f32 %v4978_v13, %v6238_v42  ;;  %v5030_v32 = vpop.f32.mrf.mxu1  ;;  %v3389_v3 = vld [vmem:[%s5550_s21 + $0x11b] sm:$0xff]  ;;  %v2996_v29 = vpack.c.bf16 %v2976_v4, %v2975_v25  ;;  %v3390_v25 = vld [vmem:[%s5550_s21 + $0x123] sm:$0xff]  ;;  %v3391_v4 = vld [vmem:[%s5550_s21 + $0x12b] sm:$0xff] }
 0x17a   : > { %v1237_v1 = vpop.f32.mrf.mxu0 }
 0x17b   : > { %v6417_v49 = vadd.f32 %v5030_v32, %v1284_v52  ;;  %v1282_v22 = vadd.f32 %v1237_v1, %v6240_v48  ;;  %v1569_v54 = vpop.f32.mrf.mxu1  ;;  %v2977_v48 = vld [vmem:[%s5550_s21 + $0x126] sm:$0xff] }
 0x17c   : > { %v5049_v60 = vpop.f32.mrf.mxu0  ;;  %5280 = vmatmul.mubr.bf16.gmra.mxu0 %v2994_v53  ;;  %v3407_v53 = vpack.c.bf16 %v3387_v20, %v3386_v5  ;;  %v2997_v52 = vpack.c.bf16 %v2978_v31, %v2977_v48 }
 0x17d   : > { %v6420_v6 = vadd.f32 %v1569_v54, %v1282_v22  ;;  %v1915_v42 = vadd.f32 %v5049_v60, %v6247_v2  ;;  %v5101_v44 = vpop.f32.mrf.mxu1  ;;  %5332 = vmatmul.mubr.bf16.gmra.mxu1 %v3405_v36  ;;  %5283 = vmatprep.mubr.bf16.mxu0 %v2995_v18  ;;  %v3408_v36 = vpack.c.bf16 %v3389_v3, %v3388_v62  ;;  %v2979_v60 = vld [vmem:[%s5550_s21 + $0x136] sm:$0xff] }
 0x17e   : > { %v1770_v50 = vpop.f32.mrf.mxu0  ;;  %5335 = vmatprep.mubr.bf16.mxu1 %v3406_v34 }
 0x17f   : > { %v6429_v61 = vadd.f32 %v5101_v44, %v1915_v42  ;;  %v1913_v46 = vadd.f32 %v1770_v50, %v6252_v41  ;;  %v2102_v9 = vpop.f32.mrf.mxu1  ;;  %v2980_v42 = vld [vmem:[%s5550_s21 + $0x13e] sm:$0xff]  ;;  %s5344_s21 = smul.u32 288, %s5532_s27 }
 0x180   : > { %v5050_v2 = vpop.f32.mrf.mxu0  ;;  %v2998_v48 = vpack.c.bf16 %v2980_v42, %v2979_v60 }
 0x181   : > { %v6434_v40 = vadd.f32 %v2102_v9, %v1913_v46  ;;  %v1916_v23 = vadd.f32 %v5050_v2, %v6255_v21  ;;  %v5102_v13 = vpop.f32.mrf.mxu1  ;;  %v3409_v9 = vpack.c.bf16 %v3391_v4, %v3390_v25  ;;  %s6678_s27 = scalar_lea.vmem %s7616_s6, %s5344_s21  ;;  %s6693_s15 = scalar_lea.vmem %s7615_s5, %s5344_s21 }
 0x182   : > { %v1773_v32 = vpop.f32.mrf.mxu0 }
 0x183   : > { %v6437_v18 = vadd.f32 %v5102_v13, %v1916_v23  ;;  %v1914_v41 = vadd.f32 %v1773_v32, %v6259_v35  ;;  %v2105_v1 = vpop.f32.mrf.mxu1 }
 0x184   : > { %v5053_v34 = vpop.f32.mrf.mxu0  ;;  %5284 = vmatmul.mubr.bf16.gmra.mxu0 %v2996_v29 }
 0x185   : > { %v6440_v22 = vadd.f32 %v2105_v1, %v1914_v41  ;;  %v1919_v21 = vadd.f32 %v5053_v34, %v6269_v45  ;;  %v5105_v54 = vpop.f32.mrf.mxu1  ;;  %5336 = vmatmul.mubr.bf16.gmra.mxu1 %v3407_v53  ;;  %5287 = vmatprep.mubr.bf16.mxu0 %v2997_v52 }
 0x186   : > { %v1786_v44 = vpop.f32.mrf.mxu0  ;;  %5339 = vmatprep.mubr.bf16.mxu1 %v3408_v36 }
 0x187   : > { %v6447_v5 = vadd.f32 %v5105_v54, %v1919_v21  ;;  %v1917_v35 = vadd.f32 %v1786_v44, %v6274_v7  ;;  %v2118_v50 = vpop.f32.mrf.mxu1 }
 0x188   : > { %v5054_v20 = vpop.f32.mrf.mxu0 }
 0x189   : > { %v6450_v31 = vadd.f32 %v2118_v50, %v1917_v35  ;;  %v1920_v45 = vadd.f32 %v5054_v20, %v6277_v47  ;;  %v5106_v46 = vpop.f32.mrf.mxu1 }
 0x18a   : > { %v1789_v62 = vpop.f32.mrf.mxu0 }
 0x18b   : > { %v6453_v3 = vadd.f32 %v5106_v46, %v1920_v45  ;;  %v1918_v2 = vadd.f32 %v1789_v62, %v6280_v37  ;;  %v2121_v29 = vpop.f32.mrf.mxu1 }
 0x18c   : > { %v5057_v23 = vpop.f32.mrf.mxu0  ;;  %5288 = vmatmul.mubr.bf16.gmra.mxu0 %v2998_v48 }
 0x18d   : > { %v6456_v13 = vadd.f32 %v2121_v29, %v1918_v2  ;;  %v1923_v7 = vadd.f32 %v5057_v23, %v6289_v56  ;;  %v5109_v53 = vpop.f32.mrf.mxu1  ;;  %5340 = vmatmul.mubr.bf16.gmra.mxu1 %v3409_v9 }
 0x18e   : > { %v1802_v52 = vpop.f32.mrf.mxu0 }
 0x18f   : > { %v6459_v32 = vadd.f32 %v5109_v53, %v1923_v7  ;;  %v1921_v47 = vadd.f32 %v1802_v52, %v6294_v59  ;;  %v2134_v36 = vpop.f32.mrf.mxu1 }
 0x190   : > { %v5058_v41 = vpop.f32.mrf.mxu0 }
 0x191   : > { %v6462_v1 = vadd.f32 %v2134_v36, %v1921_v47  ;;  %v1924_v37 = vadd.f32 %v5058_v41, %v6297_v12  ;;  %v5110_v34 = vpop.f32.mrf.mxu1 }
 0x192   : > { %v1805_v21 = vpop.f32.mrf.mxu0 }
 0x193   : > { %v6465_v54 = vadd.f32 %v5110_v34, %v1924_v37  ;;  %v1922_v60 = vadd.f32 %v1805_v21, %v6300_v10  ;;  %v2137_v56 = vpop.f32.mrf.mxu1 }
 0x194   : > { %v5061_v42 = vpop.f32.mrf.mxu0 }
 0x195   : > { %v6468_v44 = vadd.f32 %v2137_v56, %v1922_v60  ;;  %v1927_v25 = vadd.f32 %v5061_v42, %v6309_v63  ;;  %v5113_v4 = vpop.f32.mrf.mxu1 }
 0x196   : > { %v1818_v59 = vpop.f32.mrf.mxu0 }
 0x197   : > { %v6471_v35 = vadd.f32 %v5113_v4, %v1927_v25  ;;  %v1925_v50 = vadd.f32 %v1818_v59, %v6314_v57  ;;  %v2150_v20 = vpop.f32.mrf.mxu1 }
 0x198   : > { %v5062_v12 = vpop.f32.mrf.mxu0 }
 0x199   : > { %v6474_v48 = vadd.f32 %v2150_v20, %v1925_v50  ;;  %v1928_v45 = vadd.f32 %v5062_v12, %v6317_v16  ;;  %v5114_v46 = vpop.f32.mrf.mxu1 }
 0x19a   : > { %v1821_v10 = vpop.f32.mrf.mxu0 }
 0x19b   : > { %v6477_v9 = vadd.f32 %v5114_v46, %v1928_v45  ;;  %v1926_v62 = vadd.f32 %v1821_v10, %v6320_v39  ;;  %v2153_v2 = vpop.f32.mrf.mxu1 }
 0x19c   : > { %v5065_v63 = vpop.f32.mrf.mxu0 }
 0x19d   : > { %v6480_v29 = vadd.f32 %v2153_v2, %v1926_v62  ;;  %v1931_v23 = vadd.f32 %v5065_v63, %v6329_v28  ;;  %v5117_v7 = vpop.f32.mrf.mxu1 }
 0x19e   : > { %v1834_v57 = vpop.f32.mrf.mxu0 }
 0x19f   : > { %v6483_v53 = vadd.f32 %v5117_v7, %v1931_v23  ;;  %v1929_v52 = vadd.f32 %v1834_v57, %v6334_v15  ;;  %v2166_v47 = vpop.f32.mrf.mxu1 }
 0x1a0   : > { %v5066_v16 = vpop.f32.mrf.mxu0 }
 0x1a1   : > { %v6486_v36 = vadd.f32 %v2166_v47, %v1929_v52  ;;  %v1932_v41 = vadd.f32 %v5066_v16, %v6337_v0  ;;  %v5118_v37 = vpop.f32.mrf.mxu1 }
 0x1a2   : > { %v1837_v39 = vpop.f32.mrf.mxu0 }
 0x1a3   : > { %v6489_v34 = vadd.f32 %v5118_v37, %v1932_v41  ;;  %v1930_v21 = vadd.f32 %v1837_v39, %v6340_v14  ;;  %v2169_v60 = vpop.f32.mrf.mxu1 }
 0x1a4   : > { %v5069_v28 = vpop.f32.mrf.mxu0 }
 0x1a5   : > { %v6492_v56 = vadd.f32 %v2169_v60, %v1930_v21  ;;  %v1935_v42 = vadd.f32 %v5069_v28, %v6349_v8  ;;  %v5121_v25 = vpop.f32.mrf.mxu1 }
 0x1a6   : > { %v1850_v15 = vpop.f32.mrf.mxu0 }
 0x1a7   : > { %v6495_v4 = vadd.f32 %v5121_v25, %v1935_v42  ;;  %v1933_v59 = vadd.f32 %v1850_v15, %v6354_v30  ;;  %v2182_v50 = vpop.f32.mrf.mxu1 }
 0x1a8   : > { %v5070_v0 = vpop.f32.mrf.mxu0 }
 0x1a9   : > { %v6498_v20 = vadd.f32 %v2182_v50, %v1933_v59  ;;  %v1936_v12 = vadd.f32 %v5070_v0, %v6357_v51  ;;  %v5122_v45 = vpop.f32.mrf.mxu1 }
 0x1aa   : > { %v1853_v14 = vpop.f32.mrf.mxu0 }
 0x1ab   : > { %v6501_v46 = vadd.f32 %v5122_v45, %v1936_v12  ;;  %v1934_v10 = vadd.f32 %v1853_v14, %v6360_v58  ;;  %v2185_v62 = vpop.f32.mrf.mxu1 }
 0x1ac   : > { %v5073_v8 = vpop.f32.mrf.mxu0 }
 0x1ad   : > { %v6504_v2 = vadd.f32 %v2185_v62, %v1934_v10  ;;  %v1939_v63 = vadd.f32 %v5073_v8, %v6369_v27  ;;  %v5125_v23 = vpop.f32.mrf.mxu1 }
 0x1ae   : > { %v1866_v30 = vpop.f32.mrf.mxu0 }
 0x1af   : > { %v6507_v7 = vadd.f32 %v5125_v23, %v1939_v63  ;;  %v1937_v57 = vadd.f32 %v1866_v30, %v6374_v26  ;;  %v2198_v52 = vpop.f32.mrf.mxu1 }
 0x1b0   : > { %v5074_v51 = vpop.f32.mrf.mxu0 }
 0x1b1   : > { %v6510_v47 = vadd.f32 %v2198_v52, %v1937_v57  ;;  %v1940_v16 = vadd.f32 %v5074_v51, %v6377_v55  ;;  %v5126_v41 = vpop.f32.mrf.mxu1 }
 0x1b2   : > { %v1869_v58 = vpop.f32.mrf.mxu0 }
 0x1b3   : > { %v6513_v37 = vadd.f32 %v5126_v41, %v1940_v16  ;;  %v1938_v39 = vadd.f32 %v1869_v58, %v6380_v33  ;;  %v2201_v21 = vpop.f32.mrf.mxu1 }
 0x1b4   : > { %v5077_v27 = vpop.f32.mrf.mxu0 }
 0x1b5   : > { %v6516_v60 = vadd.f32 %v2201_v21, %v1938_v39  ;;  %v1943_v28 = vadd.f32 %v5077_v27, %v6389_v11  ;;  %v5129_v42 = vpop.f32.mrf.mxu1 }
 0x1b6   : > { %v1882_v26 = vpop.f32.mrf.mxu0 }
 0x1b7   : > { %v6519_v25 = vadd.f32 %v5129_v42, %v1943_v28  ;;  %v1941_v15 = vadd.f32 %v1882_v26, %v6394_v19  ;;  %v2214_v59 = vpop.f32.mrf.mxu1 }
 0x1b8   : > { %v5078_v55 = vpop.f32.mrf.mxu0 }
 0x1b9   : > { %v6522_v50 = vadd.f32 %v2214_v59, %v1941_v15  ;;  %v1944_v0 = vadd.f32 %v5078_v55, %v6397_v38  ;;  %v5130_v12 = vpop.f32.mrf.mxu1 }
 0x1ba   : > { %v1885_v33 = vpop.f32.mrf.mxu0 }
 0x1bb   : > { %v6525_v45 = vadd.f32 %v5130_v12, %v1944_v0  ;;  %v1942_v14 = vadd.f32 %v1885_v33, %v6400_v43  ;;  %v2217_v10 = vpop.f32.mrf.mxu1 }
 0x1bc   : > { %v5081_v11 = vpop.f32.mrf.mxu0 }
 0x1bd   : > { %v6528_v62 = vadd.f32 %v2217_v10, %v1942_v14  ;;  %v1947_v8 = vadd.f32 %v5081_v11, %v6409_v24  ;;  %v5133_v63 = vpop.f32.mrf.mxu1 }
 0x1be   : > { %v1898_v19 = vpop.f32.mrf.mxu0 }
 0x1bf   : > { %v6531_v23 = vadd.f32 %v5133_v63, %v1947_v8  ;;  %v1945_v30 = vadd.f32 %v1898_v19, %v6414_v17  ;;  %v2230_v57 = vpop.f32.mrf.mxu1 }
 0x1c0   : > { %v5082_v38 = vpop.f32.mrf.mxu0 }
 0x1c1   : > { %v6534_v52 = vadd.f32 %v2230_v57, %v1945_v30  ;;  %v1948_v51 = vadd.f32 %v5082_v38, %v6417_v49  ;;  %v5134_v16 = vpop.f32.mrf.mxu1 }
 0x1c2   : > { %v1901_v43 = vpop.f32.mrf.mxu0 }
 0x1c3   : > { %v6537_v41 = vadd.f32 %v5134_v16, %v1948_v51  ;;  %v1946_v58 = vadd.f32 %v1901_v43, %v6420_v6  ;;  %v2233_v39 = vpop.f32.mrf.mxu1 }
 0x1c4   : > { %v5153_v24 = vpop.f32.mrf.mxu0 }
 0x1c5   : > { %v6540_v21 = vadd.f32 %v2233_v39, %v1946_v58  ;;  %v2579_v27 = vadd.f32 %v5153_v24, %v6429_v61  ;;  %v5205_v28 = vpop.f32.mrf.mxu1 }
 0x1c6   : > { %v2434_v17 = vpop.f32.mrf.mxu0 }
 0x1c7   : > { %v6543_v42 = vadd.f32 %v5205_v28, %v2579_v27  ;;  %v2577_v26 = vadd.f32 %v2434_v17, %v6434_v40  ;;  %v2766_v15 = vpop.f32.mrf.mxu1 }
 0x1c8   : > { %v5154_v49 = vpop.f32.mrf.mxu0 }
 0x1c9   : > { %v6546_v59 = vadd.f32 %v2766_v15, %v2577_v26  ;;  %v2580_v55 = vadd.f32 %v5154_v49, %v6437_v18  ;;  %v5206_v0 = vpop.f32.mrf.mxu1 }
 0x1ca   : > { %v2437_v6 = vpop.f32.mrf.mxu0 }
 0x1cb   : > { %v6549_v12 = vadd.f32 %v5206_v0, %v2580_v55  ;;  %v2578_v33 = vadd.f32 %v2437_v6, %v6440_v22  ;;  %v2769_v14 = vpop.f32.mrf.mxu1 }
 0x1cc   : > { %v5157_v61 = vpop.f32.mrf.mxu0 }
 0x1cd   : > { %v6552_v10 = vadd.f32 %v2769_v14, %v2578_v33  ;;  %v2583_v11 = vadd.f32 %v5157_v61, %v6447_v5  ;;  %v5209_v8 = vpop.f32.mrf.mxu1 }
 0x1ce   : > { %v2450_v40 = vpop.f32.mrf.mxu0 }
 0x1cf   : > { %v6555_v63 = vadd.f32 %v5209_v8, %v2583_v11  ;;  %v2581_v19 = vadd.f32 %v2450_v40, %v6450_v31  ;;  %v2782_v30 = vpop.f32.mrf.mxu1 }
 0x1d0   : > { %v5158_v18 = vpop.f32.mrf.mxu0 }
 0x1d1   : > { %v6558_v57 = vadd.f32 %v2782_v30, %v2581_v19  ;;  %v2584_v38 = vadd.f32 %v5158_v18, %v6453_v3  ;;  %v5210_v51 = vpop.f32.mrf.mxu1 }
 0x1d2   : > { %v2453_v22 = vpop.f32.mrf.mxu0 }
 0x1d3   : > { %v6561_v16 = vadd.f32 %v5210_v51, %v2584_v38  ;;  %v2582_v43 = vadd.f32 %v2453_v22, %v6456_v13  ;;  %v2785_v58 = vpop.f32.mrf.mxu1 }
 0x1d4   : > { %v5161_v5 = vpop.f32.mrf.mxu0 }
 0x1d5   : > { %v6564_v39 = vadd.f32 %v2785_v58, %v2582_v43  ;;  %v2587_v24 = vadd.f32 %v5161_v5, %v6459_v32  ;;  %v5213_v27 = vpop.f32.mrf.mxu1 }
 0x1d6   : > { %v2466_v31 = vpop.f32.mrf.mxu0 }
 0x1d7   : > { %v6567_v28 = vadd.f32 %v5213_v27, %v2587_v24  ;;  %v2585_v17 = vadd.f32 %v2466_v31, %v6462_v1  ;;  %v2798_v26 = vpop.f32.mrf.mxu1  ;;  %v6591_v27 = vpop.permute.xlu0 %3725 }
 0x1d8   : > { %v5162_v3 = vpop.f32.mrf.mxu0 }
 0x1d9   : > { %v6570_v15 = vadd.f32 %v2798_v26, %v2585_v17  ;;  %v2588_v49 = vadd.f32 %v5162_v3, %v6465_v54  ;;  %v5214_v55 = vpop.f32.mrf.mxu1 }
 0x1da   : > { %v2469_v13 = vpop.f32.mrf.mxu0 }
 0x1db   : > { %v6573_v0 = vadd.f32 %v5214_v55, %v2588_v49  ;;  %v2586_v6 = vadd.f32 %v2469_v13, %v6468_v44  ;;  %v2801_v33 = vpop.f32.mrf.mxu1  ;;  %v6599_v13 = vpop.permute.xlu1 %3735 }
 0x1dc   : > { %v5165_v32 = vpop.f32.mrf.mxu0 }
 0x1dd   : > { %v6576_v14 = vadd.f32 %v2801_v33, %v2586_v6  ;;  %v2591_v61 = vadd.f32 %v5165_v32, %v6471_v35  ;;  %v5217_v11 = vpop.f32.mrf.mxu1 }
 0x1de   : > { %v2482_v1 = vpop.f32.mrf.mxu0 }
 0x1df   : > { %v6579_v8 = vadd.f32 %v5217_v11, %v2591_v61  ;;  %v2589_v40 = vadd.f32 %v2482_v1, %v6474_v48  ;;  %v2814_v19 = vpop.f32.mrf.mxu1  ;;  %v6604_v61 = vpop.permute.xlu0 %3730 }
 0x1e0   : > { %v5166_v54 = vpop.f32.mrf.mxu0 }
 0x1e1   : > { %v6582_v30 = vadd.f32 %v2814_v19, %v2589_v40  ;;  %v2592_v18 = vadd.f32 %v5166_v54, %v6477_v9  ;;  %v5218_v38 = vpop.f32.mrf.mxu1 }
 0x1e2   : > { %v2485_v44 = vpop.f32.mrf.mxu0 }
 0x1e3   : > { %v6585_v51 = vadd.f32 %v5218_v38, %v2592_v18  ;;  %v2590_v22 = vadd.f32 %v2485_v44, %v6480_v29  ;;  %v2817_v43 = vpop.f32.mrf.mxu1  ;;  %v6612_v38 = vpop.permute.xlu1 %3740 }
 0x1e4   : > { %v5169_v35 = vpop.f32.mrf.mxu0 }
 0x1e5   : > { %v6588_v58 = vadd.f32 %v2817_v43, %v2590_v22  ;;  %v2595_v5 = vadd.f32 %v5169_v35, %v6483_v53  ;;  %v5221_v24 = vpop.f32.mrf.mxu1  ;;  %v6617_v35 = vpop.permute.xlu0 %3745 }
 0x1e6   : > { %v2498_v48 = vpop.f32.mrf.mxu0 }
 0x1e7   : > { %v6593_v31 = vadd.f32 %v5221_v24, %v2595_v5  ;;  %v2593_v9 = vadd.f32 %v2498_v48, %v6486_v36  ;;  %v2830_v17 = vpop.f32.mrf.mxu1 }
 0x1e8   : > { %v5170_v26 = vpop.f32.mrf.mxu0 }
 0x1e9   : > { %v6596_v3 = vadd.f32 %v2830_v17, %v2593_v9  ;;  %v2596_v29 = vadd.f32 %v5170_v26, %v6489_v34  ;;  %v5222_v49 = vpop.f32.mrf.mxu1 }
 0x1ea   : > { %v2501_v55 = vpop.f32.mrf.mxu0 }
 0x1eb   : > { %v6601_v6 = vadd.f32 %v5222_v49, %v2596_v29  ;;  %v2594_v53 = vadd.f32 %v2501_v55, %v6492_v56  ;;  %v2833_v33 = vpop.f32.mrf.mxu1  ;;  %v6625_v29 = vpop.permute.xlu1 %3750 }
 0x1ec   : > { %v5173_v32 = vpop.f32.mrf.mxu0 }
 0x1ed   : > { %v6606_v11 = vadd.f32 %v2833_v33, %v2594_v53  ;;  %v2599_v36 = vadd.f32 %v5173_v32, %v6495_v4  ;;  %v5225_v1 = vpop.f32.mrf.mxu1  ;;  %v6630_v33 = vpop.permute.xlu0 %3755 }
 0x1ee   : > { %v2514_v40 = vpop.f32.mrf.mxu0 }
 0x1ef   : > { %v6609_v19 = vadd.f32 %v5225_v1, %v2599_v36  ;;  %v2597_v34 = vadd.f32 %v2514_v40, %v6498_v20  ;;  %v2846_v54 = vpop.f32.mrf.mxu1 }
 0x1f0   : > { %v5174_v18 = vpop.f32.mrf.mxu0 }
 0x1f1   : > { %v6614_v44 = vadd.f32 %v2846_v54, %v2597_v34  ;;  %v2600_v56 = vadd.f32 %v5174_v18, %v6501_v46  ;;  %v5226_v22 = vpop.f32.mrf.mxu1  ;;  %v6638_v18 = vpop.permute.xlu1 %3760 }
 0x1f2   : > { %v2517_v43 = vpop.f32.mrf.mxu0 }
 0x1f3   : > { %v6619_v5 = vadd.f32 %v5226_v22, %v2600_v56  ;;  %v2598_v4 = vadd.f32 %v2517_v43, %v6504_v2  ;;  %v2849_v24 = vpop.f32.mrf.mxu1 }
 0x1f4   : > { %v5177_v48 = vpop.f32.mrf.mxu0 }
 0x1f5   : > { %v6622_v9 = vadd.f32 %v2849_v24, %v2598_v4  ;;  %v2603_v20 = vadd.f32 %v5177_v48, %v6507_v7  ;;  %v5229_v17 = vpop.f32.mrf.mxu1  ;;  %v6643_v4 = vpop.permute.xlu0 %3765 }
 0x1f6   : > { %v2530_v26 = vpop.f32.mrf.mxu0 }
 0x1f7   : > { %v6627_v49 = vadd.f32 %v5229_v17, %v2603_v20  ;;  %v2601_v46 = vadd.f32 %v2530_v26, %v6510_v47  ;;  %v2862_v55 = vpop.f32.mrf.mxu1 }
 0x1f8   : > { %v5178_v53 = vpop.f32.mrf.mxu0 }
 0x1f9   : > { %v6632_v32 = vadd.f32 %v2862_v55, %v2601_v46  ;;  %v2604_v2 = vadd.f32 %v5178_v53, %v6513_v37  ;;  %v5230_v36 = vpop.f32.mrf.mxu1  ;;  %v6651_v55 = vpop.permute.xlu1 %3770 }
 0x1fa   : > { %v2533_v1 = vpop.f32.mrf.mxu0 }
 0x1fb   : > { %v6635_v40 = vadd.f32 %v5230_v36, %v2604_v2  ;;  %v2602_v7 = vadd.f32 %v2533_v1, %v6516_v60  ;;  %v2865_v34 = vpop.f32.mrf.mxu1  ;;  %v6656_v1 = vpop.permute.xlu0 %3775 }
 0x1fc   : > { %v5181_v54 = vpop.f32.mrf.mxu0 }
 0x1fd   : > { %v6640_v56 = vadd.f32 %v2865_v34, %v2602_v7  ;;  %v2607_v47 = vadd.f32 %v5181_v54, %v6519_v25  ;;  %v5233_v22 = vpop.f32.mrf.mxu1 }
 0x1fe   : > { %v2546_v43 = vpop.f32.mrf.mxu0 }
 0x1ff   : > { %v6645_v24 = vadd.f32 %v5233_v22, %v2607_v47  ;;  %v2605_v37 = vadd.f32 %v2546_v43, %v6522_v50  ;;  %v2878_v48 = vpop.f32.mrf.mxu1 }
 0x200   : > { %v5182_v20 = vpop.f32.mrf.mxu0 }
 0x201   : > { %v6648_v17 = vadd.f32 %v2878_v48, %v2605_v37  ;;  %v2608_v60 = vadd.f32 %v5182_v20, %v6525_v45  ;;  %v5234_v26 = vpop.f32.mrf.mxu1  ;;  %v6665_v37 = vpop.permute.xlu1 %3780 }
 0x202   : > { %v2549_v46 = vpop.f32.mrf.mxu0 }
 0x203   : > { %v6653_v25 = vadd.f32 %v5234_v26, %v2608_v60  ;;  %v2606_v53 = vadd.f32 %v2549_v46, %v6528_v62  ;;  %v2881_v2 = vpop.f32.mrf.mxu1  ;;  %v6670_v26 = vpop.permute.xlu0 %3785 }
 0x204   : > { %v5185_v36 = vpop.f32.mrf.mxu0 }
 0x205   : > { %v6658_v50 = vadd.f32 %v2881_v2, %v2606_v53  ;;  %v2611_v7 = vadd.f32 %v5185_v36, %v6531_v23  ;;  %v5237_v34 = vpop.f32.mrf.mxu1 }
 0x206   : > { %v2562_v54 = vpop.f32.mrf.mxu0 }
 0x207   : > { %v6661_v45 = vadd.f32 %v5237_v34, %v2611_v7  ;;  %v2609_v47 = vadd.f32 %v2562_v54, %v6534_v52  ;;  %v2894_v22 = vpop.f32.mrf.mxu1  ;;  %v6701_v54 = vpop.permute.xlu1 %3790 }
 0x208   : > { %v5186_v43 = vpop.f32.mrf.mxu0 }
 0x209   : > { %v6667_v62 = vadd.f32 %v2894_v22, %v2609_v47  ;;  %v2612_v48 = vadd.f32 %v5186_v43, %v6537_v41  ;;  %v5238_v20 = vpop.f32.mrf.mxu1  ;;  %v6683_v41 = vld [vmem:[%s7612_s2] ss:$0 sm:$0xff] }
 0x20a   : > { %v2565_v60 = vpop.f32.mrf.mxu0 }
 0x20b   : > { %v6672_v23 = vadd.f32 %v5238_v20, %v2612_v48  ;;  %v2610_v46 = vadd.f32 %v2565_v60, %v6540_v21  ;;  %v2897_v53 = vpop.f32.mrf.mxu1  ;;  %v6715_v20 = vpop.permute.xlu0 %3795 }
 0x20c   : > { %v5257_v52 = vpop.f32.mrf.mxu0 }
 0x20d   : > { %v6685_v2 = vadd.f32 %v2897_v53, %v2610_v46  ;;  %v3243_v36 = vadd.f32 %v5257_v52, %v6543_v42  ;;  %v6688_v7 = vpop.f32.mrf.mxu1 }
 0x20e   : > { %7714 = vst [vmem:[#allocation2_spill] sm:$0xff] %v6688_v7  ;;  %3653 = vst [vmem:[%s6678_s27 + $0x10] sm:$0xff] %v6688_v7  ;;  %v6699_v21 = vmul.f32 %v6688_v7, %v6599_v13  ;;  %v3098_v34 = vpop.f32.mrf.mxu0  ;;  %v6753_v7 = vpop.permute.xlu1 %3800 }
 0x20f   : > { %v6704_v42 = vadd.f32 %v6683_v41, %v3243_v36  ;;  %v3241_v47 = vadd.f32 %v3098_v34, %v6546_v59  ;;  %v6707_v22 = vpop.f32.mrf.mxu1 }
 0x210   : > { %7715 = vst [vmem:[#allocation3_spill] sm:$0xff] %v6699_v21  ;;  %7716 = vst [vmem:[#allocation4_spill] sm:$0xff] %v6707_v22  ;;  %v6713_v43 = vmul.f32 %v6591_v27, %v6707_v22  ;;  %v5258_v48 = vpop.f32.mrf.mxu0 }
 0x211   : > { %3651 = vst [vmem:[%s6678_s27] sm:$0xff] %v6707_v22  ;;  %3322 = vst [vmem:[%s6693_s15 + $0x10] sm:$0xff] %v6704_v42  ;;  %v6721_v60 = vmul.f32 %v6599_v13, %v6704_v42  ;;  %v6724_v59 = vadd.f32 %v6683_v41, %v3241_v47  ;;  %v3244_v46 = vadd.f32 %v5258_v48, %v6549_v12  ;;  %v6727_v53 = vpop.f32.mrf.mxu1 }
 0x212   : > { %7717 = vst [vmem:[#allocation5_spill] sm:$0xff] %v6727_v53  ;;  %3654 = vst [vmem:[%s6678_s27 + $0x18] sm:$0xff] %v6727_v53  ;;  %v6733_v52 = vmul.f32 %v6727_v53, %v6612_v38  ;;  %v3101_v36 = vpop.f32.mrf.mxu0  ;;  %v6811_v21 = vpop.permute.xlu1 %3810 }
 0x213   : > { %3320 = vst [vmem:[%s6693_s15] sm:$0xff] %v6724_v59  ;;  %v6739_v13 = vmul.f32 %v6591_v27, %v6724_v59  ;;  %v6742_v34 = vadd.f32 %v6683_v41, %v3244_v46  ;;  %v3242_v12 = vadd.f32 %v3101_v36, %v6552_v10  ;;  %v6745_v47 = vpop.f32.mrf.mxu1 }
 0x214   : > { %7718 = vst [vmem:[#allocation6_spill] sm:$0xff] %v6733_v52  ;;  %7719 = vst [vmem:[#allocation7_spill] sm:$0xff] %v6745_v47  ;;  %v6751_v48 = vmul.f32 %v6604_v61, %v6745_v47  ;;  %v5261_v53 = vpop.f32.mrf.mxu0  ;;  %v6773_v52 = vpop.permute.xlu0 %3805 }
 0x215   : > { %3652 = vst [vmem:[%s6678_s27 + $0x8] sm:$0xff] %v6745_v47  ;;  %3323 = vst [vmem:[%s6693_s15 + $0x18] sm:$0xff] %v6742_v34  ;;  %v6759_v27 = vmul.f32 %v6612_v38, %v6742_v34  ;;  %v6762_v10 = vadd.f32 %v6683_v41, %v3242_v12  ;;  %v3247_v46 = vadd.f32 %v5261_v53, %v6555_v63  ;;  %v6765_v36 = vpop.f32.mrf.mxu1 }
 0x216   : > { %7720 = vst [vmem:[#allocation8_spill] sm:$0xff] %v6765_v36  ;;  %3657 = vst [vmem:[%s6678_s27 + $0x30] sm:$0xff] %v6765_v36  ;;  %v6771_v47 = vmul.f32 %v6765_v36, %v6630_v33  ;;  %v3114_v22 = vpop.f32.mrf.mxu0 }
 0x217   : > { %3321 = vst [vmem:[%s6693_s15 + $0x8] sm:$0xff] %v6762_v10  ;;  %v6779_v38 = vmul.f32 %v6604_v61, %v6762_v10  ;;  %v6782_v63 = vadd.f32 %v6683_v41, %v3247_v46  ;;  %v3245_v53 = vadd.f32 %v3114_v22, %v6558_v57  ;;  %v6785_v12 = vpop.f32.mrf.mxu1 }
 0x218   : > { %7721 = vst [vmem:[#allocation9_spill] sm:$0xff] %v6771_v47  ;;  %7723 = vst [vmem:[#allocation11_spill] sm:$0xff] %v6785_v12  ;;  %v6791_v36 = vmul.f32 %v6617_v35, %v6785_v12  ;;  %v5262_v47 = vpop.f32.mrf.mxu0 }
 0x219   : > { %7722 = vst [vmem:[#allocation10_spill] sm:$0xff] %v6782_v63  ;;  %3655 = vst [vmem:[%s6678_s27 + $0x20] sm:$0xff] %v6785_v12  ;;  %v6797_v61 = vmul.f32 %v6630_v33, %v6782_v63  ;;  %v6800_v46 = vadd.f32 %v6683_v41, %v3245_v53  ;;  %v3248_v57 = vadd.f32 %v5262_v47, %v6561_v16  ;;  %v6803_v22 = vpop.f32.mrf.mxu1 }
 0x21a   : > { %7724 = vst [vmem:[#allocation12_spill] sm:$0xff] %v6791_v36  ;;  %3326 = vst [vmem:[%s6693_s15 + $0x30] sm:$0xff] %v6782_v63  ;;  %v6809_v12 = vmul.f32 %v6803_v22, %v6638_v18  ;;  %v3117_v36 = vpop.f32.mrf.mxu0  ;;  %v6831_v63 = vpop.permute.xlu0 %3815 }
 0x21b   : > { %7725 = vst [vmem:[#allocation13_spill] sm:$0xff] %v6803_v22  ;;  %3658 = vst [vmem:[%s6678_s27 + $0x38] sm:$0xff] %v6803_v22  ;;  %v6817_v33 = vmul.f32 %v6617_v35, %v6800_v46  ;;  %v6820_v16 = vadd.f32 %v6683_v41, %v3248_v57  ;;  %v3246_v47 = vadd.f32 %v3117_v36, %v6564_v39  ;;  %v6823_v53 = vpop.f32.mrf.mxu1 }
 0x21c   : > { %7726 = vst [vmem:[#allocation14_spill] sm:$0xff] %v6809_v12  ;;  %3324 = vst [vmem:[%s6693_s15 + $0x20] sm:$0xff] %v6800_v46  ;;  %v6829_v22 = vmul.f32 %v6625_v29, %v6823_v53  ;;  %v5265_v12 = vpop.f32.mrf.mxu0 }
 0x21d   : > { %7727 = vst [vmem:[#allocation15_spill] sm:$0xff] %v6820_v16  ;;  %7728 = vst [vmem:[#allocation16_spill] sm:$0xff] %v6823_v53  ;;  %v6837_v35 = vmul.f32 %v6638_v18, %v6820_v16  ;;  %v6840_v39 = vadd.f32 %v6683_v41, %v3246_v47  ;;  %v3251_v36 = vadd.f32 %v5265_v12, %v6567_v28  ;;  %v6843_v57 = vpop.f32.mrf.mxu1 }
 0x21e   : > { %3656 = vst [vmem:[%s6678_s27 + $0x28] sm:$0xff] %v6823_v53  ;;  %7729 = vst [vmem:[#allocation17_spill] sm:$0xff] %v6829_v22  ;;  %v6849_v53 = vmul.f32 %v6843_v57, %v6656_v1  ;;  %v3130_v22 = vpop.f32.mrf.mxu0 }
 0x21f   : > { %3327 = vst [vmem:[%s6693_s15 + $0x38] sm:$0xff] %v6820_v16  ;;  %7730 = vst [vmem:[#allocation18_spill] sm:$0xff] %v6840_v39  ;;  %v6855_v18 = vmul.f32 %v6625_v29, %v6840_v39  ;;  %v6858_v47 = vadd.f32 %v6683_v41, %v3251_v36  ;;  %v3249_v28 = vadd.f32 %v3130_v22, %v6570_v15  ;;  %v6861_v12 = vpop.f32.mrf.mxu1  ;;  %v6869_v16 = vpop.permute.xlu1 %3820 }
 0x220   : > { %7731 = vst [vmem:[#allocation19_spill] sm:$0xff] %v6843_v57  ;;  %3661 = vst [vmem:[%s6678_s27 + $0x50] sm:$0xff] %v6843_v57  ;;  %v6867_v57 = vmul.f32 %v6643_v4, %v6861_v12 }
 0x221   : > { %7732 = vst [vmem:[#allocation20_spill] sm:$0xff] %v6849_v53  ;;  %3325 = vst [vmem:[%s6693_s15 + $0x28] sm:$0xff] %v6840_v39  ;;  %v5266_v53 = vpop.f32.mrf.mxu0  ;;  %v6875_v29 = vmul.f32 %v6656_v1, %v6858_v47  ;;  %v6878_v15 = vadd.f32 %v6683_v41, %v3249_v28  ;;  %v6881_v36 = vpop.f32.mrf.mxu1 }
 0x222   : > { %7733 = vst [vmem:[#allocation21_spill] sm:$0xff] %v6858_v47  ;;  %7734 = vst [vmem:[#allocation22_spill] sm:$0xff] %v6861_v12  ;;  %v3252_v22 = vadd.f32 %v5266_v53, %v6573_v0  ;;  %v6889_v39 = vpop.permute.xlu0 %3825 }
 0x223   : > { %3659 = vst [vmem:[%s6678_s27 + $0x40] sm:$0xff] %v6861_v12  ;;  %7735 = vst [vmem:[#allocation23_spill] sm:$0xff] %v6867_v57  ;;  %v6887_v12 = vmul.f32 %v6881_v36, %v6665_v37  ;;  %v3133_v57 = vpop.f32.mrf.mxu0  ;;  %v6895_v1 = vmul.f32 %v6643_v4, %v6878_v15  ;;  %v6901_v28 = vpop.f32.mrf.mxu1 }
 0x224   : > { %3330 = vst [vmem:[%s6693_s15 + $0x50] sm:$0xff] %v6858_v47  ;;  %7736 = vst [vmem:[#allocation24_spill] sm:$0xff] %v6881_v36  ;;  %v6898_v0 = vadd.f32 %v6683_v41, %v3252_v22  ;;  %v3250_v53 = vadd.f32 %v3133_v57, %v6576_v14  ;;  %v6927_v47 = vpop.permute.xlu1 %3830 }
 0x225   : > { %3662 = vst [vmem:[%s6678_s27 + $0x58] sm:$0xff] %v6881_v36  ;;  %7737 = vst [vmem:[#allocation25_spill] sm:$0xff] %v6887_v12  ;;  %v6907_v36 = vmul.f32 %v6651_v55, %v6901_v28  ;;  %v5269_v12 = vpop.f32.mrf.mxu0  ;;  %v6919_v57 = vpop.f32.mrf.mxu1 }
 0x226   : > { %3328 = vst [vmem:[%s6693_s15 + $0x40] sm:$0xff] %v6878_v15  ;;  %7738 = vst [vmem:[#allocation26_spill] sm:$0xff] %v6898_v0  ;;  %v6913_v4 = vmul.f32 %v6665_v37, %v6898_v0  ;;  %v6916_v22 = vadd.f32 %v6683_v41, %v3250_v53  ;;  %v3255_v14 = vadd.f32 %v5269_v12, %v6579_v8 }
 0x227   : > { %7739 = vst [vmem:[#allocation27_spill] sm:$0xff] %v6901_v28  ;;  %3660 = vst [vmem:[%s6678_s27 + $0x48] sm:$0xff] %v6901_v28  ;;  %v6925_v28 = vmul.f32 %v6919_v57, %v6715_v20  ;;  %v6939_v53 = vpop.f32.mrf.mxu1 }
 0x228   : > { %7740 = vst [vmem:[#allocation28_spill] sm:$0xff] %v6907_v36  ;;  %3331 = vst [vmem:[%s6693_s15 + $0x58] sm:$0xff] %v6898_v0  ;;  %v3146_v36 = vpop.f32.mrf.mxu0  ;;  %v6933_v37 = vmul.f32 %v6651_v55, %v6916_v22  ;;  %v6936_v8 = vadd.f32 %v6683_v41, %v3255_v14  ;;  %v6947_v0 = vpop.permute.xlu0 %3835 }
 0x229   : > { %7741 = vst [vmem:[#allocation29_spill] sm:$0xff] %v6919_v57  ;;  %3665 = vst [vmem:[%s6678_s27 + $0x70] sm:$0xff] %v6919_v57  ;;  %v3253_v12 = vadd.f32 %v3146_v36, %v6582_v30  ;;  %v6945_v57 = vmul.f32 %v6670_v26, %v6939_v53  ;;  %v6959_v14 = vpop.f32.mrf.mxu1 }
 0x22a   : > { %7742 = vst [vmem:[#allocation30_spill] sm:$0xff] %v6925_v28  ;;  %3329 = vst [vmem:[%s6693_s15 + $0x48] sm:$0xff] %v6916_v22  ;;  %v5270_v28 = vpop.f32.mrf.mxu0  ;;  %v6953_v55 = vmul.f32 %v6715_v20, %v6936_v8 }
 0x22b   : > { %7743 = vst [vmem:[#allocation31_spill] sm:$0xff] %v6936_v8  ;;  %7744 = vst [vmem:[#allocation32_spill] sm:$0xff] %v6939_v53  ;;  %v6956_v30 = vadd.f32 %v6683_v41, %v3253_v12  ;;  %v3256_v36 = vadd.f32 %v5270_v28, %v6585_v51  ;;  %v6977_v28 = vpop.f32.mrf.mxu1 }
 0x22c   : > { %3663 = vst [vmem:[%s6678_s27 + $0x60] sm:$0xff] %v6939_v53  ;;  %7745 = vst [vmem:[#allocation33_spill] sm:$0xff] %v6945_v57  ;;  %v6965_v53 = vmul.f32 %v6959_v14, %v6753_v7  ;;  %v3149_v57 = vpop.f32.mrf.mxu0 }
 0x22d   : > { %3334 = vst [vmem:[%s6693_s15 + $0x70] sm:$0xff] %v6936_v8  ;;  %7746 = vst [vmem:[#allocation34_spill] sm:$0xff] %v6956_v30  ;;  %v6971_v20 = vmul.f32 %v6670_v26, %v6956_v30  ;;  %v6974_v12 = vadd.f32 %v6683_v41, %v3256_v36  ;;  %v3254_v51 = vadd.f32 %v3149_v57, %v6588_v58  ;;  %v6985_v8 = vpop.permute.xlu1 %3840  ;;  %v6997_v36 = vpop.f32.mrf.mxu1 }
 0x22e   : > { %7747 = vst [vmem:[#allocation35_spill] sm:$0xff] %v6959_v14  ;;  %3666 = vst [vmem:[%s6678_s27 + $0x78] sm:$0xff] %v6959_v14  ;;  %v6983_v14 = vmul.f32 %v6701_v54, %v6977_v28 }
 0x22f   : > { %7748 = vst [vmem:[#allocation36_spill] sm:$0xff] %v6965_v53  ;;  %3332 = vst [vmem:[%s6693_s15 + $0x60] sm:$0xff] %v6956_v30  ;;  %v5273_v53 = vpop.f32.mrf.mxu0  ;;  %v6991_v26 = vmul.f32 %v6753_v7, %v6974_v12  ;;  %v6994_v58 = vadd.f32 %v6683_v41, %v3254_v51  ;;  %v7005_v30 = vpop.permute.xlu0 %3845 }
 0x230   : > { %7749 = vst [vmem:[#allocation37_spill] sm:$0xff] %v6974_v12  ;;  %7750 = vst [vmem:[#allocation38_spill] sm:$0xff] %v6977_v28  ;;  %v3259_v57 = vadd.f32 %v5273_v53, %v6593_v31  ;;  %v7017_v51 = vpop.f32.mrf.mxu1 }
 0x231   : > { %3664 = vst [vmem:[%s6678_s27 + $0x68] sm:$0xff] %v6977_v28  ;;  %7751 = vst [vmem:[#allocation39_spill] sm:$0xff] %v6983_v14  ;;  %v7003_v28 = vmul.f32 %v6997_v36, %v6831_v63  ;;  %v3162_v14 = vpop.f32.mrf.mxu0  ;;  %v7011_v7 = vmul.f32 %v6701_v54, %v6994_v58 }
 0x232   : > { %3335 = vst [vmem:[%s6693_s15 + $0x78] sm:$0xff] %v6974_v12  ;;  %7752 = vst [vmem:[#allocation40_spill] sm:$0xff] %v6997_v36  ;;  %v7014_v31 = vadd.f32 %v6683_v41, %v3259_v57  ;;  %v3257_v53 = vadd.f32 %v3162_v14, %v6596_v3  ;;  %v7035_v14 = vpop.f32.mrf.mxu1  ;;  %v7043_v12 = vpop.permute.xlu1 %3850 }
 0x233   : > { %3669 = vst [vmem:[%s6678_s27 + $0x90] sm:$0xff] %v6997_v36  ;;  %7753 = vst [vmem:[#allocation41_spill] sm:$0xff] %v7003_v28  ;;  %v7023_v36 = vmul.f32 %v6773_v52, %v7017_v51  ;;  %v5274_v28 = vpop.f32.mrf.mxu0 }
 0x234   : > { %3333 = vst [vmem:[%s6693_s15 + $0x68] sm:$0xff] %v6994_v58  ;;  %7754 = vst [vmem:[#allocation42_spill] sm:$0xff] %v7014_v31  ;;  %v7029_v54 = vmul.f32 %v6831_v63, %v7014_v31  ;;  %v7032_v57 = vadd.f32 %v6683_v41, %v3257_v53  ;;  %v3260_v3 = vadd.f32 %v5274_v28, %v6601_v6  ;;  %v7055_v53 = vpop.f32.mrf.mxu1 }
 0x235   : > { %7755 = vst [vmem:[#allocation43_spill] sm:$0xff] %v7017_v51  ;;  %3667 = vst [vmem:[%s6678_s27 + $0x80] sm:$0xff] %v7017_v51  ;;  %v7041_v51 = vmul.f32 %v7035_v14, %v6869_v16 }
 0x236   : > { %7756 = vst [vmem:[#allocation44_spill] sm:$0xff] %v7023_v36  ;;  %3338 = vst [vmem:[%s6693_s15 + $0x90] sm:$0xff] %v7014_v31  ;;  %v3165_v36 = vpop.f32.mrf.mxu0  ;;  %v7049_v63 = vmul.f32 %v6773_v52, %v7032_v57  ;;  %v7052_v6 = vadd.f32 %v6683_v41, %v3260_v3  ;;  %v3856_v31 = vpop.permute.xlu0 %3855 }
 0x237   : > { %7757 = vst [vmem:[#allocation45_spill] sm:$0xff] %v7035_v14  ;;  %3670 = vst [vmem:[%s6678_s27 + $0x98] sm:$0xff] %v7035_v14  ;;  %v3258_v28 = vadd.f32 %v3165_v36, %v6606_v11  ;;  %v7061_v14 = vmul.f32 %v6811_v21, %v7055_v53  ;;  %v7073_v3 = vpop.f32.mrf.mxu1 }
 0x238   : > { %7758 = vst [vmem:[#allocation46_spill] sm:$0xff] %v7041_v51  ;;  %3336 = vst [vmem:[%s6693_s15 + $0x80] sm:$0xff] %v7032_v57  ;;  %v5277_v51 = vpop.f32.mrf.mxu0  ;;  %v7067_v52 = vmul.f32 %v6869_v16, %v7052_v6 }
 0x239   : > { %7759 = vst [vmem:[#allocation47_spill] sm:$0xff] %v7052_v6  ;;  %7760 = vst [vmem:[#allocation48_spill] sm:$0xff] %v7055_v53  ;;  %v7070_v11 = vadd.f32 %v6683_v41, %v3258_v28  ;;  %v3263_v36 = vadd.f32 %v5277_v51, %v6609_v19  ;;  %v7091_v51 = vpop.f32.mrf.mxu1 }
 0x23a   : > { %3668 = vst [vmem:[%s6678_s27 + $0x88] sm:$0xff] %v7055_v53  ;;  %7761 = vst [vmem:[#allocation49_spill] sm:$0xff] %v7061_v14  ;;  %v7079_v53 = vmul.f32 %v7073_v3, %v6947_v0  ;;  %v3178_v14 = vpop.f32.mrf.mxu0 }
 0x23b   : > { %3339 = vst [vmem:[%s6693_s15 + $0x98] sm:$0xff] %v7052_v6  ;;  %7762 = vst [vmem:[#allocation50_spill] sm:$0xff] %v7070_v11  ;;  %v7085_v16 = vmul.f32 %v6811_v21, %v7070_v11  ;;  %v7088_v28 = vadd.f32 %v6683_v41, %v3263_v36  ;;  %v3261_v19 = vadd.f32 %v3178_v14, %v6614_v44  ;;  %v3861_v6 = vpop.permute.xlu1 %3860  ;;  %v7109_v36 = vpop.f32.mrf.mxu1 }
 0x23c   : > { %7763 = vst [vmem:[#allocation51_spill] sm:$0xff] %v7073_v3  ;;  %3673 = vst [vmem:[%s6678_s27 + $0xb0] sm:$0xff] %v7073_v3  ;;  %v7097_v3 = vmul.f32 %v6889_v39, %v7091_v51 }
 0x23d   : > { %7764 = vst [vmem:[#allocation52_spill] sm:$0xff] %v7079_v53  ;;  %3337 = vst [vmem:[%s6693_s15 + $0x88] sm:$0xff] %v7070_v11  ;;  %v5278_v53 = vpop.f32.mrf.mxu0  ;;  %v7103_v21 = vmul.f32 %v6947_v0, %v7088_v28  ;;  %v7106_v44 = vadd.f32 %v6683_v41, %v3261_v19  ;;  %v7117_v11 = vpop.permute.xlu0 %3865 }
 0x23e   : > { %7765 = vst [vmem:[#allocation53_spill] sm:$0xff] %v7088_v28  ;;  %7766 = vst [vmem:[#allocation54_spill] sm:$0xff] %v7091_v51  ;;  %v3264_v14 = vadd.f32 %v5278_v53, %v6619_v5  ;;  %v7129_v19 = vpop.f32.mrf.mxu1 }
 0x23f   : > { %3671 = vst [vmem:[%s6678_s27 + $0xa0] sm:$0xff] %v7091_v51  ;;  %7767 = vst [vmem:[#allocation55_spill] sm:$0xff] %v7097_v3  ;;  %v7115_v51 = vmul.f32 %v7109_v36, %v6985_v8  ;;  %v3181_v3 = vpop.f32.mrf.mxu0  ;;  %v7123_v0 = vmul.f32 %v6889_v39, %v7106_v44 }
 0x240   : > { %3342 = vst [vmem:[%s6693_s15 + $0xb0] sm:$0xff] %v7088_v28  ;;  %7768 = vst [vmem:[#allocation56_spill] sm:$0xff] %v7109_v36  ;;  %v7126_v5 = vadd.f32 %v6683_v41, %v3264_v14  ;;  %v3262_v53 = vadd.f32 %v3181_v3, %v6622_v9  ;;  %v7147_v3 = vpop.f32.mrf.mxu1  ;;  %v7154_v28 = vpop.permute.xlu1 %3870 }
 0x241   : > { %3674 = vst [vmem:[%s6678_s27 + $0xb8] sm:$0xff] %v7109_v36  ;;  %7769 = vst [vmem:[#allocation57_spill] sm:$0xff] %v7115_v51  ;;  %v7135_v36 = vmul.f32 %v6927_v47, %v7129_v19  ;;  %v5281_v51 = vpop.f32.mrf.mxu0 }
 0x242   : > { %3340 = vst [vmem:[%s6693_s15 + $0xa0] sm:$0xff] %v7106_v44  ;;  %7770 = vst [vmem:[#allocation58_spill] sm:$0xff] %v7126_v5  ;;  %v7141_v39 = vmul.f32 %v6985_v8, %v7126_v5  ;;  %v7144_v14 = vadd.f32 %v6683_v41, %v3262_v53  ;;  %v3267_v9 = vadd.f32 %v5281_v51, %v6627_v49  ;;  %v7166_v53 = vpop.f32.mrf.mxu1 }
 0x243   : > { %7771 = vst [vmem:[#allocation59_spill] sm:$0xff] %v7129_v19  ;;  %3672 = vst [vmem:[%s6678_s27 + $0xa8] sm:$0xff] %v7129_v19  ;;  %v7152_v19 = vmul.f32 %v7147_v3, %v3856_v31 }
 0x244   : > { %7772 = vst [vmem:[#allocation60_spill] sm:$0xff] %v7135_v36  ;;  %3343 = vst [vmem:[%s6693_s15 + $0xb8] sm:$0xff] %v7126_v5  ;;  %v3194_v36 = vpop.f32.mrf.mxu0  ;;  %v7160_v8 = vmul.f32 %v6927_v47, %v7144_v14  ;;  %v7163_v49 = vadd.f32 %v6683_v41, %v3267_v9  ;;  %v3876_v5 = vpop.permute.xlu0 %3875 }
 0x245   : > { %7773 = vst [vmem:[#allocation61_spill] sm:$0xff] %v7147_v3  ;;  %3677 = vst [vmem:[%s6678_s27 + $0xd0] sm:$0xff] %v7147_v3  ;;  %v3265_v51 = vadd.f32 %v3194_v36, %v6632_v32  ;;  %v7172_v3 = vmul.f32 %v7005_v30, %v7166_v53  ;;  %v7183_v36 = vpop.f32.mrf.mxu1 }
 0x246   : > { %7774 = vst [vmem:[#allocation62_spill] sm:$0xff] %v7152_v19  ;;  %3341 = vst [vmem:[%s6693_s15 + $0xa8] sm:$0xff] %v7144_v14  ;;  %v5282_v19 = vpop.f32.mrf.mxu0  ;;  %v7177_v47 = vmul.f32 %v3856_v31, %v7163_v49 }
 0x247   : > { %7775 = vst [vmem:[#allocation63_spill] sm:$0xff] %v7163_v49  ;;  %7776 = vst [vmem:[#allocation64_spill] sm:$0xff] %v7166_v53  ;;  %v7180_v9 = vadd.f32 %v6683_v41, %v3265_v51  ;;  %v3268_v32 = vadd.f32 %v5282_v19, %v6635_v40  ;;  %v7200_v19 = vpop.f32.mrf.mxu1 }
 0x248   : > { %3675 = vst [vmem:[%s6678_s27 + $0xc0] sm:$0xff] %v7166_v53  ;;  %7777 = vst [vmem:[#allocation65_spill] sm:$0xff] %v7172_v3  ;;  %v7188_v53 = vmul.f32 %v7183_v36, %v3861_v6  ;;  %v3197_v3 = vpop.f32.mrf.mxu0 }
 0x249   : > { %3346 = vst [vmem:[%s6693_s15 + $0xd0] sm:$0xff] %v7163_v49  ;;  %7778 = vst [vmem:[#allocation66_spill] sm:$0xff] %v7180_v9  ;;  %v7194_v31 = vmul.f32 %v7005_v30, %v7180_v9  ;;  %v7197_v51 = vadd.f32 %v6683_v41, %v3268_v32  ;;  %v3266_v40 = vadd.f32 %v3197_v3, %v6640_v56  ;;  %v3881_v49 = vpop.permute.xlu1 %3880  ;;  %v7217_v3 = vpop.f32.mrf.mxu1 }
 0x24a   : > { %7779 = vst [vmem:[#allocation67_spill] sm:$0xff] %v7183_v36  ;;  %3678 = vst [vmem:[%s6678_s27 + $0xd8] sm:$0xff] %v7183_v36  ;;  %v7206_v36 = vmul.f32 %v7043_v12, %v7200_v19 }
 0x24b   : > { %7780 = vst [vmem:[#allocation68_spill] sm:$0xff] %v7188_v53  ;;  %3344 = vst [vmem:[%s6693_s15 + $0xc0] sm:$0xff] %v7180_v9  ;;  %v5285_v53 = vpop.f32.mrf.mxu0  ;;  %v7211_v30 = vmul.f32 %v3861_v6, %v7197_v51  ;;  %v7214_v32 = vadd.f32 %v6683_v41, %v3266_v40  ;;  %v3886_v9 = vpop.permute.xlu0 %3885 }
 0x24c   : > { %7781 = vst [vmem:[#allocation69_spill] sm:$0xff] %v7197_v51  ;;  %7782 = vst [vmem:[#allocation70_spill] sm:$0xff] %v7200_v19  ;;  %v3271_v56 = vadd.f32 %v5285_v53, %v6645_v24  ;;  %v7234_v53 = vpop.f32.mrf.mxu1 }
 0x24d   : > { %3676 = vst [vmem:[%s6678_s27 + $0xc8] sm:$0xff] %v7200_v19  ;;  %7783 = vst [vmem:[#allocation71_spill] sm:$0xff] %v7206_v36  ;;  %v7222_v19 = vmul.f32 %v7217_v3, %v3876_v5  ;;  %v3210_v36 = vpop.f32.mrf.mxu0  ;;  %v7228_v6 = vmul.f32 %v7043_v12, %v7214_v32 }
 0x24e   : > { %3347 = vst [vmem:[%s6693_s15 + $0xd8] sm:$0xff] %v7197_v51  ;;  %7784 = vst [vmem:[#allocation72_spill] sm:$0xff] %v7217_v3  ;;  %v7231_v40 = vadd.f32 %v6683_v41, %v3271_v56  ;;  %v3269_v24 = vadd.f32 %v3210_v36, %v6648_v17  ;;  %v7251_v36 = vpop.f32.mrf.mxu1  ;;  %v3891_v51 = vpop.permute.xlu1 %3890 }
 0x24f   : > { %3681 = vst [vmem:[%s6678_s27 + $0xf0] sm:$0xff] %v7217_v3  ;;  %7785 = vst [vmem:[#allocation73_spill] sm:$0xff] %v7222_v19  ;;  %v7240_v3 = vmul.f32 %v7117_v11, %v7234_v53  ;;  %v5286_v19 = vpop.f32.mrf.mxu0 }
 0x250   : > { %3345 = vst [vmem:[%s6693_s15 + $0xc8] sm:$0xff] %v7214_v32  ;;  %7786 = vst [vmem:[#allocation74_spill] sm:$0xff] %v7231_v40  ;;  %v7245_v12 = vmul.f32 %v3876_v5, %v7231_v40  ;;  %v7248_v56 = vadd.f32 %v6683_v41, %v3269_v24  ;;  %v3272_v17 = vadd.f32 %v5286_v19, %v6653_v25  ;;  %v7268_v19 = vpop.f32.mrf.mxu1 }
 0x251   : > { %7787 = vst [vmem:[#allocation75_spill] sm:$0xff] %v7234_v53  ;;  %3679 = vst [vmem:[%s6678_s27 + $0xe0] sm:$0xff] %v7234_v53  ;;  %v7256_v53 = vmul.f32 %v7251_v36, %v3881_v49 }
 0x252   : > { %7788 = vst [vmem:[#allocation76_spill] sm:$0xff] %v7240_v3  ;;  %3350 = vst [vmem:[%s6693_s15 + $0xf0] sm:$0xff] %v7231_v40  ;;  %v3213_v3 = vpop.f32.mrf.mxu0  ;;  %v7262_v5 = vmul.f32 %v7117_v11, %v7248_v56  ;;  %v7265_v24 = vadd.f32 %v6683_v41, %v3272_v17  ;;  %v3896_v40 = vpop.permute.xlu0 %3895 }
 0x253   : > { %7789 = vst [vmem:[#allocation77_spill] sm:$0xff] %v7251_v36  ;;  %3682 = vst [vmem:[%s6678_s27 + $0xf8] sm:$0xff] %v7251_v36  ;;  %v3270_v25 = vadd.f32 %v3213_v3, %v6658_v50  ;;  %v7274_v36 = vmul.f32 %v7154_v28, %v7268_v19  ;;  %v7285_v3 = vpop.f32.mrf.mxu1 }
 0x254   : > { %7790 = vst [vmem:[#allocation78_spill] sm:$0xff] %v7256_v53  ;;  %3348 = vst [vmem:[%s6693_s15 + $0xe0] sm:$0xff] %v7248_v56  ;;  %v5289_v53 = vpop.f32.mrf.mxu0  ;;  %v7279_v11 = vmul.f32 %v3881_v49, %v7265_v24 }
 0x255   : > { %7791 = vst [vmem:[#allocation79_spill] sm:$0xff] %v7265_v24  ;;  %7792 = vst [vmem:[#allocation80_spill] sm:$0xff] %v7268_v19  ;;  %v7282_v17 = vadd.f32 %v6683_v41, %v3270_v25  ;;  %v3275_v50 = vadd.f32 %v5289_v53, %v6661_v45  ;;  %v7302_v53 = vpop.f32.mrf.mxu1 }
 0x256   : > { %3680 = vst [vmem:[%s6678_s27 + $0xe8] sm:$0xff] %v7268_v19  ;;  %7793 = vst [vmem:[#allocation81_spill] sm:$0xff] %v7274_v36  ;;  %v7290_v19 = vmul.f32 %v7285_v3, %v3896_v40  ;;  %v3226_v36 = vpop.f32.mrf.mxu0 }
 0x257   : > { %3351 = vst [vmem:[%s6693_s15 + $0xf8] sm:$0xff] %v7265_v24  ;;  %7794 = vst [vmem:[#allocation82_spill] sm:$0xff] %v7282_v17  ;;  %v7296_v49 = vmul.f32 %v7154_v28, %v7282_v17  ;;  %v7299_v25 = vadd.f32 %v6683_v41, %v3275_v50  ;;  %v3273_v45 = vadd.f32 %v3226_v36, %v6667_v62  ;;  %v3901_v24 = vpop.permute.xlu1 %3900  ;;  %v7318_v36 = vpop.f32.mrf.mxu1 }
 0x258   : > { %7795 = vst [vmem:[#allocation83_spill] sm:$0xff] %v7285_v3  ;;  %3685 = vst [vmem:[%s6678_s27 + $0x110] sm:$0xff] %v7285_v3  ;;  %v7307_v3 = vmul.f32 %v3886_v9, %v7302_v53 }
 0x259   : > { %7796 = vst [vmem:[#allocation84_spill] sm:$0xff] %v7290_v19  ;;  %3349 = vst [vmem:[%s6693_s15 + $0xe8] sm:$0xff] %v7282_v17  ;;  %v5290_v19 = vpop.f32.mrf.mxu0  ;;  %v7312_v28 = vmul.f32 %v3896_v40, %v7299_v25  ;;  %v7315_v50 = vadd.f32 %v6683_v41, %v3273_v45 }
 0x25a   : > { %7797 = vst [vmem:[#allocation85_spill] sm:$0xff] %v7299_v25  ;;  %7798 = vst [vmem:[#allocation86_spill] sm:$0xff] %v7302_v53  ;;  %v3276_v62 = vadd.f32 %v5290_v19, %v6672_v23 }
 0x25b   : > { %3683 = vst [vmem:[%s6678_s27 + $0x100] sm:$0xff] %v7302_v53  ;;  %7799 = vst [vmem:[#allocation87_spill] sm:$0xff] %v7307_v3  ;;  %v7323_v53 = vmul.f32 %v7318_v36, %v3901_v24  ;;  %v3229_v3 = vpop.f32.mrf.mxu0  ;;  %v7328_v17 = vmul.f32 %v3886_v9, %v7315_v50 }
 0x25c   : > { %3354 = vst [vmem:[%s6693_s15 + $0x110] sm:$0xff] %v7299_v25  ;;  %7800 = vst [vmem:[#allocation88_spill] sm:$0xff] %v7315_v50  ;;  %v7331_v40 = vadd.f32 %v6683_v41, %v3276_v62  ;;  %v3274_v45 = vadd.f32 %v3229_v3, %v6685_v2  ;;  %v7334_v25 = vpop.f32.mrf.mxu1 }
 0x25d   : > { %7801 = vst [vmem:[#allocation89_spill] sm:$0xff] %v7318_v36  ;;  %3686 = vst [vmem:[%s6678_s27 + $0x118] sm:$0xff] %v7318_v36  ;;  %v7339_v23 = vmul.f32 %v3891_v51, %v7334_v25 }
 0x25e   : > { %7802 = vst [vmem:[#allocation90_spill] sm:$0xff] %v7323_v53  ;;  %3352 = vst [vmem:[%s6693_s15 + $0x100] sm:$0xff] %v7315_v50  ;;  %v7344_v19 = vmul.f32 %v3901_v24, %v7331_v40  ;;  %v7347_v9 = vadd.f32 %v6683_v41, %v3274_v45  ;;  %3978 = sbr.rel (%p4560_p4) target bundleno = 614 (0x266), region = 44 }
 0x25f   : > { %7803 = vst [vmem:[#allocation91_spill] sm:$0xff] %v7331_v40  ;;  %7804 = vst [vmem:[#allocation92_spill] sm:$0xff] %v7334_v25 }
 0x260   : > { %3684 = vst [vmem:[%s6678_s27 + $0x108] sm:$0xff] %v7334_v25  ;;  %7805 = vst [vmem:[#allocation93_spill] sm:$0xff] %v7339_v23  ;;  %v7352_v62 = vmul.f32 %v3891_v51, %v7347_v9 }
 0x261   : > { %3355 = vst [vmem:[%s6693_s15 + $0x118] sm:$0xff] %v7331_v40  ;;  %7806 = vst [vmem:[#allocation94_spill] sm:$0xff] %v7347_v9 }
 0x262   : > { %3353 = vst [vmem:[%s6693_s15 + $0x108] sm:$0xff] %v7347_v9 }
 0x263   : > { %v5446_v2 = vmov 0.0  }
 0x264   : > { %3979 = vst [vmem:[%s7617_s7] sm:$0x1] %v5446_v2  ;;  %3980 = vst [vmem:[%s7618_s8] sm:$0x1] %v5446_v2 }
 0x265   : > { %3981 = vst [vmem:[%s7619_s9] sm:$0x1] %v5446_v2  ;;  %3982 = vst [vmem:[%s7620_s10] sm:$0x1] %v5446_v2 }
 0x266 PF: > { %v3984_v41 = vadd.f32 %v6779_v38, %v6739_v13  ;;  %v4028_v45 = vmul.f32 %v6739_v13, %v6724_v59  ;;  %v4029_v36 = vmul.f32 %v6779_v38, %v6762_v10  ;;  %v4030_v2 = vmul.f32 %v6721_v60, %v6704_v42  ;;  %v7807_v10 = vld [vmem:[#allocation3_spill] sm:$0xff]  ;;  %v7808_v42 = vld [vmem:[#allocation18_spill] sm:$0xff]  ;;  %v7811_v9 = vld [vmem:[#allocation12_spill] sm:$0xff] }
 0x267   : > { %v4032_v59 = vmul.f32 %v6817_v33, %v6800_v46  ;;  %v7809_v40 = vld [vmem:[#allocation6_spill] sm:$0xff] }
 0x268   : > { %v3985_v51 = vadd.f32 %v3984_v41, %v6721_v60  ;;  %v4031_v41 = vmul.f32 %v6759_v27, %v6742_v34  ;;  %v4064_v23 = vadd.f32 %v4029_v36, %v4028_v45  ;;  %v4033_v60 = vmul.f32 %v6855_v18, %v7808_v42  ;;  %v7810_v36 = vld [vmem:[#allocation10_spill] sm:$0xff]  ;;  %v7816_v42 = vld [vmem:[#allocation7_spill] sm:$0xff] }
 0x269   : > { %v4034_v45 = vmul.f32 %v6797_v61, %v7810_v36  ;;  %v7818_v36 = vld [vmem:[#allocation2_spill] sm:$0xff] }
 0x26a   : > { %v3986_v24 = vadd.f32 %v3985_v51, %v6759_v27  ;;  %v4108_v51 = vadd.f32 %v6751_v48, %v6713_v43  ;;  %v4065_v13 = vadd.f32 %v4064_v23, %v4030_v2 }
 0x26c   : > { %v3987_v3 = vadd.f32 %v3986_v24, %v6817_v33  ;;  %v4109_v38 = vadd.f32 %v4108_v51, %v7807_v10  ;;  %v7812_v33 = vld [vmem:[#allocation15_spill] sm:$0xff]  ;;  %v7813_v51 = vld [vmem:[#allocation17_spill] sm:$0xff] }
 0x26d   : > { %v4035_v23 = vmul.f32 %v6837_v35, %v7812_v33 }
 0x26e   : > { %v3988_v25 = vadd.f32 %v3987_v3, %v6855_v18  ;;  %v4110_v34 = vadd.f32 %v4109_v38, %v7809_v40  ;;  %v7814_v38 = vld [vmem:[#allocation9_spill] sm:$0xff] }
 0x270   : > { %v3989_v53 = vadd.f32 %v3988_v25, %v6797_v61  ;;  %v4066_v25 = vadd.f32 %v4065_v13, %v4031_v41  ;;  %v4111_v50 = vadd.f32 %v4110_v34, %v7811_v9  ;;  %v4036_v41 = vmul.f32 %v6895_v1, %v6878_v15  ;;  %v7815_v61 = vld [vmem:[#allocation4_spill] sm:$0xff] }
 0x271   : > { %v4154_v15 = vmul.f32 %v7818_v36, %v7807_v10 }
 0x272   : > { %v3990_v24 = vadd.f32 %v3989_v53, %v6837_v35  ;;  %v4067_v53 = vadd.f32 %v4066_v25, %v4032_v59  ;;  %v4152_v59 = vmul.f32 %v6713_v43, %v7815_v61  ;;  %v4153_v25 = vmul.f32 %v6751_v48, %v7816_v42  ;;  %v7821_v48 = vld [vmem:[#allocation5_spill] sm:$0xff] }
 0x273   : > { %v4037_v35 = vmul.f32 %v6933_v37, %v6916_v22 }
 0x274   : > { %v3991_v3 = vadd.f32 %v3990_v24, %v6895_v1  ;;  %v4068_v2 = vadd.f32 %v4067_v53, %v4033_v60  ;;  %v4112_v24 = vadd.f32 %v4111_v50, %v7813_v51  ;;  %v7817_v60 = vld [vmem:[#allocation14_spill] sm:$0xff] }
 0x276   : > { %v3992_v27 = vadd.f32 %v3991_v3, %v6933_v37  ;;  %v4069_v13 = vadd.f32 %v4068_v2, %v4034_v45  ;;  %v4113_v3 = vadd.f32 %v4112_v24, %v7814_v38  ;;  %v7819_v45 = vld [vmem:[#allocation21_spill] sm:$0xff]  ;;  %v4155_v2 = vmul.f32 %v7821_v48, %v7809_v40  ;;  %v7822_v37 = vld [vmem:[#allocation26_spill] sm:$0xff]  ;;  %v7826_v40 = vld [vmem:[#allocation20_spill] sm:$0xff] }
 0x277   : > { %v4038_v53 = vmul.f32 %v6875_v29, %v7819_v45  ;;  %v4188_v24 = vadd.f32 %v4153_v25, %v4152_v59  ;;  %v7827_v25 = vld [vmem:[#allocation16_spill] sm:$0xff] }
 0x278   : > { %v3993_v46 = vadd.f32 %v3992_v27, %v6875_v29  ;;  %v4070_v50 = vadd.f32 %v4069_v13, %v4035_v23  ;;  %v4114_v27 = vadd.f32 %v4113_v3, %v7817_v60  ;;  %v4039_v23 = vmul.f32 %v6913_v4, %v7822_v37  ;;  %v7823_v13 = vld [vmem:[#allocation28_spill] sm:$0xff]  ;;  %v7824_v3 = vld [vmem:[#allocation11_spill] sm:$0xff] }
 0x279   : > { %v4156_v61 = vmul.f32 %v7811_v9, %v7824_v3  ;;  %v4189_v42 = vadd.f32 %v4188_v24, %v4154_v15  ;;  %v7828_v9 = vld [vmem:[#allocation25_spill] sm:$0xff]  ;;  %v7829_v45 = vld [vmem:[#allocation8_spill] sm:$0xff] }
 0x27a   : > { %v3994_v18 = vadd.f32 %v3993_v46, %v6913_v4  ;;  %v4071_v43 = vadd.f32 %v4070_v50, %v4036_v41  ;;  %v7820_v46 = vld [vmem:[#allocation23_spill] sm:$0xff]  ;;  %v7825_v41 = vld [vmem:[#allocation34_spill] sm:$0xff] }
 0x27b   : > { %v4115_v33 = vadd.f32 %v4114_v27, %v7820_v46  ;;  %v4157_v27 = vmul.f32 %v7813_v51, %v7827_v25  ;;  %v4190_v36 = vadd.f32 %v4189_v42, %v4155_v2  ;;  %v7831_v51 = vld [vmem:[#allocation33_spill] sm:$0xff] }
 0x27c   : > { %v3995_v34 = vadd.f32 %v3994_v18, %v6971_v20  ;;  %v4072_v18 = vadd.f32 %v4071_v43, %v4037_v35  ;;  %v4041_v35 = vmul.f32 %v7011_v7, %v6994_v58  ;;  %v4158_v43 = vmul.f32 %v7829_v45, %v7814_v38  ;;  %v7834_v38 = vld [vmem:[#allocation39_spill] sm:$0xff] }
 0x27d   : > { %v4116_v10 = vadd.f32 %v4115_v33, %v7823_v13  ;;  %v4191_v33 = vadd.f32 %v4190_v36, %v4156_v61  ;;  %v7835_v61 = vld [vmem:[#allocation22_spill] sm:$0xff] }
 0x27e   : > { %v3996_v1 = vadd.f32 %v3995_v34, %v7011_v7  ;;  %v4040_v34 = vmul.f32 %v6971_v20, %v7825_v41  ;;  %v4073_v50 = vadd.f32 %v4072_v18, %v4038_v53  ;;  %v7830_v53 = vld [vmem:[#allocation31_spill] sm:$0xff]  ;;  %v7833_v7 = vld [vmem:[#allocation37_spill] sm:$0xff]  ;;  %v4160_v42 = vmul.f32 %v7820_v46, %v7835_v61  ;;  %v7838_v36 = vld [vmem:[#allocation50_spill] sm:$0xff] }
 0x27f   : > { %v4117_v59 = vadd.f32 %v4116_v10, %v7826_v40  ;;  %v4042_v48 = vmul.f32 %v6953_v55, %v7830_v53  ;;  %v4192_v18 = vadd.f32 %v4191_v33, %v4157_v27  ;;  %v4044_v41 = vmul.f32 %v7049_v63, %v7032_v57  ;;  %v7839_v46 = vld [vmem:[#allocation36_spill] sm:$0xff] }
 0x280   : > { %v3997_v22 = vadd.f32 %v3996_v1, %v6953_v55  ;;  %v4074_v1 = vadd.f32 %v4073_v50, %v4039_v23  ;;  %v4043_v23 = vmul.f32 %v6991_v26, %v7833_v7  ;;  %v7846_v7 = vld [vmem:[#allocation32_spill] sm:$0xff] }
 0x281   : > { %v4118_v15 = vadd.f32 %v4117_v59, %v7828_v9  ;;  %v7837_v59 = vld [vmem:[#allocation27_spill] sm:$0xff] }
 0x282   : > { %v3998_v29 = vadd.f32 %v3997_v22, %v6991_v26  ;;  %v4075_v24 = vadd.f32 %v4074_v1, %v4040_v34  ;;  %v7832_v22 = vld [vmem:[#allocation13_spill] sm:$0xff]  ;;  %v4161_v25 = vmul.f32 %v7823_v13, %v7837_v59  ;;  %v7842_v13 = vld [vmem:[#allocation44_spill] sm:$0xff] }
 0x283   : > { %v4119_v2 = vadd.f32 %v4118_v15, %v7831_v51  ;;  %v4159_v37 = vmul.f32 %v7832_v22, %v7817_v60  ;;  %v7836_v60 = vld [vmem:[#allocation30_spill] sm:$0xff]  ;;  %v7840_v15 = vld [vmem:[#allocation19_spill] sm:$0xff] }
 0x284   : > { %v3999_v4 = vadd.f32 %v3998_v29, %v7049_v63  ;;  %v4076_v10 = vadd.f32 %v4075_v24, %v4041_v35  ;;  %v4193_v29 = vadd.f32 %v4192_v18, %v4158_v43  ;;  %v4162_v45 = vmul.f32 %v7840_v15, %v7826_v40  ;;  %v7841_v63 = vld [vmem:[#allocation42_spill] sm:$0xff]  ;;  %v7844_v22 = vld [vmem:[#allocation47_spill] sm:$0xff]  ;;  %v7845_v40 = vld [vmem:[#allocation49_spill] sm:$0xff] }
 0x285   : > { %v4120_v3 = vadd.f32 %v4119_v2, %v7834_v38  ;;  %v4046_v33 = vmul.f32 %v7029_v54, %v7841_v63 }
 0x286   : > { %v4000_v20 = vadd.f32 %v3999_v4, %v7085_v16  ;;  %v4077_v34 = vadd.f32 %v4076_v10, %v4042_v48  ;;  %v4194_v27 = vadd.f32 %v4193_v29, %v4159_v37  ;;  %v4045_v4 = vmul.f32 %v7085_v16, %v7838_v36  ;;  %v7843_v48 = vld [vmem:[#allocation24_spill] sm:$0xff]  ;;  %v7848_v29 = vld [vmem:[#allocation38_spill] sm:$0xff] }
 0x287   : > { %v4121_v50 = vadd.f32 %v4120_v3, %v7836_v60  ;;  %v4163_v24 = vmul.f32 %v7843_v48, %v7828_v9  ;;  %v4047_v37 = vmul.f32 %v7067_v52, %v7844_v22  ;;  %v4048_v3 = vmul.f32 %v7123_v0, %v7106_v44  ;;  %v7847_v9 = vld [vmem:[#allocation41_spill] sm:$0xff]  ;;  %v7857_v48 = vld [vmem:[#allocation66_spill] sm:$0xff]  ;;  %v7859_v22 = vld [vmem:[#allocation48_spill] sm:$0xff] }
 0x288   : > { %v4001_v58 = vadd.f32 %v4000_v20, %v7029_v54  ;;  %v4078_v35 = vadd.f32 %v4077_v34, %v4043_v23  ;;  %v4195_v43 = vadd.f32 %v4194_v27, %v4160_v42  ;;  %v4164_v23 = vmul.f32 %v7831_v51, %v7846_v7  ;;  %v7849_v51 = vld [vmem:[#allocation46_spill] sm:$0xff] }
 0x289   : > { %v4122_v1 = vadd.f32 %v4121_v50, %v7839_v46  ;;  %v4049_v34 = vmul.f32 %v7160_v8, %v7144_v14 }
 0x28a   : > { %v4002_v55 = vadd.f32 %v4001_v58, %v7067_v52  ;;  %v4079_v20 = vadd.f32 %v4078_v35, %v4044_v41  ;;  %v4196_v2 = vadd.f32 %v4195_v43, %v4161_v25  ;;  %v7850_v25 = vld [vmem:[#allocation29_spill] sm:$0xff] }
 0x28b   : > { %v4123_v53 = vadd.f32 %v4122_v1, %v7842_v13  ;;  %v4166_v27 = vmul.f32 %v7850_v25, %v7836_v60  ;;  %v7853_v1 = vld [vmem:[#allocation35_spill] sm:$0xff]  ;;  %v7855_v60 = vld [vmem:[#allocation60_spill] sm:$0xff] }
 0x28c   : > { %v4003_v26 = vadd.f32 %v4002_v55, %v7123_v0  ;;  %v4080_v18 = vadd.f32 %v4079_v20, %v4045_v4  ;;  %v4197_v10 = vadd.f32 %v4196_v2, %v4162_v45  ;;  %v4165_v55 = vmul.f32 %v7834_v38, %v7848_v29  ;;  %v7851_v0 = vld [vmem:[#allocation53_spill] sm:$0xff]  ;;  %v7852_v38 = vld [vmem:[#allocation55_spill] sm:$0xff] }
 0x28d   : > { %v4124_v58 = vadd.f32 %v4123_v53, %v7845_v40  ;;  %v4050_v36 = vmul.f32 %v7103_v21, %v7851_v0  ;;  %v4167_v15 = vmul.f32 %v7853_v1, %v7839_v46  ;;  %v7858_v46 = vld [vmem:[#allocation52_spill] sm:$0xff]  ;;  %v4056_v0 = vmul.f32 %v7262_v5, %v7248_v56 }
 0x28e   : > { %v4004_v57 = vadd.f32 %v4003_v26, %v7160_v8  ;;  %v4081_v61 = vadd.f32 %v4080_v18, %v4046_v33  ;;  %v4198_v41 = vadd.f32 %v4197_v10, %v4163_v24  ;;  %v7854_v8 = vld [vmem:[#allocation58_spill] sm:$0xff]  ;;  %v7856_v33 = vld [vmem:[#allocation43_spill] sm:$0xff]  ;;  %v4052_v24 = vmul.f32 %v7194_v31, %v7857_v48  ;;  %v7861_v10 = vld [vmem:[#allocation40_spill] sm:$0xff] }
 0x28f   : > { %v4125_v42 = vadd.f32 %v4124_v58, %v7847_v9  ;;  %v4051_v43 = vmul.f32 %v7141_v39, %v7854_v8  ;;  %v4168_v20 = vmul.f32 %v7842_v13, %v7856_v33  ;;  %v4053_v58 = vmul.f32 %v7228_v6, %v7214_v32  ;;  %v7860_v13 = vld [vmem:[#allocation57_spill] sm:$0xff]  ;;  %v7875_v48 = vld [vmem:[#allocation56_spill] sm:$0xff] }
 0x290   : > { %v4005_v16 = vadd.f32 %v4004_v57, %v7103_v21  ;;  %v4082_v50 = vadd.f32 %v4081_v61, %v4047_v37  ;;  %v4199_v26 = vadd.f32 %v4198_v41, %v4164_v23  ;;  %v4169_v37 = vmul.f32 %v7845_v40, %v7859_v22  ;;  %v7862_v61 = vld [vmem:[#allocation63_spill] sm:$0xff]  ;;  %v7863_v40 = vld [vmem:[#allocation65_spill] sm:$0xff] }
 0x291   : > { %v4126_v59 = vadd.f32 %v4125_v42, %v7849_v51  ;;  %v4054_v42 = vmul.f32 %v7177_v47, %v7862_v61  ;;  %v7864_v41 = vld [vmem:[#allocation45_spill] sm:$0xff] }
 0x292   : > { %v4006_v54 = vadd.f32 %v4005_v16, %v7141_v39  ;;  %v4083_v4 = vadd.f32 %v4082_v50, %v4048_v3  ;;  %v4200_v45 = vadd.f32 %v4199_v26, %v4165_v55 }
 0x293   : > { %v4127_v35 = vadd.f32 %v4126_v59, %v7852_v38 }
 0x294   : > { %v4007_v52 = vadd.f32 %v4006_v54, %v7194_v31  ;;  %v4084_v57 = vadd.f32 %v4083_v4, %v4049_v34  ;;  %v4201_v53 = vadd.f32 %v4200_v45, %v4166_v27  ;;  %v4170_v54 = vmul.f32 %v7861_v10, %v7847_v9  ;;  %v7866_v9 = vld [vmem:[#allocation71_spill] sm:$0xff]  ;;  %v7867_v27 = vld [vmem:[#allocation54_spill] sm:$0xff] }
 0x295   : > { %v4128_v63 = vadd.f32 %v4127_v35, %v7855_v60  ;;  %v4172_v26 = vmul.f32 %v7852_v38, %v7867_v27  ;;  %v7869_v35 = vld [vmem:[#allocation59_spill] sm:$0xff]  ;;  %v7870_v45 = vld [vmem:[#allocation82_spill] sm:$0xff]  ;;  %v7871_v38 = vld [vmem:[#allocation68_spill] sm:$0xff] }
 0x296   : > { %v4008_v44 = vadd.f32 %v4007_v52, %v7228_v6  ;;  %v4085_v2 = vadd.f32 %v4084_v57, %v4050_v36  ;;  %v4202_v18 = vadd.f32 %v4201_v53, %v4167_v15  ;;  %v4171_v52 = vmul.f32 %v7864_v41, %v7849_v51  ;;  %v7865_v6 = vld [vmem:[#allocation69_spill] sm:$0xff]  ;;  %v7868_v51 = vld [vmem:[#allocation62_spill] sm:$0xff]  ;;  %v7872_v57 = vld [vmem:[#allocation51_spill] sm:$0xff] }
 0x297   : > { %v4129_v16 = vadd.f32 %v4128_v63, %v7858_v46  ;;  %v4055_v50 = vmul.f32 %v7211_v30, %v7865_v6  ;;  %v4173_v1 = vmul.f32 %v7855_v60, %v7869_v35  ;;  %v4174_v63 = vmul.f32 %v7872_v57, %v7858_v46  ;;  %v7874_v60 = vld [vmem:[#allocation76_spill] sm:$0xff]  ;;  %v7877_v46 = vld [vmem:[#allocation81_spill] sm:$0xff]  ;;  %v7886_v27 = vld [vmem:[#allocation87_spill] sm:$0xff] }
 0x298   : > { %v4009_v14 = vadd.f32 %v4008_v44, %v7177_v47  ;;  %v4086_v7 = vadd.f32 %v4085_v2, %v4051_v43  ;;  %v4203_v3 = vadd.f32 %v4202_v18, %v4168_v20  ;;  %v7889_v35 = vld [vmem:[#allocation93_spill] sm:$0xff] }
 0x299   : > { %v4130_v23 = vadd.f32 %v4129_v16, %v7860_v13  ;;  %v7876_v16 = vld [vmem:[#allocation79_spill] sm:$0xff] }
 0x29a   : > { %v4010_v21 = vadd.f32 %v4009_v14, %v7211_v30  ;;  %v4087_v29 = vadd.f32 %v4086_v7, %v4052_v24  ;;  %v4204_v34 = vadd.f32 %v4203_v3, %v4169_v37  ;;  %v4057_v14 = vmul.f32 %v7296_v49, %v7870_v45 }
 0x29b   : > { %v4131_v55 = vadd.f32 %v4130_v23, %v7863_v40  ;;  %v4175_v24 = vmul.f32 %v7875_v48, %v7860_v13  ;;  %v4059_v22 = vmul.f32 %v7279_v11, %v7876_v16  ;;  %v7879_v23 = vld [vmem:[#allocation88_spill] sm:$0xff]  ;;  %v7880_v13 = vld [vmem:[#allocation73_spill] sm:$0xff] }
 0x29c   : > { %v4011_v39 = vadd.f32 %v4010_v21, %v7262_v5  ;;  %v4088_v59 = vadd.f32 %v4087_v29, %v4053_v58  ;;  %v4205_v44 = vadd.f32 %v4204_v34, %v4170_v54  ;;  %v7873_v5 = vld [vmem:[#allocation74_spill] sm:$0xff]  ;;  %v4060_v10 = vmul.f32 %v7328_v17, %v7879_v23  ;;  %v7884_v34 = vld [vmem:[#allocation61_spill] sm:$0xff]  ;;  %v7897_v23 = vld [vmem:[#allocation92_spill] sm:$0xff] }
 0x29d   : > { %v4132_v25 = vadd.f32 %v4131_v55, %v7866_v9  ;;  %v4058_v20 = vmul.f32 %v7245_v12, %v7873_v5  ;;  %v7882_v29 = vld [vmem:[#allocation94_spill] sm:$0xff] }
 0x29e   : > { %v4012_v31 = vadd.f32 %v4011_v39, %v7296_v49  ;;  %v4089_v36 = vadd.f32 %v4088_v59, %v4054_v42  ;;  %v4206_v15 = vadd.f32 %v4205_v44, %v4171_v52  ;;  %v7878_v39 = vld [vmem:[#allocation64_spill] sm:$0xff]  ;;  %v4061_v55 = vmul.f32 %v7352_v62, %v7882_v29  ;;  %v7883_v52 = vld [vmem:[#allocation78_spill] sm:$0xff] }
 0x29f   : > { %v4133_v4 = vadd.f32 %v4132_v25, %v7868_v51  ;;  %v4176_v58 = vmul.f32 %v7863_v40, %v7878_v39 }
 0x2a0   : > { %v4013_v32 = vadd.f32 %v4012_v31, %v7245_v12  ;;  %v4090_v8 = vadd.f32 %v4089_v36, %v4055_v50  ;;  %v4207_v33 = vadd.f32 %v4206_v15, %v4172_v26  ;;  %v7881_v31 = vld [vmem:[#allocation70_spill] sm:$0xff] }
 0x2a1   : > { %v4134_v43 = vadd.f32 %v4133_v4, %v7871_v38  ;;  %v4177_v61 = vmul.f32 %v7866_v9, %v7881_v31  ;;  %v7887_v9 = vld [vmem:[#allocation67_spill] sm:$0xff] }
 0x2a2   : > { %v4014_v47 = vadd.f32 %v4013_v32, %v7279_v11  ;;  %v4091_v53 = vadd.f32 %v4090_v8, %v4056_v0  ;;  %v4208_v2 = vadd.f32 %v4207_v33, %v4173_v1  ;;  %v4178_v32 = vmul.f32 %v7884_v34, %v7868_v51  ;;  %v7890_v51 = vld [vmem:[#allocation75_spill] sm:$0xff] }
 0x2a3   : > { %v4135_v21 = vadd.f32 %v4134_v43, %v7874_v60  ;;  %v4179_v44 = vmul.f32 %v7887_v9, %v7871_v38  ;;  %v4180_v15 = vmul.f32 %v7874_v60, %v7890_v51  ;;  %v7892_v43 = vld [vmem:[#allocation80_spill] sm:$0xff]  ;;  %v7898_v31 = vld [vmem:[#allocation83_spill] sm:$0xff] }
 0x2a4   : > { %v4015_v30 = vadd.f32 %v4014_v47, %v7328_v17  ;;  %v4092_v37 = vadd.f32 %v4091_v53, %v4057_v14  ;;  %v4209_v7 = vadd.f32 %v4208_v2, %v4174_v63  ;;  %v7885_v17 = vld [vmem:[#allocation85_spill] sm:$0xff]  ;;  %v7891_v14 = vld [vmem:[#allocation84_spill] sm:$0xff]  ;;  %v4181_v57 = vmul.f32 %v7877_v46, %v7892_v43 }
 0x2a5   : > { %v4136_v18 = vadd.f32 %v4135_v21, %v7877_v46  ;;  %v4062_v59 = vmul.f32 %v7312_v28, %v7885_v17  ;;  %v7895_v2 = vld [vmem:[#allocation77_spill] sm:$0xff] }
 0x2a6   : > { %v4016_v56 = vadd.f32 %v4015_v30, %v7352_v62  ;;  %v4093_v54 = vadd.f32 %v4092_v37, %v4058_v20  ;;  %v4210_v42 = vadd.f32 %v4209_v7, %v4175_v24  ;;  %v7888_v62 = vld [vmem:[#allocation91_spill] sm:$0xff]  ;;  %v7894_v20 = vld [vmem:[#allocation72_spill] sm:$0xff] }
 0x2a7   : > { %v4137_v3 = vadd.f32 %v4136_v18, %v7880_v13  ;;  %v4063_v36 = vmul.f32 %v7344_v19, %v7888_v62  ;;  %v4182_v53 = vmul.f32 %v7894_v20, %v7880_v13  ;;  %v7896_v18 = vld [vmem:[#allocation86_spill] sm:$0xff] }
 0x2a8   : > { %v4017_v49 = vadd.f32 %v4016_v56, %v7312_v28  ;;  %v4094_v41 = vadd.f32 %v4093_v54, %v4059_v22  ;;  %v4211_v6 = vadd.f32 %v4210_v42, %v4176_v58  ;;  %v7893_v56 = vld [vmem:[#allocation90_spill] sm:$0xff]  ;;  %v4184_v39 = vmul.f32 %v7886_v27, %v7896_v18 }
 0x2a9   : > { %v4138_v40 = vadd.f32 %v4137_v3, %v7883_v52 }
 0x2aa   : > { %v4018_v12 = vadd.f32 %v4017_v49, %v7344_v19  ;;  %v4095_v25 = vadd.f32 %v4094_v41, %v4060_v10  ;;  %v4212_v47 = vadd.f32 %v4211_v6, %v4177_v61  ;;  %v3983_v19 = vld [vmem:[%s7617_s7] sm:$0x1]  ;;  %v4183_v49 = vmul.f32 %v7895_v2, %v7883_v52  ;;  %v7899_v52 = vld [vmem:[#allocation89_spill] sm:$0xff] }
 0x2ab   : > { %v4139_v26 = vadd.f32 %v4138_v40, %v7886_v27  ;;  %v4185_v10 = vmul.f32 %v7889_v35, %v7897_v23  ;;  %v4186_v61 = vmul.f32 %v7898_v31, %v7891_v14  ;;  %v4107_v41 = vld [vmem:[%s7619_s9] sm:$0x1]  ;;  %v4187_v40 = vmul.f32 %v7899_v52, %v7893_v56 }
 0x2ac   : > { %v4019_v11 = vrot.slane %v4018_v12, 4  ;;  %v4096_v4 = vadd.f32 %v4095_v25, %v4061_v55  ;;  %v4213_v30 = vadd.f32 %v4212_v47, %v4178_v32  ;;  %v4027_v55 = vld [vmem:[%s7618_s8] sm:$0x1] }
 0x2ad   : > { %v4140_v1 = vadd.f32 %v4139_v26, %v7889_v35 }
 0x2ae   : > { %v4020_v50 = vadd.f32 %v4019_v11, %v4018_v12  ;;  %v4097_v28 = vadd.f32 %v4096_v4, %v4062_v59  ;;  %v4214_v38 = vadd.f32 %v4213_v30, %v4179_v44 }
 0x2af   : > { %v4141_v8 = vadd.f32 %v4140_v1, %v7891_v14 }
 0x2b0   : > { %v4021_v0 = vrot.slane %v4020_v50, 2  ;;  %v4098_v33 = vadd.f32 %v4097_v28, %v4063_v36  ;;  %v4215_v60 = vadd.f32 %v4214_v38, %v4180_v15 }
 0x2b1   : > { %v4142_v5 = vadd.f32 %v4141_v8, %v7893_v56 }
 0x2b2   : > { %v4022_v45 = vadd.f32 %v4021_v0, %v4020_v50  ;;  %v4099_v48 = vrot.slane %v4098_v33, 4  ;;  %v4216_v16 = vadd.f32 %v4215_v60, %v4181_v57  ;;  %v4151_v0 = vld [vmem:[%s7620_s10] sm:$0x1] }
 0x2b3   : > { %v4143_v24 = vrot.slane %v4142_v5, 4 }
 0x2b4   : > { %v4023_v63 = vrot.slane %v4022_v45, 1  ;;  %v4100_v37 = vadd.f32 %v4099_v48, %v4098_v33  ;;  %v4217_v58 = vadd.f32 %v4216_v16, %v4182_v53 }
 0x2b5   : > { %v4144_v46 = vadd.f32 %v4143_v24, %v4142_v5 }
 0x2b6   : > { %v4024_v21 = vadd.f32 %v4023_v63, %v4022_v45  ;;  %v4101_v7 = vrot.slane %v4100_v37, 2  ;;  %v4218_v54 = vadd.f32 %v4217_v58, %v4183_v49 }
 0x2b7   : > { %v4145_v12 = vrot.slane %v4144_v46, 2 }
 0x2b8   : > { %v4025_v22 = vadd.f32 %v4024_v21, %v3983_v19  ;;  %v4102_v13 = vadd.f32 %v4101_v7, %v4100_v37  ;;  %v4219_v42 = vadd.f32 %v4218_v54, %v4184_v39 }
 0x2b9   : > { %v4146_v3 = vadd.f32 %v4145_v12, %v4144_v46 }
 0x2ba   : > { %4026 = vst [vmem:[%s7617_s7] sm:$0x1] %v4025_v22  ;;  %v4103_v11 = vrot.slane %v4102_v13, 1  ;;  %v4220_v34 = vadd.f32 %v4219_v42, %v4185_v10 }
 0x2bb   : > { %v4147_v29 = vrot.slane %v4146_v3, 1 }
 0x2bc   : > { %v4104_v32 = vadd.f32 %v4103_v11, %v4102_v13  ;;  %v4221_v50 = vadd.f32 %v4220_v34, %v4186_v61 }
 0x2bd   : > { %v4148_v6 = vadd.f32 %v4147_v29, %v4146_v3 }
 0x2be   : > { %v4105_v17 = vadd.f32 %v4104_v32, %v4027_v55  ;;  %v4222_v25 = vadd.f32 %v4221_v50, %v4187_v40 }
 0x2bf   : > { %v4149_v59 = vadd.f32 %v4148_v6, %v4107_v41 }
 0x2c0   : > { %4106 = vst [vmem:[%s7618_s8] sm:$0x1] %v4105_v17  ;;  %v4223_v27 = vrot.slane %v4222_v25, 4 }
 0x2c1   : > { %4150 = vst [vmem:[%s7619_s9] sm:$0x1] %v4149_v59 }
 0x2c2   : > { %v4224_v26 = vadd.f32 %v4223_v27, %v4222_v25 }
 0x2c4   : > { %v4225_v9 = vrot.slane %v4224_v26, 2 }
 0x2c6   : > { %v4226_v44 = vadd.f32 %v4225_v9, %v4224_v26 }
 0x2c8   : > { %v4227_v47 = vrot.slane %v4226_v44, 1 }
 0x2ca   : > { %v4228_v62 = vadd.f32 %v4227_v47, %v4226_v44 }
 0x2cc   : > { %v4229_v36 = vadd.f32 %v4228_v62, %v4151_v0 }
 0x2ce   : > { %4230 = vst [vmem:[%s7620_s10] sm:$0x1] %v4229_v36 }
 0x2cf PF: > { %s21_s13 = sadd.s32 1, %s5443_s13  }
 0x2d0   : > { %p18_p5 = scmp.ge.s32.totalorder %s21_s13, 4  }
 0x2d2   :  { %20 = sbr.rel (!%p18_p5) target bundleno = 1 (0x1), region = 126 }

</bundles_post_ra>
